<compile_context>
chip_gen: v7x
topology: tpu7x:2x2x1
jax: 0.10.0
libtpu: 0.0.40
codegen_flags: <defaults>
</compile_context>

<pallas_src>
import numpy as np
import jax
import jax.numpy as jnp
from jax.experimental import pallas as pl
from jax.experimental.pallas import tpu as pltpu

H = W = 9                  # spatial size pinned by LayerNorm((C, 9, 9))
HW = H * W
TAPS = 9                   # 3x3 kernel taps
LN_EPS = 1e-5
CR_PAD = 8                 # SE bottleneck zero-padded to 8 lanes (mathematically exact)


# --------------------------- static tap geometry -----------------------------
def _tap_geometry(s_tile):
    """Per-tap flat source offset and valid destination-row window on (s_tile*HW)."""
    L = s_tile * HW
    geom = []
    for kh in range(3):
        for kw in range(3):
            s = (kh - 1) * W + (kw - 1)        # src_row = dst_row + s
            lo, hi = max(0, -s), L - max(0, s)  # dst rows whose src is in range
            geom.append((s, lo, hi))
    return geom


# ------------------------------ Pallas kernel --------------------------------
def _make_kernel(s_tile, C):
    L = s_tile * HW
    inv_hw = np.float32(1.0 / HW)
    inv_cnt = np.float32(1.0 / (HW * C))
    geom = _tap_geometry(s_tile)

    def kernel(x_ref, mask_ref, pool_ref, scat_ref,
               w0_ref, g0_ref, b0_ref, w1_ref, g1_ref, b1_ref,
               l0_ref, l1_ref, out_ref, xcat_ref):
        blk = pl.program_id(1)

        # First residual block of this batch tile: seed the resident activation.
        @pl.when(blk == 0)
        def _():
            out_ref[...] = x_ref[...]

        a_in = out_ref[...]                       # (L, C) activation entering block
        masks = mask_ref[...]                     # (L, TAPS) 0/1 border masks
        pool = pool_ref[...]                      # (S, L)  per-sample pooling
        scat = scat_ref[...]                      # (L, S)  per-sample broadcast

        def conv3x3(a, w_stack):
            # Build X_cat = [9 shifted/masked tap copies] (L, 9*C) in a VMEM
            # scratch (no MXU involved), then one fused K=9*C matmul.
            xcat_ref[...] = jnp.zeros((L, TAPS * C), jnp.float32)
            for t in range(TAPS):
                s, lo, hi = geom[t]
                m_t = masks[lo:hi, t:t + 1]                    # (hi-lo, 1)
                xcat_ref[lo:hi, t * C:(t + 1) * C] = (
                    m_t * a[lo + s:hi + s, :])
            return jnp.dot(xcat_ref[...], w_stack,
                           preferred_element_type=jnp.float32)

        def layer_norm(a, g, b):
            # Per-sample LayerNorm over the (C, 9, 9) slab, one-pass statistics.
            s1 = jnp.sum(jnp.dot(pool, a, preferred_element_type=jnp.float32),
                         axis=1, keepdims=True)                # (S, 1)
            s2 = jnp.sum(jnp.dot(pool, a * a, preferred_element_type=jnp.float32),
                         axis=1, keepdims=True)                # (S, 1)
            mu = s1 * inv_cnt
            var = s2 * inv_cnt - mu * mu
            rstd = jax.lax.rsqrt(var + LN_EPS)
            mu_f = jnp.dot(scat, mu, preferred_element_type=jnp.float32)      # (L,1)
            rstd_f = jnp.dot(scat, rstd, preferred_element_type=jnp.float32)  # (L,1)
            return (a - mu_f) * (rstd_f * g) + b

        t0 = conv3x3(a_in, w0_ref[...])
        t0 = jnp.maximum(layer_norm(t0, g0_ref[...], b0_ref[...]), 0.0)
        t1 = conv3x3(t0, w1_ref[...])
        t1 = layer_norm(t1, g1_ref[...], b1_ref[...])

        # Squeeze-and-excite, batched over all samples of this tile.
        avg = jnp.dot(pool, t1, preferred_element_type=jnp.float32) * inv_hw   # (S, C)
        y = jnp.maximum(jnp.dot(avg, l0_ref[...],
                                preferred_element_type=jnp.float32), 0.0)      # (S, CR_PAD)
        y = jnp.dot(y, l1_ref[...], preferred_element_type=jnp.float32)        # (S, C)
        y = pl.reciprocal(1.0 + jnp.exp(-y), approx=True)                      # sigmoid
        gate = jnp.dot(scat, y, preferred_element_type=jnp.float32)            # (L, C)

        out_ref[...] = jnp.maximum(a_in + t1 * gate, 0.0)

    return kernel


def residual_layer_pallas(x_tiles, kp, s_tile):
    num_tiles, L, C = x_tiles.shape
    block_num = kp["w0"].shape[0]
    kernel = _make_kernel(s_tile, C)

    def const(shape):
        return pl.BlockSpec(shape, lambda i, b: (0,) * len(shape))

    def per_tile():
        return pl.BlockSpec((None, L, C), lambda i, b: (i, 0, 0))

    def per_block(shape):
        return pl.BlockSpec((None,) + shape, lambda i, b: (b,) + (0,) * len(shape))

    grid_spec = pltpu.PrefetchScalarGridSpec(
        num_scalar_prefetch=0,
        grid=(num_tiles, block_num),
        in_specs=[
            per_tile(),                               # x (one batch tile)
            const((L, TAPS)),                         # per-tap border masks
            const((s_tile, L)),                       # pooling matrix  (S, L)
            const((L, s_tile)),                       # scatter matrix  (L, S)
            per_block((TAPS * C, C)),                 # conv0 stacked tap weights
            per_block((L, C)),                        # gamma0 (tiled per sample)
            per_block((L, C)),                        # beta0
            per_block((TAPS * C, C)),                 # conv1 stacked tap weights
            per_block((L, C)),                        # gamma1
            per_block((L, C)),                        # beta1
            per_block((C, CR_PAD)),                   # SE linear0 (C -> C/r, padded)
            per_block((CR_PAD, C)),                   # SE linear1 (C/r -> C, padded)
        ],
        out_specs=per_tile(),
        scratch_shapes=[pltpu.VMEM((L, TAPS * C), jnp.float32)],   # X_cat
    )
    return pl.pallas_call(
        kernel,
        out_shape=jax.ShapeDtypeStruct((num_tiles, L, C), jnp.float32),
        grid_spec=grid_spec,
        compiler_params=pltpu.CompilerParams(
            dimension_semantics=("parallel", "arbitrary")),
    )(x_tiles, kp["mask"], kp["pool"], kp["scat"],
      kp["w0"], kp["g0"], kp["b0"], kp["w1"], kp["g1"], kp["b1"],
      kp["l0"], kp["l1"])


# ------------------------------ host-side setup -------------------------------
def _make_tap_masks(s_tile):
    L = s_tile * HW
    m = np.zeros((L, TAPS), np.float32)
    for kh in range(3):
        for kw in range(3):
            t = kh * 3 + kw
            dh, dw = kh - 1, kw - 1
            for h in range(H):
                for w in range(W):
                    if 0 <= h + dh < H and 0 <= w + dw < W:
                        for s in range(s_tile):
                            m[s * HW + h * W + w, t] = 1.0
    return jnp.asarray(m)


def _make_pool_matrix(s_tile):
    p = np.zeros((s_tile, s_tile * HW), np.float32)
    for s in range(s_tile):
        p[s, s * HW:(s + 1) * HW] = 1.0
    return jnp.asarray(p)


def init_block_params(key, C, Cr):
    k0, k1, k2, k3, k4, k5, k6, k7 = jax.random.split(key, 8)
    return dict(
        conv0=jax.random.normal(k0, (C, C, 3, 3), jnp.float32) / np.sqrt(9 * C),
        conv1=jax.random.normal(k1, (C, C, 3, 3), jnp.float32) / np.sqrt(9 * C),
        gamma0=1.0 + 0.1 * jax.random.normal(k4, (C, H, W), jnp.float32),
        beta0=0.1 * jax.random.normal(k5, (C, H, W), jnp.float32),
        gamma1=1.0 + 0.1 * jax.random.normal(k6, (C, H, W), jnp.float32),
        beta1=0.1 * jax.random.normal(k7, (C, H, W), jnp.float32),
        lin0=jax.random.normal(k2, (C, Cr), jnp.float32) / np.sqrt(C),   # y @ lin0
        lin1=jax.random.normal(k3, (Cr, C), jnp.float32) / np.sqrt(Cr),  # y @ lin1
    )


def pack_params(params_list, C, s_tile):
    """Stack per-block params along a leading 'block' axis, in kernel layout."""
    def taps(wgt):   # (Cout, Cin, 3, 3) -> (9*Cin, Cout), tap-major rows
        return jnp.transpose(wgt, (2, 3, 1, 0)).reshape(TAPS * C, C)

    def affine(a):   # LayerNorm affine (C, 9, 9) -> (81, C), tiled per sample
        f = jnp.transpose(a, (1, 2, 0)).reshape(HW, C)
        return jnp.tile(f, (s_tile, 1))

    def pad_l0(wgt):  # (C, Cr) -> (C, CR_PAD), zero padded (exact)
        return jnp.zeros((C, CR_PAD), jnp.float32).at[:, :wgt.shape[1]].set(wgt)

    def pad_l1(wgt):  # (Cr, C) -> (CR_PAD, C)
        return jnp.zeros((CR_PAD, C), jnp.float32).at[:wgt.shape[0], :].set(wgt)

    stack = lambda fn, name: jnp.stack([fn(p[name]) for p in params_list])
    pool = _make_pool_matrix(s_tile)
    return dict(
        w0=stack(taps, "conv0"), w1=stack(taps, "conv1"),
        g0=stack(affine, "gamma0"), b0=stack(affine, "beta0"),
        g1=stack(affine, "gamma1"), b1=stack(affine, "beta1"),
        l0=stack(pad_l0, "lin0"), l1=stack(pad_l1, "lin1"),
        mask=_make_tap_masks(s_tile), pool=pool, scat=jnp.transpose(pool),
    )


def residual_layer(x_nchw, params_list, batch_tile):
    """Forward pass of ResidualLayer.  x: (N, C, 9, 9) NCHW, like PyTorch."""
    N, C, h, w = x_nchw.shape
    assert (h, w) == (H, W) and N % batch_tile == 0
    kp = pack_params(params_list, C, batch_tile)
    # NCHW -> (batch tiles, batch_tile*81, C): spatial on sublanes, channels on lanes
    x = jnp.transpose(x_nchw, (0, 2, 3, 1)).reshape(
        N // batch_tile, batch_tile * HW, C)
    out = residual_layer_pallas(x, kp, batch_tile)
    return jnp.transpose(out.reshape(N, H, W, C), (0, 3, 1, 2))


# ------------------------- pure-JAX reference (check) -------------------------
def reference_block(x, p):
    def conv(a, wgt):
        return jax.lax.conv_general_dilated(
            a, wgt, (1, 1), ((1, 1), (1, 1)),
            dimension_numbers=("NCHW", "OIHW", "NCHW"),
            precision=jax.lax.Precision.HIGHEST)

    def ln(a, g, b):
        mu = jnp.mean(a, axis=(1, 2, 3), keepdims=True)
        var = jnp.mean((a - mu) ** 2, axis=(1, 2, 3), keepdims=True)
        return (a - mu) / jnp.sqrt(var + LN_EPS) * g[None] + b[None]

    t = jax.nn.relu(ln(conv(x, p["conv0"]), p["gamma0"], p["beta0"]))
    t = ln(conv(t, p["conv1"]), p["gamma1"], p["beta1"])
    y = jnp.mean(t, axis=(2, 3))                       # avg_pool2d over full spatial
    y = jax.nn.relu(y @ p["lin0"])
    y = jax.nn.sigmoid(y @ p["lin1"])
    return jax.nn.relu(x + t * y[:, :, None, None])


if __name__ == "__main__":
    N, C, BLOCK_NUM, REDUCTION = 4, 16, 2, 8
    BATCH_TILE = 2   # 2 samples per grid step -> 2 parallel steps (v7x: one per TC)

    key = jax.random.PRNGKey(0)
    keys = jax.random.split(key, BLOCK_NUM + 1)
    x = jax.random.normal(keys[0], (N, C, H, W), jnp.float32)      # NCHW, like PyTorch
    params_list = [init_block_params(k, C, C // REDUCTION) for k in keys[1:]]

    run = jax.jit(residual_layer, static_argnums=(2,))
    out = jax.block_until_ready(run(x, params_list, BATCH_TILE))

    ref = x
    for p in params_list:
        ref = reference_block(ref, p)
    np.testing.assert_allclose(np.asarray(out), np.asarray(ref),
                               rtol=5e-2, atol=5e-2)

    print("KERNEL_OK")
</pallas_src>

<mosaic_0001>
module attributes {stable_mosaic.version = 11 : i64} {
  func.func @kernel(%arg0: i32, %arg1: i32, %arg2: memref<1x162x16xf32, #tpu.memory_space<vmem>>, %arg3: memref<162x9xf32, #tpu.memory_space<vmem>>, %arg4: memref<2x162xf32, #tpu.memory_space<vmem>>, %arg5: memref<162x2xf32, #tpu.memory_space<vmem>>, %arg6: memref<1x144x16xf32, #tpu.memory_space<vmem>>, %arg7: memref<1x162x16xf32, #tpu.memory_space<vmem>>, %arg8: memref<1x162x16xf32, #tpu.memory_space<vmem>>, %arg9: memref<1x144x16xf32, #tpu.memory_space<vmem>>, %arg10: memref<1x162x16xf32, #tpu.memory_space<vmem>>, %arg11: memref<1x162x16xf32, #tpu.memory_space<vmem>>, %arg12: memref<1x16x8xf32, #tpu.memory_space<vmem>>, %arg13: memref<1x8x16xf32, #tpu.memory_space<vmem>>, %arg14: memref<1x162x16xf32, #tpu.memory_space<vmem>>, %arg15: memref<162x144xf32, #tpu.memory_space<vmem>>) attributes {dimension_semantics = [#tpu.dimension_semantics<parallel>, #tpu.dimension_semantics<arbitrary>], iteration_bounds = array<i64: 2, 2>, scalar_prefetch = 0 : i64, scratch_operands = 1 : i64, tpu.core_type = #tpu.core_type<tc>, window_params = [{transform_indices = @transform_0, window_bounds = array<i64: 1, 162, 16>}, {pipeline_mode = #tpu.pipeline_mode<synchronous>, transform_indices = @transform_1, window_bounds = array<i64: 162, 9>}, {pipeline_mode = #tpu.pipeline_mode<synchronous>, transform_indices = @transform_2, window_bounds = array<i64: 2, 162>}, {pipeline_mode = #tpu.pipeline_mode<synchronous>, transform_indices = @transform_3, window_bounds = array<i64: 162, 2>}, {transform_indices = @transform_4, window_bounds = array<i64: 1, 144, 16>}, {transform_indices = @transform_5, window_bounds = array<i64: 1, 162, 16>}, {transform_indices = @transform_6, window_bounds = array<i64: 1, 162, 16>}, {transform_indices = @transform_7, window_bounds = array<i64: 1, 144, 16>}, {transform_indices = @transform_8, window_bounds = array<i64: 1, 162, 16>}, {transform_indices = @transform_9, window_bounds = array<i64: 1, 162, 16>}, {transform_indices = @transform_10, window_bounds = array<i64: 1, 16, 8>}, {transform_indices = @transform_11, window_bounds = array<i64: 1, 8, 16>}, {transform_indices = @transform_12, window_bounds = array<i64: 1, 162, 16>}]} {
    %c0_i32 = arith.constant 0 : i32
    %0 = arith.cmpi eq, %arg1, %c0_i32 : i32
    %1 = arith.extui %0 : i1 to i32
    %c0_i32_0 = arith.constant 0 : i32
    %2 = arith.cmpi ne, %1, %c0_i32_0 : i32
    scf.if %2 {
      %c0_99 = arith.constant 0 : index
      %c0_100 = arith.constant 0 : index
      %c0_101 = arith.constant 0 : index
      %191 = vector.load %arg2[%c0_99, %c0_100, %c0_101] : memref<1x162x16xf32, #tpu.memory_space<vmem>>, vector<1x162x16xf32>
      %192 = vector.shape_cast %191 : vector<1x162x16xf32> to vector<162x16xf32>
      %c0_102 = arith.constant 0 : index
      %c0_103 = arith.constant 0 : index
      %c0_104 = arith.constant 0 : index
      %193 = vector.load %arg14[%c0_102, %c0_103, %c0_104] : memref<1x162x16xf32, #tpu.memory_space<vmem>>, vector<1x162x16xf32>
      %194 = vector.shape_cast %193 : vector<1x162x16xf32> to vector<162x16xf32>
      %195 = vector.shape_cast %192 : vector<162x16xf32> to vector<1x162x16xf32>
      tpu.vector_store %arg14[%c0_102, %c0_103, %c0_104], %195 {strides = array<i32>} : memref<1x162x16xf32, #tpu.memory_space<vmem>>, vector<1x162x16xf32>,
    } else {
    }
    %c0 = arith.constant 0 : index
    %c0_1 = arith.constant 0 : index
    %c0_2 = arith.constant 0 : index
    %3 = vector.load %arg14[%c0, %c0_1, %c0_2] : memref<1x162x16xf32, #tpu.memory_space<vmem>>, vector<1x162x16xf32>
    %4 = vector.shape_cast %3 : vector<1x162x16xf32> to vector<162x16xf32>
    %c0_3 = arith.constant 0 : index
    %c0_4 = arith.constant 0 : index
    %5 = vector.load %arg3[%c0_3, %c0_4] : memref<162x9xf32, #tpu.memory_space<vmem>>, vector<162x9xf32>
    %c0_5 = arith.constant 0 : index
    %c0_6 = arith.constant 0 : index
    %6 = vector.load %arg4[%c0_5, %c0_6] : memref<2x162xf32, #tpu.memory_space<vmem>>, vector<2x162xf32>
    %c0_7 = arith.constant 0 : index
    %c0_8 = arith.constant 0 : index
    %7 = vector.load %arg5[%c0_7, %c0_8] : memref<162x2xf32, #tpu.memory_space<vmem>>, vector<162x2xf32>
    %c0_9 = arith.constant 0 : index
    %c0_10 = arith.constant 0 : index
    %c0_11 = arith.constant 0 : index
    %8 = vector.load %arg6[%c0_9, %c0_10, %c0_11] : memref<1x144x16xf32, #tpu.memory_space<vmem>>, vector<1x144x16xf32>
    %9 = vector.shape_cast %8 : vector<1x144x16xf32> to vector<144x16xf32>
    %cst = arith.constant 0.000000e+00 : f32
    %10 = vector.broadcast %cst : f32 to vector<162x144xf32>
    %c0_12 = arith.constant 0 : index
    %c0_13 = arith.constant 0 : index
    %11 = vector.load %arg15[%c0_12, %c0_13] : memref<162x144xf32, #tpu.memory_space<vmem>>, vector<162x144xf32>
    tpu.vector_store %arg15[%c0_12, %c0_13], %10 {strides = array<i32>} : memref<162x144xf32, #tpu.memory_space<vmem>>, vector<162x144xf32>,
    %12 = vector.extract_strided_slice %5 {offsets = [10, 0], sizes = [152, 1], strides = [1, 1]} : vector<162x9xf32> to vector<152x1xf32>
    %13 = vector.extract_strided_slice %4 {offsets = [0, 0], sizes = [152, 16], strides = [1, 1]} : vector<162x16xf32> to vector<152x16xf32>
    %14 = vector.broadcast %12 : vector<152x1xf32> to vector<152x16xf32>
    %15 = arith.mulf %14, %13 : vector<152x16xf32>
    %c10 = arith.constant 10 : index
    %c0_14 = arith.constant 0 : index
    %16 = vector.load %arg15[%c10, %c0_14] : memref<162x144xf32, #tpu.memory_space<vmem>>, vector<152x16xf32>
    tpu.vector_store %arg15[%c10, %c0_14], %15 {strides = array<i32>} : memref<162x144xf32, #tpu.memory_space<vmem>>, vector<152x16xf32>,
    %17 = vector.extract_strided_slice %5 {offsets = [9, 1], sizes = [153, 1], strides = [1, 1]} : vector<162x9xf32> to vector<153x1xf32>
    %18 = vector.extract_strided_slice %4 {offsets = [0, 0], sizes = [153, 16], strides = [1, 1]} : vector<162x16xf32> to vector<153x16xf32>
    %19 = vector.broadcast %17 : vector<153x1xf32> to vector<153x16xf32>
    %20 = arith.mulf %19, %18 : vector<153x16xf32>
    %c9 = arith.constant 9 : index
    %c16 = arith.constant 16 : index
    %21 = vector.load %arg15[%c9, %c16] : memref<162x144xf32, #tpu.memory_space<vmem>>, vector<153x16xf32>
    tpu.vector_store %arg15[%c9, %c16], %20 {strides = array<i32>} : memref<162x144xf32, #tpu.memory_space<vmem>>, vector<153x16xf32>,
    %22 = vector.extract_strided_slice %5 {offsets = [8, 2], sizes = [154, 1], strides = [1, 1]} : vector<162x9xf32> to vector<154x1xf32>
    %23 = vector.extract_strided_slice %4 {offsets = [0, 0], sizes = [154, 16], strides = [1, 1]} : vector<162x16xf32> to vector<154x16xf32>
    %24 = vector.broadcast %22 : vector<154x1xf32> to vector<154x16xf32>
    %25 = arith.mulf %24, %23 : vector<154x16xf32>
    %c8 = arith.constant 8 : index
    %c32 = arith.constant 32 : index
    %26 = vector.load %arg15[%c8, %c32] : memref<162x144xf32, #tpu.memory_space<vmem>>, vector<154x16xf32>
    tpu.vector_store %arg15[%c8, %c32], %25 {strides = array<i32>} : memref<162x144xf32, #tpu.memory_space<vmem>>, vector<154x16xf32>,
    %27 = vector.extract_strided_slice %5 {offsets = [1, 3], sizes = [161, 1], strides = [1, 1]} : vector<162x9xf32> to vector<161x1xf32>
    %28 = vector.extract_strided_slice %4 {offsets = [0, 0], sizes = [161, 16], strides = [1, 1]} : vector<162x16xf32> to vector<161x16xf32>
    %29 = vector.broadcast %27 : vector<161x1xf32> to vector<161x16xf32>
    %30 = arith.mulf %29, %28 : vector<161x16xf32>
    %c1 = arith.constant 1 : index
    %c48 = arith.constant 48 : index
    %31 = vector.load %arg15[%c1, %c48] : memref<162x144xf32, #tpu.memory_space<vmem>>, vector<161x16xf32>
    tpu.vector_store %arg15[%c1, %c48], %30 {strides = array<i32>} : memref<162x144xf32, #tpu.memory_space<vmem>>, vector<161x16xf32>,
    %32 = vector.extract_strided_slice %5 {offsets = [0, 4], sizes = [162, 1], strides = [1, 1]} : vector<162x9xf32> to vector<162x1xf32>
    %33 = vector.broadcast %32 : vector<162x1xf32> to vector<162x16xf32>
    %34 = arith.mulf %33, %4 : vector<162x16xf32>
    %c0_15 = arith.constant 0 : index
    %c64 = arith.constant 64 : index
    %35 = vector.load %arg15[%c0_15, %c64] : memref<162x144xf32, #tpu.memory_space<vmem>>, vector<162x16xf32>
    tpu.vector_store %arg15[%c0_15, %c64], %34 {strides = array<i32>} : memref<162x144xf32, #tpu.memory_space<vmem>>, vector<162x16xf32>,
    %36 = vector.extract_strided_slice %5 {offsets = [0, 5], sizes = [161, 1], strides = [1, 1]} : vector<162x9xf32> to vector<161x1xf32>
    %37 = vector.extract_strided_slice %4 {offsets = [1, 0], sizes = [161, 16], strides = [1, 1]} : vector<162x16xf32> to vector<161x16xf32>
    %38 = vector.broadcast %36 : vector<161x1xf32> to vector<161x16xf32>
    %39 = arith.mulf %38, %37 : vector<161x16xf32>
    %c0_16 = arith.constant 0 : index
    %c80 = arith.constant 80 : index
    %40 = vector.load %arg15[%c0_16, %c80] : memref<162x144xf32, #tpu.memory_space<vmem>>, vector<161x16xf32>
    tpu.vector_store %arg15[%c0_16, %c80], %39 {strides = array<i32>} : memref<162x144xf32, #tpu.memory_space<vmem>>, vector<161x16xf32>,
    %41 = vector.extract_strided_slice %5 {offsets = [0, 6], sizes = [154, 1], strides = [1, 1]} : vector<162x9xf32> to vector<154x1xf32>
    %42 = vector.extract_strided_slice %4 {offsets = [8, 0], sizes = [154, 16], strides = [1, 1]} : vector<162x16xf32> to vector<154x16xf32>
    %43 = vector.broadcast %41 : vector<154x1xf32> to vector<154x16xf32>
    %44 = arith.mulf %43, %42 : vector<154x16xf32>
    %c0_17 = arith.constant 0 : index
    %c96 = arith.constant 96 : index
    %45 = vector.load %arg15[%c0_17, %c96] : memref<162x144xf32, #tpu.memory_space<vmem>>, vector<154x16xf32>
    tpu.vector_store %arg15[%c0_17, %c96], %44 {strides = array<i32>} : memref<162x144xf32, #tpu.memory_space<vmem>>, vector<154x16xf32>,
    %46 = vector.extract_strided_slice %5 {offsets = [0, 7], sizes = [153, 1], strides = [1, 1]} : vector<162x9xf32> to vector<153x1xf32>
    %47 = vector.extract_strided_slice %4 {offsets = [9, 0], sizes = [153, 16], strides = [1, 1]} : vector<162x16xf32> to vector<153x16xf32>
    %48 = vector.broadcast %46 : vector<153x1xf32> to vector<153x16xf32>
    %49 = arith.mulf %48, %47 : vector<153x16xf32>
    %c0_18 = arith.constant 0 : index
    %c112 = arith.constant 112 : index
    %50 = vector.load %arg15[%c0_18, %c112] : memref<162x144xf32, #tpu.memory_space<vmem>>, vector<153x16xf32>
    tpu.vector_store %arg15[%c0_18, %c112], %49 {strides = array<i32>} : memref<162x144xf32, #tpu.memory_space<vmem>>, vector<153x16xf32>,
    %51 = vector.extract_strided_slice %5 {offsets = [0, 8], sizes = [152, 1], strides = [1, 1]} : vector<162x9xf32> to vector<152x1xf32>
    %52 = vector.extract_strided_slice %4 {offsets = [10, 0], sizes = [152, 16], strides = [1, 1]} : vector<162x16xf32> to vector<152x16xf32>
    %53 = vector.broadcast %51 : vector<152x1xf32> to vector<152x16xf32>
    %54 = arith.mulf %53, %52 : vector<152x16xf32>
    %c0_19 = arith.constant 0 : index
    %c128 = arith.constant 128 : index
    %55 = vector.load %arg15[%c0_19, %c128] : memref<162x144xf32, #tpu.memory_space<vmem>>, vector<152x16xf32>
    tpu.vector_store %arg15[%c0_19, %c128], %54 {strides = array<i32>} : memref<162x144xf32, #tpu.memory_space<vmem>>, vector<152x16xf32>,
    %c0_20 = arith.constant 0 : index
    %c0_21 = arith.constant 0 : index
    %56 = vector.load %arg15[%c0_20, %c0_21] : memref<162x144xf32, #tpu.memory_space<vmem>>, vector<162x144xf32>
    %cst_22 = arith.constant dense<0.000000e+00> : vector<162x16xf32>
    %57 = tpu.matmul %56, %9, %cst_22 {dimension_numbers = #tpu.dot_dimension_numbers<[1], [0], [0], [1], [0, 0, 1, 1], [], []>} : vector<162x144xf32>, vector<144x16xf32>, vector<162x16xf32> -> vector<162x16xf32>
    %c0_23 = arith.constant 0 : index
    %c0_24 = arith.constant 0 : index
    %c0_25 = arith.constant 0 : index
    %58 = vector.load %arg7[%c0_23, %c0_24, %c0_25] : memref<1x162x16xf32, #tpu.memory_space<vmem>>, vector<1x162x16xf32>
    %59 = vector.shape_cast %58 : vector<1x162x16xf32> to vector<162x16xf32>
    %c0_26 = arith.constant 0 : index
    %c0_27 = arith.constant 0 : index
    %c0_28 = arith.constant 0 : index
    %60 = vector.load %arg8[%c0_26, %c0_27, %c0_28] : memref<1x162x16xf32, #tpu.memory_space<vmem>>, vector<1x162x16xf32>
    %61 = vector.shape_cast %60 : vector<1x162x16xf32> to vector<162x16xf32>
    %cst_29 = arith.constant dense<0.000000e+00> : vector<2x16xf32>
    %62 = tpu.matmul %6, %57, %cst_29 {dimension_numbers = #tpu.dot_dimension_numbers<[1], [0], [0], [1], [0, 0, 1, 1], [], []>} : vector<2x162xf32>, vector<162x16xf32>, vector<2x16xf32> -> vector<2x16xf32>
    %cst_30 = arith.constant dense<0.000000e+00> : vector<2xf32>
    %63 = vector.multi_reduction <add>, %62, %cst_30 [1] : vector<2x16xf32> to vector<2xf32>
    %64 = vector.shape_cast %63 : vector<2xf32> to vector<2x1xf32>
    %65 = arith.mulf %57, %57 : vector<162x16xf32>
    %cst_31 = arith.constant dense<0.000000e+00> : vector<2x16xf32>
    %66 = tpu.matmul %6, %65, %cst_31 {dimension_numbers = #tpu.dot_dimension_numbers<[1], [0], [0], [1], [0, 0, 1, 1], [], []>} : vector<2x162xf32>, vector<162x16xf32>, vector<2x16xf32> -> vector<2x16xf32>
    %cst_32 = arith.constant dense<0.000000e+00> : vector<2xf32>
    %67 = vector.multi_reduction <add>, %66, %cst_32 [1] : vector<2x16xf32> to vector<2xf32>
    %68 = vector.shape_cast %67 : vector<2xf32> to vector<2x1xf32>
    %cst_33 = arith.constant 7.71604944E-4 : f32
    %69 = vector.broadcast %cst_33 : f32 to vector<2x1xf32>
    %70 = arith.mulf %64, %69 : vector<2x1xf32>
    %cst_34 = arith.constant 7.71604944E-4 : f32
    %71 = vector.broadcast %cst_34 : f32 to vector<2x1xf32>
    %72 = arith.mulf %68, %71 : vector<2x1xf32>
    %73 = arith.mulf %70, %70 : vector<2x1xf32>
    %74 = arith.subf %72, %73 : vector<2x1xf32>
    %cst_35 = arith.constant 9.99999974E-6 : f32
    %75 = vector.broadcast %cst_35 : f32 to vector<2x1xf32>
    %76 = arith.addf %74, %75 : vector<2x1xf32>
    %77 = math.rsqrt %76 : vector<2x1xf32>
    %cst_36 = arith.constant dense<0.000000e+00> : vector<162x1xf32>
    %78 = tpu.matmul %7, %70, %cst_36 {dimension_numbers = #tpu.dot_dimension_numbers<[1], [0], [0], [1], [0, 0, 1, 1], [], []>} : vector<162x2xf32>, vector<2x1xf32>, vector<162x1xf32> -> vector<162x1xf32>
    %cst_37 = arith.constant dense<0.000000e+00> : vector<162x1xf32>
    %79 = tpu.matmul %7, %77, %cst_37 {dimension_numbers = #tpu.dot_dimension_numbers<[1], [0], [0], [1], [0, 0, 1, 1], [], []>} : vector<162x2xf32>, vector<2x1xf32>, vector<162x1xf32> -> vector<162x1xf32>
    %80 = vector.broadcast %78 : vector<162x1xf32> to vector<162x16xf32>
    %81 = arith.subf %57, %80 : vector<162x16xf32>
    %82 = vector.broadcast %79 : vector<162x1xf32> to vector<162x16xf32>
    %83 = arith.mulf %82, %59 : vector<162x16xf32>
    %84 = arith.mulf %81, %83 : vector<162x16xf32>
    %85 = arith.addf %84, %61 : vector<162x16xf32>
    %cst_38 = arith.constant 0.000000e+00 : f32
    %86 = vector.broadcast %cst_38 : f32 to vector<162x16xf32>
    %87 = arith.maximumf %85, %86 : vector<162x16xf32>
    %c0_39 = arith.constant 0 : index
    %c0_40 = arith.constant 0 : index
    %c0_41 = arith.constant 0 : index
    %88 = vector.load %arg9[%c0_39, %c0_40, %c0_41] : memref<1x144x16xf32, #tpu.memory_space<vmem>>, vector<1x144x16xf32>
    %89 = vector.shape_cast %88 : vector<1x144x16xf32> to vector<144x16xf32>
    %cst_42 = arith.constant 0.000000e+00 : f32
    %90 = vector.broadcast %cst_42 : f32 to vector<162x144xf32>
    %c0_43 = arith.constant 0 : index
    %c0_44 = arith.constant 0 : index
    %91 = vector.load %arg15[%c0_43, %c0_44] : memref<162x144xf32, #tpu.memory_space<vmem>>, vector<162x144xf32>
    tpu.vector_store %arg15[%c0_43, %c0_44], %90 {strides = array<i32>} : memref<162x144xf32, #tpu.memory_space<vmem>>, vector<162x144xf32>,
    %92 = vector.extract_strided_slice %5 {offsets = [10, 0], sizes = [152, 1], strides = [1, 1]} : vector<162x9xf32> to vector<152x1xf32>
    %93 = vector.extract_strided_slice %87 {offsets = [0, 0], sizes = [152, 16], strides = [1, 1]} : vector<162x16xf32> to vector<152x16xf32>
    %94 = vector.broadcast %92 : vector<152x1xf32> to vector<152x16xf32>
    %95 = arith.mulf %94, %93 : vector<152x16xf32>
    %c10_45 = arith.constant 10 : index
    %c0_46 = arith.constant 0 : index
    %96 = vector.load %arg15[%c10_45, %c0_46] : memref<162x144xf32, #tpu.memory_space<vmem>>, vector<152x16xf32>
    tpu.vector_store %arg15[%c10_45, %c0_46], %95 {strides = array<i32>} : memref<162x144xf32, #tpu.memory_space<vmem>>, vector<152x16xf32>,
    %97 = vector.extract_strided_slice %5 {offsets = [9, 1], sizes = [153, 1], strides = [1, 1]} : vector<162x9xf32> to vector<153x1xf32>
    %98 = vector.extract_strided_slice %87 {offsets = [0, 0], sizes = [153, 16], strides = [1, 1]} : vector<162x16xf32> to vector<153x16xf32>
    %99 = vector.broadcast %97 : vector<153x1xf32> to vector<153x16xf32>
    %100 = arith.mulf %99, %98 : vector<153x16xf32>
    %c9_47 = arith.constant 9 : index
    %c16_48 = arith.constant 16 : index
    %101 = vector.load %arg15[%c9_47, %c16_48] : memref<162x144xf32, #tpu.memory_space<vmem>>, vector<153x16xf32>
    tpu.vector_store %arg15[%c9_47, %c16_48], %100 {strides = array<i32>} : memref<162x144xf32, #tpu.memory_space<vmem>>, vector<153x16xf32>,
    %102 = vector.extract_strided_slice %5 {offsets = [8, 2], sizes = [154, 1], strides = [1, 1]} : vector<162x9xf32> to vector<154x1xf32>
    %103 = vector.extract_strided_slice %87 {offsets = [0, 0], sizes = [154, 16], strides = [1, 1]} : vector<162x16xf32> to vector<154x16xf32>
    %104 = vector.broadcast %102 : vector<154x1xf32> to vector<154x16xf32>
    %105 = arith.mulf %104, %103 : vector<154x16xf32>
    %c8_49 = arith.constant 8 : index
    %c32_50 = arith.constant 32 : index
    %106 = vector.load %arg15[%c8_49, %c32_50] : memref<162x144xf32, #tpu.memory_space<vmem>>, vector<154x16xf32>
    tpu.vector_store %arg15[%c8_49, %c32_50], %105 {strides = array<i32>} : memref<162x144xf32, #tpu.memory_space<vmem>>, vector<154x16xf32>,
    %107 = vector.extract_strided_slice %5 {offsets = [1, 3], sizes = [161, 1], strides = [1, 1]} : vector<162x9xf32> to vector<161x1xf32>
    %108 = vector.extract_strided_slice %87 {offsets = [0, 0], sizes = [161, 16], strides = [1, 1]} : vector<162x16xf32> to vector<161x16xf32>
    %109 = vector.broadcast %107 : vector<161x1xf32> to vector<161x16xf32>
    %110 = arith.mulf %109, %108 : vector<161x16xf32>
    %c1_51 = arith.constant 1 : index
    %c48_52 = arith.constant 48 : index
    %111 = vector.load %arg15[%c1_51, %c48_52] : memref<162x144xf32, #tpu.memory_space<vmem>>, vector<161x16xf32>
    tpu.vector_store %arg15[%c1_51, %c48_52], %110 {strides = array<i32>} : memref<162x144xf32, #tpu.memory_space<vmem>>, vector<161x16xf32>,
    %112 = vector.extract_strided_slice %5 {offsets = [0, 4], sizes = [162, 1], strides = [1, 1]} : vector<162x9xf32> to vector<162x1xf32>
    %113 = vector.broadcast %112 : vector<162x1xf32> to vector<162x16xf32>
    %114 = arith.mulf %113, %87 : vector<162x16xf32>
    %c0_53 = arith.constant 0 : index
    %c64_54 = arith.constant 64 : index
    %115 = vector.load %arg15[%c0_53, %c64_54] : memref<162x144xf32, #tpu.memory_space<vmem>>, vector<162x16xf32>
    tpu.vector_store %arg15[%c0_53, %c64_54], %114 {strides = array<i32>} : memref<162x144xf32, #tpu.memory_space<vmem>>, vector<162x16xf32>,
    %116 = vector.extract_strided_slice %5 {offsets = [0, 5], sizes = [161, 1], strides = [1, 1]} : vector<162x9xf32> to vector<161x1xf32>
    %117 = vector.extract_strided_slice %87 {offsets = [1, 0], sizes = [161, 16], strides = [1, 1]} : vector<162x16xf32> to vector<161x16xf32>
    %118 = vector.broadcast %116 : vector<161x1xf32> to vector<161x16xf32>
    %119 = arith.mulf %118, %117 : vector<161x16xf32>
    %c0_55 = arith.constant 0 : index
    %c80_56 = arith.constant 80 : index
    %120 = vector.load %arg15[%c0_55, %c80_56] : memref<162x144xf32, #tpu.memory_space<vmem>>, vector<161x16xf32>
    tpu.vector_store %arg15[%c0_55, %c80_56], %119 {strides = array<i32>} : memref<162x144xf32, #tpu.memory_space<vmem>>, vector<161x16xf32>,
    %121 = vector.extract_strided_slice %5 {offsets = [0, 6], sizes = [154, 1], strides = [1, 1]} : vector<162x9xf32> to vector<154x1xf32>
    %122 = vector.extract_strided_slice %87 {offsets = [8, 0], sizes = [154, 16], strides = [1, 1]} : vector<162x16xf32> to vector<154x16xf32>
    %123 = vector.broadcast %121 : vector<154x1xf32> to vector<154x16xf32>
    %124 = arith.mulf %123, %122 : vector<154x16xf32>
    %c0_57 = arith.constant 0 : index
    %c96_58 = arith.constant 96 : index
    %125 = vector.load %arg15[%c0_57, %c96_58] : memref<162x144xf32, #tpu.memory_space<vmem>>, vector<154x16xf32>
    tpu.vector_store %arg15[%c0_57, %c96_58], %124 {strides = array<i32>} : memref<162x144xf32, #tpu.memory_space<vmem>>, vector<154x16xf32>,
    %126 = vector.extract_strided_slice %5 {offsets = [0, 7], sizes = [153, 1], strides = [1, 1]} : vector<162x9xf32> to vector<153x1xf32>
    %127 = vector.extract_strided_slice %87 {offsets = [9, 0], sizes = [153, 16], strides = [1, 1]} : vector<162x16xf32> to vector<153x16xf32>
    %128 = vector.broadcast %126 : vector<153x1xf32> to vector<153x16xf32>
    %129 = arith.mulf %128, %127 : vector<153x16xf32>
    %c0_59 = arith.constant 0 : index
    %c112_60 = arith.constant 112 : index
    %130 = vector.load %arg15[%c0_59, %c112_60] : memref<162x144xf32, #tpu.memory_space<vmem>>, vector<153x16xf32>
    tpu.vector_store %arg15[%c0_59, %c112_60], %129 {strides = array<i32>} : memref<162x144xf32, #tpu.memory_space<vmem>>, vector<153x16xf32>,
    %131 = vector.extract_strided_slice %5 {offsets = [0, 8], sizes = [152, 1], strides = [1, 1]} : vector<162x9xf32> to vector<152x1xf32>
    %132 = vector.extract_strided_slice %87 {offsets = [10, 0], sizes = [152, 16], strides = [1, 1]} : vector<162x16xf32> to vector<152x16xf32>
    %133 = vector.broadcast %131 : vector<152x1xf32> to vector<152x16xf32>
    %134 = arith.mulf %133, %132 : vector<152x16xf32>
    %c0_61 = arith.constant 0 : index
    %c128_62 = arith.constant 128 : index
    %135 = vector.load %arg15[%c0_61, %c128_62] : memref<162x144xf32, #tpu.memory_space<vmem>>, vector<152x16xf32>
    tpu.vector_store %arg15[%c0_61, %c128_62], %134 {strides = array<i32>} : memref<162x144xf32, #tpu.memory_space<vmem>>, vector<152x16xf32>,
    %c0_63 = arith.constant 0 : index
    %c0_64 = arith.constant 0 : index
    %136 = vector.load %arg15[%c0_63, %c0_64] : memref<162x144xf32, #tpu.memory_space<vmem>>, vector<162x144xf32>
    %cst_65 = arith.constant dense<0.000000e+00> : vector<162x16xf32>
    %137 = tpu.matmul %136, %89, %cst_65 {dimension_numbers = #tpu.dot_dimension_numbers<[1], [0], [0], [1], [0, 0, 1, 1], [], []>} : vector<162x144xf32>, vector<144x16xf32>, vector<162x16xf32> -> vector<162x16xf32>
    %c0_66 = arith.constant 0 : index
    %c0_67 = arith.constant 0 : index
    %c0_68 = arith.constant 0 : index
    %138 = vector.load %arg10[%c0_66, %c0_67, %c0_68] : memref<1x162x16xf32, #tpu.memory_space<vmem>>, vector<1x162x16xf32>
    %139 = vector.shape_cast %138 : vector<1x162x16xf32> to vector<162x16xf32>
    %c0_69 = arith.constant 0 : index
    %c0_70 = arith.constant 0 : index
    %c0_71 = arith.constant 0 : index
    %140 = vector.load %arg11[%c0_69, %c0_70, %c0_71] : memref<1x162x16xf32, #tpu.memory_space<vmem>>, vector<1x162x16xf32>
    %141 = vector.shape_cast %140 : vector<1x162x16xf32> to vector<162x16xf32>
    %cst_72 = arith.constant dense<0.000000e+00> : vector<2x16xf32>
    %142 = tpu.matmul %6, %137, %cst_72 {dimension_numbers = #tpu.dot_dimension_numbers<[1], [0], [0], [1], [0, 0, 1, 1], [], []>} : vector<2x162xf32>, vector<162x16xf32>, vector<2x16xf32> -> vector<2x16xf32>
    %cst_73 = arith.constant dense<0.000000e+00> : vector<2xf32>
    %143 = vector.multi_reduction <add>, %142, %cst_73 [1] : vector<2x16xf32> to vector<2xf32>
    %144 = vector.shape_cast %143 : vector<2xf32> to vector<2x1xf32>
    %145 = arith.mulf %137, %137 : vector<162x16xf32>
    %cst_74 = arith.constant dense<0.000000e+00> : vector<2x16xf32>
    %146 = tpu.matmul %6, %145, %cst_74 {dimension_numbers = #tpu.dot_dimension_numbers<[1], [0], [0], [1], [0, 0, 1, 1], [], []>} : vector<2x162xf32>, vector<162x16xf32>, vector<2x16xf32> -> vector<2x16xf32>
    %cst_75 = arith.constant dense<0.000000e+00> : vector<2xf32>
    %147 = vector.multi_reduction <add>, %146, %cst_75 [1] : vector<2x16xf32> to vector<2xf32>
    %148 = vector.shape_cast %147 : vector<2xf32> to vector<2x1xf32>
    %cst_76 = arith.constant 7.71604944E-4 : f32
    %149 = vector.broadcast %cst_76 : f32 to vector<2x1xf32>
    %150 = arith.mulf %144, %149 : vector<2x1xf32>
    %cst_77 = arith.constant 7.71604944E-4 : f32
    %151 = vector.broadcast %cst_77 : f32 to vector<2x1xf32>
    %152 = arith.mulf %148, %151 : vector<2x1xf32>
    %153 = arith.mulf %150, %150 : vector<2x1xf32>
    %154 = arith.subf %152, %153 : vector<2x1xf32>
    %cst_78 = arith.constant 9.99999974E-6 : f32
    %155 = vector.broadcast %cst_78 : f32 to vector<2x1xf32>
    %156 = arith.addf %154, %155 : vector<2x1xf32>
    %157 = math.rsqrt %156 : vector<2x1xf32>
    %cst_79 = arith.constant dense<0.000000e+00> : vector<162x1xf32>
    %158 = tpu.matmul %7, %150, %cst_79 {dimension_numbers = #tpu.dot_dimension_numbers<[1], [0], [0], [1], [0, 0, 1, 1], [], []>} : vector<162x2xf32>, vector<2x1xf32>, vector<162x1xf32> -> vector<162x1xf32>
    %cst_80 = arith.constant dense<0.000000e+00> : vector<162x1xf32>
    %159 = tpu.matmul %7, %157, %cst_80 {dimension_numbers = #tpu.dot_dimension_numbers<[1], [0], [0], [1], [0, 0, 1, 1], [], []>} : vector<162x2xf32>, vector<2x1xf32>, vector<162x1xf32> -> vector<162x1xf32>
    %160 = vector.broadcast %158 : vector<162x1xf32> to vector<162x16xf32>
    %161 = arith.subf %137, %160 : vector<162x16xf32>
    %162 = vector.broadcast %159 : vector<162x1xf32> to vector<162x16xf32>
    %163 = arith.mulf %162, %139 : vector<162x16xf32>
    %164 = arith.mulf %161, %163 : vector<162x16xf32>
    %165 = arith.addf %164, %141 : vector<162x16xf32>
    %cst_81 = arith.constant dense<0.000000e+00> : vector<2x16xf32>
    %166 = tpu.matmul %6, %165, %cst_81 {dimension_numbers = #tpu.dot_dimension_numbers<[1], [0], [0], [1], [0, 0, 1, 1], [], []>} : vector<2x162xf32>, vector<162x16xf32>, vector<2x16xf32> -> vector<2x16xf32>
    %cst_82 = arith.constant 0.0123456791 : f32
    %167 = vector.broadcast %cst_82 : f32 to vector<2x16xf32>
    %168 = arith.mulf %166, %167 : vector<2x16xf32>
    %c0_83 = arith.constant 0 : index
    %c0_84 = arith.constant 0 : index
    %c0_85 = arith.constant 0 : index
    %169 = vector.load %arg12[%c0_83, %c0_84, %c0_85] : memref<1x16x8xf32, #tpu.memory_space<vmem>>, vector<1x16x8xf32>
    %170 = vector.shape_cast %169 : vector<1x16x8xf32> to vector<16x8xf32>
    %cst_86 = arith.constant dense<0.000000e+00> : vector<2x8xf32>
    %171 = tpu.matmul %168, %170, %cst_86 {dimension_numbers = #tpu.dot_dimension_numbers<[1], [0], [0], [1], [0, 0, 1, 1], [], []>} : vector<2x16xf32>, vector<16x8xf32>, vector<2x8xf32> -> vector<2x8xf32>
    %cst_87 = arith.constant 0.000000e+00 : f32
    %172 = vector.broadcast %cst_87 : f32 to vector<2x8xf32>
    %173 = arith.maximumf %171, %172 : vector<2x8xf32>
    %c0_88 = arith.constant 0 : index
    %c0_89 = arith.constant 0 : index
    %c0_90 = arith.constant 0 : index
    %174 = vector.load %arg13[%c0_88, %c0_89, %c0_90] : memref<1x8x16xf32, #tpu.memory_space<vmem>>, vector<1x8x16xf32>
    %175 = vector.shape_cast %174 : vector<1x8x16xf32> to vector<8x16xf32>
    %cst_91 = arith.constant dense<0.000000e+00> : vector<2x16xf32>
    %176 = tpu.matmul %173, %175, %cst_91 {dimension_numbers = #tpu.dot_dimension_numbers<[1], [0], [0], [1], [0, 0, 1, 1], [], []>} : vector<2x8xf32>, vector<8x16xf32>, vector<2x16xf32> -> vector<2x16xf32>
    %cst_92 = arith.constant 0.000000e+00 : f32
    %177 = vector.broadcast %cst_92 : f32 to vector<2x16xf32>
    %178 = arith.subf %177, %176 : vector<2x16xf32>
    %179 = math.exp %178 : vector<2x16xf32>
    %cst_93 = arith.constant 1.000000e+00 : f32
    %180 = vector.broadcast %cst_93 : f32 to vector<2x16xf32>
    %181 = arith.addf %180, %179 : vector<2x16xf32>
    %182 = tpu.reciprocal %181 {approx = true} : vector<2x16xf32> -> vector<2x16xf32>
    %cst_94 = arith.constant dense<0.000000e+00> : vector<162x16xf32>
    %183 = tpu.matmul %7, %182, %cst_94 {dimension_numbers = #tpu.dot_dimension_numbers<[1], [0], [0], [1], [0, 0, 1, 1], [], []>} : vector<162x2xf32>, vector<2x16xf32>, vector<162x16xf32> -> vector<162x16xf32>
    %184 = arith.mulf %165, %183 : vector<162x16xf32>
    %185 = arith.addf %4, %184 : vector<162x16xf32>
    %cst_95 = arith.constant 0.000000e+00 : f32
    %186 = vector.broadcast %cst_95 : f32 to vector<162x16xf32>
    %187 = arith.maximumf %185, %186 : vector<162x16xf32>
    %c0_96 = arith.constant 0 : index
    %c0_97 = arith.constant 0 : index
    %c0_98 = arith.constant 0 : index
    %188 = vector.load %arg14[%c0_96, %c0_97, %c0_98] : memref<1x162x16xf32, #tpu.memory_space<vmem>>, vector<1x162x16xf32>
    %189 = vector.shape_cast %188 : vector<1x162x16xf32> to vector<162x16xf32>
    %190 = vector.shape_cast %187 : vector<162x16xf32> to vector<1x162x16xf32>
    tpu.vector_store %arg14[%c0_96, %c0_97, %c0_98], %190 {strides = array<i32>} : memref<1x162x16xf32, #tpu.memory_space<vmem>>, vector<1x162x16xf32>,
    return
  }
  func.func @transform_0(%arg0: i32, %arg1: i32) -> (i32, i32, i32) {
    %c0_i32 = arith.constant 0 : i32
    %c0_i32_0 = arith.constant 0 : i32
    %c0_i32_1 = arith.constant 0 : i32
    return %arg0, %c0_i32, %c0_i32_0 : i32, i32, i32
  }
  func.func @transform_1(%arg0: i32, %arg1: i32) -> (i32, i32) {
    %c0_i32 = arith.constant 0 : i32
    %c0_i32_0 = arith.constant 0 : i32
    %c0_i32_1 = arith.constant 0 : i32
    return %c0_i32, %c0_i32_0 : i32, i32
  }
  func.func @transform_2(%arg0: i32, %arg1: i32) -> (i32, i32) {
    %c0_i32 = arith.constant 0 : i32
    %c0_i32_0 = arith.constant 0 : i32
    %c0_i32_1 = arith.constant 0 : i32
    return %c0_i32, %c0_i32_0 : i32, i32
  }
  func.func @transform_3(%arg0: i32, %arg1: i32) -> (i32, i32) {
    %c0_i32 = arith.constant 0 : i32
    %c0_i32_0 = arith.constant 0 : i32
    %c0_i32_1 = arith.constant 0 : i32
    return %c0_i32, %c0_i32_0 : i32, i32
  }
  func.func @transform_4(%arg0: i32, %arg1: i32) -> (i32, i32, i32) {
    %c0_i32 = arith.constant 0 : i32
    %c0_i32_0 = arith.constant 0 : i32
    %c0_i32_1 = arith.constant 0 : i32
    return %arg1, %c0_i32, %c0_i32_0 : i32, i32, i32
  }
  func.func @transform_5(%arg0: i32, %arg1: i32) -> (i32, i32, i32) {
    %c0_i32 = arith.constant 0 : i32
    %c0_i32_0 = arith.constant 0 : i32
    %c0_i32_1 = arith.constant 0 : i32
    return %arg1, %c0_i32, %c0_i32_0 : i32, i32, i32
  }
  func.func @transform_6(%arg0: i32, %arg1: i32) -> (i32, i32, i32) {
    %c0_i32 = arith.constant 0 : i32
    %c0_i32_0 = arith.constant 0 : i32
    %c0_i32_1 = arith.constant 0 : i32
    return %arg1, %c0_i32, %c0_i32_0 : i32, i32, i32
  }
  func.func @transform_7(%arg0: i32, %arg1: i32) -> (i32, i32, i32) {
    %c0_i32 = arith.constant 0 : i32
    %c0_i32_0 = arith.constant 0 : i32
    %c0_i32_1 = arith.constant 0 : i32
    return %arg1, %c0_i32, %c0_i32_0 : i32, i32, i32
  }
  func.func @transform_8(%arg0: i32, %arg1: i32) -> (i32, i32, i32) {
    %c0_i32 = arith.constant 0 : i32
    %c0_i32_0 = arith.constant 0 : i32
    %c0_i32_1 = arith.constant 0 : i32
    return %arg1, %c0_i32, %c0_i32_0 : i32, i32, i32
  }
  func.func @transform_9(%arg0: i32, %arg1: i32) -> (i32, i32, i32) {
    %c0_i32 = arith.constant 0 : i32
    %c0_i32_0 = arith.constant 0 : i32
    %c0_i32_1 = arith.constant 0 : i32
    return %arg1, %c0_i32, %c0_i32_0 : i32, i32, i32
  }
  func.func @transform_10(%arg0: i32, %arg1: i32) -> (i32, i32, i32) {
    %c0_i32 = arith.constant 0 : i32
    %c0_i32_0 = arith.constant 0 : i32
    %c0_i32_1 = arith.constant 0 : i32
    return %arg1, %c0_i32, %c0_i32_0 : i32, i32, i32
  }
  func.func @transform_11(%arg0: i32, %arg1: i32) -> (i32, i32, i32) {
    %c0_i32 = arith.constant 0 : i32
    %c0_i32_0 = arith.constant 0 : i32
    %c0_i32_1 = arith.constant 0 : i32
    return %arg1, %c0_i32, %c0_i32_0 : i32, i32, i32
  }
  func.func @transform_12(%arg0: i32, %arg1: i32) -> (i32, i32, i32) {
    %c0_i32 = arith.constant 0 : i32
    %c0_i32_0 = arith.constant 0 : i32
    %c0_i32_1 = arith.constant 0 : i32
    return %arg0, %c0_i32, %c0_i32_0 : i32, i32, i32
  }
}

</mosaic_0001>

<bundles_post_ra>
// kernel: residual_layer.1
= control target key start
LH: loop header
LB: loop body
LE: loop exit
PB: predicated region body
PF: predicated region fallthrough
CT: control target
= control target key end

     0   :  { %s8252_s21 = smov 0   ;;  %s8254_s22 = smov 0   ;;  %s13066_s0 = inlined_call_operand.vmem [shape: f32[2,162,16], index: 0, kind: input, shape index: {}]   ;;  %s13067_s1 = inlined_call_operand.vmem [shape: f32[162,9], index: 1, kind: input, shape index: {}]   ;;  %s13068_s2 = inlined_call_operand.vmem [shape: f32[2,162], index: 2, kind: input, shape index: {}]   ;;  %s13069_s3 = inlined_call_operand.vmem [shape: f32[162,2], index: 3, kind: input, shape index: {}]   ;;  %s13070_s4 = inlined_call_operand.vmem [shape: f32[2,144,16], index: 4, kind: input, shape index: {}]   ;;  %s13071_s5 = inlined_call_operand.vmem [shape: f32[2,162,16], index: 5, kind: input, shape index: {}]   ;;  %s13072_s6 = inlined_call_operand.vmem [shape: f32[2,162,16], index: 6, kind: input, shape index: {}]   ;;  %s13073_s7 = inlined_call_operand.vmem [shape: f32[2,144,16], index: 7, kind: input, shape index: {}]   ;;  %s13074_s8 = inlined_call_operand.vmem [shape: f32[2,162,16], index: 8, kind: input, shape index: {}]   ;;  %s13075_s9 = inlined_call_operand.vmem [shape: f32[2,162,16], index: 9, kind: input, shape index: {}]   ;;  %s13076_s10 = inlined_call_operand.vmem [shape: f32[2,16,8], index: 10, kind: input, shape index: {}]   ;;  %s13077_s11 = inlined_call_operand.vmem [shape: f32[2,8,16], index: 11, kind: input, shape index: {}]   ;;  %s13078_s12 = inlined_call_operand.vmem [shape: f32[2,162,16], index: 12, kind: output, shape index: {}]  }
   0x1   :  { %13362 = sst [smem:[#allocation210_spill]] %s13066_s0  ;;  %s8256_s23 = smov 0  }
   0x2   :  { %13363 = sst [smem:[#allocation211_spill]] %s13068_s2  ;;  %s8258_s24 = smov 0  }
   0x3   :  { %13364 = sst [smem:[#allocation212_spill]] %s13069_s3  ;;  %s8260_s25 = smov 0  }
   0x4   :  { %13365 = sst [smem:[#allocation213_spill]] %s13070_s4 }
   0x5   :  { %13366 = sst [smem:[#allocation214_spill]] %s13071_s5 }
   0x6   :  { %13367 = sst [smem:[#allocation215_spill]] %s13072_s6 }
   0x7 LB: > { %13368 = sst [smem:[#allocation3_spill]] %s8158_s23  ;;  %s31_s26 = sadd.s32 1, %s8158_s23  ;;  %s8166_s25 = sphi %s8260_s25, %s22_s25   ;;  %s8162_s24 = sphi %s8258_s24, %s14038_s24   ;;  %s8158_s23 = sphi %s8256_s23, %s14037_s23   ;;  %s8154_s22 = sphi %s8254_s22, %s14036_s22   ;;  %s8150_s21 = sphi %s8252_s21, %s14035_s21  }
   0x8   : > { %13369 = sst [smem:[#allocation4_spill]] %s8162_s24  ;;  %s34_s27 = sadd.s32 1, %s8162_s24 }
   0x9   : > { %13370 = sst [smem:[#allocation5_spill]] %s8166_s25  ;;  %p32_p0 = scmp.ge.s32.totalorder %s31_s26, 2 }
   0xa   : > { %p7002_p1 = scmp.ge.s32.totalorder %s8166_s25, 1  ;;  %p453_p2 = scmp.lt.s32.totalorder %s8166_s25, 5 }
   0xb   : > { %s14040_s26 = smov (%p32_p0, %s31_s26), 0  ;;  %s14042_s27 = smov (!%p32_p0, %s34_s27), %s8162_s24 }
   0xc   : > { %13371 = sst [smem:[#allocation6_spill]] %s14040_s26  ;;  %p454_p3 = pnand %p7002_p1, %p453_p2 }
   0xd   : > { %p36_p4 = scmp.ge.s32.totalorder %s14042_s27, 2 }
   0xe   : > { %457 = sbr.rel (%p454_p3) target bundleno = 4449 (0x1161), region = 68 }
   0xf   : > { %s14044_s27 = smov (%p36_p4, %s14042_s27), 0 }
  0x10   : > { %13372 = sst [smem:[#allocation7_spill]] %s14044_s27 }
  0x15   : > { %p534_p5 = scmp.lt.s32.totalorder %s8154_s22, 1  ;;  %p539_p6 = scmp.lt.s32.totalorder %s8150_s21, 1 }
  0x16   : > { %s13373_s0 = sld [smem:[#allocation210_spill]]  ;;  %s13374_s4 = sld [smem:[#allocation213_spill]] }
  0x17   : > { %s14046_s22 = smov (!%p534_p5, %s8154_s22), 1  ;;  %s13375_s5 = sld [smem:[#allocation214_spill]] }
  0x18   : > { %s540_s28 = scalar_select %p539_p6, %s8150_s21, 1 }
  0x19   : > { %s7860_s29 = smul.u32 168, %s14046_s22  ;;  %s13376_s6 = sld [smem:[#allocation215_spill]] }
  0x1a   : > { %s7861_s30 = smul.u32 144, %s540_s28  ;;  %s7182_s13 = sshll.u32 %s540_s28, 4 }
  0x1b   : > { %s7862_s17 = smul.u32 168, %s540_s28  ;;  %s8324_s23 = scalar_lea.vmem %s13076_s10, %s7182_s13 }
  0x1c   : > { %s8289_s16 = scalar_lea.vmem %s13373_s0, %s7860_s29  ;;  %s8294_s20 = scalar_lea.vmem %s13374_s4, %s7861_s30 }
  0x1d   : > { %s8299_s24 = scalar_lea.vmem %s13073_s7, %s7861_s30  ;;  %s8304_s25 = scalar_lea.vmem %s13375_s5, %s7862_s17 }
  0x1e   : > { %s8314_s18 = scalar_lea.vmem %s13074_s8, %s7862_s17  ;;  %s8319_s26 = scalar_lea.vmem %s13075_s9, %s7862_s17 }
  0x1f   : > { %s8309_s15 = scalar_lea.vmem %s13376_s6, %s7862_s17  ;;  %s7012_s22 = sshll.u32 %s540_s28, 3 }
  0x20   : > { %s8329_s14 = scalar_lea.vmem %s13077_s11, %s7012_s22  ;;  %s8334_s2 = scalar_lea.vmem %s13078_s12, %s7860_s29 }
  0x21   : > { %p7014_p7 = scmp.ne.s32.totalorder %s8150_s21, 0 }
  0x22   : > { %v587_v0 = vld [vmem:[%s8289_s16] sm:$0xff] (!%p7014_p7)  ;;  %vm608_vm0 = vcmask (!%p7014_p7), 130048   ;;  %v588_v1 = vld [vmem:[%s8289_s16 + $0x8] sm:$0xff] (!%p7014_p7)  ;;  %v589_v2 = vld [vmem:[%s8289_s16 + $0x10] sm:$0xff] (!%p7014_p7)  ;;  %vm629_vm1 = vcmask (!%p7014_p7), 123904  }
  0x23   : > { %586 = sbr.rel (%p7014_p7) target bundleno = 46 (0x2e), region = 72  ;;  %609 = vst.msk [vmem:[%s8334_s2] sm:$0xff] (!%p7014_p7), %vm608_vm0, %v587_v0  ;;  %610 = vst.msk [vmem:[%s8334_s2 + $0x8] sm:$0xff] (!%p7014_p7), %vm608_vm0, %v588_v1  ;;  %v590_v3 = vld [vmem:[%s8289_s16 + $0x18] sm:$0xff] (!%p7014_p7)  ;;  %v591_v4 = vld [vmem:[%s8289_s16 + $0x20] sm:$0xff] (!%p7014_p7) }
  0x24   : > { %611 = vst.msk [vmem:[%s8334_s2 + $0x10] sm:$0xff] (!%p7014_p7), %vm608_vm0, %v589_v2  ;;  %v592_v5 = vld [vmem:[%s8289_s16 + $0x28] sm:$0xff] (!%p7014_p7)  ;;  %612 = vst.msk [vmem:[%s8334_s2 + $0x18] sm:$0xff] (!%p7014_p7), %vm608_vm0, %v590_v3  ;;  %v593_v6 = vld [vmem:[%s8289_s16 + $0x30] sm:$0xff] (!%p7014_p7) }
  0x25   : > { %613 = vst.msk [vmem:[%s8334_s2 + $0x20] sm:$0xff] (!%p7014_p7), %vm608_vm0, %v591_v4  ;;  %614 = vst.msk [vmem:[%s8334_s2 + $0x28] sm:$0xff] (!%p7014_p7), %vm608_vm0, %v592_v5  ;;  %v594_v7 = vld [vmem:[%s8289_s16 + $0x38] sm:$0xff] (!%p7014_p7)  ;;  %v595_v8 = vld [vmem:[%s8289_s16 + $0x40] sm:$0xff] (!%p7014_p7) }
  0x26   : > { %615 = vst.msk [vmem:[%s8334_s2 + $0x30] sm:$0xff] (!%p7014_p7), %vm608_vm0, %v593_v6  ;;  %616 = vst.msk [vmem:[%s8334_s2 + $0x38] sm:$0xff] (!%p7014_p7), %vm608_vm0, %v594_v7  ;;  %v596_v9 = vld [vmem:[%s8289_s16 + $0x48] sm:$0xff] (!%p7014_p7)  ;;  %v597_v10 = vld [vmem:[%s8289_s16 + $0x50] sm:$0xff] (!%p7014_p7) }
  0x27   : > { %617 = vst.msk [vmem:[%s8334_s2 + $0x40] sm:$0xff] (!%p7014_p7), %vm608_vm0, %v595_v8  ;;  %v598_v11 = vld [vmem:[%s8289_s16 + $0x58] sm:$0xff] (!%p7014_p7)  ;;  %618 = vst.msk [vmem:[%s8334_s2 + $0x48] sm:$0xff] (!%p7014_p7), %vm608_vm0, %v596_v9  ;;  %v599_v12 = vld [vmem:[%s8289_s16 + $0x60] sm:$0xff] (!%p7014_p7) }
  0x28   : > { %619 = vst.msk [vmem:[%s8334_s2 + $0x50] sm:$0xff] (!%p7014_p7), %vm608_vm0, %v597_v10  ;;  %620 = vst.msk [vmem:[%s8334_s2 + $0x58] sm:$0xff] (!%p7014_p7), %vm608_vm0, %v598_v11  ;;  %v600_v13 = vld [vmem:[%s8289_s16 + $0x68] sm:$0xff] (!%p7014_p7)  ;;  %v601_v14 = vld [vmem:[%s8289_s16 + $0x70] sm:$0xff] (!%p7014_p7) }
  0x29   : > { %621 = vst.msk [vmem:[%s8334_s2 + $0x60] sm:$0xff] (!%p7014_p7), %vm608_vm0, %v599_v12  ;;  %622 = vst.msk [vmem:[%s8334_s2 + $0x68] sm:$0xff] (!%p7014_p7), %vm608_vm0, %v600_v13  ;;  %v602_v15 = vld [vmem:[%s8289_s16 + $0x78] sm:$0xff] (!%p7014_p7)  ;;  %v603_v16 = vld [vmem:[%s8289_s16 + $0x80] sm:$0xff] (!%p7014_p7) }
  0x2a   : > { %623 = vst.msk [vmem:[%s8334_s2 + $0x70] sm:$0xff] %vm608_vm0, %v601_v14  ;;  %v604_v17 = vld [vmem:[%s8289_s16 + $0x88] sm:$0xff]  ;;  %624 = vst.msk [vmem:[%s8334_s2 + $0x78] sm:$0xff] %vm608_vm0, %v602_v15  ;;  %v605_v18 = vld [vmem:[%s8289_s16 + $0x90] sm:$0xff] }
  0x2b   : > { %625 = vst.msk [vmem:[%s8334_s2 + $0x80] sm:$0xff] %vm608_vm0, %v603_v16  ;;  %626 = vst.msk [vmem:[%s8334_s2 + $0x88] sm:$0xff] %vm608_vm0, %v604_v17  ;;  %v606_v19 = vld [vmem:[%s8289_s16 + $0x98] sm:$0xff]  ;;  %v607_v20 = vld [vmem:[%s8289_s16 + $0xa0] sm:$0x3] }
  0x2c   : > { %627 = vst.msk [vmem:[%s8334_s2 + $0x90] sm:$0xff] %vm608_vm0, %v605_v18  ;;  %628 = vst.msk [vmem:[%s8334_s2 + $0x98] sm:$0xff] %vm608_vm0, %v606_v19 }
  0x2d   : > { %630 = vst.msk [vmem:[%s8334_s2 + $0xa0] sm:$0x3] %vm629_vm1, %v607_v20 }
  0x2e PF: > { %v8402_v21 = vld [vmem:[%s13067_s1 + $0x10] sm:$0xff]  ;;  %v653_v22 = vld [vmem:[%s13067_s1 + $0x8] sm:$0xff]  ;;  %v13090_v23 = vmov 2   ;;  %v13100_v24 = vmov 1   ;;  %v8413_v25 = vld [vmem:[%s13067_s1 + $0x38] sm:$0xff]  ;;  %v13096_v27 = vmov 5  }
  0x2f   : > { %7929 = vset.pattern.permute.xlu0 %v13090_v23  ;;  %7922 = vset.pattern.permute.xlu1 %v13100_v24  ;;  %v8418_v26 = vld [vmem:[%s13067_s1] sm:$0xff]  ;;  %v8426_v28 = vld [vmem:[%s13067_s1 + $0x68] sm:$0xff]  ;;  %v13084_v30 = vmov 3   ;;  %v13088_v31 = vmov 7   ;;  %v8449_v33 = vld [vmem:[%s13067_s1 + $0x30] sm:$0xff]  ;;  %v13086_v36 = vmov 6  }
  0x30   : > { %1244 = vperm.xlu0 %7929, %v8402_v21   ;;  %976 = vperm.xlu1 %7922, %v653_v22   ;;  %v8433_v29 = vld [vmem:[%s13067_s1 + $0x88] sm:$0xff]  ;;  %v8441_v32 = vld [vmem:[%s13067_s1 + $0x20] sm:$0xff]  ;;  %v13094_v38 = vmov 4   ;;  %v8483_v39 = vld [vmem:[%s13067_s1 + $0x18] sm:$0xff]  ;;  %vm1955_vm2 = vcmask 1046528   ;;  %s8175_s22 = smov 64  }
  0x31   : > { %v8457_v34 = vld [vmem:[%s13067_s1 + $0x60] sm:$0xff]  ;;  %v8464_v35 = vld [vmem:[%s13067_s1 + $0x48] sm:$0xff]  ;;  %v8501_v40 = vld [vmem:[%s13067_s1 + $0x98] sm:$0xff]  ;;  %s8177_s3 = smov 80   ;;  %s8178_s0 = smov 32   ;;  %vm1056_vm3 = vcmask 1040384  }
  0x32   : > { %v8471_v37 = vld [vmem:[%s13067_s1 + $0x80] sm:$0xff]  ;;  %v8518_v41 = vld [vmem:[%s13067_s1 + $0x28] sm:$0xff]  ;;  %v8525_v42 = vld [vmem:[%s13067_s1 + $0x58] sm:$0xff]  ;;  %s8179_s4 = smov 48   ;;  %vm714_vm4 = vcmask 130048   ;;  %s8181_s5 = smov 112  }
  0x33   : > { %v8533_v43 = vld [vmem:[%s13067_s1 + $0x40] sm:$0xff]  ;;  %v8541_v44 = vld [vmem:[%s13067_s1 + $0x50] sm:$0xff]  ;;  %v8548_v45 = vld [vmem:[%s13067_s1 + $0x78] sm:$0xff]  ;;  %s8182_s6 = smov 16   ;;  %s8183_s21 = smov 96   ;;  %vm2626_vm5 = vcmask 1045504  }
  0x34   : > { %1264 = vperm.xlu0 %7929, %v8413_v25   ;;  %7923 = vset.pattern.permute.xlu1 %v13096_v27  ;;  %v8556_v46 = vld [vmem:[%s13067_s1 + $0x90] sm:$0xff]  ;;  %v8593_v53 = vld [vmem:[%s13067_s1 + $0xa0] sm:$0x3]  ;;  %v8693_v18 = vld [vmem:[%s8334_s2 + $0x8] sm:$0xff]  ;;  %vm954_vm6 = vcmask 130050   ;;  %vm876_vm7 = vcmask 1041408  }
  0x35   : > { %1872 = vperm.xlu1 %7923, %v8418_v26   ;;  %v8629_v63 = vld [vmem:[%s13067_s1 + $0x70] sm:$0xff]  ;;  %v8698_v19 = vld [vmem:[%s8334_s2] sm:$0xff]  ;;  %vm1635_vm8 = vcmask 523649   ;;  %vm1848_vm9 = vcmask 654848   ;;  %vm13325_vm10 = vcmask 786048   ;;  %vm1216_vm11 = vcmask 261249  }
  0x36   : > { %v1956_v20 = vrot.slane %v8698_v19, 1  ;;  %vm13324_vm12 = vcmask 392448   ;;  %vm13322_vm13 = vcmask 917248   ;;  %vm13323_vm14 = vcmask 523648   ;;  %s13776_s28 = sld [smem:[#allocation211_spill]]  ;;  %s13783_s13 = sld [smem:[#allocation212_spill]] }
  0x37   : > { %vm13320_vm15 = vcmask 1048448   ;;  %vm13321_vm0 = vcmask 261248   ;;  %vm755_vm1 = vcmask 123904  }
  0x38   : > { %1288 = vperm.xlu0 %7929, %v8426_v28  }
  0x39   : > { %7924 = vset.pattern.permute.xlu1 %v13090_v23 }
  0x3a   : > { %1240 = vperm.xlu1 %7924, %v653_v22  }
  0x3c   : > { %1304 = vperm.xlu0 %7929, %v8433_v29  }
  0x3e   : > { %7925 = vset.pattern.permute.xlu1 %v13084_v30 }
  0x3f   : > { %1447 = vperm.xlu1 %7925, %v653_v22  }
  0x40   : > { %7987 = vset.pattern.permute.xlu0 %v13088_v31 }
  0x41   : > { %2353 = vperm.xlu0 %7987, %v653_v22  }
  0x43   : > { %7926 = vset.pattern.permute.xlu1 %v13088_v31 }
  0x44   : > { %2349 = vperm.xlu1 %7926, %v8418_v26  }
  0x45   : > { %2365 = vperm.xlu0 %7987, %v8441_v32  }
  0x48   : > { %7927 = vset.pattern.permute.xlu1 %v13100_v24 }
  0x49   : > { %2373 = vperm.xlu0 %7987, %v8449_v33   ;;  %980 = vperm.xlu1 %7927, %v8402_v21  }
  0x4d   : > { %2397 = vperm.xlu0 %7987, %v8457_v34   ;;  %7928 = vset.pattern.permute.xlu1 %v13096_v27 }
  0x4e   : > { %1876 = vperm.xlu1 %7928, %v653_v22  }
  0x51   : > { %2385 = vperm.xlu0 %7987, %v8464_v35  }
  0x52   : > { %7930 = vset.pattern.permute.xlu1 %v13086_v36 }
  0x53   : > { %2151 = vperm.xlu1 %7930, %v653_v22  }
  0x55   : > { %2413 = vperm.xlu0 %7987, %v8471_v37  }
  0x57   : > { %7931 = vset.pattern.permute.xlu1 %v13084_v30 }
  0x58   : > { %1451 = vperm.xlu1 %7931, %v8402_v21  }
  0x59   : > { %7990 = vset.pattern.permute.xlu0 %v13094_v38 }
  0x5a   : > { %1660 = vperm.xlu0 %7990, %v8418_v26  }
  0x5c   : > { %7932 = vset.pattern.permute.xlu1 %v13094_v38 }
  0x5d   : > { %1668 = vperm.xlu1 %7932, %v8402_v21  }
  0x5e   : > { %1664 = vperm.xlu0 %7990, %v653_v22  }
  0x61   : > { %7933 = vset.pattern.permute.xlu1 %v13100_v24 }
  0x62   : > { %1676 = vperm.xlu0 %7990, %v8441_v32   ;;  %984 = vperm.xlu1 %7933, %v8483_v39  }
  0x66   : > { %1684 = vperm.xlu0 %7990, %v8449_v33   ;;  %7934 = vset.pattern.permute.xlu1 %v13090_v23 }
  0x67   : > { %1248 = vperm.xlu1 %7934, %v8483_v39  }
  0x6a   : > { %1708 = vperm.xlu0 %7990, %v8457_v34  }
  0x6b   : > { %7935 = vset.pattern.permute.xlu1 %v13086_v36 }
  0x6c   : > { %2155 = vperm.xlu1 %7935, %v8402_v21  }
  0x6e   : > { %1696 = vperm.xlu0 %7990, %v8464_v35  }
  0x70   : > { %7936 = vset.pattern.permute.xlu1 %v13088_v31 }
  0x71   : > { %2357 = vperm.xlu1 %7936, %v8402_v21  }
  0x72   : > { %1724 = vperm.xlu0 %7990, %v8471_v37  }
  0x75   : > { %7937 = vset.pattern.permute.xlu1 %v13094_v38 }
  0x76   : > { %1736 = vperm.xlu0 %7990, %v8501_v40   ;;  %1672 = vperm.xlu1 %7937, %v8483_v39  }
  0x7a   : > { %8001 = vset.pattern.permute.xlu0 %v13086_v36  ;;  %7938 = vset.pattern.permute.xlu1 %v13096_v27 }
  0x7b   : > { %2147 = vperm.xlu0 %8001, %v8418_v26   ;;  %1884 = vperm.xlu1 %7938, %v8483_v39  }
  0x7f   : > { %2159 = vperm.xlu0 %8001, %v8483_v39   ;;  %7939 = vset.pattern.permute.xlu1 %v13090_v23 }
  0x80   : > { %1252 = vperm.xlu1 %7939, %v8441_v32  }
  0x83   : > { %2163 = vperm.xlu0 %8001, %v8441_v32  }
  0x84   : > { %7940 = vset.pattern.permute.xlu1 %v13084_v30 }
  0x85   : > { %1459 = vperm.xlu1 %7940, %v8441_v32  }
  0x87   : > { %2167 = vperm.xlu0 %8001, %v8518_v41  }
  0x89   : > { %7941 = vset.pattern.permute.xlu1 %v13088_v31 }
  0x8a   : > { %2361 = vperm.xlu1 %7941, %v8483_v39  }
  0x8b   : > { %2191 = vperm.xlu0 %8001, %v8525_v42  }
  0x8e   : > { %7942 = vset.pattern.permute.xlu1 %v13100_v24 }
  0x8f   : > { %2179 = vperm.xlu0 %8001, %v8533_v43   ;;  %992 = vperm.xlu1 %7942, %v8518_v41  }
  0x93   : > { %2183 = vperm.xlu0 %8001, %v8464_v35   ;;  %1012 = vperm.xlu1 %7942, %v8541_v44  }
  0x97   : > { %2207 = vperm.xlu0 %8001, %v8548_v45   ;;  %7943 = vset.pattern.permute.xlu1 %v13090_v23 }
  0x98   : > { %1256 = vperm.xlu1 %7943, %v8518_v41  }
  0x9b   : > { %2219 = vperm.xlu0 %8001, %v8556_v46  }
  0x9c   : > { %1276 = vperm.xlu1 %7943, %v8541_v44  }
  0x9f   : > { %2223 = vperm.xlu0 %8001, %v8501_v40  }
  0xa0   : > { %7944 = vset.pattern.permute.xlu1 %v13084_v30 }
  0xa1   : > { %1463 = vperm.xlu1 %7944, %v8518_v41  }
  0xa3   : > { %8004 = vset.pattern.permute.xlu0 %v13100_v24 }
  0xa4   : > { %988 = vperm.xlu0 %8004, %v8441_v32  }
  0xa5   : > { %1483 = vperm.xlu1 %7944, %v8541_v44  }
  0xa8   : > { %996 = vperm.xlu0 %8004, %v8449_v33  }
  0xa9   : > { %7945 = vset.pattern.permute.xlu1 %v13094_v38 }
  0xaa   : > { %1680 = vperm.xlu1 %7945, %v8518_v41  }
  0xac   : > { %1020 = vperm.xlu0 %8004, %v8457_v34  }
  0xae   : > { %1700 = vperm.xlu1 %7945, %v8541_v44  }
  0xaf   : > { %v8571_v47 = vpop.permute.xlu1 %976  ;;  %v8573_v48 = vpop.permute.xlu0 %1244 }
  0xb0   : > { %13377 = vst [vmem:[#allocation8_spill] sm:$0xff] %v8571_v47  ;;  %13378 = vst [vmem:[#allocation9_spill] sm:$0xff] %v8573_v48  ;;  %1008 = vperm.xlu0 %8004, %v8464_v35  }
  0xb2   : > { %7946 = vset.pattern.permute.xlu1 %v13100_v24 }
  0xb3   : > { %1016 = vperm.xlu1 %7946, %v8525_v42   ;;  %v8578_v49 = vpop.permute.xlu0 %1264 }
  0xb4   : > { %13379 = vst [vmem:[#allocation10_spill] sm:$0xff] %v8578_v49  ;;  %1036 = vperm.xlu0 %8004, %v8471_v37   ;;  %v8581_v50 = vpop.permute.xlu1 %1872 }
  0xb5   : > { %13380 = vst [vmem:[#allocation11_spill] sm:$0xff] %v8581_v50 }
  0xb7   : > { %7947 = vset.pattern.permute.xlu1 %v13096_v27  ;;  %v8584_v51 = vpop.permute.xlu0 %1288 }
  0xb8   : > { %13381 = vst [vmem:[#allocation12_spill] sm:$0xff] %v8584_v51  ;;  %1048 = vperm.xlu0 %8004, %v8501_v40   ;;  %1892 = vperm.xlu1 %7947, %v8518_v41  }
  0xb9   : > { %v8588_v52 = vpop.permute.xlu1 %1240 }
  0xba   : > { %13382 = vst [vmem:[#allocation13_spill] sm:$0xff] %v8588_v52 }
  0xbb   : > { %v8595_v54 = vpop.permute.xlu0 %1304 }
  0xbc   : > { %13383 = vst [vmem:[#allocation14_spill] sm:$0xff] %v8595_v54  ;;  %1052 = vperm.xlu0 %8004, %v8593_v53   ;;  %7948 = vset.pattern.permute.xlu1 %v13090_v23 }
  0xbd   : > { %1260 = vperm.xlu1 %7948, %v8449_v33  }
  0xbe   : > { %v8600_v55 = vpop.permute.xlu1 %1447 }
  0xbf   : > { %13384 = vst [vmem:[#allocation15_spill] sm:$0xff] %v8600_v55 }
  0xc0   : > { %8007 = vset.pattern.permute.xlu0 %v13084_v30  ;;  %v8603_v56 = vpop.permute.xlu0 %2353 }
  0xc1   : > { %13385 = vst [vmem:[#allocation16_spill] sm:$0xff] %v8603_v56  ;;  %1443 = vperm.xlu0 %8007, %v8418_v26   ;;  %1280 = vperm.xlu1 %7948, %v8525_v42  }
  0xc3   : > { %v8607_v57 = vpop.permute.xlu1 %2349 }
  0xc4   : > { %13386 = vst [vmem:[#allocation17_spill] sm:$0xff] %v8607_v57  ;;  %v8609_v58 = vpop.permute.xlu0 %2365 }
  0xc5   : > { %13387 = vst [vmem:[#allocation18_spill] sm:$0xff] %v8609_v58  ;;  %1455 = vperm.xlu0 %8007, %v8483_v39   ;;  %7949 = vset.pattern.permute.xlu1 %v13086_v36 }
  0xc6   : > { %2187 = vperm.xlu1 %7949, %v8541_v44  }
  0xc8   : > { %v8614_v59 = vpop.permute.xlu1 %980  ;;  %v8616_v60 = vpop.permute.xlu0 %2373 }
  0xc9   : > { %13388 = vst [vmem:[#allocation19_spill] sm:$0xff] %v8614_v59  ;;  %13389 = vst [vmem:[#allocation20_spill] sm:$0xff] %v8616_v60  ;;  %1487 = vperm.xlu0 %8007, %v8525_v42  }
  0xca   : > { %7950 = vset.pattern.permute.xlu1 %v13084_v30 }
  0xcb   : > { %1467 = vperm.xlu1 %7950, %v8449_v33  }
  0xcc   : > { %v8621_v61 = vpop.permute.xlu0 %2397 }
  0xcd   : > { %13390 = vst [vmem:[#allocation21_spill] sm:$0xff] %v8621_v61  ;;  %1475 = vperm.xlu0 %8007, %v8533_v43   ;;  %v8624_v62 = vpop.permute.xlu1 %1876  ;;  %v13434_v61 = vmov 3  }
  0xce   : > { %13391 = vst [vmem:[#allocation22_spill] sm:$0xff] %v8624_v62 }
  0xcf   : > { %7951 = vset.pattern.permute.xlu1 %v13088_v31 }
  0xd0   : > { %2369 = vperm.xlu1 %7951, %v8518_v41   ;;  %v8633_v0 = vpop.permute.xlu0 %2385 }
  0xd1   : > { %13392 = vst [vmem:[#allocation23_spill] sm:$0xff] %v8633_v0  ;;  %1499 = vperm.xlu0 %8007, %v8629_v63   ;;  %v13429_v0 = vmov 6  }
  0xd2   : > { %v8636_v1 = vpop.permute.xlu1 %2151 }
  0xd3   : > { %13393 = vst [vmem:[#allocation24_spill] sm:$0xff] %v8636_v1 }
  0xd4   : > { %2389 = vperm.xlu1 %7951, %v8541_v44   ;;  %v8639_v2 = vpop.permute.xlu0 %2413 }
  0xd5   : > { %13394 = vst [vmem:[#allocation25_spill] sm:$0xff] %v8639_v2  ;;  %1515 = vperm.xlu0 %8007, %v8556_v46  }
  0xd7   : > { %v8642_v3 = vpop.permute.xlu1 %1451 }
  0xd8   : > { %13395 = vst [vmem:[#allocation26_spill] sm:$0xff] %v8642_v3  ;;  %7952 = vset.pattern.permute.xlu1 %v13094_v38 }
  0xd9   : > { %1523 = vperm.xlu0 %8007, %v8593_v53   ;;  %1704 = vperm.xlu1 %7952, %v8525_v42   ;;  %v8647_v4 = vpop.permute.xlu0 %1660 }
  0xda   : > { %13396 = vst [vmem:[#allocation27_spill] sm:$0xff] %v8647_v4  ;;  %v1743_v22 = vmul.f32 %v8647_v4, %v8698_v19 }
  0xdc   : > { %v8649_v5 = vpop.permute.xlu1 %1668 }
  0xdd   : > { %13397 = vst [vmem:[#allocation28_spill] sm:$0xff] %v8649_v5  ;;  %8010 = vset.pattern.permute.xlu0 %v13096_v27  ;;  %7953 = vset.pattern.permute.xlu1 %v13100_v24  ;;  %v8653_v6 = vpop.permute.xlu0 %1664 }
  0xde   : > { %13398 = vst [vmem:[#allocation29_spill] sm:$0xff] %v8653_v6  ;;  %1880 = vperm.xlu0 %8010, %v8402_v21   ;;  %1000 = vperm.xlu1 %7953, %v8413_v25   ;;  %v1957_v21 = vrot.slane %v8693_v18, 1 }
  0xe1   : > { %v8657_v7 = vpop.permute.xlu1 %984  ;;  %v8659_v8 = vpop.permute.xlu0 %1676 }
  0xe2   : > { %13399 = vst [vmem:[#allocation30_spill] sm:$0xff] %v8657_v7  ;;  %13400 = vst [vmem:[#allocation31_spill] sm:$0xff] %v8659_v8  ;;  %1888 = vperm.xlu0 %8010, %v8441_v32   ;;  %7954 = vset.pattern.permute.xlu1 %v13096_v27 }
  0xe3   : > { %1896 = vperm.xlu1 %7954, %v8449_v33  }
  0xe5   : > { %v8664_v9 = vpop.permute.xlu0 %1684 }
  0xe6   : > { %13401 = vst [vmem:[#allocation32_spill] sm:$0xff] %v8664_v9  ;;  %1912 = vperm.xlu0 %8010, %v8541_v44   ;;  %v8667_v10 = vpop.permute.xlu1 %1248  ;;  %v13441_v9 = vmov 4  }
  0xe7   : > { %13402 = vst [vmem:[#allocation33_spill] sm:$0xff] %v8667_v10  ;;  %1916 = vperm.xlu1 %7954, %v8525_v42  }
  0xe9   : > { %v8670_v11 = vpop.permute.xlu0 %1708 }
  0xea   : > { %13403 = vst [vmem:[#allocation34_spill] sm:$0xff] %v8670_v11  ;;  %1900 = vperm.xlu0 %8010, %v8413_v25   ;;  %v13437_v11 = vmov 7  }
  0xeb   : > { %7955 = vset.pattern.permute.xlu1 %v13090_v23  ;;  %v8674_v12 = vpop.permute.xlu1 %2155 }
  0xec   : > { %13404 = vst [vmem:[#allocation35_spill] sm:$0xff] %v8674_v12  ;;  %1284 = vperm.xlu1 %7955, %v8457_v34   ;;  %v8908_v12 = vld [vmem:[%s8334_s2 + $0x20] sm:$0xff] }
  0xed   : > { %v8677_v13 = vpop.permute.xlu0 %1696  ;;  %13468 = vst [vmem:[#allocation90_spill] sm:$0xff] %v8908_v12 }
  0xee   : > { %13405 = vst [vmem:[#allocation36_spill] sm:$0xff] %v8677_v13  ;;  %1924 = vperm.xlu0 %8010, %v8426_v28  }
  0xf0   : > { %7956 = vset.pattern.permute.xlu1 %v13086_v36  ;;  %v8681_v14 = vpop.permute.xlu1 %2357 }
  0xf1   : > { %13406 = vst [vmem:[#allocation37_spill] sm:$0xff] %v8681_v14  ;;  %2171 = vperm.xlu1 %7956, %v8449_v33   ;;  %v8684_v15 = vpop.permute.xlu0 %1724  ;;  %v1958_v33 = vsel %vm1955_vm2, %v1956_v20, %v1957_v21 }
  0xf2   : > { %13407 = vst [vmem:[#allocation38_spill] sm:$0xff] %v8684_v15  ;;  %1908 = vperm.xlu0 %8010, %v8464_v35   ;;  %v2018_v36 = vmul.f32 %v1958_v33, %v8581_v50 }
  0xf5   : > { %7957 = vset.pattern.permute.xlu1 %v13084_v30  ;;  %v8688_v16 = vpop.permute.xlu1 %1672  ;;  %v8690_v17 = vpop.permute.xlu0 %1736  ;;  %v13092_v30 = vmov 8  }
  0xf6   : > { %13408 = vst [vmem:[#allocation39_spill] sm:$0xff] %v8688_v16  ;;  %13409 = vst [vmem:[#allocation40_spill] sm:$0xff] %v8690_v17  ;;  %1940 = vperm.xlu0 %8010, %v8433_v29   ;;  %1471 = vperm.xlu1 %7957, %v8413_v25   ;;  %v13425_v17 = vmov 2  }
  0xfa   : > { %1952 = vperm.xlu0 %8010, %v8593_v53   ;;  %1491 = vperm.xlu1 %7957, %v8457_v34   ;;  %v8706_v26 = vpop.permute.xlu1 %1884  ;;  %v8708_v32 = vpop.permute.xlu0 %2147 }
  0xfb   : > { %13410 = vst [vmem:[#allocation41_spill] sm:$0xff] %v8706_v26  ;;  %13411 = vst [vmem:[#allocation42_spill] sm:$0xff] %v8708_v32 }
  0xfe   : > { %7958 = vset.pattern.permute.xlu1 %v13088_v31  ;;  %1785 = vrot.lane.b32.xlu0 %v1743_v22, %s8175_s22  ;;  %v8713_v39 = vpop.permute.xlu0 %2159  ;;  %v1319_v22 = vmul.f32 %v8588_v52, %v8698_v19  ;;  %v8727_v31 = vld [vmem:[%s8334_s2 + $0x10] sm:$0xff]  ;;  %v13108_v52 = vrot.slane %v8693_v18, 7 }
  0xff   : > { %13412 = vst [vmem:[#allocation43_spill] sm:$0xff] %v8713_v39  ;;  %2393 = vperm.xlu1 %7958, %v8525_v42   ;;  %v8716_v41 = vpop.permute.xlu1 %1252  ;;  %8019 = vset.pattern.permute.xlu0 %v13092_v30  ;;  %v1744_v30 = vmul.f32 %v8653_v6, %v8693_v18  ;;  %v13104_v33 = vrot.slane %v8727_v31, 1  ;;  %v13109_v6 = vrot.slane %v8727_v31, 7  ;;  %v1745_v2 = vmul.f32 %v8649_v5, %v8727_v31 }
 0x100   : > { %13413 = vst [vmem:[#allocation44_spill] sm:$0xff] %v8716_v41 }
 0x101   : > { %v8748_v50 = vsel %vm1955_vm2, %v1957_v21, %v13104_v33  ;;  %v8767_v21 = vsel %vm1056_vm3, %v13108_v52, %v13109_v6  ;;  %v13422_v33 = vmov 5  }
 0x102   : > { %2060 = vrot.lane.b32.xlu0 %v2018_v36, %s8177_s3  ;;  %v8721_v20 = vpop.permute.xlu0 %2163  ;;  %13421 = vst [vmem:[#allocation52_spill] sm:$0xff] %v8767_v21 }
 0x103   : > { %13414 = vst [vmem:[#allocation45_spill] sm:$0xff] %v8721_v20  ;;  %7959 = vset.pattern.permute.xlu1 %v13094_v38 }
 0x104   : > { %1688 = vperm.xlu1 %7959, %v8413_v25   ;;  %v8730_v23 = vpop.permute.xlu1 %1459 }
 0x105   : > { %13415 = vst [vmem:[#allocation46_spill] sm:$0xff] %v8730_v23 }
 0x106   : > { %1359 = vrot.lane.b32.xlu0 %v1319_v22, %s8178_s0  ;;  %v8735_v36 = vpop.permute.xlu0 %2167  ;;  %v2019_v22 = vmul.f32 %v8748_v50, %v8624_v62 }
 0x107   : > { %13416 = vst [vmem:[#allocation47_spill] sm:$0xff] %v8735_v36 }
 0x108   : > { %7960 = vset.pattern.permute.xlu1 %v13100_v24  ;;  %v1320_v24 = vmul.f32 %v8573_v48, %v8693_v18  ;;  %v1532_v48 = vmul.f32 %v8642_v3, %v8767_v21 }
 0x109   : > { %1004 = vperm.xlu1 %7960, %v8533_v43   ;;  %v8740_v38 = vpop.permute.xlu1 %2361 }
 0x10a   : > { %13417 = vst [vmem:[#allocation48_spill] sm:$0xff] %v8740_v38  ;;  %1787 = vrot.lane.b32.xlu0 %v1744_v30, %s8175_s22  ;;  %v8743_v27 = vpop.permute.xlu0 %2191 }
 0x10b   : > { %13418 = vst [vmem:[#allocation49_spill] sm:$0xff] %v8743_v27 }
 0x10d   : > { %1024 = vperm.xlu1 %7960, %v8426_v28  }
 0x10e   : > { %v8756_v4 = vpop.permute.xlu1 %992  ;;  %2062 = vrot.lane.b32.xlu0 %v2019_v22, %s8177_s3  ;;  %v8759_v30 = vpop.permute.xlu0 %2179 }
 0x10f   : > { %13419 = vst [vmem:[#allocation50_spill] sm:$0xff] %v8756_v4  ;;  %13420 = vst [vmem:[#allocation51_spill] sm:$0xff] %v8759_v30 }
 0x111   : > { %7961 = vset.pattern.permute.xlu1 %v13422_v33 }
 0x112   : > { %1920 = vperm.xlu1 %7961, %v8457_v34   ;;  %v8771_v62 = vpop.permute.xlu1 %1012  ;;  %1361 = vrot.lane.b32.xlu0 %v1320_v24, %s8178_s0  ;;  %v8774_v22 = vpop.permute.xlu0 %2183 }
 0x113   : > { %13423 = vst [vmem:[#allocation53_spill] sm:$0xff] %v8771_v62  ;;  %13424 = vst [vmem:[#allocation54_spill] sm:$0xff] %v8774_v22 }
 0x116   : > { %7962 = vset.pattern.permute.xlu1 %v13425_v17  ;;  %1576 = vrot.lane.b32.xlu0 %v1532_v48, %s8179_s4  ;;  %v8780_v52 = vpop.permute.xlu0 %2207 }
 0x117   : > { %13426 = vst [vmem:[#allocation55_spill] sm:$0xff] %v8780_v52  ;;  %1268 = vperm.xlu1 %7962, %v8533_v43   ;;  %v8783_v6 = vpop.permute.xlu1 %1256 }
 0x118   : > { %13427 = vst [vmem:[#allocation56_spill] sm:$0xff] %v8783_v6 }
 0x11a   : > { %1789 = vrot.lane.b32.xlu0 %v1745_v2, %s8175_s22  ;;  %v8788_v24 = vpop.permute.xlu0 %2219 }
 0x11b   : > { %13428 = vst [vmem:[#allocation57_spill] sm:$0xff] %v8788_v24  ;;  %7963 = vset.pattern.permute.xlu1 %v13429_v0  ;;  %v8791_v3 = vpop.permute.xlu1 %1276  ;;  %v13445_v24 = vmov 1  }
 0x11c   : > { %13430 = vst [vmem:[#allocation58_spill] sm:$0xff] %v8791_v3  ;;  %2175 = vperm.xlu1 %7963, %v8413_v25  }
 0x11e   : > { %v8794_v48 = vpop.permute.xlu0 %2223 }
 0x11f   : > { %13431 = vst [vmem:[#allocation59_spill] sm:$0xff] %v8794_v48 }
 0x120   : > { %2195 = vperm.xlu1 %7963, %v8457_v34   ;;  %v8797_v22 = vpop.permute.xlu1 %1463 }
 0x121   : > { %13432 = vst [vmem:[#allocation60_spill] sm:$0xff] %v8797_v22 }
 0x123   : > { %v8799_v30 = vpop.permute.xlu0 %988 }
 0x124   : > { %13433 = vst [vmem:[#allocation61_spill] sm:$0xff] %v8799_v30  ;;  %7964 = vset.pattern.permute.xlu1 %v13434_v61  ;;  %v8802_v5 = vpop.permute.xlu1 %1483 }
 0x125   : > { %13435 = vst [vmem:[#allocation62_spill] sm:$0xff] %v8802_v5  ;;  %1495 = vperm.xlu1 %7964, %v8426_v28  }
 0x127   : > { %v8805_v2 = vpop.permute.xlu0 %996 }
 0x128   : > { %13436 = vst [vmem:[#allocation63_spill] sm:$0xff] %v8805_v2 }
 0x129   : > { %7965 = vset.pattern.permute.xlu1 %v13437_v11  ;;  %v8808_v27 = vpop.permute.xlu1 %1680 }
 0x12a   : > { %13438 = vst [vmem:[#allocation64_spill] sm:$0xff] %v8808_v27  ;;  %2377 = vperm.xlu1 %7965, %v8413_v25  }
 0x12b   : > { %v8811_v48 = vpop.permute.xlu0 %1020 }
 0x12c   : > { %13439 = vst [vmem:[#allocation65_spill] sm:$0xff] %v8811_v48 }
 0x12d   : > { %v8813_v49 = vpop.permute.xlu1 %1700 }
 0x12e   : > { %13440 = vst [vmem:[#allocation66_spill] sm:$0xff] %v8813_v49  ;;  %7966 = vset.pattern.permute.xlu1 %v13441_v9 }
 0x12f   : > { %1692 = vperm.xlu1 %7966, %v8533_v43   ;;  %v8817_v22 = vpop.permute.xlu0 %1008 }
 0x130   : > { %13442 = vst [vmem:[#allocation67_spill] sm:$0xff] %v8817_v22 }
 0x132   : > { %v8819_v5 = vpop.permute.xlu1 %1016 }
 0x133   : > { %13443 = vst [vmem:[#allocation68_spill] sm:$0xff] %v8819_v5  ;;  %1712 = vperm.xlu1 %7966, %v8426_v28   ;;  %v8822_v2 = vpop.permute.xlu0 %1036 }
 0x134   : > { %13444 = vst [vmem:[#allocation69_spill] sm:$0xff] %v8822_v2 }
 0x137   : > { %7967 = vset.pattern.permute.xlu1 %v13445_v24  ;;  %v8825_v27 = vpop.permute.xlu1 %1892  ;;  %v8827_v25 = vpop.permute.xlu0 %1048 }
 0x138   : > { %13446 = vst [vmem:[#allocation70_spill] sm:$0xff] %v8825_v27  ;;  %13447 = vst [vmem:[#allocation71_spill] sm:$0xff] %v8827_v25  ;;  %1028 = vperm.xlu1 %7967, %v8629_v63  }
 0x13b   : > { %v8830_v3 = vpop.permute.xlu0 %1052 }
 0x13c   : > { %13448 = vst [vmem:[#allocation72_spill] sm:$0xff] %v8830_v3  ;;  %7968 = vset.pattern.permute.xlu1 %v13422_v33  ;;  %v8833_v6 = vpop.permute.xlu1 %1260 }
 0x13d   : > { %13449 = vst [vmem:[#allocation73_spill] sm:$0xff] %v8833_v6  ;;  %1904 = vperm.xlu1 %7968, %v8533_v43  }
 0x140   : > { %v8836_v62 = vpop.permute.xlu1 %1280  ;;  %v8838_v8 = vpop.permute.xlu0 %1443 }
 0x141   : > { %13450 = vst [vmem:[#allocation74_spill] sm:$0xff] %v8836_v62  ;;  %13451 = vst [vmem:[#allocation75_spill] sm:$0xff] %v8838_v8  ;;  %7969 = vset.pattern.permute.xlu1 %v13425_v17 }
 0x142   : > { %1272 = vperm.xlu1 %7969, %v8464_v35  }
 0x144   : > { %v8842_v27 = vpop.permute.xlu0 %1455 }
 0x145   : > { %13452 = vst [vmem:[#allocation76_spill] sm:$0xff] %v8842_v27  ;;  %v8844_v25 = vpop.permute.xlu1 %2187 }
 0x146   : > { %13453 = vst [vmem:[#allocation77_spill] sm:$0xff] %v8844_v25  ;;  %1292 = vperm.xlu1 %7969, %v8629_v63  }
 0x148   : > { %v8847_v3 = vpop.permute.xlu0 %1487 }
 0x149   : > { %13454 = vst [vmem:[#allocation78_spill] sm:$0xff] %v8847_v3 }
 0x14a   : > { %7970 = vset.pattern.permute.xlu1 %v13429_v0  ;;  %v8850_v6 = vpop.permute.xlu1 %1467 }
 0x14b   : > { %13455 = vst [vmem:[#allocation79_spill] sm:$0xff] %v8850_v6  ;;  %2199 = vperm.xlu1 %7970, %v8426_v28   ;;  %v8868_v6 = vld [vmem:[%s8334_s2 + $0x18] sm:$0xff] }
 0x14c   : > { %v8853_v62 = vpop.permute.xlu0 %1475 }
 0x14d   : > { %13456 = vst [vmem:[#allocation80_spill] sm:$0xff] %v8853_v62 }
 0x14f   : > { %7971 = vset.pattern.permute.xlu1 %v13434_v61  ;;  %v8856_v23 = vpop.permute.xlu1 %2369 }
 0x150   : > { %13457 = vst [vmem:[#allocation81_spill] sm:$0xff] %v8856_v23  ;;  %1479 = vperm.xlu1 %7971, %v8464_v35   ;;  %v8859_v39 = vpop.permute.xlu0 %1499  ;;  %v1961_v23 = vrot.slane %v8868_v6, 1 }
 0x151   : > { %13458 = vst [vmem:[#allocation82_spill] sm:$0xff] %v8859_v39  ;;  %v13463_v39 = vrot.slane %v8727_v31, 1 }
 0x153   : > { %v8861_v25 = vpop.permute.xlu1 %2389  ;;  %v8879_v30 = vsel %vm1955_vm2, %v13463_v39, %v1961_v23  ;;  %v13466_v39 = vrot.slane %v8727_v31, 7 }
 0x154   : > { %13459 = vst [vmem:[#allocation83_spill] sm:$0xff] %v8861_v25  ;;  %7972 = vset.pattern.permute.xlu1 %v13437_v11  ;;  %v8864_v54 = vpop.permute.xlu0 %1515 }
 0x155   : > { %13460 = vst [vmem:[#allocation84_spill] sm:$0xff] %v8864_v54  ;;  %2381 = vperm.xlu1 %7972, %v8533_v43  }
 0x158   : > { %v8870_v41 = vpop.permute.xlu1 %1704  ;;  %v8872_v15 = vpop.permute.xlu0 %1523 }
 0x159   : > { %13461 = vst [vmem:[#allocation85_spill] sm:$0xff] %v8870_v41  ;;  %13462 = vst [vmem:[#allocation86_spill] sm:$0xff] %v8872_v15  ;;  %2401 = vperm.xlu1 %7972, %v8426_v28   ;;  %v13154_v15 = vrot.slane %v8868_v6, 7 }
 0x15b   : > { %v8896_v52 = vsel %vm1056_vm3, %v13466_v39, %v13154_v15  ;;  %v1746_v39 = vmul.f32 %v8688_v16, %v8868_v6 }
 0x15d   : > { %v8881_v14 = vpop.permute.xlu0 %1880  ;;  %7973 = vset.pattern.permute.xlu1 %v13441_v9  ;;  %v8884_v43 = vpop.permute.xlu1 %1000 }
 0x15e   : > { %13464 = vst [vmem:[#allocation87_spill] sm:$0xff] %v8881_v14  ;;  %13465 = vst [vmem:[#allocation88_spill] sm:$0xff] %v8884_v43  ;;  %v2020_v54 = vmul.f32 %v8879_v30, %v8881_v14  ;;  %1716 = vperm.xlu1 %7973, %v8629_v63   ;;  %v1321_v43 = vmul.f32 %v8667_v10, %v8727_v31  ;;  %v1963_v31 = vrot.slane %v8908_v12, 1 }
 0x160   : > { %2064 = vrot.lane.b32.xlu0 %v2020_v54, %s8177_s3  ;;  %v1533_v54 = vmul.f32 %v8842_v27, %v8896_v52  ;;  %v8921_v27 = vld [vmem:[%s8334_s2 + $0x28] sm:$0xff] }
 0x161   : > { %v13158_v10 = vrot.slane %v8921_v27, 1 }
 0x162   : > { %7974 = vset.pattern.permute.xlu1 %v13445_v24  ;;  %v8901_v14 = vpop.permute.xlu1 %1896 }
 0x163   : > { %13467 = vst [vmem:[#allocation89_spill] sm:$0xff] %v8901_v14  ;;  %1032 = vperm.xlu1 %7974, %v8548_v45  }
 0x164   : > { %1363 = vrot.lane.b32.xlu0 %v1321_v43, %s8178_s0  ;;  %v8926_v43 = vsel %vm1955_vm2, %v1961_v23, %v1963_v31  ;;  %v1966_v23 = vsel %vm1955_vm2, %v1963_v31, %v13158_v10  ;;  %v13473_v10 = vrot.slane %v8868_v6, 7 }
 0x166   : > { %v8910_v21 = vpop.permute.xlu1 %1916 }
 0x167   : > { %13469 = vst [vmem:[#allocation91_spill] sm:$0xff] %v8910_v21  ;;  %7975 = vset.pattern.permute.xlu1 %v13422_v33 }
 0x168   : > { %1928 = vperm.xlu1 %7975, %v8629_v63   ;;  %1578 = vrot.lane.b32.xlu0 %v1533_v54, %s8179_s4  ;;  %v2021_v54 = vmul.f32 %v8926_v43, %v8706_v26 }
 0x16b   : > { %v8918_v15 = vpop.permute.xlu1 %1284 }
 0x16c   : > { %13470 = vst [vmem:[#allocation92_spill] sm:$0xff] %v8918_v15  ;;  %7976 = vset.pattern.permute.xlu1 %v13425_v17  ;;  %1791 = vrot.lane.b32.xlu0 %v1746_v39, %s8175_s22  ;;  %v13159_v39 = vmov 0.0   ;;  %v9076_v15 = vld [vmem:[%s8334_s2 + $0x58] sm:$0xff] }
 0x16d   : > { %1296 = vperm.xlu1 %7976, %v8548_v45   ;;  %735 = vst.msk [vmem:[#allocation2 + $0xa8] sm:$0xff] %vm714_vm4, %v13159_v39  ;;  %713 = vst [vmem:[#allocation2] sm:$0xff] %v13159_v39 }
 0x16e   : > { %715 = vst.msk [vmem:[#allocation2 + $0x8] sm:$0xff] %vm714_vm4, %v13159_v39  ;;  %716 = vst [vmem:[#allocation2 + $0x10] sm:$0xff] %v13159_v39 }
 0x16f   : > { %717 = vst.msk [vmem:[#allocation2 + $0x18] sm:$0xff] %vm714_vm4, %v13159_v39  ;;  %718 = vst [vmem:[#allocation2 + $0x20] sm:$0xff] %v13159_v39 }
 0x170   : > { %v8932_v14 = vpop.permute.xlu1 %2171  ;;  %2066 = vrot.lane.b32.xlu0 %v2021_v54, %s8177_s3  ;;  %719 = vst.msk [vmem:[#allocation2 + $0x28] sm:$0xff] %vm714_vm4, %v13159_v39  ;;  %720 = vst [vmem:[#allocation2 + $0x30] sm:$0xff] %v13159_v39  ;;  %v2431_v54 = vmul.f32 %v8740_v38, %v1966_v23  ;;  %v9020_v38 = vpop.permute.xlu0 %1888 }
 0x171   : > { %13471 = vst [vmem:[#allocation93_spill] sm:$0xff] %v8932_v14  ;;  %7977 = vset.pattern.permute.xlu1 %v13429_v0  ;;  %721 = vst.msk [vmem:[#allocation2 + $0x38] sm:$0xff] %vm714_vm4, %v13159_v39 }
 0x172   : > { %2203 = vperm.xlu1 %7977, %v8629_v63   ;;  %722 = vst [vmem:[#allocation2 + $0x40] sm:$0xff] %v13159_v39  ;;  %723 = vst.msk [vmem:[#allocation2 + $0x48] sm:$0xff] %vm714_vm4, %v13159_v39 }
 0x173   : > { %724 = vst [vmem:[#allocation2 + $0x50] sm:$0xff] %v13159_v39  ;;  %725 = vst.msk [vmem:[#allocation2 + $0x58] sm:$0xff] %vm714_vm4, %v13159_v39 }
 0x174   : > { %2591 = vperm.xlu0 %8019, %v8541_v44   ;;  %726 = vst [vmem:[#allocation2 + $0x60] sm:$0xff] %v13159_v39  ;;  %727 = vst.msk [vmem:[#allocation2 + $0x68] sm:$0xff] %vm714_vm4, %v13159_v39  ;;  %v13164_v44 = vrot.slane %v8908_v12, 7 }
 0x175   : > { %728 = vst [vmem:[#allocation2 + $0x70] sm:$0xff] %v13159_v39  ;;  %729 = vst.msk [vmem:[#allocation2 + $0x78] sm:$0xff] %vm714_vm4, %v13159_v39  ;;  %v9003_v31 = vpop.permute.xlu1 %1471 }
 0x176   : > { %730 = vst [vmem:[#allocation2 + $0x80] sm:$0xff] %v13159_v39  ;;  %731 = vst.msk [vmem:[#allocation2 + $0x88] sm:$0xff] %vm714_vm4, %v13159_v39  ;;  %7978 = vset.pattern.permute.xlu1 %v13434_v61 }
 0x177   : > { %732 = vst [vmem:[#allocation2 + $0x90] sm:$0xff] %v13159_v39  ;;  %733 = vst.msk [vmem:[#allocation2 + $0x98] sm:$0xff] %vm714_vm4, %v13159_v39  ;;  %1503 = vperm.xlu1 %7978, %v8548_v45  }
 0x178   : > { %734 = vst [vmem:[#allocation2 + $0xa0] sm:$0xff] %v13159_v39  ;;  %736 = vst [vmem:[#allocation2 + $0xb0] sm:$0xff] %v13159_v39  ;;  %2474 = vrot.lane.b32.xlu0 %v2431_v54, %s8181_s5 }
 0x179   : > { %737 = vst.msk [vmem:[#allocation2 + $0xb8] sm:$0xff] %vm714_vm4, %v13159_v39  ;;  %738 = vst [vmem:[#allocation2 + $0xc0] sm:$0xff] %v13159_v39  ;;  %v9016_v26 = vpop.permute.xlu1 %1491 }
 0x17a   : > { %739 = vst.msk [vmem:[#allocation2 + $0xc8] sm:$0xff] %vm714_vm4, %v13159_v39  ;;  %740 = vst [vmem:[#allocation2 + $0xd0] sm:$0xff] %v13159_v39 }
 0x17b   : > { %741 = vst.msk [vmem:[#allocation2 + $0xd8] sm:$0xff] %vm714_vm4, %v13159_v39  ;;  %742 = vst [vmem:[#allocation2 + $0xe0] sm:$0xff] %v13159_v39  ;;  %7979 = vset.pattern.permute.xlu1 %v13437_v11 }
 0x17c   : > { %743 = vst.msk [vmem:[#allocation2 + $0xe8] sm:$0xff] %vm714_vm4, %v13159_v39  ;;  %744 = vst [vmem:[#allocation2 + $0xf0] sm:$0xff] %v13159_v39  ;;  %2405 = vperm.xlu1 %7979, %v8629_v63   ;;  %v2230_v63 = vmul.f32 %v8721_v20, %v8921_v27 }
 0x17d   : > { %745 = vst.msk [vmem:[#allocation2 + $0xf8] sm:$0xff] %vm714_vm4, %v13159_v39  ;;  %746 = vst [vmem:[#allocation2 + $0x100] sm:$0xff] %v13159_v39 }
 0x17e   : > { %747 = vst.msk [vmem:[#allocation2 + $0x108] sm:$0xff] %vm714_vm4, %v13159_v39  ;;  %748 = vst [vmem:[#allocation2 + $0x110] sm:$0xff] %v13159_v39  ;;  %v9026_v54 = vpop.permute.xlu1 %2393 }
 0x17f   : > { %749 = vst.msk [vmem:[#allocation2 + $0x118] sm:$0xff] %vm714_vm4, %v13159_v39  ;;  %750 = vst [vmem:[#allocation2 + $0x120] sm:$0xff] %v13159_v39 }
 0x180   : > { %751 = vst.msk [vmem:[#allocation2 + $0x128] sm:$0xff] %vm714_vm4, %v13159_v39  ;;  %752 = vst [vmem:[#allocation2 + $0x130] sm:$0xff] %v13159_v39  ;;  %7980 = vset.pattern.permute.xlu1 %v13441_v9 }
 0x181   : > { %753 = vst.msk [vmem:[#allocation2 + $0x138] sm:$0xff] %vm714_vm4, %v13159_v39  ;;  %754 = vst [vmem:[#allocation2 + $0x140] sm:$0x3] %v13159_v39  ;;  %v9014_v39 = vsel %vm1056_vm3, %v13473_v10, %v13164_v44  ;;  %v9029_v10 = vld [vmem:[%s8334_s2 + $0x30] sm:$0xff]  ;;  %1720 = vperm.xlu1 %7980, %v8548_v45  }
 0x182   : > { %13472 = vst [vmem:[#allocation94_spill] sm:$0xff] %v9003_v31  ;;  %13474 = vst [vmem:[#allocation95_spill] sm:$0xff] %v9014_v39  ;;  %v1120_v16 = vmul.f32 %v9014_v39, %v8756_v4  ;;  %v2022_v31 = vmul.f32 %v1966_v23, %v9020_v38  ;;  %v13169_v44 = vrot.slane %v9029_v10, 1 }
 0x183   : > { %13475 = vst [vmem:[#allocation96_spill] sm:$0xff] %v9016_v26  ;;  %13476 = vst [vmem:[#allocation97_spill] sm:$0xff] %v9020_v38  ;;  %v9035_v23 = vpop.permute.xlu1 %1688 }
 0x184   : > { %1164 = vrot.lane.b32.xlu0 %v1120_v16, %s8182_s6  ;;  %13477 = vst [vmem:[#allocation98_spill] sm:$0xff] %v9026_v54  ;;  %13478 = vst [vmem:[#allocation99_spill] sm:$0xff] %v9035_v23  ;;  %v9040_v16 = vpop.permute.xlu0 %1912 }
 0x185   : > { %13479 = vst [vmem:[#allocation100_spill] sm:$0xff] %v9040_v16  ;;  %7981 = vset.pattern.permute.xlu1 %v13422_v33 }
 0x186   : > { %1932 = vperm.xlu1 %7981, %v8548_v45  }
 0x188   : > { %2068 = vrot.lane.b32.xlu0 %v2022_v31, %s8177_s3  ;;  %v13480_v31 = vrot.slane %v8921_v27, 1  ;;  %v9053_v20 = vpop.permute.xlu1 %1004  ;;  %v9060_v54 = vpop.permute.xlu0 %1900  ;;  %v9064_v27 = vld [vmem:[%s8334_s2 + $0x48] sm:$0xff] }
 0x189   : > { %13482 = vst [vmem:[#allocation102_spill] sm:$0xff] %v9053_v20  ;;  %13484 = vst [vmem:[#allocation104_spill] sm:$0xff] %v9060_v54  ;;  %v13179_v26 = vrot.slane %v9064_v27, 7 }
 0x18a   : > { %v9049_v38 = vsel %vm1955_vm2, %v13480_v31, %v13169_v44  ;;  %7982 = vset.pattern.permute.xlu1 %v13425_v17 }
 0x18b   : > { %13481 = vst [vmem:[#allocation101_spill] sm:$0xff] %v9049_v38  ;;  %v2432_v4 = vmul.f32 %v8609_v58, %v9049_v38  ;;  %1300 = vperm.xlu1 %7982, %v8471_v37  }
 0x18c   : > { %2595 = vperm.xlu0 %8019, %v8525_v42   ;;  %v9057_v42 = vld [vmem:[%s8334_s2 + $0x50] sm:$0xff]  ;;  %v9066_v31 = vpop.permute.xlu1 %1024 }
 0x18d   : > { %13483 = vst [vmem:[#allocation103_spill] sm:$0xff] %v9057_v42  ;;  %13485 = vst [vmem:[#allocation105_spill] sm:$0xff] %v9066_v31  ;;  %v1076_v44 = vrot.slane %v9057_v42, 7  ;;  %v1753_v58 = vmul.f32 %v8813_v49, %v9057_v42  ;;  %v1977_v31 = vrot.slane %v9076_v15, 1  ;;  %v9086_v49 = vpop.permute.xlu0 %1924  ;;  %v13488_v39 = vrot.slane %v9057_v42, 1 }
 0x18e   : > { %13486 = vst [vmem:[#allocation106_spill] sm:$0xff] %v9086_v49 }
 0x18f   : > { %7983 = vset.pattern.permute.xlu1 %v13434_v61  ;;  %v9095_v12 = vsel %vm1955_vm2, %v13488_v39, %v1977_v31  ;;  %v13188_v39 = vrot.slane %v9076_v15, 7 }
 0x190   : > { %2274 = vrot.lane.b32.xlu0 %v2230_v63, %s8183_s21  ;;  %1507 = vperm.xlu1 %7983, %v8471_v37   ;;  %13489 = vst [vmem:[#allocation108_spill] sm:$0xff] %v9095_v12 }
 0x191   : > { %v9088_v63 = vpop.permute.xlu1 %1920  ;;  %v9104_v49 = vpop.permute.xlu0 %1908 }
 0x192   : > { %13487 = vst [vmem:[#allocation107_spill] sm:$0xff] %v9088_v63  ;;  %13491 = vst [vmem:[#allocation110_spill] sm:$0xff] %v9104_v49 }
 0x194   : > { %2476 = vrot.lane.b32.xlu0 %v2432_v4, %s8181_s5  ;;  %v9084_v4 = vsel %vm1056_vm3, %v13179_v26, %v1076_v44  ;;  %7984 = vset.pattern.permute.xlu1 %v13437_v11 }
 0x195   : > { %v1126_v38 = vmul.f32 %v9084_v4, %v8819_v5  ;;  %2409 = vperm.xlu1 %7984, %v8548_v45  }
 0x196   : > { %v9102_v26 = vpop.permute.xlu1 %1268 }
 0x197   : > { %13490 = vst [vmem:[#allocation109_spill] sm:$0xff] %v9102_v26 }
 0x198   : > { %1805 = vrot.lane.b32.xlu0 %v1753_v58, %s8175_s22  ;;  %v2028_v58 = vmul.f32 %v9095_v12, %v9040_v16  ;;  %v9113_v16 = vld [vmem:[%s8334_s2 + $0x60] sm:$0xff]  ;;  %v1079_v12 = vsel %vm1056_vm3, %v1076_v44, %v13188_v39 }
 0x199   : > { %7985 = vset.pattern.permute.xlu1 %v13445_v24  ;;  %13493 = vst [vmem:[#allocation112_spill] sm:$0xff] %v9113_v16  ;;  %v13189_v49 = vrot.slane %v9113_v16, 1  ;;  %v1541_v26 = vmul.f32 %v8847_v3, %v1079_v12 }
 0x19a   : > { %1040 = vperm.xlu1 %7985, %v8433_v29  }
 0x19b   : > { %v9110_v5 = vpop.permute.xlu1 %2175 }
 0x19c   : > { %1176 = vrot.lane.b32.xlu0 %v1126_v38, %s8182_s6  ;;  %13492 = vst [vmem:[#allocation111_spill] sm:$0xff] %v9110_v5  ;;  %v2231_v38 = vmul.f32 %v8735_v36, %v9029_v10 }
 0x19e   : > { %7986 = vset.pattern.permute.xlu1 %v13422_v33 }
 0x19f   : > { %1936 = vperm.xlu1 %7986, %v8471_v37   ;;  %v9126_v5 = vpop.permute.xlu1 %2195 }
 0x1a0   : > { %2080 = vrot.lane.b32.xlu0 %v2028_v58, %s8177_s3  ;;  %v9121_v58 = vpop.permute.xlu0 %1940  ;;  %13495 = vst [vmem:[#allocation114_spill] sm:$0xff] %v9126_v5 }
 0x1a1   : > { %13494 = vst [vmem:[#allocation113_spill] sm:$0xff] %v9121_v58 }
 0x1a3   : > { %7988 = vset.pattern.permute.xlu1 %v13429_v0 }
 0x1a4   : > { %2599 = vperm.xlu0 %8019, %v8457_v34   ;;  %v1980_v34 = vsel %vm1955_vm2, %v1977_v31, %v13189_v49  ;;  %v9133_v36 = vpop.permute.xlu0 %1952  ;;  %2211 = vperm.xlu1 %7988, %v8471_v37   ;;  %v9137_v44 = vpop.permute.xlu1 %1495  ;;  %v1754_v37 = vmul.f32 %v8870_v41, %v9076_v15  ;;  %v1127_v49 = vmul.f32 %v1079_v12, %v8811_v48  ;;  %v9171_v48 = vld [vmem:[%s8334_s2 + $0x40] sm:$0xff] }
 0x1a5   : > { %13496 = vst [vmem:[#allocation115_spill] sm:$0xff] %v9133_v36  ;;  %13497 = vst [vmem:[#allocation116_spill] sm:$0xff] %v9137_v44  ;;  %v2438_v39 = vmul.f32 %v8861_v25, %v1980_v34  ;;  %v2029_v25 = vmul.f32 %v1980_v34, %v8910_v21  ;;  %v1971_v41 = vrot.slane %v9171_v48, 1 }
 0x1a8   : > { %2276 = vrot.lane.b32.xlu0 %v2231_v38, %s8183_s21  ;;  %7989 = vset.pattern.permute.xlu1 %v13434_v61  ;;  %v9143_v38 = vpop.permute.xlu0 %1785 }
 0x1a9   : > { %1511 = vperm.xlu1 %7989, %v8433_v29   ;;  %v9146_v31 = vpop.permute.xlu1 %2377 }
 0x1aa   : > { %13498 = vst [vmem:[#allocation117_spill] sm:$0xff] %v9146_v31 }
 0x1ac   : > { %1594 = vrot.lane.b32.xlu0 %v1541_v26, %s8179_s4 }
 0x1ad   : > { %7991 = vset.pattern.permute.xlu1 %v13441_v9 }
 0x1ae   : > { %1728 = vperm.xlu1 %7991, %v8433_v29   ;;  %v9154_v26 = vpop.permute.xlu1 %1692 }
 0x1af   : > { %13499 = vst [vmem:[#allocation118_spill] sm:$0xff] %v9154_v26 }
 0x1b0   : > { %2488 = vrot.lane.b32.xlu0 %v2438_v39, %s8181_s5  ;;  %v9156_v39 = vpop.permute.xlu0 %2060 }
 0x1b2   : > { %7992 = vset.pattern.permute.xlu1 %v13445_v24  ;;  %v9161_v3 = vpop.permute.xlu1 %1712 }
 0x1b3   : > { %13500 = vst [vmem:[#allocation119_spill] sm:$0xff] %v9161_v3  ;;  %1044 = vperm.xlu1 %7992, %v8556_v46  }
 0x1b4   : > { %1807 = vrot.lane.b32.xlu0 %v1754_v37, %s8175_s22  ;;  %v9165_v12 = vpop.permute.xlu0 %1359  ;;  %v9168_v37 = vld [vmem:[%s8334_s2 + $0x38] sm:$0xff] }
 0x1b5   : > { %v13198_v24 = vrot.slane %v9168_v37, 1 }
 0x1b7   : > { %7993 = vset.pattern.permute.xlu1 %v13425_v17  ;;  %v1972_v34 = vsel %vm1955_vm2, %v13198_v24, %v1971_v41 }
 0x1b8   : > { %1178 = vrot.lane.b32.xlu0 %v1127_v49, %s8182_s6  ;;  %v9175_v49 = vpop.permute.xlu1 %1028  ;;  %1308 = vperm.xlu1 %7993, %v8556_v46   ;;  %v9185_v21 = vpop.permute.xlu0 %1787 }
 0x1b9   : > { %13501 = vst [vmem:[#allocation120_spill] sm:$0xff] %v9175_v49 }
 0x1bc   : > { %2082 = vrot.lane.b32.xlu0 %v2029_v25, %s8177_s3  ;;  %v2232_v25 = vmul.f32 %v8932_v14, %v9168_v37  ;;  %7994 = vset.pattern.permute.xlu1 %v13429_v0  ;;  %v9188_v36 = vpop.permute.xlu1 %1904  ;;  %v1070_v14 = vrot.slane %v9168_v37, 7  ;;  %v9195_v49 = vpop.permute.xlu0 %2062  ;;  %v1750_v0 = vmul.f32 %v9035_v23, %v9168_v37 }
 0x1bd   : > { %13502 = vst [vmem:[#allocation121_spill] sm:$0xff] %v9188_v36  ;;  %2215 = vperm.xlu1 %7994, %v8433_v29  }
 0x1c0   : > { %2603 = vperm.xlu0 %8019, %v8426_v28   ;;  %v2434_v28 = vmul.f32 %v8616_v60, %v1972_v34 }
 0x1c1   : > { %7995 = vset.pattern.permute.xlu1 %v13437_v11  ;;  %v9198_v24 = vpop.permute.xlu1 %1272 }
 0x1c2   : > { %13503 = vst [vmem:[#allocation122_spill] sm:$0xff] %v9198_v24  ;;  %2417 = vperm.xlu1 %7995, %v8433_v29   ;;  %v9215_v24 = vpop.permute.xlu0 %1361  ;;  %v2025_v29 = vmul.f32 %v1972_v34, %v9060_v54  ;;  %v13210_v34 = vrot.slane %v9171_v48, 7 }
 0x1c4   : > { %2278 = vrot.lane.b32.xlu0 %v2232_v25, %s8183_s21  ;;  %v13202_v25 = vrot.slane %v9029_v10, 7  ;;  %v1073_v44 = vsel %vm1056_vm3, %v1070_v14, %v13210_v34 }
 0x1c5   : > { %v9210_v60 = vpop.permute.xlu1 %1292 }
 0x1c6   : > { %13505 = vst [vmem:[#allocation124_spill] sm:$0xff] %v9210_v60  ;;  %7996 = vset.pattern.permute.xlu1 %v13441_v9 }
 0x1c7   : > { %1732 = vperm.xlu1 %7996, %v8556_v46  }
 0x1c8   : > { %2480 = vrot.lane.b32.xlu0 %v2434_v28, %s8181_s5  ;;  %v9208_v28 = vsel %vm1056_vm3, %v13202_v25, %v1070_v14  ;;  %v9225_v25 = vpop.permute.xlu0 %1576 }
 0x1c9   : > { %13504 = vst [vmem:[#allocation123_spill] sm:$0xff] %v9208_v28  ;;  %v1123_v3 = vmul.f32 %v9208_v28, %v9053_v20  ;;  %v1538_v28 = vmul.f32 %v8853_v62, %v1073_v44  ;;  %v13214_v62 = vmov 0  }
 0x1cb   : > { %7997 = vset.pattern.permute.xlu1 %v13422_v33 }
 0x1cc   : > { %1799 = vrot.lane.b32.xlu0 %v1750_v0, %s8175_s22  ;;  %v9220_v0 = vpop.permute.xlu1 %2199  ;;  %1944 = vperm.xlu1 %7997, %v8556_v46   ;;  %v9235_v54 = vpop.permute.xlu0 %1789 }
 0x1cd   : > { %13506 = vst [vmem:[#allocation125_spill] sm:$0xff] %v9220_v0 }
 0x1d0   : > { %1170 = vrot.lane.b32.xlu0 %v1123_v3, %s8182_s6  ;;  %v9227_v20 = vpop.permute.xlu1 %1479  ;;  %7998 = vset.pattern.permute.xlu1 %v13425_v17  ;;  %v1331_v3 = vmul.f32 %v8584_v51, %v9113_v16  ;;  %v1973_v51 = vrot.slane %v9064_v27, 1 }
 0x1d1   : > { %13507 = vst [vmem:[#allocation126_spill] sm:$0xff] %v9227_v20  ;;  %1312 = vperm.xlu1 %7998, %v8501_v40  }
 0x1d2   : > { %v9251_v63 = vpop.permute.xlu0 %2064  ;;  %v1974_v14 = vsel %vm1955_vm2, %v1971_v41, %v1973_v51 }
 0x1d4   : > { %2074 = vrot.lane.b32.xlu0 %v2025_v29, %s8177_s3  ;;  %v9237_v23 = vpop.permute.xlu1 %2381  ;;  %v9241_v29 = vld [vmem:[%s8334_s2 + $0x68] sm:$0xff] }
 0x1d5   : > { %13508 = vst [vmem:[#allocation127_spill] sm:$0xff] %v9237_v23  ;;  %7999 = vset.pattern.permute.xlu1 %v13434_v61 }
 0x1d6   : > { %1519 = vperm.xlu1 %7999, %v8501_v40   ;;  %v9261_v61 = vpop.permute.xlu0 %1363 }
 0x1d8   : > { %2587 = vperm.xlu0 %8019, %v8464_v35   ;;  %v2238_v35 = vmul.f32 %v9126_v5, %v9241_v29  ;;  %v2435_v5 = vmul.f32 %v9146_v31, %v1974_v14 }
 0x1da   : > { %8000 = vset.pattern.permute.xlu1 %v13437_v11 }
 0x1db   : > { %2421 = vperm.xlu1 %8000, %v8556_v46   ;;  %v9273_v46 = vpop.permute.xlu0 %1578 }
 0x1dc   : > { %1383 = vrot.lane.b32.xlu0 %v1331_v3, %s8178_s0  ;;  %v9254_v3 = vpop.permute.xlu1 %2401 }
 0x1dd   : > { %13509 = vst [vmem:[#allocation128_spill] sm:$0xff] %v9254_v3 }
 0x1df   : > { %8002 = vset.pattern.permute.xlu1 %v13422_v33  ;;  %v8040_v33 = vld [vmem:[%s13067_s1 + $0x8] sm:$0xff]  ;;  %v9284_v31 = vpop.permute.xlu0 %1791 }
 0x1e0   : > { %2290 = vrot.lane.b32.xlu0 %v2238_v35, %s8183_s21  ;;  %v9263_v34 = vpop.permute.xlu1 %1716  ;;  %1948 = vperm.xlu1 %8002, %v8501_v40   ;;  %v1751_v35 = vmul.f32 %v9154_v26, %v9171_v48  ;;  %v13514_v26 = vmov 8  }
 0x1e1   : > { %13510 = vst [vmem:[#allocation129_spill] sm:$0xff] %v9263_v34 }
 0x1e4   : > { %1588 = vrot.lane.b32.xlu0 %v1538_v28, %s8179_s4  ;;  %v9271_v41 = vpop.permute.xlu1 %1032  ;;  %v1124_v28 = vmul.f32 %v1073_v44, %v8817_v22  ;;  %8003 = vset.pattern.permute.xlu1 %v13214_v62  ;;  %v2026_v44 = vmul.f32 %v1974_v14, %v9188_v36  ;;  %v2648_v22 = vrot.slane %v9113_v16, 2  ;;  %v13517_v36 = vmov 0  }
 0x1e5   : > { %13511 = vst [vmem:[#allocation130_spill] sm:$0xff] %v9271_v41  ;;  %759 = vperm.xlu1 %8003, %v8040_v33  }
 0x1e8   : > { %2482 = vrot.lane.b32.xlu0 %v2435_v5, %s8181_s5  ;;  %v9281_v5 = vpop.permute.xlu1 %1928 }
 0x1e9   : > { %13512 = vst [vmem:[#allocation131_spill] sm:$0xff] %v9281_v5  ;;  %8005 = vset.pattern.permute.xlu1 %v13437_v11  ;;  %v8041_v11 = vld [vmem:[%s13067_s1] sm:$0xff] }
 0x1ea   : > { %2425 = vperm.xlu1 %8005, %v8501_v40  }
 0x1ec   : > { %1801 = vrot.lane.b32.xlu0 %v1751_v35, %s8175_s22  ;;  %v9289_v62 = vpop.permute.xlu1 %1296  ;;  %v13221_v35 = vrot.slane %v9076_v15, 2 }
 0x1ed   : > { %13513 = vst [vmem:[#allocation132_spill] sm:$0xff] %v9289_v62 }
 0x1ee   : > { %8006 = vset.pattern.permute.xlu1 %v13514_v26  ;;  %v2649_v14 = vsel %vm2626_vm5, %v13221_v35, %v2648_v22 }
 0x1ef   : > { %2551 = vperm.xlu1 %8006, %v8041_v11   ;;  %v9320_v11 = vld [vmem:[%s8334_s2 + $0x70] sm:$0xff] }
 0x1f0   : > { %1172 = vrot.lane.b32.xlu0 %v1124_v28, %s8182_s6  ;;  %v9295_v28 = vpop.permute.xlu0 %2066  ;;  %v2239_v35 = vmul.f32 %v9220_v0, %v9320_v11  ;;  %v13523_v0 = vrot.slane %v9057_v42, 1 }
 0x1f1   : > { %13515 = vst [vmem:[#allocation133_spill] sm:$0xff] %v9295_v28  ;;  %v9301_v40 = vpop.permute.xlu1 %2203 }
 0x1f2   : > { %13516 = vst [vmem:[#allocation134_spill] sm:$0xff] %v9301_v40 }
 0x1f3   : > { %8008 = vset.pattern.permute.xlu1 %v13517_v36 }
 0x1f4   : > { %2076 = vrot.lane.b32.xlu0 %v2026_v44, %s8177_s3  ;;  %v1332_v44 = vmul.f32 %v9210_v60, %v9241_v29  ;;  %v9309_v34 = vpop.permute.xlu0 %2591 }
 0x1f5   : > { %13518 = vst [vmem:[#allocation135_spill] sm:$0xff] %v9309_v34  ;;  %v2695_v3 = vmul.f32 %v2649_v14, %v9309_v34  ;;  %v13521_v14 = vrot.slane %v9064_v27, 7  ;;  %v13522_v34 = vrot.slane %v9171_v48, 7  ;;  %v13229_v48 = vrot.slane %v9241_v29, 2 }
 0x1f6   : > { %v9325_v60 = vpop.permute.xlu1 %1503 }
 0x1f7   : > { %2714 = vst.msk [vmem:[#allocation2 + $0xa8] sm:$0xff] %vm714_vm4, %v2695_v3  ;;  %13519 = vst [vmem:[#allocation136_spill] sm:$0xff] %v9325_v60 }
 0x1f8   : > { %2611 = vperm.xlu0 %8019, %v8548_v45   ;;  %v9315_v45 = vld [vmem:[%s13067_s1 + $0x10] sm:$0xff]  ;;  %v9327_v16 = vpop.permute.xlu0 %2474 }
 0x1f9   : > { %764 = vperm.xlu1 %8008, %v9315_v45   ;;  %13520 = vst [vmem:[#allocation137_spill] sm:$0xff] %v9327_v16  ;;  %v9344_v16 = vsel %vm1955_vm2, %v1973_v51, %v13523_v0  ;;  %v696_v51 = vld [vmem:[%s8294_s20 + $0x8] sm:$0xff] }
 0x1fa   : > { %13524 = vst [vmem:[#allocation138_spill] sm:$0xff] %v9344_v16 }
 0x1fc   : > { %1385 = vrot.lane.b32.xlu0 %v1332_v44, %s8178_s0  ;;  %v9336_v44 = vsel %vm1056_vm3, %v13522_v34, %v13521_v14  ;;  %v2436_v34 = vmul.f32 %v9237_v23, %v9344_v16  ;;  %v9369_v23 = vld [vmem:[%s8334_s2 + $0x78] sm:$0xff]  ;;  %v13529_v16 = vrot.slane %v9320_v11, 7 }
 0x1fd   : > { %8009 = vset.pattern.permute.xlu1 %v13425_v17  ;;  %v1539_v3 = vmul.f32 %v9227_v20, %v9336_v44  ;;  %v9346_v17 = vpop.permute.xlu1 %2405  ;;  %v13232_v20 = vrot.slane %v9241_v29, 7  ;;  %13528 = vst [vmem:[#allocation142_spill] sm:$0xff] %v9369_v23 }
 0x1fe   : > { %1316 = vperm.xlu1 %8009, %v8593_v53   ;;  %13525 = vst [vmem:[#allocation139_spill] sm:$0xff] %v9346_v17 }
 0x200   : > { %2292 = vrot.lane.b32.xlu0 %v2239_v35, %s8183_s21  ;;  %v9348_v35 = vpop.permute.xlu0 %1164 }
 0x201   : > { %v9359_v14 = vpop.permute.xlu1 %1720 }
 0x202   : > { %8011 = vset.pattern.permute.xlu1 %v13441_v9  ;;  %13527 = vst [vmem:[#allocation141_spill] sm:$0xff] %v9359_v14  ;;  %v2651_v9 = vsel %vm2626_vm5, %v2648_v22, %v13229_v48  ;;  %v13247_v14 = vmov 0.0|0.0  }
 0x203   : > { %1740 = vperm.xlu1 %8011, %v8593_v53   ;;  %v695_v53 = vld [vmem:[%s8294_s20] sm:$0xff]  ;;  %7635 = vmatprep.subr.bf16.mxu0 %v13247_v14 }
 0x204   : > { %1590 = vrot.lane.b32.xlu0 %v1539_v3, %s8179_s4  ;;  %v9357_v0 = vpop.permute.xlu0 %2068  ;;  %v1752_v3 = vmul.f32 %v8677_v13, %v9064_v27  ;;  %v7636_v48 = vpack.c.bf16 %v696_v51, %v695_v53  ;;  %7842 = vmatprep.subr.bf16.mxu1 %v13247_v14  ;;  %v697_v51 = vld [vmem:[%s8294_s20 + $0x10] sm:$0xff] }
 0x205   : > { %13526 = vst [vmem:[#allocation140_spill] sm:$0xff] %v9357_v0  ;;  %v13237_v0 = vrot.slane %v9369_v23, 1  ;;  %v9387_v28 = vpop.permute.xlu1 %1932 }
 0x206   : > { %13531 = vst [vmem:[#allocation144_spill] sm:$0xff] %v9387_v28  ;;  %7637 = vmatpush1.bf16.msra.mxu0 %v7636_v48  ;;  %7851 = vmatpush1.bf16.msra.mxu1 %v7636_v48 }
 0x207   : > { %8012 = vset.pattern.permute.xlu1 %v13514_v26  ;;  %7638 = vmatprep.subr.bf16.mxu0 %v13247_v14 }
 0x208   : > { %2484 = vrot.lane.b32.xlu0 %v2436_v34, %s8181_s5  ;;  %v9379_v34 = vsel %vm1056_vm3, %v13232_v20, %v13529_v16  ;;  %2555 = vperm.xlu1 %8012, %v8040_v33   ;;  %v9391_v16 = vrot.slane %v8698_v19, 7 }
 0x209   : > { %v1130_v33 = vmul.f32 %v9379_v34, %v9271_v41  ;;  %7843 = vmatprep.subr.bf16.mxu1 %v13247_v14  ;;  %v699_v41 = vld [vmem:[%s8294_s20 + $0x20] sm:$0xff] }
 0x20a   : > { %v1530_v20 = vmul.f32 %v8838_v8, %v9391_v16 }
 0x20b   : > { %v9381_v22 = vpop.permute.xlu0 %2595 }
 0x20c   : > { %13530 = vst [vmem:[#allocation143_spill] sm:$0xff] %v9381_v22  ;;  %v2696_v13 = vmul.f32 %v2651_v9, %v9381_v22  ;;  %1803 = vrot.lane.b32.xlu0 %v1752_v3, %s8175_s22  ;;  %v698_v9 = vld [vmem:[%s8294_s20 + $0x18] sm:$0xff]  ;;  %v13236_v3 = vrot.slane %v9320_v11, 1  ;;  %8013 = vset.pattern.permute.xlu1 %v13517_v36  ;;  %v700_v22 = vld [vmem:[%s8294_s20 + $0x28] sm:$0xff] }
 0x20d   : > { %v7639_v19 = vpack.c.bf16 %v698_v9, %v697_v51  ;;  %v9422_v9 = vpop.permute.xlu1 %1300  ;;  %v7642_v8 = vpack.c.bf16 %v700_v22, %v699_v41  ;;  %v701_v41 = vld [vmem:[%s8294_s20 + $0x30] sm:$0xff]  ;;  %v702_v22 = vld [vmem:[%s8294_s20 + $0x38] sm:$0xff] }
 0x20e   : > { %2715 = vst.msk [vmem:[#allocation2 + $0xb8] sm:$0xff] %vm714_vm4, %v2696_v13  ;;  %v9409_v13 = vld [vmem:[%s13067_s1 + $0x18] sm:$0xff]  ;;  %v9418_v48 = vsel %vm1955_vm2, %v13236_v3, %v13237_v0  ;;  %13532 = vst [vmem:[#allocation145_spill] sm:$0xff] %v9422_v9  ;;  %v1116_v3 = vmul.f32 %v9391_v16, %v8571_v47  ;;  %v1333_v0 = vmul.f32 %v9289_v62, %v9320_v11  ;;  %v9449_v62 = vld [vmem:[%s8334_s2 + $0x80] sm:$0xff] }
 0x20f   : > { %v9401_v53 = vpop.permute.xlu0 %2274  ;;  %769 = vperm.xlu1 %8013, %v9409_v13   ;;  %7640 = vmatpush1.bf16.msra.mxu0 %v7639_v19  ;;  %v2032_v51 = vmul.f32 %v9418_v48, %v9281_v5  ;;  %v13244_v5 = vrot.slane %v9369_v23, 7  ;;  %v2240_v47 = vmul.f32 %v9301_v40, %v9369_v23  ;;  %v704_v9 = vld [vmem:[%s8294_s20 + $0x48] sm:$0xff]  ;;  %v13535_v40 = vrot.slane %v9320_v11, 7 }
 0x210   : > { %1184 = vrot.lane.b32.xlu0 %v1130_v33, %s8182_s6  ;;  %7641 = vmatprep.subr.bf16.mxu0 %v13247_v14 }
 0x211   : > { %7852 = vmatpush1.bf16.msra.mxu1 %v7639_v19  ;;  %v9440_v19 = vpop.permute.xlu1 %1507  ;;  %v1087_v28 = vsel %vm1056_vm3, %v13535_v40, %v13244_v5  ;;  %v13537_v5 = vrot.slane %v9449_v62, 1 }
 0x212   : > { %7844 = vmatprep.subr.bf16.mxu1 %v13247_v14  ;;  %13533 = vst [vmem:[#allocation146_spill] sm:$0xff] %v9440_v19 }
 0x213   : > { %v9427_v33 = vpop.permute.xlu0 %2476  ;;  %1572 = vrot.lane.b32.xlu1 %v1530_v20, %s8179_s4  ;;  %7643 = vmatpush1.bf16.msra.mxu0 %v7642_v8 }
 0x214   : > { %2088 = vrot.lane.b32.xlu0 %v2032_v51, %s8177_s3  ;;  %8014 = vset.pattern.permute.xlu1 %v13514_v26  ;;  %v7645_v51 = vpack.c.bf16 %v702_v22, %v701_v41  ;;  %v705_v41 = vld [vmem:[%s8294_s20 + $0x50] sm:$0xff] }
 0x215   : > { %7644 = vmatprep.subr.bf16.mxu0 %v13247_v14  ;;  %7853 = vmatpush1.bf16.msra.mxu1 %v7642_v8  ;;  %v703_v8 = vld [vmem:[%s8294_s20 + $0x40] sm:$0xff]  ;;  %v9460_v22 = vpop.permute.xlu1 %2409 }
 0x216   : > { %7845 = vmatprep.subr.bf16.mxu1 %v13247_v14  ;;  %13534 = vst [vmem:[#allocation147_spill] sm:$0xff] %v9460_v22  ;;  %v13540_v22 = vmov 0.0|0.0  }
 0x217   : > { %v9442_v20 = vpop.permute.xlu0 %1805  ;;  %1156 = vrot.lane.b32.xlu1 %v1116_v3, %s8182_s6  ;;  %7646 = vmatpush1.bf16.msra.mxu0 %v7645_v51  ;;  %v7648_v3 = vpack.c.bf16 %v704_v9, %v703_v8  ;;  %v2226_v9 = vmul.f32 %v8708_v32, %v8693_v18  ;;  %v1545_v8 = vmul.f32 %v9325_v60, %v1087_v28 }
 0x218   : > { %1387 = vrot.lane.b32.xlu0 %v1333_v0, %s8178_s0  ;;  %7647 = vmatprep.subr.bf16.mxu0 %v13247_v14 }
 0x219   : > { %7854 = vmatpush1.bf16.msra.mxu1 %v7645_v51  ;;  %v13538_v51 = vrot.slane %v9369_v23, 1 }
 0x21a   : > { %7846 = vmatprep.subr.bf16.mxu1 %v13247_v14 }
 0x21b   : > { %v9457_v0 = vpop.permute.xlu0 %1176  ;;  %2559 = vperm.xlu1 %8014, %v9315_v45   ;;  %7649 = vmatpush1.bf16.msra.mxu0 %v7648_v3  ;;  %v13536_v45 = vrot.slane %v8693_v18, 7  ;;  %v9485_v32 = vsel %vm1955_vm2, %v13538_v51, %v13537_v5  ;;  %v9492_v18 = vpop.permute.xlu1 %1040  ;;  %v707_v51 = vld [vmem:[%s8294_s20 + $0x60] sm:$0xff] }
 0x21c   : > { %2294 = vrot.lane.b32.xlu0 %v2240_v47, %s8183_s21  ;;  %7650 = vmatprep.subr.bf16.mxu0 %v13247_v14  ;;  %v706_v47 = vld [vmem:[%s8294_s20 + $0x58] sm:$0xff]  ;;  %13539 = vst [vmem:[#allocation148_spill] sm:$0xff] %v9485_v32  ;;  %13541 = vst [vmem:[#allocation149_spill] sm:$0xff] %v9492_v18  ;;  %v8051_v18 = vld [vmem:[%s13067_s1 + $0x68] sm:$0xff] }
 0x21d   : > { %7855 = vmatpush1.bf16.msra.mxu1 %v7648_v3  ;;  %v1059_v40 = vsel %vm1056_vm3, %v9391_v16, %v13536_v45  ;;  %v7651_v14 = vpack.c.bf16 %v706_v47, %v705_v41  ;;  %v13542_v16 = vrot.slane %v9320_v11, 2  ;;  %v13543_v3 = vrot.slane %v9241_v29, 2 }
 0x21e   : > { %7847 = vmatprep.subr.bf16.mxu1 %v13540_v22  ;;  %v1531_v5 = vmul.f32 %v8600_v55, %v1059_v40  ;;  %v2442_v41 = vmul.f32 %v9346_v17, %v9485_v32  ;;  %v1131_v17 = vmul.f32 %v1087_v28, %v8822_v2  ;;  %v711_v28 = vld [vmem:[%s8294_s20 + $0x80] sm:$0xff]  ;;  %v8048_v2 = vld [vmem:[%s13067_s1 + $0x50] sm:$0xff]  ;;  %v13554_v55 = vrot.slane %v9320_v11, 2 }
 0x21f   : > { %v9487_v60 = vpop.permute.xlu0 %2080  ;;  %2266 = vrot.lane.b32.xlu1 %v2226_v9, %s8183_s21  ;;  %v2653_v45 = vsel %vm2626_vm5, %v13543_v3, %v13542_v16  ;;  %7652 = vmatpush1.bf16.msra.mxu0 %v7651_v14  ;;  %v708_v9 = vld [vmem:[%s8294_s20 + $0x68] sm:$0xff]  ;;  %v2428_v3 = vmul.f32 %v8607_v57, %v8748_v50  ;;  %v1117_v50 = vmul.f32 %v1059_v40, %v8614_v59  ;;  %v13547_v40 = vmov 0.0  }
 0x220   : > { %1602 = vrot.lane.b32.xlu0 %v1545_v8, %s8179_s4  ;;  %7653 = vmatprep.subr.bf16.mxu0 %v13540_v22  ;;  %v7654_v47 = vpack.c.bf16 %v708_v9, %v707_v51  ;;  %v709_v51 = vld [vmem:[%s8294_s20 + $0x70] sm:$0xff]  ;;  %v712_v9 = vld [vmem:[%s8294_s20 + $0x88] sm:$0xff]  ;;  %v2429_v57 = vmul.f32 %v8603_v56, %v8879_v30 }
 0x221   : > { %7856 = vmatpush1.bf16.msra.mxu1 %v7651_v14  ;;  %v9515_v14 = vpop.permute.xlu1 %1936  ;;  %v13555_v30 = vld [vmem:[#allocation52_spill] sm:$0xff] }
 0x222   : > { %7848 = vmatprep.subr.bf16.mxu1 %v13540_v22  ;;  %13545 = vst [vmem:[#allocation151_spill] sm:$0xff] %v9515_v14  ;;  %v1118_v56 = vmul.f32 %v13555_v30, %v8657_v7  ;;  %v8052_v30 = vld [vmem:[%s13067_s1 + $0x48] sm:$0xff]  ;;  %v1088_v7 = vrot.slane %v9449_v62, 7 }
 0x223   : > { %v9505_v8 = vpop.permute.xlu0 %2599  ;;  %1574 = vrot.lane.b32.xlu1 %v1531_v5, %s8179_s4  ;;  %7655 = vmatpush1.bf16.msra.mxu0 %v7654_v47 }
 0x224   : > { %13544 = vst [vmem:[#allocation150_spill] sm:$0xff] %v9505_v8  ;;  %v2697_v16 = vmul.f32 %v2653_v45, %v9505_v8  ;;  %2496 = vrot.lane.b32.xlu0 %v2442_v41, %s8181_s5  ;;  %7656 = vmatprep.subr.bf16.mxu0 %v13540_v22  ;;  %v710_v45 = vld [vmem:[%s8294_s20 + $0x78] sm:$0xff]  ;;  %v13262_v8 = vrot.slane %v9369_v23, 2 }
 0x225   : > { %7857 = vmatpush1.bf16.msra.mxu1 %v7654_v47  ;;  %v7657_v5 = vpack.c.bf16 %v710_v45, %v709_v51  ;;  %v7660_v51 = vpack.c.bf16 %v712_v9, %v711_v28 }
 0x226   : > { %2716 = vst.msk [vmem:[#allocation2 + $0xc8] sm:$0xff] %vm714_vm4, %v2697_v16  ;;  %7849 = vmatprep.subr.bf16.mxu1 %v13540_v22  ;;  %v9529_v16 = vpop.permute.xlu1 %2211 }
 0x227   : > { %v9520_v41 = vpop.permute.xlu0 %2276  ;;  %2468 = vrot.lane.b32.xlu1 %v2428_v3, %s8181_s5  ;;  %7658 = vmatpush1.bf16.msra.mxu0 %v7657_v5  ;;  %13546 = vst [vmem:[#allocation152_spill] sm:$0xff] %v9529_v16 }
 0x228   : > { %1186 = vrot.lane.b32.xlu0 %v1131_v17, %s8182_s6  ;;  %7659 = vmatprep.subr.bf16.mxu0 %v13540_v22  ;;  %v9537_v17 = vld [vmem:[%s13067_s1 + $0x88] sm:$0xff] }
 0x229   : > { %7858 = vmatpush1.bf16.msra.mxu1 %v7657_v5  ;;  %v8045_v5 = vld [vmem:[%s13067_s1 + $0x20] sm:$0xff] }
 0x22a   : > { %7850 = vmatprep.subr.bf16.mxu1 %v13540_v22  ;;  %v9545_v45 = vpop.permute.xlu1 %1511 }
 0x22b   : > { %v9531_v47 = vpop.permute.xlu0 %1594  ;;  %1158 = vrot.lane.b32.xlu1 %v1117_v50, %s8182_s6  ;;  %7661 = vmatpush1.bf16.msra.mxu0 %v7660_v51  ;;  %13549 = vst [vmem:[#allocation154_spill] sm:$0xff] %v9545_v45  ;;  %v9553_v50 = vld [vmem:[%s8334_s2 + $0x10] sm:$0xff] }
 0x22c   : > { %2619 = vperm.xlu0 %8019, %v9537_v17   ;;  %7363 = vmatprep.subr.mxu0 %v13547_v40  ;;  %v2227_v28 = vmul.f32 %v9553_v50, %v8636_v1 }
 0x22d   : > { %7859 = vmatpush1.bf16.msra.mxu1 %v7660_v51 }
 0x22e   : > { %7662 = vmatprep.subr.bf16.mxu1 %v13540_v22  ;;  %v9560_v51 = vpop.permute.xlu1 %1728  ;;  %v2655_v22 = vsel %vm2626_vm5, %v13554_v55, %v13262_v8 }
 0x22f   : > { %v9542_v3 = vpop.permute.xlu0 %2488  ;;  %2563 = vperm.xlu1 %8014, %v9409_v13   ;;  %13551 = vst [vmem:[#allocation156_spill] sm:$0xff] %v9560_v51  ;;  %v9565_v13 = vld [vmem:[%s13067_s1 + $0x28] sm:$0xff] }
 0x230   : > { %13548 = vst [vmem:[#allocation153_spill] sm:$0xff] %v9542_v3  ;;  %8029 = vset.pattern.permute.xlu0 %v13517_v36 }
 0x231   : > { %774 = vperm.xlu0 %8029, %v8045_v5  }
 0x232   : > { %v9583_v1 = vpop.permute.xlu1 %1044 }
 0x233   : > { %v9557_v9 = vpop.permute.xlu0 %1807  ;;  %2268 = vrot.lane.b32.xlu1 %v2227_v28, %s8183_s21  ;;  %v9577_v28 = vld [vmem:[%s13067_s1 + $0x30] sm:$0xff]  ;;  %13552 = vst [vmem:[#allocation157_spill] sm:$0xff] %v9583_v1 }
 0x234   : > { %13550 = vst [vmem:[#allocation155_spill] sm:$0xff] %v9557_v9  ;;  %8015 = vset.pattern.permute.xlu1 %v13517_v36 }
 0x235   : > { %779 = vperm.xlu0 %8029, %v9565_v13  }
 0x237   : > { %v9569_v40 = vpop.permute.xlu0 %1178  ;;  %804 = vperm.xlu1 %8015, %v8048_v2   ;;  %v9591_v2 = vld [vmem:[%s13067_s1 + $0x38] sm:$0xff]  ;;  %v9602_v1 = vpop.permute.xlu1 %1308 }
 0x238   : > { %13556 = vst [vmem:[#allocation52_spill] sm:$0xff] %v9602_v1 }
 0x239   : > { %784 = vperm.xlu0 %8029, %v9577_v28  }
 0x23b   : > { %v9585_v59 = vpop.permute.xlu0 %2082  ;;  %2470 = vrot.lane.b32.xlu1 %v2429_v57, %s8181_s5 }
 0x23c   : > { %13553 = vst [vmem:[#allocation158_spill] sm:$0xff] %v9585_v59  ;;  %8016 = vset.pattern.permute.xlu1 %v13514_v26  ;;  %v9614_v8 = vpop.permute.xlu1 %2215 }
 0x23d   : > { %789 = vperm.xlu0 %8029, %v9591_v2   ;;  %13559 = vst [vmem:[#allocation161_spill] sm:$0xff] %v9614_v8 }
 0x23f   : > { %v9604_v57 = vpop.permute.xlu0 %2603  ;;  %1160 = vrot.lane.b32.xlu1 %v1118_v56, %s8182_s6 }
 0x240   : > { %13557 = vst [vmem:[#allocation159_spill] sm:$0xff] %v9604_v57  ;;  %v2698_v16 = vmul.f32 %v2655_v22, %v9604_v57  ;;  %v13560_v22 = vld [vmem:[#allocation35_spill] sm:$0xff] }
 0x241   : > { %819 = vperm.xlu0 %8029, %v8051_v18   ;;  %v2228_v56 = vmul.f32 %v13560_v22, %v8868_v6  ;;  %v9625_v18 = vpop.permute.xlu1 %2417  ;;  %v13565_v22 = vrot.slane %v9369_v23, 7 }
 0x242   : > { %2717 = vst.msk [vmem:[#allocation2 + $0xd8] sm:$0xff] %vm714_vm4, %v2698_v16  ;;  %13562 = vst [vmem:[#allocation163_spill] sm:$0xff] %v9625_v18  ;;  %v8053_v16 = vld [vmem:[%s13067_s1 + $0x78] sm:$0xff] }
 0x243   : > { %v9612_v55 = vpop.permute.xlu0 %2278  ;;  %2567 = vperm.xlu1 %8016, %v8045_v5   ;;  %v13563_v5 = vld [vmem:[#allocation55_spill] sm:$0xff]  ;;  %v9638_v1 = vsel %vm1056_vm3, %v13565_v22, %v1088_v7 }
 0x244   : > { %13558 = vst [vmem:[#allocation160_spill] sm:$0xff] %v9612_v55  ;;  %13566 = vst [vmem:[#allocation165_spill] sm:$0xff] %v9638_v1  ;;  %v9654_v22 = vld [vmem:[%s8334_s2 + $0x88] sm:$0xff] }
 0x245   : > { %799 = vperm.xlu0 %8029, %v8052_v30   ;;  %v2241_v30 = vmul.f32 %v13563_v5, %v9449_v62  ;;  %v1546_v5 = vmul.f32 %v9440_v19, %v9638_v1  ;;  %13569 = vst [vmem:[#allocation167_spill] sm:$0xff] %v9654_v22 }
 0x247   : > { %v9621_v57 = vpop.permute.xlu0 %2480  ;;  %2270 = vrot.lane.b32.xlu1 %v2228_v56, %s8183_s21  ;;  %v8054_v56 = vld [vmem:[%s13067_s1 + $0x58] sm:$0xff] }
 0x248   : > { %13561 = vst [vmem:[#allocation162_spill] sm:$0xff] %v9621_v57  ;;  %8017 = vset.pattern.permute.xlu1 %v13517_v36  ;;  %v9646_v57 = vpop.permute.xlu1 %1732 }
 0x249   : > { %829 = vperm.xlu0 %8029, %v8053_v16   ;;  %v13567_v16 = vld [vmem:[#allocation37_spill] sm:$0xff]  ;;  %13568 = vst [vmem:[#allocation166_spill] sm:$0xff] %v9646_v57 }
 0x24a   : > { %v2430_v18 = vmul.f32 %v13567_v16, %v8926_v43  ;;  %v13571_v16 = vld [vmem:[#allocation38_spill] sm:$0xff] }
 0x24b   : > { %v9633_v6 = vpop.permute.xlu0 %1799  ;;  %809 = vperm.xlu1 %8017, %v8054_v56   ;;  %v13270_v56 = vrot.slane %v9057_v42, 2  ;;  %v1759_v23 = vmul.f32 %v13571_v16, %v9449_v62  ;;  %v1090_v42 = vrot.slane %v9654_v22, 7 }
 0x24c   : > { %13564 = vst [vmem:[#allocation164_spill] sm:$0xff] %v9633_v6  ;;  %v9663_v19 = vpop.permute.xlu1 %1944 }
 0x24d   : > { %2296 = vrot.lane.b32.xlu0 %v2241_v30, %s8183_s21  ;;  %v13570_v30 = vld [vmem:[#allocation61_spill] sm:$0xff]  ;;  %13572 = vst [vmem:[#allocation168_spill] sm:$0xff] %v9663_v19 }
 0x24e   : > { %v1119_v43 = vmul.f32 %v8896_v52, %v13570_v30  ;;  %v13575_v52 = vrot.slane %v9449_v62, 1 }
 0x24f   : > { %v9650_v6 = vpop.permute.xlu0 %1170  ;;  %2472 = vrot.lane.b32.xlu1 %v2430_v18, %s8181_s5  ;;  %v1989_v18 = vrot.slane %v9654_v22, 1 }
 0x250   : > { %8018 = vset.pattern.permute.xlu1 %v13514_v26 }
 0x251   : > { %1604 = vrot.lane.b32.xlu0 %v1546_v5, %s8179_s4  ;;  %v13574_v5 = vrot.slane %v9076_v15, 2  ;;  %v9678_v16 = vsel %vm1955_vm2, %v13575_v52, %v1989_v18 }
 0x252   : > { %13576 = vst [vmem:[#allocation170_spill] sm:$0xff] %v9678_v16  ;;  %v2034_v30 = vmul.f32 %v9678_v16, %v9515_v14  ;;  %v13580_v14 = vld [vmem:[#allocation14_spill] sm:$0xff] }
 0x253   : > { %v9665_v1 = vpop.permute.xlu0 %2074  ;;  %1162 = vrot.lane.b32.xlu1 %v1119_v43, %s8182_s6  ;;  %v2647_v55 = vsel %vm2626_vm5, %v13270_v56, %v13574_v5  ;;  %v9690_v5 = vld [vmem:[%s8334_s2 + $0x18] sm:$0xff]  ;;  %v13579_v56 = vld [vmem:[#allocation44_spill] sm:$0xff]  ;;  %v1335_v16 = vmul.f32 %v13580_v14, %v9449_v62 }
 0x254   : > { %13573 = vst [vmem:[#allocation169_spill] sm:$0xff] %v9665_v1  ;;  %v1322_v52 = vmul.f32 %v9690_v5, %v13579_v56  ;;  %v13585_v56 = vld [vmem:[#allocation43_spill] sm:$0xff] }
 0x255   : > { %1817 = vrot.lane.b32.xlu0 %v1759_v23, %s8175_s22  ;;  %v9685_v23 = vpop.permute.xlu1 %1312 }
 0x256   : > { %13578 = vst [vmem:[#allocation172_spill] sm:$0xff] %v9685_v23 }
 0x257   : > { %v9682_v1 = vpop.permute.xlu0 %2587  ;;  %2571 = vperm.xlu1 %8018, %v9565_v13  }
 0x258   : > { %13577 = vst [vmem:[#allocation171_spill] sm:$0xff] %v9682_v1  ;;  %v2694_v43 = vmul.f32 %v2647_v55, %v9682_v1  ;;  %v9701_v1 = vsel %vm1056_vm3, %v1088_v7, %v1090_v42 }
 0x259   : > { %2092 = vrot.lane.b32.xlu0 %v2034_v30, %s8177_s3  ;;  %13582 = vst [vmem:[#allocation174_spill] sm:$0xff] %v9701_v1  ;;  %v9704_v13 = vpop.permute.xlu1 %1519  ;;  %v13584_v30 = vld [vmem:[#allocation90_spill] sm:$0xff]  ;;  %v1547_v14 = vmul.f32 %v9545_v45, %v9701_v1 }
 0x25a   : > { %2713 = vst.msk [vmem:[#allocation2 + $0x98] sm:$0xff] %vm714_vm4, %v2694_v43  ;;  %13583 = vst [vmem:[#allocation175_spill] sm:$0xff] %v9704_v13  ;;  %v2229_v23 = vmul.f32 %v13585_v56, %v13584_v30  ;;  %v9711_v43 = vld [vmem:[%s8334_s2 + $0x90] sm:$0xff]  ;;  %v8056_v45 = vld [vmem:[%s13067_s1 + $0x60] sm:$0xff] }
 0x25b   : > { %v9698_v55 = vpop.permute.xlu0 %1383  ;;  %1365 = vrot.lane.b32.xlu1 %v1322_v52, %s8178_s0  ;;  %v1991_v7 = vrot.slane %v9711_v43, 1  ;;  %v1760_v52 = vmul.f32 %v9560_v51, %v9654_v22  ;;  %v13591_v13 = vld [vmem:[#allocation46_spill] sm:$0xff] }
 0x25c   : > { %13581 = vst [vmem:[#allocation173_spill] sm:$0xff] %v9698_v55  ;;  %8020 = vset.pattern.permute.xlu1 %v13517_v36 }
 0x25d   : > { %1391 = vrot.lane.b32.xlu0 %v1335_v16, %s8178_s0  ;;  %v9720_v16 = vpop.permute.xlu1 %2421 }
 0x25e   : > { %13587 = vst [vmem:[#allocation176_spill] sm:$0xff] %v9720_v16 }
 0x25f   : > { %v9715_v55 = vpop.permute.xlu0 %2290  ;;  %2272 = vrot.lane.b32.xlu1 %v2229_v23, %s8183_s21  ;;  %v9731_v23 = vsel %vm1955_vm2, %v1989_v18, %v1991_v7  ;;  %v9746_v18 = vld [vmem:[%s8334_s2 + $0x20] sm:$0xff] }
 0x260   : > { %13586 = vst [vmem:[#allocation90_spill] sm:$0xff] %v9715_v55  ;;  %13589 = vst [vmem:[#allocation178_spill] sm:$0xff] %v9731_v23  ;;  %v2035_v1 = vmul.f32 %v9731_v23, %v9121_v58  ;;  %v13285_v58 = vrot.slane %v9711_v43, 7 }
 0x261   : > { %1606 = vrot.lane.b32.xlu0 %v1547_v14, %s8179_s4  ;;  %v13590_v14 = vld [vmem:[#allocation95_spill] sm:$0xff]  ;;  %v9737_v32 = vpop.permute.xlu1 %1948 }
 0x262   : > { %v1534_v55 = vmul.f32 %v13591_v13, %v13590_v14  ;;  %13592 = vst [vmem:[#allocation95_spill] sm:$0xff] %v9737_v32  ;;  %v2243_v13 = vmul.f32 %v9614_v8, %v9711_v43  ;;  %v9765_v23 = vsel %vm1056_vm3, %v1090_v42, %v13285_v58  ;;  %v13599_v8 = vld [vmem:[#allocation84_spill] sm:$0xff]  ;;  %v13290_v42 = vrot.slane %v9449_v62, 2 }
 0x263   : > { %v9724_v56 = vpop.permute.xlu0 %1588  ;;  %814 = vperm.xlu1 %8020, %v8056_v45   ;;  %v8057_v45 = vld [vmem:[%s8334_s2] sm:$0xff]  ;;  %13598 = vst [vmem:[#allocation182_spill] sm:$0xff] %v9765_v23  ;;  %v13289_v58 = vrot.slane %v9654_v22, 2 }
 0x264   : > { %13588 = vst [vmem:[#allocation177_spill] sm:$0xff] %v9724_v56  ;;  %v877_v56 = vrot.slane %v8057_v45, 6  ;;  %v13597_v45 = vld [vmem:[#allocation53_spill] sm:$0xff] }
 0x265   : > { %1819 = vrot.lane.b32.xlu0 %v1760_v52, %s8175_s22  ;;  %v13594_v52 = vld [vmem:[#allocation31_spill] sm:$0xff] }
 0x266   : > { %v1747_v14 = vmul.f32 %v9746_v18, %v13594_v52  ;;  %v1125_v52 = vmul.f32 %v9336_v44, %v13597_v45  ;;  %v13288_v44 = vrot.slane %v9553_v50, 2  ;;  %v9779_v45 = vld [vmem:[%s8334_s2 + $0x98] sm:$0xff] }
 0x267   : > { %v9739_v51 = vpop.permute.xlu0 %2482  ;;  %1580 = vrot.lane.b32.xlu1 %v1534_v55, %s8179_s4  ;;  %v9755_v55 = vpop.permute.xlu1 %759 }
 0x268   : > { %13593 = vst [vmem:[#allocation179_spill] sm:$0xff] %v9739_v51  ;;  %8021 = vset.pattern.permute.xlu1 %v13514_v26  ;;  %13596 = vst [vmem:[#allocation181_spill] sm:$0xff] %v9755_v55 }
 0x269   : > { %2094 = vrot.lane.b32.xlu0 %v2035_v1, %s8177_s3  ;;  %v934_v1 = vmul.f32 %v877_v56, %v9755_v55 }
 0x26b   : > { %v9753_v51 = vpop.permute.xlu0 %1801  ;;  %1793 = vrot.lane.b32.xlu1 %v1747_v14, %s8175_s22  ;;  %955 = vst.msk [vmem:[#allocation2 + $0x10] sm:$0xfc] %vm954_vm6, %v934_v1  ;;  %v9774_v14 = vld [vmem:[%s8334_s2 + $0x8] sm:$0xff]  ;;  %v9781_v55 = vpop.permute.xlu1 %2425  ;;  %v1993_v1 = vrot.slane %v9779_v45, 1 }
 0x26c   : > { %13595 = vst [vmem:[#allocation180_spill] sm:$0xff] %v9753_v51  ;;  %v1548_v51 = vmul.f32 %v13599_v8, %v9765_v23  ;;  %13600 = vst [vmem:[#allocation183_spill] sm:$0xff] %v9781_v55  ;;  %v13293_v59 = vrot.slane %v9774_v14, 6 }
 0x26d   : > { %2300 = vrot.lane.b32.xlu0 %v2243_v13, %s8183_s21  ;;  %v2627_v13 = vrot.slane %v9774_v14, 2 }
 0x26f   : > { %v9769_v3 = vpop.permute.xlu0 %1172  ;;  %1174 = vrot.lane.b32.xlu1 %v1125_v52, %s8182_s6  ;;  %v1761_v52 = vmul.f32 %v9646_v57, %v9711_v43  ;;  %v2629_v23 = vsel %vm2626_vm5, %v2627_v13, %v13288_v44  ;;  %v13602_v57 = vld [vmem:[#allocation56_spill] sm:$0xff] }
 0x270   : > { %v1323_v9 = vmul.f32 %v9746_v18, %v13602_v57 }
 0x271   : > { %1608 = vrot.lane.b32.xlu0 %v1548_v51, %s8179_s4  ;;  %v2659_v51 = vsel %vm2626_vm5, %v13290_v42, %v13289_v58  ;;  %v9817_v42 = vld [vmem:[%s8334_s2 + $0xa0] sm:$0x3] }
 0x272   : > { %v9828_v57 = vrot.slane %v9817_v42, 1 }
 0x273   : > { %v9789_v8 = vpop.permute.xlu0 %2076  ;;  %2575 = vperm.xlu1 %8021, %v9577_v28   ;;  %v9807_v28 = vpop.permute.xlu1 %2551 }
 0x274   : > { %13601 = vst [vmem:[#allocation184_spill] sm:$0xff] %v9789_v8  ;;  %v9805_v8 = vsel %vm1955_vm2, %v1991_v7, %v1993_v1  ;;  %13604 = vst [vmem:[#allocation186_spill] sm:$0xff] %v9807_v28  ;;  %v879_v7 = vsel %vm876_vm7, %v877_v56, %v13293_v59  ;;  %v2744_v59 = vld [vmem:[#allocation2 + $0xa8] sm:$0xff] }
 0x275   : > { %1821 = vrot.lane.b32.xlu0 %v1761_v52, %s8175_s22  ;;  %13603 = vst [vmem:[#allocation185_spill] sm:$0xff] %v9805_v8  ;;  %v2036_v13 = vmul.f32 %v9805_v8, %v9663_v19  ;;  %v2685_v52 = vmul.f32 %v2629_v23, %v9807_v28  ;;  %v13606_v23 = vld [vmem:[#allocation58_spill] sm:$0xff]  ;;  %v9841_v28 = vld [vmem:[#allocation2 + $0xb8] sm:$0xff]  ;;  %7025 = vmatprep.mubr.msk.f32.mxu1 %vm714_vm4, %v2744_v59 }
 0x276   : > { %v1328_v19 = vmul.f32 %v13606_v23, %v9064_v27  ;;  %v9843_v27 = vld [vmem:[#allocation2 + $0xc8] sm:$0xff]  ;;  %v1996_v23 = vsel %vm1955_vm2, %v1993_v1, %v9828_v57  ;;  %v9860_v1 = vld [vmem:[#allocation2 + $0x98] sm:$0xff] }
 0x277   : > { %v9812_v44 = vpop.permute.xlu0 %2611  ;;  %1367 = vrot.lane.b32.xlu1 %v1323_v9, %s8178_s0  ;;  %2704 = vst.msk [vmem:[#allocation2 + $0x8] sm:$0xff] %vm714_vm4, %v2685_v52  ;;  %v13607_v9 = vld [vmem:[#allocation57_spill] sm:$0xff]  ;;  %v9834_v52 = vld [vmem:[%s8334_s2 + $0x28] sm:$0xff]  ;;  %13611 = vst [vmem:[#allocation191_spill] sm:$0xff] %v9860_v1 }
 0x278   : > { %13605 = vst [vmem:[#allocation187_spill] sm:$0xff] %v9812_v44  ;;  %v2700_v58 = vmul.f32 %v2659_v51, %v9812_v44  ;;  %8022 = vset.pattern.permute.xlu1 %v13517_v36  ;;  %v2244_v51 = vmul.f32 %v13607_v9, %v9779_v45  ;;  %v9837_v44 = vpop.permute.xlu1 %764  ;;  %v9850_v9 = vld [vmem:[#allocation2] sm:$0xff]  ;;  %v13612_v59 = vrot.slane %v9834_v52, 7 }
 0x279   : > { %2096 = vrot.lane.b32.xlu0 %v2036_v13, %s8177_s3  ;;  %13608 = vst [vmem:[#allocation188_spill] sm:$0xff] %v9837_v44  ;;  %3996 = vst.msk [vmem:[#allocation2 + $0xa8] sm:$0xff] %vm714_vm4, %v9850_v9  ;;  %v9858_v13 = vld [vmem:[#allocation2 + $0xd8] sm:$0xff] }
 0x27a   : > { %2719 = vst.msk [vmem:[#allocation2 + $0xf8] sm:$0xff] %vm714_vm4, %v2700_v58  ;;  %v935_v58 = vmul.f32 %v879_v7, %v9837_v44  ;;  %3998 = vst.msk [vmem:[#allocation2 + $0xb8] sm:$0xff] %vm714_vm4, %v9850_v9  ;;  %v2446_v44 = vmul.f32 %v9720_v16, %v1996_v23  ;;  %v2037_v16 = vmul.f32 %v1996_v23, %v9737_v32  ;;  %v13622_v23 = vrot.slane %v9553_v50, 2  ;;  %v13623_v32 = vld [vmem:[#allocation64_spill] sm:$0xff] }
 0x27b   : > { %v9839_v56 = vpop.permute.xlu0 %1385  ;;  %1377 = vrot.lane.b32.xlu1 %v1328_v19, %s8178_s0  ;;  %4000 = vst.msk [vmem:[#allocation2 + $0xc8] sm:$0xff] %vm714_vm4, %v9850_v9  ;;  %13610 = vst [vmem:[#allocation190_spill] sm:$0xff] %v9858_v13  ;;  %v13613_v19 = vrot.slane %v13584_v30, 7 }
 0x27c   : > { %13609 = vst [vmem:[#allocation189_spill] sm:$0xff] %v9839_v56  ;;  %4002 = vst.msk [vmem:[#allocation2 + $0xd8] sm:$0xff] %vm714_vm4, %v9850_v9 }
 0x27d   : > { %2302 = vrot.lane.b32.xlu0 %v2244_v51, %s8183_s21  ;;  %3994 = vst.msk [vmem:[#allocation2 + $0x98] sm:$0xff] %vm714_vm4, %v9850_v9  ;;  %956 = vst.msk [vmem:[#allocation2 + $0x20] sm:$0xff] %vm714_vm4, %v935_v58  ;;  %v1067_v7 = vsel %vm1056_vm3, %v13613_v19, %v13612_v59  ;;  %v9876_v1 = vpop.permute.xlu1 %1316  ;;  %v9881_v51 = vld [vmem:[%s13067_s1 + $0x40] sm:$0xff]  ;;  %v13617_v59 = vld [vmem:[#allocation60_spill] sm:$0xff] }
 0x27e   : > { %13615 = vst [vmem:[#allocation193_spill] sm:$0xff] %v9876_v1  ;;  %v2724_v58 = vld [vmem:[#allocation2 + $0x8] sm:$0xff]  ;;  %v1535_v19 = vmul.f32 %v13617_v59, %v1067_v7  ;;  %756 = vst.msk [vmem:[#allocation2 + $0x148] sm:$0x3] %vm755_vm1, %v9850_v9 }
 0x27f   : > { %v9874_v22 = vpop.permute.xlu0 %2292  ;;  %794 = vperm.xlu1 %8022, %v9881_v51   ;;  %7015 = vmatprep.mubr.msk.f32.mxu0 %vm714_vm4, %v2724_v58  ;;  %3976 = vst.msk [vmem:[#allocation2 + $0x8] sm:$0xff] %vm714_vm4, %v9850_v9  ;;  %v2630_v58 = vrot.slane %v9690_v5, 2 }
 0x280   : > { %13614 = vst [vmem:[#allocation192_spill] sm:$0xff] %v9874_v22 }
 0x281   : > { %2504 = vrot.lane.b32.xlu0 %v2446_v44, %s8181_s5  ;;  %v9888_v30 = vld [vmem:[#allocation2 + $0xf8] sm:$0xff]  ;;  %v13620_v44 = vld [vmem:[#allocation62_spill] sm:$0xff] }
 0x282   : > { %13616 = vst [vmem:[#allocation194_spill] sm:$0xff] %v9888_v30  ;;  %4006 = vst.msk [vmem:[#allocation2 + $0xf8] sm:$0xff] %vm714_vm4, %v9850_v9  ;;  %v9898_v13 = vpop.permute.xlu1 %1740  ;;  %v1540_v59 = vmul.f32 %v13620_v44, %v9084_v4  ;;  %v2447_v30 = vmul.f32 %v9781_v55, %v9828_v57  ;;  %v1338_v4 = vmul.f32 %v9876_v1, %v9779_v45 }
 0x283   : > { %v9894_v22 = vpop.permute.xlu0 %1590  ;;  %1582 = vrot.lane.b32.xlu1 %v1535_v19, %s8179_s4  ;;  %13619 = vst [vmem:[#allocation196_spill] sm:$0xff] %v9898_v13  ;;  %v2631_v19 = vsel %vm2626_vm5, %v13622_v23, %v2630_v58  ;;  %v13627_v23 = vld [vmem:[#allocation63_spill] sm:$0xff]  ;;  %v1763_v1 = vmul.f32 %v9898_v13, %v9817_v42 }
 0x284   : > { %13618 = vst [vmem:[#allocation195_spill] sm:$0xff] %v9894_v22  ;;  %8023 = vset.pattern.permute.xlu1 %v13514_v26  ;;  %v1748_v22 = vmul.f32 %v9834_v52, %v13623_v32  ;;  %v1121_v32 = vmul.f32 %v1067_v7, %v13627_v23 }
 0x285   : > { %2098 = vrot.lane.b32.xlu0 %v2037_v16, %s8177_s3  ;;  %v13303_v16 = vrot.slane %v9553_v50, 6 }
 0x287   : > { %v9906_v56 = vpop.permute.xlu0 %2484  ;;  %1592 = vrot.lane.b32.xlu1 %v1540_v59, %s8179_s4  ;;  %v9916_v8 = vpop.permute.xlu1 %2555 }
 0x288   : > { %13621 = vst [vmem:[#allocation197_spill] sm:$0xff] %v9906_v56  ;;  %13624 = vst [vmem:[#allocation198_spill] sm:$0xff] %v9916_v8  ;;  %v2686_v55 = vmul.f32 %v2631_v19, %v9916_v8 }
 0x289   : > { %2506 = vrot.lane.b32.xlu0 %v2447_v30, %s8181_s5  ;;  %v13626_v30 = vrot.slane %v9774_v14, 6  ;;  %v13630_v14 = vld [vmem:[#allocation101_spill] sm:$0xff] }
 0x28a   : > { %2705 = vst.msk [vmem:[#allocation2 + $0x18] sm:$0xff] %vm714_vm4, %v2686_v55  ;;  %v13629_v55 = vld [vmem:[#allocation70_spill] sm:$0xff] }
 0x28b   : > { %v9921_v44 = vpop.permute.xlu0 %1803  ;;  %1795 = vrot.lane.b32.xlu1 %v1748_v22, %s8175_s22  ;;  %v881_v59 = vsel %vm876_vm7, %v13626_v30, %v13303_v16 }
 0x28c   : > { %13625 = vst [vmem:[#allocation199_spill] sm:$0xff] %v9921_v44 }
 0x28d   : > { %1397 = vrot.lane.b32.xlu0 %v1338_v4, %s8178_s0  ;;  %v2023_v4 = vmul.f32 %v13630_v14, %v13629_v55  ;;  %v13632_v14 = vld [vmem:[#allocation73_spill] sm:$0xff] }
 0x28e   : > { %v9934_v19 = vpop.permute.xlu1 %769 }
 0x28f   : > { %13628 = vst [vmem:[#allocation200_spill] sm:$0xff] %v9934_v19  ;;  %v9936_v8 = vpop.permute.xlu0 %1184  ;;  %v936_v22 = vmul.f32 %v881_v59, %v9934_v19  ;;  %1166 = vrot.lane.b32.xlu1 %v1121_v32, %s8182_s6  ;;  %v2632_v32 = vrot.slane %v9746_v18, 2 }
 0x291   : > { %1825 = vrot.lane.b32.xlu0 %v1763_v1, %s8175_s22  ;;  %957 = vst.msk [vmem:[#allocation2 + $0x30] sm:$0xff] %vm714_vm4, %v936_v22  ;;  %v9948_v59 = vld [vmem:[#allocation2 + $0x18] sm:$0xff] }
 0x292   : > { %v1573_v30 = vpop.permute.xlu1 %1572  ;;  %3978 = vst.msk [vmem:[#allocation2 + $0x18] sm:$0xff] %vm714_vm4, %v9850_v9 }
 0x293   : > { %v9944_v7 = vpop.permute.xlu0 %2088  ;;  %1636 = vst.msk [vmem:[#allocation2] sm:$0xfe] %vm1635_vm8, %v1573_v30  ;;  %2070 = vrot.lane.b32.xlu1 %v2023_v4, %s8177_s3  ;;  %v1324_v4 = vmul.f32 %v9834_v52, %v13632_v14 }
 0x294   : > { %13631 = vst [vmem:[#allocation101_spill] sm:$0xff] %v9944_v7  ;;  %1849 = vst.msk [vmem:[#allocation2] sm:$0xff] %vm1848_vm9, %v9143_v38  ;;  %v2633_v38 = vsel %vm2626_vm5, %v2630_v58, %v2632_v32  ;;  %v13635_v58 = vld [vmem:[#allocation74_spill] sm:$0xff] }
 0x295   : > { %2124 = vst.msk [vmem:[#allocation2] sm:$0xff] %vm13325_vm10, %v9156_v39 }
 0x296   : > { %v1157_v22 = vpop.permute.xlu1 %1156 }
 0x297   : > { %v9957_v1 = vpop.permute.xlu0 %1387  ;;  %1217 = vst.msk [vmem:[#allocation2 + $0x10] sm:$0xfe] %vm1216_vm11, %v1157_v22  ;;  %2579 = vperm.xlu1 %8023, %v9591_v2   ;;  %v9974_v2 = vld [vmem:[%s8334_s2 + $0x50] sm:$0xff] }
 0x298   : > { %1420 = vst.msk [vmem:[#allocation2 + $0x10] sm:$0xff] %vm13324_vm12, %v9165_v12  ;;  %v1329_v12 = vmul.f32 %v9974_v2, %v13635_v58 }
 0x29a   : > { %v9968_v39 = vpop.permute.xlu1 %2559 }
 0x29b   : > { %v9966_v30 = vpop.permute.xlu0 %2294  ;;  %13634 = vst [vmem:[#allocation202_spill] sm:$0xff] %v9968_v39  ;;  %v2687_v16 = vmul.f32 %v2633_v38, %v9968_v39  ;;  %1369 = vrot.lane.b32.xlu1 %v1324_v4, %s8178_s0  ;;  %v9984_v38 = vld [vmem:[%s8334_s2 + $0x58] sm:$0xff] }
 0x29c   : > { %13633 = vst [vmem:[#allocation201_spill] sm:$0xff] %v9966_v30  ;;  %8024 = vset.pattern.permute.xlu1 %v13517_v36  ;;  %v13636_v4 = vld [vmem:[#allocation77_spill] sm:$0xff] }
 0x29d   : > { %2706 = vst.msk [vmem:[#allocation2 + $0x28] sm:$0xff] %vm714_vm4, %v2687_v16  ;;  %v2236_v55 = vmul.f32 %v9984_v38, %v13636_v4  ;;  %v13307_v16 = vrot.slane %v9779_v45, 2 }
 0x29e   : > { %v2267_v13 = vpop.permute.xlu1 %2266 }
 0x29f   : > { %v9979_v22 = vpop.permute.xlu0 %1602  ;;  %2327 = vst.msk [vmem:[#allocation2] sm:$0xff] %vm13322_vm13, %v2267_v13  ;;  %1379 = vrot.lane.b32.xlu1 %v1329_v12, %s8178_s0  ;;  %v10013_v13 = vld [vmem:[%s13067_s1 + $0x70] sm:$0xff] }
 0x2a2   : > { %v1575_v14 = vpop.permute.xlu1 %1574 }
 0x2a3   : > { %v9988_v23 = vpop.permute.xlu0 %2496  ;;  %1638 = vst.msk [vmem:[#allocation2 + $0x10] sm:$0xff] %vm13323_vm14, %v1575_v14  ;;  %2286 = vrot.lane.b32.xlu1 %v2236_v55, %s8183_s21  ;;  %v13638_v14 = vrot.slane %v9029_v10, 7  ;;  %v13639_v55 = vrot.slane %v9834_v52, 7 }
 0x2a4   : > { %13637 = vst [vmem:[#allocation203_spill] sm:$0xff] %v9988_v23  ;;  %1850 = vst.msk [vmem:[#allocation2 + $0x10] sm:$0xff] %vm1848_vm9, %v9185_v21  ;;  %v9996_v12 = vld [vmem:[#allocation2 + $0x28] sm:$0xff]  ;;  %v13643_v23 = vrot.slane %v9029_v10, 1 }
 0x2a5   : > { %2125 = vst.msk [vmem:[#allocation2 + $0x10] sm:$0xff] %vm13325_vm10, %v9195_v49  ;;  %v1069_v4 = vsel %vm1056_vm3, %v13639_v55, %v13638_v14  ;;  %v13640_v49 = vrot.slane %v9711_v43, 2  ;;  %v13308_v14 = vrot.slane %v9834_v52, 2  ;;  %v13641_v55 = vld [vmem:[#allocation79_spill] sm:$0xff] }
 0x2a6   : > { %3980 = vst.msk [vmem:[#allocation2 + $0x28] sm:$0xff] %vm714_vm4, %v9850_v9  ;;  %v2469_v58 = vpop.permute.xlu1 %2468  ;;  %v1536_v39 = vmul.f32 %v13641_v55, %v1069_v4 }
 0x2a7   : > { %v10007_v21 = vpop.permute.xlu0 %1186  ;;  %2529 = vst.msk [vmem:[#allocation2] sm:$0xff] %vm13320_vm15, %v2469_v58  ;;  %824 = vperm.xlu1 %8024, %v10013_v13   ;;  %v2663_v19 = vsel %vm2626_vm5, %v13640_v49, %v13307_v16  ;;  %v13642_v58 = vrot.slane %v9168_v37, 1  ;;  %v882_v49 = vrot.slane %v9690_v5, 6  ;;  %v2635_v10 = vsel %vm2626_vm5, %v2632_v32, %v13308_v14  ;;  %v13645_v37 = vld [vmem:[#allocation81_spill] sm:$0xff] }
 0x2a9   : > { %v1970_v30 = vsel %vm1955_vm2, %v13643_v23, %v13642_v58  ;;  %v10071_v58 = vld [vmem:[%s8334_s2 + $0x30] sm:$0xff] }
 0x2aa   : > { %v1159_v7 = vpop.permute.xlu1 %1158  ;;  %v2433_v23 = vmul.f32 %v13645_v37, %v1970_v30 }
 0x2ab   : > { %v10028_v56 = vpop.permute.xlu0 %2619  ;;  %1219 = vst.msk [vmem:[#allocation2 + $0x20] sm:$0xff] %vm13321_vm0, %v1159_v7  ;;  %1584 = vrot.lane.b32.xlu1 %v1536_v39, %s8179_s4  ;;  %v10067_v39 = vld [vmem:[%s8334_s2 + $0x48] sm:$0xff] }
 0x2ac   : > { %13644 = vst [vmem:[#allocation204_spill] sm:$0xff] %v10028_v56  ;;  %v2702_v44 = vmul.f32 %v2663_v19, %v10028_v56  ;;  %1421 = vst.msk [vmem:[#allocation2 + $0x20] sm:$0xff] %vm13324_vm12, %v9215_v24  ;;  %8025 = vset.pattern.permute.xlu1 %v13514_v26  ;;  %v13646_v19 = vrot.slane %v9553_v50, 6  ;;  %v884_v24 = vrot.slane %v9746_v18, 6 }
 0x2ad   : > { %1639 = vst.msk [vmem:[#allocation2 + $0x20] sm:$0xff] %vm13323_vm14, %v9225_v25 }
 0x2ae   : > { %2721 = vst.msk [vmem:[#allocation2 + $0x118] sm:$0xff] %vm714_vm4, %v2702_v44  ;;  %v883_v5 = vsel %vm876_vm7, %v13646_v19, %v882_v49  ;;  %v10050_v7 = vpop.permute.xlu1 %2563  ;;  %v2723_v32 = vld [vmem:[#allocation2] sm:$0xff] }
 0x2af   : > { %1851 = vst.msk [vmem:[#allocation2 + $0x20] sm:$0xff] %vm1848_vm9, %v9235_v54  ;;  %v2688_v25 = vmul.f32 %v2635_v10, %v10050_v7  ;;  %2893 = vmatmul.mubr.f32.vlgmr.msra.gmra.mrb[0].mxu0 %v2723_v32  ;;  %3975 = vst [vmem:[#allocation2] sm:$0xff] %v9850_v9  ;;  %2478 = vrot.lane.b32.xlu1 %v2433_v23, %s8181_s5  ;;  %v10063_v54 = vld [vmem:[%s8334_s2 + $0x40] sm:$0xff]  ;;  %v13647_v10 = vld [vmem:[#allocation32_spill] sm:$0xff]  ;;  %v885_v23 = vsel %vm876_vm7, %v882_v49, %v884_v24 }
 0x2b0   : > { %2126 = vst.msk [vmem:[#allocation2 + $0x20] sm:$0xff] %vm13325_vm10, %v9251_v63  ;;  %v10055_v44 = vpop.permute.xlu0 %774  ;;  %7016 = vmatprep.mubr.msk.f32.mxu0 %vm714_vm4, %v9948_v59  ;;  %v892_v18 = vrot.slane %v10063_v54, 6  ;;  %v13309_v63 = vrot.slane %v10067_v39, 6  ;;  %v1749_v19 = vmul.f32 %v10071_v58, %v13647_v10  ;;  %v13648_v49 = vld [vmem:[#allocation88_spill] sm:$0xff] }
 0x2b1   : > { %v937_v50 = vmul.f32 %v883_v5, %v10055_v44  ;;  %2707 = vst.msk [vmem:[#allocation2 + $0x38] sm:$0xff] %vm714_vm4, %v2688_v25  ;;  %v886_v5 = vrot.slane %v9834_v52, 6  ;;  %v1122_v37 = vmul.f32 %v1069_v4, %v13648_v49  ;;  %v13310_v4 = vrot.slane %v10071_v58, 6  ;;  %v10155_v49 = vld [vmem:[%s8334_s2 + $0x68] sm:$0xff] }
 0x2b2   : > { %v2269_v59 = vpop.permute.xlu1 %2268  ;;  %v895_v14 = vsel %vm876_vm7, %v892_v18, %v13309_v63  ;;  %v13651_v63 = vld [vmem:[#allocation89_spill] sm:$0xff] }
 0x2b3   : > { %958 = vst.msk [vmem:[#allocation2 + $0x40] sm:$0xff] %vm714_vm4, %v937_v50  ;;  %1797 = vrot.lane.b32.xlu1 %v1749_v19, %s8175_s22  ;;  %v887_v55 = vsel %vm876_vm7, %v884_v24, %v886_v5 }
 0x2b4   : > { %2328 = vst.msk [vmem:[#allocation2 + $0x10] sm:$0xff] %vm13322_vm13, %v2269_v59  ;;  %v10080_v32 = vpop.permute.xlu0 %779 }
 0x2b5   : > { %v938_v16 = vmul.f32 %v885_v23, %v10080_v32  ;;  %v10087_v25 = vld [vmem:[#allocation2 + $0x118] sm:$0xff] }
 0x2b6   : > { %4010 = vst.msk [vmem:[#allocation2 + $0x118] sm:$0xff] %vm714_vm4, %v9850_v9  ;;  %v10094_v50 = vpop.permute.xlu1 %804 }
 0x2b7   : > { %959 = vst.msk [vmem:[#allocation2 + $0x50] sm:$0xff] %vm714_vm4, %v938_v16  ;;  %13649 = vst [vmem:[#allocation32_spill] sm:$0xff] %v10094_v50  ;;  %v943_v19 = vmul.f32 %v895_v14, %v10094_v50  ;;  %1168 = vrot.lane.b32.xlu1 %v1122_v37, %s8182_s6  ;;  %v2024_v16 = vmul.f32 %v1970_v30, %v13651_v63  ;;  %v13313_v30 = vrot.slane %v9984_v38, 6  ;;  %v10120_v37 = vld [vmem:[%s8334_s2 + $0x60] sm:$0xff] }
 0x2b8   : > { %1222 = vst.msk [vmem:[#allocation2 + $0x50] sm:$0xff] %vm13321_vm0, %v9348_v35  ;;  %v10099_v23 = vpop.permute.xlu0 %784  ;;  %v10104_v59 = vld [vmem:[#allocation2 + $0x38] sm:$0xff]  ;;  %v889_v35 = vsel %vm876_vm7, %v886_v5, %v13310_v4  ;;  %v13314_v4 = vrot.slane %v10071_v58, 2 }
 0x2b9   : > { %13650 = vst [vmem:[#allocation205_spill] sm:$0xff] %v10099_v23  ;;  %v939_v24 = vmul.f32 %v887_v55, %v10099_v23  ;;  %964 = vst.msk [vmem:[#allocation2 + $0xa0] sm:$0xff] %vm714_vm4, %v943_v19  ;;  %v13312_v19 = vrot.slane %v10120_v37, 6 }
 0x2ba   : > { %3982 = vst.msk [vmem:[#allocation2 + $0x38] sm:$0xff] %vm714_vm4, %v9850_v9  ;;  %v2471_v14 = vpop.permute.xlu1 %2470 }
 0x2bb   : > { %960 = vst.msk [vmem:[#allocation2 + $0x60] sm:$0xff] %vm714_vm4, %v939_v24  ;;  %2072 = vrot.lane.b32.xlu1 %v2024_v16, %s8177_s3  ;;  %v901_v24 = vsel %vm876_vm7, %v13313_v30, %v13312_v19  ;;  %v13654_v19 = vrot.slane %v9834_v52, 2  ;;  %v13655_v16 = vld [vmem:[#allocation10_spill] sm:$0xff] }
 0x2bc   : > { %2530 = vst.msk [vmem:[#allocation2 + $0x10] sm:$0xff] %vm13320_vm15, %v2471_v14  ;;  %v10115_v55 = vpop.permute.xlu0 %789  ;;  %v10131_v14 = vld [vmem:[%s8334_s2 + $0x38] sm:$0xff] }
 0x2bd   : > { %13652 = vst [vmem:[#allocation206_spill] sm:$0xff] %v10115_v55  ;;  %v940_v5 = vmul.f32 %v889_v35, %v10115_v55  ;;  %v2637_v30 = vsel %vm2626_vm5, %v13654_v19, %v13314_v4  ;;  %v13657_v4 = vld [vmem:[#allocation133_spill] sm:$0xff] }
 0x2be   : > { %v1161_v63 = vpop.permute.xlu1 %1160 }
 0x2bf   : > { %961 = vst.msk [vmem:[#allocation2 + $0x70] sm:$0xff] %vm714_vm4, %v940_v5  ;;  %2583 = vperm.xlu1 %8025, %v9881_v51   ;;  %v1325_v5 = vmul.f32 %v10071_v58, %v13655_v16 }
 0x2c0   : > { %1220 = vst.msk [vmem:[#allocation2 + $0x30] sm:$0xff] %vm13321_vm0, %v1161_v63  ;;  %v10136_v50 = vpop.permute.xlu0 %819  ;;  %v13656_v63 = vrot.slane %v10131_v14, 6 }
 0x2c1   : > { %13653 = vst [vmem:[#allocation207_spill] sm:$0xff] %v10136_v50  ;;  %1422 = vst.msk [vmem:[#allocation2 + $0x30] sm:$0xff] %vm13324_vm12, %v9261_v61  ;;  %v946_v35 = vmul.f32 %v901_v24, %v10136_v50  ;;  %v13315_v24 = vrot.slane %v9320_v11, 6 }
 0x2c2   : > { %1640 = vst.msk [vmem:[#allocation2 + $0x30] sm:$0xff] %vm13323_vm14, %v9273_v46  ;;  %v893_v51 = vsel %vm876_vm7, %v13656_v63, %v892_v18  ;;  %v10162_v52 = vpop.permute.xlu1 %2567 }
 0x2c3   : > { %1852 = vst.msk [vmem:[#allocation2 + $0x30] sm:$0xff] %vm1848_vm9, %v9284_v31  ;;  %v2725_v19 = vld [vmem:[#allocation2 + $0x10] sm:$0xff]  ;;  %v2689_v46 = vmul.f32 %v2637_v30, %v10162_v52  ;;  %1371 = vrot.lane.b32.xlu1 %v1325_v5, %s8178_s0  ;;  %v896_v31 = vrot.slane %v9974_v2, 6 }
 0x2c4   : > { %967 = vst.msk [vmem:[#allocation2 + $0xd0] sm:$0xff] %vm714_vm4, %v946_v35  ;;  %v10167_v18 = vpop.permute.xlu0 %799  ;;  %2898 = vmatmul.mubr.f32.gmra.mrb[2].mxu0 %v2725_v19  ;;  %3977 = vst [vmem:[#allocation2 + $0x10] sm:$0xff] %v9850_v9  ;;  %v13659_v35 = vld [vmem:[#allocation92_spill] sm:$0xff]  ;;  %v13662_v19 = vrot.slane %v10067_v39, 6 }
 0x2c5   : > { %2127 = vst.msk [vmem:[#allocation2 + $0x30] sm:$0xff] %vm13325_vm10, %v13657_v4  ;;  %13658 = vst [vmem:[#allocation133_spill] sm:$0xff] %v10167_v18  ;;  %v942_v63 = vmul.f32 %v893_v51, %v10167_v18  ;;  %7017 = vmatprep.mubr.msk.f32.mxu0 %vm714_vm4, %v9996_v12  ;;  %v1330_v61 = vmul.f32 %v9984_v38, %v13659_v35  ;;  %v13660_v4 = vrot.slane %v10155_v49, 6  ;;  %v13663_v35 = vld [vmem:[#allocation49_spill] sm:$0xff] }
 0x2c6   : > { %2708 = vst.msk [vmem:[#allocation2 + $0x48] sm:$0xff] %vm714_vm4, %v2689_v46  ;;  %v2271_v5 = vpop.permute.xlu1 %2270  ;;  %v897_v46 = vsel %vm876_vm7, %v13662_v19, %v896_v31  ;;  %v13666_v19 = vld [vmem:[#allocation94_spill] sm:$0xff] }
 0x2c7   : > { %v905_v30 = vsel %vm876_vm7, %v13660_v4, %v13315_v24  ;;  %963 = vst.msk [vmem:[#allocation2 + $0x90] sm:$0xff] %vm714_vm4, %v942_v63  ;;  %1381 = vrot.lane.b32.xlu1 %v1330_v61, %s8178_s0  ;;  %v2237_v4 = vmul.f32 %v10120_v37, %v13663_v35  ;;  %v13317_v63 = vrot.slane %v10120_v37, 7 }
 0x2c8   : > { %1226 = vst.msk [vmem:[#allocation2 + $0x90] sm:$0xff] %vm13321_vm0, %v9769_v3  ;;  %v10187_v12 = vpop.permute.xlu0 %829 }
 0x2c9   : > { %2329 = vst.msk [vmem:[#allocation2 + $0x20] sm:$0xff] %vm13322_vm13, %v2271_v5  ;;  %13661 = vst [vmem:[#allocation208_spill] sm:$0xff] %v10187_v12  ;;  %v948_v51 = vmul.f32 %v905_v30, %v10187_v12  ;;  %v13665_v5 = vld [vmem:[#allocation123_spill] sm:$0xff] }
 0x2ca   : > { %v10198_v3 = vpop.permute.xlu1 %809  ;;  %v1537_v24 = vmul.f32 %v13666_v19, %v13665_v5  ;;  %v13669_v5 = vld [vmem:[#allocation112_spill] sm:$0xff] }
 0x2cb   : > { %969 = vst.msk [vmem:[#allocation2 + $0xf0] sm:$0xff] %vm714_vm4, %v948_v51  ;;  %13664 = vst [vmem:[#allocation209_spill] sm:$0xff] %v10198_v3  ;;  %v944_v61 = vmul.f32 %v897_v46, %v10198_v3  ;;  %2288 = vrot.lane.b32.xlu1 %v2237_v4, %s8183_s21  ;;  %v13667_v51 = vrot.slane %v9076_v15, 7  ;;  %v13668_v4 = vld [vmem:[#allocation96_spill] sm:$0xff]  ;;  %v13670_v35 = vrot.slane %v13669_v5, 1  ;;  %v13674_v5 = vld [vmem:[#allocation105_spill] sm:$0xff] }
 0x2cc   : > { %1232 = vst.msk [vmem:[#allocation2 + $0xf0] sm:$0xff] %vm13321_vm0, %v9936_v8  ;;  %v13319_v8 = vrot.slane %v10155_v49, 1 }
 0x2cd   : > { %1434 = vst.msk [vmem:[#allocation2 + $0xf0] sm:$0xff] %vm13324_vm12, %v9957_v1  ;;  %v2732_v30 = vld [vmem:[#allocation2 + $0x48] sm:$0xff]  ;;  %v1081_v1 = vsel %vm1056_vm3, %v13667_v51, %v13317_v63 }
 0x2ce   : > { %965 = vst.msk [vmem:[#allocation2 + $0xb0] sm:$0xff] %vm714_vm4, %v944_v61  ;;  %3984 = vst.msk [vmem:[#allocation2 + $0x48] sm:$0xff] %vm714_vm4, %v9850_v9  ;;  %v2473_v46 = vpop.permute.xlu1 %2472  ;;  %v1542_v61 = vmul.f32 %v13668_v4, %v1081_v1  ;;  %v1982_v15 = vsel %vm1955_vm2, %v13670_v35, %v13319_v8  ;;  %v13673_v35 = vld [vmem:[#allocation34_spill] sm:$0xff]  ;;  %v13677_v8 = vld [vmem:[#allocation107_spill] sm:$0xff] }
 0x2cf   : > { %1652 = vst.msk [vmem:[#allocation2 + $0xf0] sm:$0xff] %vm13323_vm14, %v9979_v22  ;;  %1586 = vrot.lane.b32.xlu1 %v1537_v24, %s8179_s4  ;;  %v2638_v22 = vrot.slane %v10131_v14, 2  ;;  %v13672_v24 = vld [vmem:[#allocation98_spill] sm:$0xff] }
 0x2d0   : > { %1228 = vst.msk [vmem:[#allocation2 + $0xb0] sm:$0xff] %vm13321_vm0, %v9457_v0  ;;  %v13671_v0 = vrot.slane %v10071_v58, 2 }
 0x2d1   : > { %2531 = vst.msk [vmem:[#allocation2 + $0x20] sm:$0xff] %vm13320_vm15, %v2473_v46  ;;  %v2439_v46 = vmul.f32 %v13672_v24, %v1982_v15  ;;  %v2030_v24 = vmul.f32 %v1982_v15, %v13677_v8  ;;  %v13679_v15 = vld [vmem:[#allocation109_spill] sm:$0xff] }
 0x2d2   : > { %v1163_v12 = vpop.permute.xlu1 %1162  ;;  %v2639_v51 = vsel %vm2626_vm5, %v13671_v0, %v2638_v22  ;;  %v1128_v0 = vmul.f32 %v1081_v1, %v13674_v5 }
 0x2d3   : > { %1221 = vst.msk [vmem:[#allocation2 + $0x40] sm:$0xff] %vm13321_vm0, %v1163_v12  ;;  %1596 = vrot.lane.b32.xlu1 %v1542_v61, %s8179_s4  ;;  %v1755_v12 = vmul.f32 %v10120_v37, %v13673_v35 }
 0x2d6   : > { %v10236_v63 = vpop.permute.xlu1 %2571 }
 0x2d7   : > { %v2690_v50 = vmul.f32 %v2639_v51, %v10236_v63  ;;  %2490 = vrot.lane.b32.xlu1 %v2439_v46, %s8181_s5 }
 0x2d8   : > { %v2727_v4 = vld [vmem:[#allocation2 + $0x20] sm:$0xff] }
 0x2d9   : > { %2903 = vmatmul.mubr.f32.gmra.mrb[4].mxu0 %v2727_v4  ;;  %3979 = vst [vmem:[#allocation2 + $0x20] sm:$0xff] %v9850_v9  ;;  %2709 = vst.msk [vmem:[#allocation2 + $0x58] sm:$0xff] %vm714_vm4, %v2690_v50  ;;  %v13675_v4 = vld [vmem:[#allocation137_spill] sm:$0xff] }
 0x2da   : > { %7018 = vmatprep.mubr.msk.f32.mxu0 %vm714_vm4, %v10104_v59  ;;  %v1366_v61 = vpop.permute.xlu1 %1365  ;;  %v13676_v59 = vrot.slane %v9984_v38, 6 }
 0x2db   : > { %1423 = vst.msk [vmem:[#allocation2 + $0x40] sm:$0xff] %vm13324_vm12, %v1366_v61  ;;  %1809 = vrot.lane.b32.xlu1 %v1755_v12, %s8175_s22  ;;  %v1326_v61 = vmul.f32 %v10131_v14, %v13679_v15 }
 0x2dc   : > { %v899_v46 = vsel %vm876_vm7, %v896_v31, %v13676_v59  ;;  %v13682_v59 = vrot.slane %v9241_v29, 7 }
 0x2de   : > { %v2273_v51 = vpop.permute.xlu1 %2272 }
 0x2df   : > { %2330 = vst.msk [vmem:[#allocation2 + $0x30] sm:$0xff] %vm13322_vm13, %v2273_v51  ;;  %1180 = vrot.lane.b32.xlu1 %v1128_v0, %s8182_s6  ;;  %v13681_v0 = vld [vmem:[#allocation111_spill] sm:$0xff] }
 0x2e0   : > { %2532 = vst.msk [vmem:[#allocation2 + $0x30] sm:$0xff] %vm13320_vm15, %v13675_v4  ;;  %v2734_v50 = vld [vmem:[#allocation2 + $0x58] sm:$0xff]  ;;  %v2233_v51 = vmul.f32 %v10063_v54, %v13681_v0 }
 0x2e1   : > { %3986 = vst.msk [vmem:[#allocation2 + $0x58] sm:$0xff] %vm714_vm4, %v9850_v9 }
 0x2e2   : > { %v10259_v12 = vpop.permute.xlu1 %814 }
 0x2e3   : > { %13678 = vst [vmem:[#allocation123_spill] sm:$0xff] %v10259_v12  ;;  %v945_v1 = vmul.f32 %v899_v46, %v10259_v12  ;;  %2084 = vrot.lane.b32.xlu1 %v2030_v24, %s8177_s3  ;;  %v13683_v46 = vrot.slane %v10120_v37, 7 }
 0x2e5   : > { %966 = vst.msk [vmem:[#allocation2 + $0xc0] sm:$0xff] %vm714_vm4, %v945_v1  ;;  %v1083_v1 = vsel %vm1056_vm3, %v13683_v46, %v13682_v59  ;;  %v13688_v46 = vrot.slane %v10131_v14, 6 }
 0x2e6   : > { %1229 = vst.msk [vmem:[#allocation2 + $0xc0] sm:$0xff] %vm13321_vm0, %v9569_v40  ;;  %v1581_v38 = vpop.permute.xlu1 %1580  ;;  %v13680_v40 = vld [vmem:[#allocation140_spill] sm:$0xff] }
 0x2e7   : > { %1641 = vst.msk [vmem:[#allocation2 + $0x40] sm:$0xff] %vm13323_vm14, %v1581_v38  ;;  %2607 = vperm.xlu1 %8025, %v10013_v13   ;;  %v2729_v31 = vld [vmem:[#allocation2 + $0x30] sm:$0xff]  ;;  %v2640_v13 = vrot.slane %v10063_v54, 2 }
 0x2e8   : > { %2908 = vmatmul.mubr.f32.gmra.mrb[6].mxu0 %v2729_v31  ;;  %3981 = vst [vmem:[#allocation2 + $0x30] sm:$0xff] %v9850_v9  ;;  %v13684_v31 = vld [vmem:[#allocation116_spill] sm:$0xff] }
 0x2e9   : > { %7019 = vmatprep.mubr.msk.f32.mxu0 %vm714_vm4, %v2732_v30  ;;  %v2641_v4 = vsel %vm2626_vm5, %v2638_v22, %v2640_v13  ;;  %v13685_v22 = vrot.slane %v9320_v11, 1 }
 0x2ea   : > { %v1794_v24 = vpop.permute.xlu1 %1793 }
 0x2eb   : > { %1853 = vst.msk [vmem:[#allocation2 + $0x40] sm:$0xff] %vm1848_vm9, %v1794_v24  ;;  %1373 = vrot.lane.b32.xlu1 %v1326_v61, %s8178_s0  ;;  %v1543_v61 = vmul.f32 %v13684_v31, %v1083_v1  ;;  %v13686_v24 = vrot.slane %v10155_v49, 1 }
 0x2ec   : > { %2128 = vst.msk [vmem:[#allocation2 + $0x40] sm:$0xff] %vm13325_vm10, %v13680_v40  ;;  %8026 = vset.pattern.permute.xlu1 %v13517_v36 }
 0x2ed   : > { %2331 = vst.msk [vmem:[#allocation2 + $0x40] sm:$0xff] %vm13322_vm13, %v9401_v53  ;;  %v1984_v40 = vsel %vm1955_vm2, %v13686_v24, %v13685_v22  ;;  %v13690_v24 = vld [vmem:[#allocation119_spill] sm:$0xff] }
 0x2ee   : > { %2533 = vst.msk [vmem:[#allocation2 + $0x40] sm:$0xff] %vm13320_vm15, %v9427_v33  ;;  %v1175_v30 = vpop.permute.xlu1 %1174  ;;  %v10298_v33 = vld [vmem:[%s13067_s1 + $0x80] sm:$0xff] }
 0x2ef   : > { %1227 = vst.msk [vmem:[#allocation2 + $0xa0] sm:$0xff] %vm13321_vm0, %v1175_v30  ;;  %2280 = vrot.lane.b32.xlu1 %v2233_v51, %s8183_s21  ;;  %v13687_v30 = vld [vmem:[#allocation21_spill] sm:$0xff] }
 0x2f2   : > { %v10292_v38 = vpop.permute.xlu1 %2575 }
 0x2f3   : > { %v2691_v53 = vmul.f32 %v2641_v4, %v10292_v38  ;;  %834 = vperm.xlu1 %8026, %v10298_v33   ;;  %v2440_v4 = vmul.f32 %v13687_v30, %v1984_v40 }
 0x2f5   : > { %2710 = vst.msk [vmem:[#allocation2 + $0x68] sm:$0xff] %vm714_vm4, %v2691_v53  ;;  %v2731_v29 = vld [vmem:[#allocation2 + $0x40] sm:$0xff]  ;;  %v13689_v53 = vrot.slane %v10071_v58, 6 }
 0x2f6   : > { %v1368_v51 = vpop.permute.xlu1 %1367  ;;  %2913 = vmatmul.mubr.f32.gmra.mrb[8].mxu0 %v2731_v29  ;;  %3983 = vst [vmem:[#allocation2 + $0x40] sm:$0xff] %v9850_v9 }
 0x2f7   : > { %1424 = vst.msk [vmem:[#allocation2 + $0x50] sm:$0xff] %vm13324_vm12, %v1368_v51  ;;  %1598 = vrot.lane.b32.xlu1 %v1543_v61, %s8179_s4  ;;  %7020 = vmatprep.mubr.msk.f32.mxu0 %vm714_vm4, %v2734_v50  ;;  %v891_v29 = vsel %vm876_vm7, %v13689_v53, %v13688_v46  ;;  %v1756_v61 = vmul.f32 %v10155_v49, %v13690_v24 }
 0x2fa   : > { %v1378_v59 = vpop.permute.xlu1 %1377 }
 0x2fb   : > { %1429 = vst.msk [vmem:[#allocation2 + $0xa0] sm:$0xff] %vm13324_vm12, %v1378_v59  ;;  %2492 = vrot.lane.b32.xlu1 %v2440_v4, %s8181_s5  ;;  %v13692_v4 = vld [vmem:[#allocation120_spill] sm:$0xff]  ;;  %v13693_v59 = vld [vmem:[#allocation106_spill] sm:$0xff] }
 0x2fc   : > { %v10320_v22 = vld [vmem:[#allocation2 + $0x68] sm:$0xff]  ;;  %v1129_v14 = vmul.f32 %v1083_v1, %v13692_v4  ;;  %v2031_v46 = vmul.f32 %v1984_v40, %v13693_v59  ;;  %v13694_v1 = vld [vmem:[#allocation122_spill] sm:$0xff] }
 0x2fd   : > { %3988 = vst.msk [vmem:[#allocation2 + $0x68] sm:$0xff] %vm714_vm4, %v9850_v9  ;;  %v13695_v40 = vld [vmem:[#allocation51_spill] sm:$0xff] }
 0x2fe   : > { %v10326_v50 = vpop.permute.xlu1 %794 }
 0x2ff   : > { %13691 = vst [vmem:[#allocation112_spill] sm:$0xff] %v10326_v50  ;;  %v941_v51 = vmul.f32 %v891_v29, %v10326_v50  ;;  %1811 = vrot.lane.b32.xlu1 %v1756_v61, %s8175_s22  ;;  %v1327_v29 = vmul.f32 %v10063_v54, %v13694_v1  ;;  %v2234_v61 = vmul.f32 %v10067_v39, %v13695_v40 }
 0x301   : > { %962 = vst.msk [vmem:[#allocation2 + $0x80] sm:$0xff] %vm714_vm4, %v941_v51 }
 0x302   : > { %1225 = vst.msk [vmem:[#allocation2 + $0x80] sm:$0xff] %vm13321_vm0, %v9650_v6  ;;  %v1583_v58 = vpop.permute.xlu1 %1582 }
 0x303   : > { %1642 = vst.msk [vmem:[#allocation2 + $0x50] sm:$0xff] %vm13323_vm14, %v1583_v58  ;;  %1182 = vrot.lane.b32.xlu1 %v1129_v14, %s8182_s6  ;;  %v13696_v14 = vld [vmem:[#allocation82_spill] sm:$0xff] }
 0x304   : > { %v1544_v58 = vmul.f32 %v13696_v14, %v9379_v34  ;;  %v13698_v34 = vld [vmem:[#allocation129_spill] sm:$0xff] }
 0x306   : > { %v1593_v53 = vpop.permute.xlu1 %1592 }
 0x307   : > { %1647 = vst.msk [vmem:[#allocation2 + $0xa0] sm:$0xff] %vm13323_vm14, %v1593_v53  ;;  %2086 = vrot.lane.b32.xlu1 %v2031_v46, %s8177_s3 }
 0x308   : > { %1859 = vst.msk [vmem:[#allocation2 + $0xa0] sm:$0xff] %vm1848_vm9, %v9442_v20  ;;  %v2642_v20 = vrot.slane %v10067_v39, 2  ;;  %v8076_v39 = vld [vmem:[%s13067_s1 + $0x98] sm:$0xff] }
 0x309   : > { %2134 = vst.msk [vmem:[#allocation2 + $0xa0] sm:$0xff] %vm13325_vm10, %v9487_v60 }
 0x30a   : > { %v1796_v6 = vpop.permute.xlu1 %1795  ;;  %v2643_v60 = vsel %vm2626_vm5, %v2640_v13, %v2642_v20  ;;  %v8073_v13 = vld [vmem:[%s8334_s2 + $0x70] sm:$0xff] }
 0x30b   : > { %1854 = vst.msk [vmem:[#allocation2 + $0x50] sm:$0xff] %vm1848_vm9, %v1796_v6  ;;  %1375 = vrot.lane.b32.xlu1 %v1327_v29, %s8178_s0  ;;  %v1757_v6 = vmul.f32 %v8073_v13, %v13698_v34  ;;  %v13705_v13 = vrot.slane %v10120_v37, 6 }
 0x30e   : > { %v1167_v51 = vpop.permute.xlu1 %1166 }
 0x30f   : > { %1223 = vst.msk [vmem:[#allocation2 + $0x60] sm:$0xff] %vm13321_vm0, %v1167_v51  ;;  %2282 = vrot.lane.b32.xlu1 %v2234_v61, %s8183_s21 }
 0x312   : > { %v2071_v54 = vpop.permute.xlu1 %2070 }
 0x313   : > { %2129 = vst.msk [vmem:[#allocation2 + $0x50] sm:$0xff] %vm13325_vm10, %v2071_v54  ;;  %839 = vperm.xlu1 %8026, %v9537_v17   ;;  %v13697_v17 = vld [vmem:[#allocation128_spill] sm:$0xff]  ;;  %v13700_v54 = vld [vmem:[#allocation138_spill] sm:$0xff] }
 0x314   : > { %2332 = vst.msk [vmem:[#allocation2 + $0x50] sm:$0xff] %vm13322_vm13, %v9520_v41  ;;  %v2441_v29 = vmul.f32 %v13697_v17, %v9418_v48  ;;  %v13699_v48 = vld [vmem:[#allocation110_spill] sm:$0xff] }
 0x315   : > { %v13717_v17 = vld [vmem:[#allocation162_spill] sm:$0xff] }
 0x316   : > { %v10361_v46 = vpop.permute.xlu1 %2579 }
 0x317   : > { %v2692_v53 = vmul.f32 %v2643_v60, %v10361_v46  ;;  %1600 = vrot.lane.b32.xlu1 %v1544_v58, %s8179_s4  ;;  %v2027_v60 = vmul.f32 %v13700_v54, %v13699_v48  ;;  %v13701_v58 = vld [vmem:[#allocation155_spill] sm:$0xff] }
 0x318   : > { %8027 = vset.pattern.permute.xlu1 %v13514_v26 }
 0x319   : > { %2711 = vst.msk [vmem:[#allocation2 + $0x78] sm:$0xff] %vm714_vm4, %v2692_v53  ;;  %v13702_v53 = vld [vmem:[#allocation158_spill] sm:$0xff] }
 0x31a   : > { %v1370_v41 = vpop.permute.xlu1 %1369 }
 0x31b   : > { %1425 = vst.msk [vmem:[#allocation2 + $0x60] sm:$0xff] %vm13324_vm12, %v1370_v41  ;;  %2494 = vrot.lane.b32.xlu1 %v2441_v29, %s8181_s5  ;;  %v13703_v41 = vld [vmem:[#allocation153_spill] sm:$0xff] }
 0x31e   : > { %v1380_v61 = vpop.permute.xlu1 %1379 }
 0x31f   : > { %1430 = vst.msk [vmem:[#allocation2 + $0xb0] sm:$0xff] %vm13324_vm12, %v1380_v61  ;;  %1813 = vrot.lane.b32.xlu1 %v1757_v6, %s8175_s22 }
 0x320   : > { %1648 = vst.msk [vmem:[#allocation2 + $0xb0] sm:$0xff] %vm13323_vm14, %v9531_v47  ;;  %v2738_v51 = vld [vmem:[#allocation2 + $0x78] sm:$0xff]  ;;  %v13704_v47 = vrot.slane %v10155_v49, 6 }
 0x321   : > { %1860 = vst.msk [vmem:[#allocation2 + $0xb0] sm:$0xff] %vm1848_vm9, %v13701_v58  ;;  %v13707_v58 = vld [vmem:[#allocation54_spill] sm:$0xff] }
 0x322   : > { %3990 = vst.msk [vmem:[#allocation2 + $0x78] sm:$0xff] %vm714_vm4, %v9850_v9  ;;  %v2287_v29 = vpop.permute.xlu1 %2286  ;;  %v903_v6 = vsel %vm876_vm7, %v13705_v13, %v13704_v47  ;;  %v10416_v13 = vld [vmem:[%s8334_s2 + $0x78] sm:$0xff] }
 0x323   : > { %2135 = vst.msk [vmem:[#allocation2 + $0xb0] sm:$0xff] %vm13325_vm10, %v13702_v53  ;;  %2078 = vrot.lane.b32.xlu1 %v2027_v60, %s8177_s3  ;;  %v2235_v53 = vmul.f32 %v9974_v2, %v13707_v58  ;;  %v8074_v2 = vld [vmem:[%s13067_s1 + $0x90] sm:$0xff] }
 0x324   : > { %2337 = vst.msk [vmem:[#allocation2 + $0xa0] sm:$0xff] %vm13322_vm13, %v2287_v29  ;;  %v13709_v29 = vld [vmem:[#allocation23_spill] sm:$0xff] }
 0x325   : > { %2539 = vst.msk [vmem:[#allocation2 + $0xa0] sm:$0xff] %vm13320_vm15, %v13703_v41 }
 0x326   : > { %v10394_v61 = vpop.permute.xlu1 %824 }
 0x327   : > { %13706 = vst [vmem:[#allocation137_spill] sm:$0xff] %v10394_v61  ;;  %v947_v54 = vmul.f32 %v903_v6, %v10394_v61  ;;  %2615 = vperm.xlu1 %8027, %v10298_v33   ;;  %v13708_v33 = vld [vmem:[#allocation108_spill] sm:$0xff]  ;;  %v13710_v6 = vld [vmem:[#allocation141_spill] sm:$0xff] }
 0x328   : > { %v2437_v41 = vmul.f32 %v13709_v29, %v13708_v33 }
 0x329   : > { %968 = vst.msk [vmem:[#allocation2 + $0xe0] sm:$0xff] %vm714_vm4, %v947_v54 }
 0x32a   : > { %v1585_v60 = vpop.permute.xlu1 %1584 }
 0x32b   : > { %1643 = vst.msk [vmem:[#allocation2 + $0x60] sm:$0xff] %vm13323_vm14, %v1585_v60  ;;  %2284 = vrot.lane.b32.xlu1 %v2235_v53, %s8183_s21  ;;  %v13711_v60 = vld [vmem:[#allocation144_spill] sm:$0xff] }
 0x32c   : > { %v2743_v49 = vld [vmem:[#allocation2 + $0xa0] sm:$0xff]  ;;  %8028 = vset.pattern.permute.xlu1 %v13517_v36 }
 0x32d   : > { %2943 = vmatmul.mubr.f32.vlgmr.msra.gmra.mrb[0].mxu1 %v2743_v49  ;;  %3995 = vst [vmem:[#allocation2 + $0xa0] sm:$0xff] %v9850_v9  ;;  %v13712_v49 = vld [vmem:[#allocation148_spill] sm:$0xff] }
 0x32e   : > { %7026 = vmatprep.mubr.msk.f32.mxu1 %vm714_vm4, %v9841_v28  ;;  %v2479_v37 = vpop.permute.xlu1 %2478  ;;  %v1758_v28 = vmul.f32 %v10416_v13, %v13710_v6  ;;  %v13765_v6 = vld [vmem:[#allocation201_spill] sm:$0xff] }
 0x32f   : > { %2534 = vst.msk [vmem:[#allocation2 + $0x50] sm:$0xff] %vm13320_vm15, %v2479_v37  ;;  %844 = vperm.xlu1 %8028, %v8074_v2   ;;  %v2033_v37 = vmul.f32 %v13712_v49, %v13711_v60 }
 0x332   : > { %v1798_v47 = vpop.permute.xlu1 %1797 }
 0x333   : > { %1855 = vst.msk [vmem:[#allocation2 + $0x60] sm:$0xff] %vm1848_vm9, %v1798_v47  ;;  %2486 = vrot.lane.b32.xlu1 %v2437_v41, %s8181_s5  ;;  %v13713_v41 = vld [vmem:[#allocation160_spill] sm:$0xff]  ;;  %v13714_v47 = vld [vmem:[#allocation103_spill] sm:$0xff] }
 0x336   : > { %v1169_v54 = vpop.permute.xlu1 %1168  ;;  %v2733_v53 = vld [vmem:[#allocation2 + $0x50] sm:$0xff] }
 0x337   : > { %1224 = vst.msk [vmem:[#allocation2 + $0x70] sm:$0xff] %vm13321_vm0, %v1169_v54  ;;  %1815 = vrot.lane.b32.xlu1 %v1758_v28, %s8175_s22  ;;  %2918 = vmatmul.mubr.f32.gmra.mrb[10].mxu0 %v2733_v53  ;;  %3985 = vst [vmem:[#allocation2 + $0x50] sm:$0xff] %v9850_v9  ;;  %v13715_v54 = vrot.slane %v13714_v47, 2  ;;  %v13716_v53 = vld [vmem:[#allocation145_spill] sm:$0xff]  ;;  %v13719_v47 = vld [vmem:[#allocation147_spill] sm:$0xff] }
 0x338   : > { %7021 = vmatprep.mubr.msk.f32.mxu0 %vm714_vm4, %v10320_v22  ;;  %v1334_v22 = vmul.f32 %v10416_v13, %v13716_v53 }
 0x339   : > { %v2645_v28 = vsel %vm2626_vm5, %v2642_v20, %v13715_v54 }
 0x33a   : > { %v2073_v33 = vpop.permute.xlu1 %2072 }
 0x33b   : > { %2130 = vst.msk [vmem:[#allocation2 + $0x60] sm:$0xff] %vm13325_vm10, %v2073_v33  ;;  %2090 = vrot.lane.b32.xlu1 %v2033_v37, %s8177_s3 }
 0x33c   : > { %2333 = vst.msk [vmem:[#allocation2 + $0x60] sm:$0xff] %vm13322_vm13, %v13713_v41  ;;  %v13718_v41 = vld [vmem:[#allocation170_spill] sm:$0xff] }
 0x33d   : > { %2535 = vst.msk [vmem:[#allocation2 + $0x60] sm:$0xff] %vm13320_vm15, %v13717_v17  ;;  %v2443_v17 = vmul.f32 %v13719_v47, %v13718_v41  ;;  %v13723_v41 = vld [vmem:[#allocation152_spill] sm:$0xff]  ;;  %v13728_v47 = vld [vmem:[#allocation174_spill] sm:$0xff] }
 0x33e   : > { %v10440_v49 = vpop.permute.xlu1 %2583 }
 0x33f   : > { %v2693_v33 = vmul.f32 %v2645_v28, %v10440_v49  ;;  %1389 = vrot.lane.b32.xlu1 %v1334_v22, %s8178_s0  ;;  %v13720_v22 = vld [vmem:[#allocation149_spill] sm:$0xff] }
 0x341   : > { %2712 = vst.msk [vmem:[#allocation2 + $0x88] sm:$0xff] %vm714_vm4, %v2693_v33  ;;  %v13721_v33 = vld [vmem:[#allocation165_spill] sm:$0xff] }
 0x342   : > { %v1372_v37 = vpop.permute.xlu1 %1371 }
 0x343   : > { %1426 = vst.msk [vmem:[#allocation2 + $0x70] sm:$0xff] %vm13324_vm12, %v1372_v37  ;;  %849 = vperm.xlu1 %8028, %v8076_v39   ;;  %v1132_v37 = vmul.f32 %v13721_v33, %v13720_v22 }
 0x344   : > { %v2735_v20 = vld [vmem:[#allocation2 + $0x60] sm:$0xff] }
 0x345   : > { %2923 = vmatmul.mubr.f32.gmra.mrb[12].mxu0 %v2735_v20  ;;  %3987 = vst [vmem:[#allocation2 + $0x60] sm:$0xff] %v9850_v9  ;;  %v13722_v20 = vld [vmem:[#allocation164_spill] sm:$0xff] }
 0x346   : > { %v1382_v54 = vpop.permute.xlu1 %1381  ;;  %7022 = vmatprep.mubr.msk.f32.mxu0 %vm714_vm4, %v2738_v51 }
 0x347   : > { %1431 = vst.msk [vmem:[#allocation2 + $0xc0] sm:$0xff] %vm13324_vm12, %v1382_v54  ;;  %2498 = vrot.lane.b32.xlu1 %v2443_v17, %s8181_s5  ;;  %v13724_v54 = vld [vmem:[#allocation169_spill] sm:$0xff] }
 0x348   : > { %8030 = vset.pattern.permute.xlu1 %v13514_v26  ;;  %v10456_v28 = vld [vmem:[#allocation2 + $0x88] sm:$0xff] }
 0x349   : > { %3992 = vst.msk [vmem:[#allocation2 + $0x88] sm:$0xff] %vm714_vm4, %v9850_v9  ;;  %v10468_v26 = vld [vmem:[%s8334_s2 + $0x88] sm:$0xff] }
 0x34a   : > { %v2289_v39 = vpop.permute.xlu1 %2288  ;;  %v2242_v17 = vmul.f32 %v10468_v26, %v13723_v41  ;;  %v910_v30 = vrot.slane %v10468_v26, 6 }
 0x34b   : > { %2338 = vst.msk [vmem:[#allocation2 + $0xb0] sm:$0xff] %vm13322_vm13, %v2289_v39  ;;  %1188 = vrot.lane.b32.xlu1 %v1132_v37, %s8182_s6  ;;  %v13725_v37 = vld [vmem:[#allocation178_spill] sm:$0xff] }
 0x34e   : > { %v1587_v51 = vpop.permute.xlu1 %1586 }
 0x34f   : > { %1644 = vst.msk [vmem:[#allocation2 + $0x70] sm:$0xff] %vm13323_vm14, %v1587_v51  ;;  %2623 = vperm.xlu1 %8030, %v8074_v2   ;;  %v13726_v2 = vld [vmem:[#allocation25_spill] sm:$0xff] }
 0x350   : > { %1856 = vst.msk [vmem:[#allocation2 + $0x70] sm:$0xff] %vm1848_vm9, %v13722_v20  ;;  %v2444_v39 = vmul.f32 %v13726_v2, %v13725_v37  ;;  %v13727_v20 = vld [vmem:[#allocation157_spill] sm:$0xff] }
 0x351   : > { %2131 = vst.msk [vmem:[#allocation2 + $0x70] sm:$0xff] %vm13325_vm10, %v13724_v54  ;;  %v1133_v41 = vmul.f32 %v13728_v47, %v13727_v20  ;;  %v13729_v54 = vld [vmem:[#allocation52_spill] sm:$0xff]  ;;  %v13730_v37 = vld [vmem:[#allocation173_spill] sm:$0xff] }
 0x352   : > { %v1597_v33 = vpop.permute.xlu1 %1596 }
 0x353   : > { %1649 = vst.msk [vmem:[#allocation2 + $0xc0] sm:$0xff] %vm13323_vm14, %v1597_v33  ;;  %2298 = vrot.lane.b32.xlu1 %v2242_v17, %s8183_s21  ;;  %v1336_v17 = vmul.f32 %v10468_v26, %v13729_v54 }
 0x354   : > { %8031 = vset.pattern.permute.xlu1 %v13517_v36 }
 0x356   : > { %v2491_v51 = vpop.permute.xlu1 %2490 }
 0x357   : > { %2540 = vst.msk [vmem:[#allocation2 + $0xb0] sm:$0xff] %vm13320_vm15, %v2491_v51  ;;  %2500 = vrot.lane.b32.xlu1 %v2444_v39, %s8181_s5  ;;  %v13732_v39 = vrot.slane %v9449_v62, 2  ;;  %v13733_v51 = vld [vmem:[#allocation142_spill] sm:$0xff] }
 0x358   : > { %v13738_v62 = vld [vmem:[#allocation182_spill] sm:$0xff] }
 0x35a   : > { %v1810_v22 = vpop.permute.xlu1 %1809 }
 0x35b   : > { %1861 = vst.msk [vmem:[#allocation2 + $0xc0] sm:$0xff] %vm1848_vm9, %v1810_v22  ;;  %1190 = vrot.lane.b32.xlu1 %v1133_v41, %s8182_s6  ;;  %v8078_v22 = vld [vmem:[%s13067_s1 + $0xa0] sm:$0x3] }
 0x35c   : > { %v13731_v41 = vld [vmem:[#allocation90_spill] sm:$0xff] }
 0x35e   : > { %v1181_v36 = vpop.permute.xlu1 %1180  ;;  %v2745_v33 = vld [vmem:[#allocation2 + $0xb0] sm:$0xff] }
 0x35f   : > { %1230 = vst.msk [vmem:[#allocation2 + $0xd0] sm:$0xff] %vm13321_vm0, %v1181_v36  ;;  %1393 = vrot.lane.b32.xlu1 %v1336_v17, %s8178_s0  ;;  %2948 = vmatmul.mubr.f32.gmra.mrb[2].mxu1 %v2745_v33  ;;  %3997 = vst [vmem:[#allocation2 + $0xb0] sm:$0xff] %v9850_v9  ;;  %v13734_v17 = vrot.slane %v13733_v51, 2  ;;  %v13736_v33 = vld [vmem:[#allocation163_spill] sm:$0xff] }
 0x360   : > { %1432 = vst.msk [vmem:[#allocation2 + $0xd0] sm:$0xff] %vm13324_vm12, %v13730_v37  ;;  %7027 = vmatprep.mubr.msk.f32.mxu1 %vm714_vm4, %v9843_v27  ;;  %v13735_v27 = vld [vmem:[#allocation185_spill] sm:$0xff] }
 0x361   : > { %v2657_v36 = vsel %vm2626_vm5, %v13734_v17, %v13732_v39  ;;  %v2445_v37 = vmul.f32 %v13736_v33, %v13735_v27  ;;  %v1094_v39 = vrot.slane %v9779_v45, 7  ;;  %v13739_v17 = vld [vmem:[#allocation177_spill] sm:$0xff]  ;;  %v13741_v33 = vld [vmem:[#allocation180_spill] sm:$0xff]  ;;  %v13744_v27 = vld [vmem:[#allocation179_spill] sm:$0xff] }
 0x362   : > { %v2085_v47 = vpop.permute.xlu1 %2084 }
 0x363   : > { %2136 = vst.msk [vmem:[#allocation2 + $0xc0] sm:$0xff] %vm13325_vm10, %v2085_v47  ;;  %854 = vperm.xlu1 %8031, %v8078_v22  }
 0x364   : > { %2339 = vst.msk [vmem:[#allocation2 + $0xc0] sm:$0xff] %vm13322_vm13, %v13731_v41  ;;  %v13737_v41 = vld [vmem:[#allocation71_spill] sm:$0xff] }
 0x365   : > { %v1134_v2 = vmul.f32 %v13738_v62, %v13737_v41  ;;  %v13745_v41 = vrot.slane %v10416_v13, 6 }
 0x366   : > { %v10509_v47 = vpop.permute.xlu1 %2607 }
 0x367   : > { %v2699_v22 = vmul.f32 %v2657_v36, %v10509_v47  ;;  %2502 = vrot.lane.b32.xlu1 %v2445_v37, %s8181_s5  ;;  %v10523_v36 = vld [vmem:[%s8334_s2 + $0x90] sm:$0xff] }
 0x368   : > { %v13740_v37 = vld [vmem:[#allocation172_spill] sm:$0xff] }
 0x369   : > { %2718 = vst.msk [vmem:[#allocation2 + $0xe8] sm:$0xff] %vm714_vm4, %v2699_v22  ;;  %v1337_v62 = vmul.f32 %v10523_v36, %v13740_v37  ;;  %v13742_v22 = vld [vmem:[#allocation184_spill] sm:$0xff]  ;;  %v13746_v37 = vrot.slane %v9320_v11, 6 }
 0x36a   : > { %v1374_v51 = vpop.permute.xlu1 %1373 }
 0x36b   : > { %1427 = vst.msk [vmem:[#allocation2 + $0x80] sm:$0xff] %vm13324_vm12, %v1374_v51  ;;  %1192 = vrot.lane.b32.xlu1 %v1134_v2, %s8182_s6  ;;  %v13743_v51 = vrot.slane %v9711_v43, 7 }
 0x36c   : > { %1645 = vst.msk [vmem:[#allocation2 + $0x80] sm:$0xff] %vm13323_vm14, %v13739_v17 }
 0x36d   : > { %1857 = vst.msk [vmem:[#allocation2 + $0x80] sm:$0xff] %vm1848_vm9, %v13741_v33  ;;  %v1095_v17 = vsel %vm1056_vm3, %v13743_v51, %v1094_v39  ;;  %v907_v33 = vsel %vm876_vm7, %v13746_v37, %v13745_v41  ;;  %v13749_v51 = vld [vmem:[#allocation40_spill] sm:$0xff]  ;;  %v13750_v37 = vld [vmem:[#allocation59_spill] sm:$0xff] }
 0x36e   : > { %2132 = vst.msk [vmem:[#allocation2 + $0x80] sm:$0xff] %vm13325_vm10, %v13742_v22  ;;  %v2281_v2 = vpop.permute.xlu1 %2280  ;;  %v13747_v22 = vld [vmem:[#allocation175_spill] sm:$0xff] }
 0x36f   : > { %2334 = vst.msk [vmem:[#allocation2 + $0x70] sm:$0xff] %vm13322_vm13, %v2281_v2  ;;  %1395 = vrot.lane.b32.xlu1 %v1337_v62, %s8178_s0  ;;  %v1549_v54 = vmul.f32 %v13747_v22, %v1095_v17 }
 0x370   : > { %2536 = vst.msk [vmem:[#allocation2 + $0x70] sm:$0xff] %vm13320_vm15, %v13744_v27  ;;  %v10543_v20 = vld [vmem:[#allocation2 + $0xe8] sm:$0xff]  ;;  %v8080_v27 = vld [vmem:[%s8334_s2 + $0x98] sm:$0xff] }
 0x371   : > { %4004 = vst.msk [vmem:[#allocation2 + $0xe8] sm:$0xff] %vm714_vm4, %v9850_v9  ;;  %v1762_v60 = vmul.f32 %v8080_v27, %v13749_v51  ;;  %v10574_v51 = vld [vmem:[#allocation2 + $0x138] sm:$0xff] }
 0x372   : > { %v10548_v62 = vpop.permute.xlu1 %834  ;;  %4014 = vst.msk [vmem:[#allocation2 + $0x138] sm:$0xff] %vm714_vm4, %v9850_v9 }
 0x373   : > { %13748 = vst [vmem:[#allocation140_spill] sm:$0xff] %v10548_v62  ;;  %v949_v2 = vmul.f32 %v907_v33, %v10548_v62  ;;  %1610 = vrot.lane.b32.xlu1 %v1549_v54, %s8179_s4  ;;  %v2245_v54 = vmul.f32 %v13750_v37, %v9817_v42  ;;  %v1527_v33 = vrot.slane %v9817_v42, 7 }
 0x375   : > { %970 = vst.msk [vmem:[#allocation2 + $0x100] sm:$0xff] %vm714_vm4, %v949_v2 }
 0x376   : > { %1233 = vst.msk [vmem:[#allocation2 + $0x100] sm:$0xff] %vm13321_vm0, %v10007_v21  ;;  %v1599_v11 = vpop.permute.xlu1 %1598  ;;  %v13751_v21 = vld [vmem:[#allocation72_spill] sm:$0xff] }
 0x377   : > { %1650 = vst.msk [vmem:[#allocation2 + $0xd0] sm:$0xff] %vm13323_vm14, %v1599_v11  ;;  %1823 = vrot.lane.b32.xlu1 %v1762_v60, %s8175_s22  ;;  %v2737_v41 = vld [vmem:[#allocation2 + $0x70] sm:$0xff]  ;;  %v1135_v27 = vmul.f32 %v1095_v17, %v13751_v21  ;;  %v1528_v60 = vsel %vm1056_vm3, %v1094_v39, %v1527_v33  ;;  %v13753_v39 = vld [vmem:[#allocation189_spill] sm:$0xff]  ;;  %v13754_v17 = vld [vmem:[#allocation190_spill] sm:$0xff] }
 0x378   : > { %2928 = vmatmul.mubr.f32.gmra.mrb[14].mxu0 %v2737_v41  ;;  %3989 = vst [vmem:[#allocation2 + $0x70] sm:$0xff] %v9850_v9  ;;  %v13752_v41 = vld [vmem:[#allocation86_spill] sm:$0xff]  ;;  %v13755_v33 = vld [vmem:[#allocation115_spill] sm:$0xff] }
 0x379   : > { %7023 = vmatprep.mubr.msk.f32.mxu0 %vm714_vm4, %v10456_v28  ;;  %v1550_v37 = vmul.f32 %v1528_v60, %v13752_v41  ;;  %v13763_v41 = vmov 0.0|0.0  }
 0x37a   : > { %v2493_v2 = vpop.permute.xlu1 %2492 }
 0x37b   : > { %2541 = vst.msk [vmem:[#allocation2 + $0xc0] sm:$0xff] %vm13320_vm15, %v2493_v2  ;;  %2304 = vrot.lane.b32.xlu1 %v2245_v54, %s8183_s21  ;;  %v2038_v2 = vmul.f32 %v9828_v57, %v13755_v33  ;;  %v10597_v57 = vld [vmem:[#allocation2 + $0x148] sm:$0x3] }
 0x37c   : > { %v13762_v33 = vld [vmem:[#allocation191_spill] sm:$0xff] }
 0x37e   : > { %v1812_v11 = vpop.permute.xlu1 %1811 }
 0x37f   : > { %1862 = vst.msk [vmem:[#allocation2 + $0xd0] sm:$0xff] %vm1848_vm9, %v1812_v11  ;;  %1194 = vrot.lane.b32.xlu1 %v1135_v27, %s8182_s6  ;;  %v8081_v11 = vld [vmem:[%s8334_s2 + $0x80] sm:$0xff] }
 0x382   : > { %v10572_v22 = vpop.f32.mrb[0].mxu0  ;;  %v1183_v28 = vpop.permute.xlu1 %1182  ;;  %v2747_v42 = vld [vmem:[#allocation2 + $0xc0] sm:$0xff] }
 0x383   : > { %1231 = vst.msk [vmem:[#allocation2 + $0xe0] sm:$0xff] %vm13321_vm0, %v1183_v28  ;;  %v2896_v54 = vpop.f32.mrb[1].mxu0  ;;  %1612 = vrot.lane.b32.xlu1 %v1550_v37, %s8179_s4  ;;  %2953 = vmatmul.mubr.f32.gmra.mrb[4].mxu1 %v2747_v42  ;;  %3999 = vst [vmem:[#allocation2 + $0xc0] sm:$0xff] %v9850_v9  ;;  %v13756_v37 = vld [vmem:[#allocation192_spill] sm:$0xff]  ;;  %v13757_v9 = vld [vmem:[#allocation195_spill] sm:$0xff]  ;;  %v908_v28 = vrot.slane %v8081_v11, 6 }
 0x384   : > { %1433 = vst.msk [vmem:[#allocation2 + $0xe0] sm:$0xff] %vm13324_vm12, %v13753_v39  ;;  %7028 = vmatprep.mubr.msk.f32.mxu1 %vm714_vm4, %v13754_v17  ;;  %v13758_v42 = vld [vmem:[#allocation199_spill] sm:$0xff]  ;;  %v10599_v39 = vld [vmem:[#allocation2 + $0x110] sm:$0xff]  ;;  %v13759_v17 = vld [vmem:[#allocation197_spill] sm:$0xff] }
 0x385   : > { %4016 = vst.msk [vmem:[#allocation2 + $0x148] sm:$0x3] %vm755_vm1, %v10599_v39 }
 0x386   : > { %v2087_v27 = vpop.permute.xlu1 %2086 }
 0x387   : > { %2137 = vst.msk [vmem:[#allocation2 + $0xd0] sm:$0xff] %vm13325_vm10, %v2087_v27  ;;  %2100 = vrot.lane.b32.xlu1 %v2038_v2, %s8177_s3  ;;  %v13760_v2 = vrot.slane %v10416_v13, 6 }
 0x388   : > { %2340 = vst.msk [vmem:[#allocation2 + $0xd0] sm:$0xff] %vm13322_vm13, %v13756_v37 }
 0x389   : > { %v909_v27 = vsel %vm876_vm7, %v13760_v2, %v908_v28 }
 0x38a   : > { %v1376_v60 = vpop.permute.xlu1 %1375 }
 0x38b   : > { %1428 = vst.msk [vmem:[#allocation2 + $0x90] sm:$0xff] %vm13324_vm12, %v1376_v60 }
 0x38c   : > { %1646 = vst.msk [vmem:[#allocation2 + $0x90] sm:$0xff] %vm13323_vm14, %v13757_v9  ;;  %v10612_v9 = vpop.permute.xlu0 %2296 }
 0x38d   : > { %1858 = vst.msk [vmem:[#allocation2 + $0x90] sm:$0xff] %vm1848_vm9, %v13758_v42 }
 0x38e   : > { %v2283_v54 = vpop.permute.xlu1 %2282 }
 0x38f   : > { %2335 = vst.msk [vmem:[#allocation2 + $0x80] sm:$0xff] %vm13322_vm13, %v2283_v54  ;;  %v10619_v54 = vmul.f32 %v10572_v22, %v10572_v22 }
 0x390   : > { %2537 = vst.msk [vmem:[#allocation2 + $0x80] sm:$0xff] %vm13320_vm15, %v13759_v17  ;;  %v1605_v21 = vpop.permute.xlu0 %1604 }
 0x392   : > { %v10609_v37 = vpop.permute.xlu1 %839 }
 0x393   : > { %13761 = vst [vmem:[#allocation138_spill] sm:$0xff] %v10609_v37  ;;  %v950_v60 = vmul.f32 %v909_v27, %v10609_v37 }
 0x395   : > { %971 = vst.msk [vmem:[#allocation2 + $0x110] sm:$0xff] %vm714_vm4, %v950_v60  ;;  %v13766_v60 = vld [vmem:[#allocation203_spill] sm:$0xff] }
 0x396   : > { %v1601_v11 = vpop.permute.xlu1 %1600 }
 0x397   : > { %v10615_v42 = vpop.f32.mrb[2].mxu0  ;;  %1651 = vst.msk [vmem:[#allocation2 + $0xe0] sm:$0xff] %vm13323_vm14, %v1601_v11  ;;  %v2739_v27 = vld [vmem:[#allocation2 + $0x80] sm:$0xff] }
 0x398   : > { %v7663_v13 = vpack.c.bf16 %v10615_v42, %v10572_v22  ;;  %v10626_v17 = vmul.f32 %v10615_v42, %v10615_v42  ;;  %v2901_v2 = vpop.f32.mrb[3].mxu0  ;;  %2933 = vmatmul.mubr.f32.gmra.mrb[16].mxu0 %v2739_v27  ;;  %3991 = vst [vmem:[#allocation2 + $0x80] sm:$0xff] %v10599_v39  ;;  %v1818_v27 = vpop.permute.xlu0 %1817 }
 0x399   : > { %7024 = vmatprep.mubr.msk.f32.mxu0 %vm714_vm4, %v13762_v33  ;;  %v13764_v2 = vld [vmem:[#allocation101_spill] sm:$0xff] }
 0x39a   : > { %7664 = vmatpush1.bf16.msra.mxu1 %v7663_v13  ;;  %v2495_v11 = vpop.permute.xlu1 %2494 }
 0x39b   : > { %7665 = vmatprep.subr.bf16.mxu1 %v13763_v41  ;;  %2542 = vst.msk [vmem:[#allocation2 + $0xd0] sm:$0xff] %vm13320_vm15, %v2495_v11  ;;  %v13768_v11 = vld [vmem:[#allocation167_spill] sm:$0xff] }
 0x39c   : > { %v2093_v59 = vpop.permute.xlu0 %2092 }
 0x39e   : > { %v1814_v53 = vpop.permute.xlu1 %1813 }
 0x39f   : > { %1863 = vst.msk [vmem:[#allocation2 + $0xe0] sm:$0xff] %vm1848_vm9, %v1814_v53  ;;  %v13767_v53 = vrot.slane %v9711_v43, 2 }
 0x3a0   : > { %2138 = vst.msk [vmem:[#allocation2 + $0xe0] sm:$0xff] %vm13325_vm10, %v13764_v2  ;;  %v13769_v2 = vrot.slane %v13768_v11, 2  ;;  %v911_v11 = vsel %vm876_vm7, %v908_v28, %v910_v30 }
 0x3a1   : > { %2341 = vst.msk [vmem:[#allocation2 + $0xe0] sm:$0xff] %vm13322_vm13, %v13765_v6 }
 0x3a2   : > { %2543 = vst.msk [vmem:[#allocation2 + $0xe0] sm:$0xff] %vm13320_vm15, %v13766_v60  ;;  %v2079_v33 = vpop.permute.xlu1 %2078  ;;  %v2749_v13 = vld [vmem:[#allocation2 + $0xd0] sm:$0xff]  ;;  %v2661_v14 = vsel %vm2626_vm5, %v13769_v2, %v13767_v53  ;;  %v13770_v53 = vld [vmem:[#allocation194_spill] sm:$0xff] }
 0x3a3   : > { %2133 = vst.msk [vmem:[#allocation2 + $0x90] sm:$0xff] %vm13325_vm10, %v2079_v33  ;;  %2958 = vmatmul.mubr.f32.gmra.mrb[6].mxu1 %v2749_v13  ;;  %4001 = vst [vmem:[#allocation2 + $0xd0] sm:$0xff] %v10599_v39 }
 0x3a4   : > { %7029 = vmatprep.mubr.msk.f32.mxu1 %vm714_vm4, %v10543_v20 }
 0x3a6   : > { %v10651_v6 = vpop.permute.xlu1 %2615 }
 0x3a7   : > { %v2701_v60 = vmul.f32 %v2661_v14, %v10651_v6  ;;  %v1392_v14 = vpop.permute.xlu0 %1391 }
 0x3a9   : > { %2720 = vst.msk [vmem:[#allocation2 + $0x108] sm:$0xff] %vm714_vm4, %v2701_v60  ;;  %v2751_v33 = vld [vmem:[#allocation2 + $0xe0] sm:$0xff] }
 0x3aa   : > { %2963 = vmatmul.mubr.f32.gmra.mrb[8].mxu1 %v2751_v33  ;;  %4003 = vst [vmem:[#allocation2 + $0xe0] sm:$0xff] %v10599_v39  ;;  %v2285_v20 = vpop.permute.xlu1 %2284 }
 0x3ab   : > { %2336 = vst.msk [vmem:[#allocation2 + $0x90] sm:$0xff] %vm13322_vm13, %v2285_v20  ;;  %7030 = vmatprep.mubr.msk.f32.mxu1 %vm714_vm4, %v13770_v53  ;;  %v1607_v34 = vpop.permute.xlu0 %1606 }
 0x3ac   : > { %v10657_v13 = vpop.f32.mrb[4].mxu0 }
 0x3ad   : > { %v2906_v43 = vpop.f32.mrb[5].mxu0 }
 0x3ae   : > { %v10663_v2 = vpop.permute.xlu1 %844 }
 0x3af   : > { %13771 = vst [vmem:[#allocation155_spill] sm:$0xff] %v10663_v2  ;;  %v951_v26 = vmul.f32 %v911_v11, %v10663_v2  ;;  %v1820_v43 = vpop.permute.xlu0 %1819  ;;  %v10677_v11 = vmul.f32 %v10657_v13, %v10657_v13 }
 0x3b0   : > { %v2756_v60 = vld [vmem:[#allocation2 + $0x108] sm:$0xff] }
 0x3b1   : > { %972 = vst.msk [vmem:[#allocation2 + $0x120] sm:$0xff] %vm714_vm4, %v951_v26  ;;  %4008 = vst.msk [vmem:[#allocation2 + $0x108] sm:$0xff] %vm714_vm4, %v10599_v39 }
 0x3b2   : > { %v2487_v33 = vpop.permute.xlu1 %2486 }
 0x3b3   : > { %2538 = vst.msk [vmem:[#allocation2 + $0x90] sm:$0xff] %vm13320_vm15, %v2487_v33  ;;  %v2095_v8 = vpop.permute.xlu0 %2094 }
 0x3b6   : > { %v1816_v20 = vpop.permute.xlu1 %1815 }
 0x3b7   : > { %1864 = vst.msk [vmem:[#allocation2 + $0xf0] sm:$0xff] %vm1848_vm9, %v1816_v20 }
 0x3ba   : > { %v2091_v28 = vpop.permute.xlu1 %2090  ;;  %v2741_v53 = vld [vmem:[#allocation2 + $0x90] sm:$0xff] }
 0x3bb   : > { %2139 = vst.msk [vmem:[#allocation2 + $0xf0] sm:$0xff] %vm13325_vm10, %v2091_v28  ;;  %v10672_v4 = vpop.f32.mrb[6].mxu0  ;;  %2938 = vmatmul.mubr.f32.gmra.mrb[18].mxu0 %v2741_v53  ;;  %3993 = vst [vmem:[#allocation2 + $0x90] sm:$0xff] %v10599_v39  ;;  %v912_v28 = vrot.slane %v10523_v36, 6  ;;  %v2301_v53 = vpop.permute.xlu0 %2300 }
 0x3bc   : > { %2342 = vst.msk [vmem:[#allocation2 + $0xf0] sm:$0xff] %vm13322_vm13, %v10612_v9  ;;  %v7666_v26 = vpack.c.bf16 %v10672_v4, %v10657_v13  ;;  %v10685_v33 = vmul.f32 %v10672_v4, %v10672_v4  ;;  %v2911_v20 = vpop.f32.mrb[7].mxu0 }
 0x3bd   : > { %v913_v9 = vsel %vm876_vm7, %v910_v30, %v912_v28 }
 0x3be   : > { %v1390_v31 = vpop.permute.xlu1 %1389  ;;  %7667 = vmatpush1.bf16.msra.mxu1 %v7666_v26 }
 0x3bf   : > { %1435 = vst.msk [vmem:[#allocation2 + $0x100] sm:$0xff] %vm13324_vm12, %v1390_v31  ;;  %7668 = vmatprep.subr.bf16.mxu1 %v13763_v41  ;;  %v8083_v31 = vld [vmem:[%s8334_s2 + $0xa0] sm:$0x3]  ;;  %v1609_v35 = vpop.permute.xlu0 %1608 }
 0x3c0   : > { %1653 = vst.msk [vmem:[#allocation2 + $0x100] sm:$0xff] %vm13323_vm14, %v1605_v21  ;;  %v2664_v24 = vrot.slane %v8083_v31, 2 }
 0x3c1   : > { %1865 = vst.msk [vmem:[#allocation2 + $0x100] sm:$0xff] %vm1848_vm9, %v1818_v27 }
 0x3c2   : > { %2140 = vst.msk [vmem:[#allocation2 + $0x100] sm:$0xff] %vm13325_vm10, %v2093_v59  ;;  %v10696_v36 = vpop.permute.xlu1 %849  ;;  %v13773_v59 = vrot.slane %v9779_v45, 2 }
 0x3c3   : > { %13772 = vst [vmem:[#allocation158_spill] sm:$0xff] %v10696_v36  ;;  %v952_v20 = vmul.f32 %v913_v9, %v10696_v36  ;;  %v1822_v45 = vpop.permute.xlu0 %1821 }
 0x3c4   : > { %v2665_v27 = vsel %vm2626_vm5, %v13773_v59, %v2664_v24 }
 0x3c5   : > { %973 = vst.msk [vmem:[#allocation2 + $0x130] sm:$0xff] %vm714_vm4, %v952_v20 }
 0x3c6   : > { %v2499_v26 = vpop.permute.xlu1 %2498 }
 0x3c7   : > { %2544 = vst.msk [vmem:[#allocation2 + $0xf0] sm:$0xff] %vm13320_vm15, %v2499_v26 }
 0x3c9   : > { %v10702_v5 = vpop.f32.mrb[8].mxu0 }
 0x3ca   : > { %v1189_v21 = vpop.permute.xlu1 %1188  ;;  %v2916_v30 = vpop.f32.mrb[9].mxu0 }
 0x3cb   : > { %1234 = vst.msk [vmem:[#allocation2 + $0x110] sm:$0xff] %vm13321_vm0, %v1189_v21 }
 0x3cc   : > { %1436 = vst.msk [vmem:[#allocation2 + $0x110] sm:$0xff] %vm13324_vm12, %v1392_v14  ;;  %v2097_v14 = vpop.permute.xlu0 %2096 }
 0x3cd   : > { %1654 = vst.msk [vmem:[#allocation2 + $0x110] sm:$0xff] %vm13323_vm14, %v1607_v34 }
 0x3ce   : > { %1866 = vst.msk [vmem:[#allocation2 + $0x110] sm:$0xff] %vm1848_vm9, %v1820_v43  ;;  %v10711_v9 = vpop.permute.xlu1 %2623  ;;  %v2753_v20 = vld [vmem:[#allocation2 + $0xf0] sm:$0xff] }
 0x3cf   : > { %13774 = vst [vmem:[#allocation153_spill] sm:$0xff] %v10711_v9  ;;  %2141 = vst.msk [vmem:[#allocation2 + $0x110] sm:$0xff] %vm13325_vm10, %v2095_v8  ;;  %v2703_v26 = vmul.f32 %v2665_v27, %v10711_v9  ;;  %2968 = vmatmul.mubr.f32.gmra.mrb[10].mxu1 %v2753_v20 }
 0x3d0   : > { %4005 = vst [vmem:[#allocation2 + $0xf0] sm:$0xff] %v10599_v39  ;;  %2344 = vst.msk [vmem:[#allocation2 + $0x110] sm:$0xff] %vm13322_vm13, %v2301_v53  ;;  %7031 = vmatprep.mubr.msk.f32.mxu1 %vm714_vm4, %v2756_v60  ;;  %v2303_v53 = vpop.permute.xlu0 %2302 }
 0x3d1   : > { %2722 = vst.msk [vmem:[#allocation2 + $0x128] sm:$0xff] %vm714_vm4, %v2703_v26 }
 0x3d2   : > { %v2299_v24 = vpop.permute.xlu1 %2298 }
 0x3d3   : > { %2343 = vst.msk [vmem:[#allocation2 + $0x100] sm:$0xff] %vm13322_vm13, %v2299_v24 }
 0x3d4   : > { %v2505_v30 = vpop.permute.xlu0 %2504 }
 0x3d6   : > { %v2501_v34 = vpop.permute.xlu1 %2500 }
 0x3d7   : > { %2545 = vst.msk [vmem:[#allocation2 + $0x100] sm:$0xff] %vm13320_vm15, %v2501_v34 }
 0x3d8   : > { %v2760_v8 = vld [vmem:[#allocation2 + $0x128] sm:$0xff] }
 0x3d9   : > { %4012 = vst.msk [vmem:[#allocation2 + $0x128] sm:$0xff] %vm714_vm4, %v10599_v39 }
 0x3da   : > { %v1191_v43 = vpop.permute.xlu1 %1190 }
 0x3db   : > { %1235 = vst.msk [vmem:[#allocation2 + $0x120] sm:$0xff] %vm13321_vm0, %v1191_v43 }
 0x3de   : > { %v1394_v31 = vpop.permute.xlu1 %1393  ;;  %v2755_v60 = vld [vmem:[#allocation2 + $0x100] sm:$0xff] }
 0x3df   : > { %1437 = vst.msk [vmem:[#allocation2 + $0x120] sm:$0xff] %vm13324_vm12, %v1394_v31  ;;  %2973 = vmatmul.mubr.f32.gmra.mrb[12].mxu1 %v2755_v60  ;;  %4007 = vst [vmem:[#allocation2 + $0x100] sm:$0xff] %v10599_v39 }
 0x3e0   : > { %1655 = vst.msk [vmem:[#allocation2 + $0x120] sm:$0xff] %vm13323_vm14, %v1609_v35  ;;  %7032 = vmatprep.mubr.msk.f32.mxu1 %vm714_vm4, %v10087_v25 }
 0x3e1   : > { %1867 = vst.msk [vmem:[#allocation2 + $0x120] sm:$0xff] %vm1848_vm9, %v1822_v45 }
 0x3e2   : > { %2142 = vst.msk [vmem:[#allocation2 + $0x120] sm:$0xff] %vm13325_vm10, %v2097_v14  ;;  %v10731_v21 = vpop.permute.xlu1 %854 }
 0x3e3   : > { %13775 = vst [vmem:[#allocation108_spill] sm:$0xff] %v10731_v21  ;;  %2345 = vst.msk [vmem:[#allocation2 + $0x120] sm:$0xff] %vm13322_vm13, %v2303_v53  ;;  %v953_v59 = vmul.f32 %v912_v28, %v10731_v21  ;;  %v2099_v28 = vpop.permute.xlu0 %2098  ;;  %vm1237_vm13 = vcmask 255104  }
 0x3e4   : > { %2547 = vst.msk [vmem:[#allocation2 + $0x120] sm:$0xff] %vm13320_vm15, %v2505_v30 }
 0x3e5   : > { %974 = vst.msk [vmem:[#allocation2 + $0x140] sm:$0x3] %vm755_vm1, %v953_v59 }
 0x3e6   : > { %v2503_v27 = vpop.permute.xlu1 %2502 }
 0x3e7   : > { %2546 = vst.msk [vmem:[#allocation2 + $0x110] sm:$0xff] %vm13320_vm15, %v2503_v27  ;;  %v2507_v34 = vpop.permute.xlu0 %2506  ;;  %vm2346_vm15 = vcmask 911104  }
 0x3ea   : > { %v1193_v35 = vpop.permute.xlu1 %1192 }
 0x3eb   : > { %1236 = vst.msk [vmem:[#allocation2 + $0x130] sm:$0xff] %vm13321_vm0, %v1193_v35  ;;  %v2759_v25 = vld [vmem:[#allocation2 + $0x120] sm:$0xff]  ;;  %vm13326_vm0 = vcmask 1041280   ;;  %v10764_v35 = vmul.f32 %v10702_v5, %v10702_v5 }
 0x3ec   : > { %4011 = vst [vmem:[#allocation2 + $0x120] sm:$0xff] %v10599_v39 }
 0x3ee   : > { %v1396_v20 = vpop.permute.xlu1 %1395  ;;  %v2757_v26 = vld [vmem:[#allocation2 + $0x110] sm:$0xff] }
 0x3ef   : > { %1438 = vst.msk [vmem:[#allocation2 + $0x130] sm:$0xff] %vm13324_vm12, %v1396_v20  ;;  %2978 = vmatmul.mubr.f32.gmra.mrb[14].mxu1 %v2757_v26  ;;  %4009 = vst [vmem:[#allocation2 + $0x110] sm:$0xff] %v10599_v39  ;;  %vm13338_vm12 = vcmask 517504  }
 0x3f0   : > { %7033 = vmatprep.mubr.msk.f32.mxu1 %vm714_vm4, %v2760_v8  ;;  %v1398_v8 = vpop.permute.xlu0 %1397 }
 0x3f2   : > { %v1611_v45 = vpop.permute.xlu1 %1610 }
 0x3f3   : > { %1656 = vst.msk [vmem:[#allocation2 + $0x130] sm:$0xff] %vm13323_vm14, %v1611_v45  ;;  %2983 = vmatmul.mubr.f32.gmra.mrb[16].mxu1 %v2759_v25  ;;  %vm1439_vm14 = vcmask 386304  }
 0x3f4   : > { %7034 = vmatprep.mubr.msk.f32.mxu1 %vm714_vm4, %v10574_v51  ;;  %v1826_v60 = vpop.permute.xlu0 %1825 }
 0x3f6   : > { %v1824_v24 = vpop.permute.xlu1 %1823 }
 0x3f7   : > { %1868 = vst.msk [vmem:[#allocation2 + $0x130] sm:$0xff] %vm1848_vm9, %v1824_v24 }
 0x3f8   : > { %2143 = vst.msk [vmem:[#allocation2 + $0x130] sm:$0xff] %vm13325_vm10, %v2099_v28  ;;  %vm13337_vm10 = vcmask 648704  }
 0x3fa   : > { %v2305_v14 = vpop.permute.xlu1 %2304 }
 0x3fb   : > { %2347 = vst.msk [vmem:[#allocation2 + $0x130] sm:$0x3] %vm2346_vm15, %v2305_v14 }
 0x3fc   : > { %2549 = vst.msk [vmem:[#allocation2 + $0x130] sm:$0x1] %vm13326_vm0, %v2507_v34  ;;  %vm13327_vm0 = vcmask 778880  }
 0x3fe   : > { %v1195_v43 = vpop.permute.xlu1 %1194 }
 0x3ff   : > { %1238 = vst.msk [vmem:[#allocation2 + $0x140] sm:$0x3] %vm1237_vm13, %v1195_v43 }
 0x400   : > { %v10751_v51 = vpop.f32.mrb[0].mxu1  ;;  %1440 = vst.msk [vmem:[#allocation2 + $0x140] sm:$0x3] %vm1439_vm14, %v1398_v8 }
 0x401   : > { %v2946_v53 = vpop.f32.mrb[1].mxu1  ;;  %v10782_v14 = vmul.f32 %v10751_v51, %v10751_v51 }
 0x402   : > { %v1613_v31 = vpop.permute.xlu1 %1612 }
 0x403   : > { %1658 = vst.msk [vmem:[#allocation2 + $0x140] sm:$0x3] %vm13338_vm12, %v1613_v31  ;;  %v2761_v30 = vld [vmem:[#allocation2 + $0x130] sm:$0xff]  ;;  %vm3232_vm12 = vcmask 15360  }
 0x404   : > { %2988 = vmatmul.mubr.f32.gmra.mrb[18].mxu1 %v2761_v30  ;;  %4013 = vst [vmem:[#allocation2 + $0x130] sm:$0xff] %v10599_v39  ;;  %1870 = vst.msk [vmem:[#allocation2 + $0x140] sm:$0x3] %vm13337_vm10, %v1826_v60  ;;  %vm8186_vm10 = vmmov 0  }
 0x405   : > { %7035 = vmatprep.mubr.msk.f32.mxu1 %vm714_vm4, %v10597_v57  ;;  %v10812_v31 = vld.sshfl [vmem:[%s13776_s28] sm:$0x33 pattern:$0x76325410]  ;;  %7365 = vmatprep.mubr.msk.f32.mxu0 %vm8186_vm10, %v10599_v39 }
 0x406   : > { %v2101_v59 = vpop.permute.xlu1 %2100  ;;  %v10816_v57 = vcombine.high %v10812_v31, %v10812_v31 }
 0x407   : > { %2145 = vst.msk [vmem:[#allocation2 + $0x140] sm:$0x1] %vm13327_vm0, %v2101_v59  ;;  %vm3050_vm0 = vcmask 277504  }
 0x408   : > { %13777 = vst [vmem:[#allocation148_spill] sm:$0xff] %v10816_v57 }
 0x40a   : > { %v10760_v27 = vpop.f32.mrb[10].mxu0 }
 0x40b   : > { %v7669_v25 = vpack.c.bf16 %v10760_v27, %v10702_v5  ;;  %v10770_v20 = vmul.f32 %v10760_v27, %v10760_v27  ;;  %v2921_v26 = vpop.f32.mrb[11].mxu0 }
 0x40d   : > { %7670 = vmatpush1.bf16.msra.mxu1 %v7669_v25 }
 0x40e   : > { %v2763_v28 = vld [vmem:[#allocation2 + $0x140] sm:$0x3]  ;;  %7671 = vmatprep.subr.bf16.mxu1 %v13763_v41 }
 0x40f   : > { %4015 = vst [vmem:[#allocation2 + $0x140] sm:$0x3] %v10599_v39  ;;  %2993 = vmatmul.mubr.f32.gmra.mrb[20].mxu1 %v2763_v28 }
 0x410   : > { %7038 = vmatprep.mubr.msk.f32.mxu1 %vm3050_vm0, %v10816_v57 }
 0x418   : > { %v10776_v45 = vpop.f32.mrb[12].mxu0 }
 0x419   : > { %v2926_v24 = vpop.f32.mrb[13].mxu0  ;;  %v10796_v30 = vmul.f32 %v10776_v45, %v10776_v45 }
 0x432   : > { %v10778_v34 = vpop.f32.mrb[2].mxu1 }
 0x433   : > { %v7678_v8 = vpack.c.bf16 %v10778_v34, %v10751_v51  ;;  %v10788_v43 = vmul.f32 %v10778_v34, %v10778_v34  ;;  %v2951_v53 = vpop.f32.mrb[3].mxu1 }
 0x44b   : > { %v10792_v60 = vpop.f32.mrb[14].mxu0 }
 0x44c   : > { %v7672_v59 = vpack.c.bf16 %v10792_v60, %v10776_v45  ;;  %v10802_v25 = vmul.f32 %v10792_v60, %v10792_v60  ;;  %v2931_v26 = vpop.f32.mrb[15].mxu0 }
 0x44e   : > { %7673 = vmatpush1.bf16.msra.mxu1 %v7672_v59 }
 0x44f   : > { %7674 = vmatprep.subr.bf16.mxu1 %v13763_v41 }
 0x456   : > { %v10807_v24 = vpop.f32.mrb[4].mxu1 }
 0x457   : > { %v2956_v53 = vpop.f32.mrb[5].mxu1 }
 0x458   : > { %v10826_v53 = vmul.f32 %v10807_v24, %v10807_v24 }
 0x46b   : > { %v10820_v26 = vpop.f32.mrb[16].mxu0 }
 0x46c   : > { %v2936_v59 = vpop.f32.mrb[17].mxu0  ;;  %v3137_v36 = vmul.f32 %v10820_v26, %v10820_v26 }
 0x476   : > { %v10822_v28 = vpop.f32.mrb[6].mxu1 }
 0x477   : > { %v7681_v29 = vpack.c.bf16 %v10822_v28, %v10807_v24  ;;  %v10832_v48 = vmul.f32 %v10822_v28, %v10822_v28  ;;  %v2961_v58 = vpop.f32.mrb[7].mxu1 }
 0x479   : > { %v7711_v40 = vpack.c.bf16 %v10832_v48, %v10826_v53 }
 0x47d   : > { %v10836_v1 = vpop.f32.mrb[8].mxu1 }
 0x47e   : > { %v2966_v59 = vpop.f32.mrb[9].mxu1  ;;  %v3143_v58 = vmul.f32 %v10836_v1, %v10836_v1 }
 0x48e   : > { %v10838_v21 = vpop.f32.mrb[18].mxu0 }
 0x48f   : > { %v7675_v2 = vpack.c.bf16 %v10838_v21, %v10820_v26  ;;  %v3138_v37 = vmul.f32 %v10838_v21, %v10838_v21  ;;  %v2941_v62 = vpop.f32.mrb[19].mxu0 }
 0x491   : > { %v7705_v61 = vpack.c.bf16 %v3138_v37, %v3137_v36  ;;  %7676 = vmatpush1.bf16.msra.mxu1 %v7675_v2 }
 0x492   : > { %7677 = vmatprep.subr.bf16.mxu1 %v13763_v41 }
 0x495   : > { %7679 = vmatpush1.bf16.msra.mxu1 %v7678_v8 }
 0x496   : > { %7680 = vmatprep.subr.bf16.mxu1 %v13763_v41 }
 0x499   : > { %7682 = vmatpush1.bf16.msra.mxu1 %v7681_v29 }
 0x49a   : > { %7683 = vmatprep.subr.bf16.mxu1 %v13763_v41 }
 0x4a2   : > { %v10849_v48 = vpop.f32.mrb[10].mxu1 }
 0x4a3   : > { %v7684_v53 = vpack.c.bf16 %v10849_v48, %v10836_v1  ;;  %v3144_v62 = vmul.f32 %v10849_v48, %v10849_v48  ;;  %v2971_v37 = vpop.f32.mrb[11].mxu1 }
 0x4a5   : > { %v7714_v2 = vpack.c.bf16 %v3144_v62, %v3143_v58  ;;  %7685 = vmatpush1.bf16.msra.mxu1 %v7684_v53 }
 0x4a6   : > { %7686 = vmatprep.subr.bf16.mxu1 %v13763_v41 }
 0x4b2   : > { %v10858_v36 = vpop.f32.mrb[12].mxu1 }
 0x4b3   : > { %v2976_v29 = vpop.f32.mrb[13].mxu1  ;;  %v3145_v59 = vmul.f32 %v10858_v36, %v10858_v36 }
 0x4c2   : > { %v10860_v8 = vpop.f32.mrb[14].mxu1 }
 0x4c3   : > { %v7687_v0 = vpack.c.bf16 %v10860_v8, %v10858_v36  ;;  %v3146_v12 = vmul.f32 %v10860_v8, %v10860_v8  ;;  %v2981_v19 = vpop.f32.mrb[15].mxu1 }
 0x4c5   : > { %v7717_v37 = vpack.c.bf16 %v3146_v12, %v3145_v59  ;;  %7688 = vmatpush1.bf16.msra.mxu1 %v7687_v0  ;;  %v13778_v59 = vpack.c.bf16 %v10626_v17, %v10619_v54  ;;  %v13782_v54 = vpack.c.bf16 %v10788_v43, %v10782_v14 }
 0x4c6   : > { %v10868_v58 = vpop.f32.mrb[16].mxu1  ;;  %7689 = vmatprep.subr.bf16.mxu1 %v13763_v41 }
 0x4c7   : > { %v2986_v53 = vpop.f32.mrb[17].mxu1  ;;  %v3147_v29 = vmul.f32 %v10868_v58, %v10868_v58 }
 0x4c8   : > { %v10959_v53 = vld [vmem:[%s13783_s13 + $0x28] sm:$0xff] }
 0x4d7   : > { %v10871_v62 = vpop.f32.mrb[18].mxu1 }
 0x4d8   : > { %v7690_v3 = vpack.c.bf16 %v10871_v62, %v10868_v58  ;;  %v3148_v15 = vmul.f32 %v10871_v62, %v10871_v62  ;;  %v2991_v18 = vpop.f32.mrb[19].mxu1 }
 0x4d9   : > { %v13779_v18 = vpack.c.bf16 %v10685_v33, %v10677_v11 }
 0x4da   : > { %v7720_v19 = vpack.c.bf16 %v3148_v15, %v3147_v29  ;;  %7691 = vmatpush1.bf16.msra.mxu1 %v7690_v3  ;;  %v13780_v3 = vpack.c.bf16 %v10770_v20, %v10764_v35  ;;  %v13781_v15 = vpack.c.bf16 %v10802_v25, %v10796_v30  ;;  %v675_v30 = vld [vmem:[%s13783_s13 + $0x8] sm:$0xff]  ;;  %v676_v25 = vld [vmem:[%s13783_s13 + $0x10] sm:$0xff] }
 0x4db   : > { %3096 = vmatprep.subr.mxu1 %v10599_v39  ;;  %v10968_v29 = vld [vmem:[%s13783_s13 + $0x30] sm:$0xff] }
 0x4e2   : > { %v10880_v12 = vpop.f32.mrb[20].mxu1 }
 0x4e3   : > { %v2996_v0 = vpop.f32.mrb[21].mxu1  ;;  %7037 = vmatpush1.msk.msra.mxu1 %vm876_vm7, %v10880_v12 }
 0x4e4   : > { %3121 = vmatmul.mubr.f32.vlgmr.msra.gmra.mrb[22].mxu1 %v10812_v31  ;;  %7692 = vmatprep.subr.bf16.mxu1 %v13763_v41  ;;  %v10986_v0 = vld [vmem:[%s13783_s13 + $0x40] sm:$0xff] }
 0x4e5   : > { %7694 = vmatpush1.bf16.msra.mxu1 %v13778_v59  ;;  %7040 = vmatprep.mubr.msk.f32.mxu1 %vm3050_vm0, %v10816_v57  ;;  %v683_v59 = vld [vmem:[%s13783_s13 + $0x48] sm:$0xff] }
 0x4e6   : > { %7695 = vmatprep.subr.bf16.mxu1 %v13763_v41 }
 0x4e9   : > { %7697 = vmatpush1.bf16.msra.mxu1 %v13779_v18  ;;  %v684_v18 = vld [vmem:[%s13783_s13 + $0x50] sm:$0xff] }
 0x4ea   : > { %7698 = vmatprep.subr.bf16.mxu1 %v13763_v41 }
 0x4ed   : > { %7700 = vmatpush1.bf16.msra.mxu1 %v13780_v3 }
 0x4ee   : > { %7701 = vmatprep.subr.bf16.mxu1 %v13763_v41 }
 0x4f1   : > { %7703 = vmatpush1.bf16.msra.mxu1 %v13781_v15 }
 0x4f2   : > { %7704 = vmatprep.subr.bf16.mxu1 %v13763_v41 }
 0x4f5   : > { %7706 = vmatpush1.bf16.msra.mxu1 %v7705_v61  ;;  %v3149_v61 = vmul.f32 %v10880_v12, %v10880_v12 }
 0x4f6   : > { %7707 = vmatprep.subr.bf16.mxu1 %v13763_v41 }
 0x4f9   : > { %7709 = vmatpush1.bf16.msra.mxu1 %v13782_v54 }
 0x4fa   : > { %7710 = vmatprep.subr.bf16.mxu1 %v13763_v41 }
 0x4fd   : > { %7712 = vmatpush1.bf16.msra.mxu1 %v7711_v40 }
 0x4fe   : > { %7713 = vmatprep.subr.bf16.mxu1 %v13763_v41 }
 0x501   : > { %7715 = vmatpush1.bf16.msra.mxu1 %v7714_v2  ;;  %v677_v2 = vld [vmem:[%s13783_s13 + $0x18] sm:$0xff] }
 0x502   : > { %7716 = vmatprep.subr.bf16.mxu1 %v13763_v41 }
 0x505   : > { %7718 = vmatpush1.bf16.msra.mxu1 %v7717_v37  ;;  %v678_v37 = vld [vmem:[%s13783_s13 + $0x20] sm:$0xff] }
 0x506   : > { %7719 = vmatprep.subr.bf16.mxu1 %v13763_v41 }
 0x509   : > { %7721 = vmatpush1.bf16.msra.mxu1 %v7720_v19  ;;  %v10977_v19 = vld [vmem:[%s13783_s13 + $0x38] sm:$0xff] }
 0x50a   : > { %3193 = vmatprep.subr.mxu1 %v10599_v39 }
 0x50d   : > { %7039 = vmatpush1.msk.msra.mxu1 %vm876_vm7, %v3149_v61 }
 0x50e   : > { %3218 = vmatmul.mubr.f32.vlgmr.msra.gmra.mrb[24].mxu1 %v10812_v31  ;;  %7298 = vmatprep.subr.mxu1 %v10599_v39  ;;  %v674_v31 = vld [vmem:[%s13783_s13] sm:$0xff] }
 0x50f   : > { %7300 = vmatprep.mubr.msk.f32.mxu1 %vm8186_vm10, %v10599_v39 }
 0x5b7   : > { %v3122_v40 = vpop.f32.mrb[22].mxu1 }
 0x5b8   : > { %v3126_v17 = vsel %vm755_vm1, %v3122_v40, 0.0  ;;  %v3124_v11 = vpop.f32.mrb[23].mxu1  ;;  %v685_v40 = vld [vmem:[%s13783_s13 + $0x58] sm:$0xff] }
 0x5b9   : > { %3127 = vadd.xlane.f32.xlu0 %v3126_v17  ;;  %v686_v11 = vld [vmem:[%s13783_s13 + $0x60] sm:$0xff] }
 0x5e1   : > { %v3219_v33 = vpop.f32.mrb[24].mxu1 }
 0x5e2   : > { %v3223_v35 = vsel %vm755_vm1, %v3219_v33, 0.0  ;;  %v3221_v20 = vpop.f32.mrb[25].mxu1  ;;  %v687_v33 = vld [vmem:[%s13783_s13 + $0x68] sm:$0xff] }
 0x5e3   : > { %3224 = vadd.xlane.f32.xlu1 %v3223_v35  ;;  %v688_v35 = vld [vmem:[%s13783_s13 + $0x70] sm:$0xff] }
 0x646   : > { %v3128_v14 = vpop.xlane.xlu0 %3127 }
 0x647   : > { %v3226_v43 = vmul.f32 0.00077160494, %v3128_v14  ;;  %v689_v14 = vld [vmem:[%s13783_s13 + $0x78] sm:$0xff] }
 0x649   : > { %7299 = vmatpush3.msk.msra.mxu1 %vm876_vm7, %v3226_v43  ;;  %v3228_v15 = vmul.f32 %v3226_v43, %v3226_v43  ;;  %v690_v43 = vld [vmem:[%s13783_s13 + $0x80] sm:$0xff] }
 0x64a   : > { %7301 = vmatmul.mubr.msk.f32.vlgmr.msra.gmra.mrb[26].mxu1 %vm3232_vm12, %v674_v31  ;;  %7722 = vmatprep.subr.bf16.mxu1 %v13763_v41 }
 0x64b   : > { %7303 = vmatprep.mubr.msk.f32.mxu1 %vm8186_vm10, %v10599_v39 }
 0x64e   : > { %7304 = vmatmul.mubr.msk.f32.gmra.mrb[28].mxu1 %vm3232_vm12, %v675_v30 }
 0x64f   : > { %7306 = vmatprep.mubr.msk.f32.mxu1 %vm8186_vm10, %v10599_v39 }
 0x652   : > { %7307 = vmatmul.mubr.msk.f32.gmra.mrb[30].mxu1 %vm3232_vm12, %v676_v25 }
 0x653   : > { %7309 = vmatprep.mubr.msk.f32.mxu1 %vm8186_vm10, %v10599_v39 }
 0x656   : > { %7310 = vmatmul.mubr.msk.f32.gmra.mrb[32].mxu1 %vm3232_vm12, %v677_v2 }
 0x657   : > { %7312 = vmatprep.mubr.msk.f32.mxu1 %vm8186_vm10, %v10599_v39 }
 0x65a   : > { %7313 = vmatmul.mubr.msk.f32.gmra.mrb[34].mxu1 %vm3232_vm12, %v678_v37 }
 0x65b   : > { %7315 = vmatprep.mubr.msk.f32.mxu1 %vm8186_vm10, %v10599_v39 }
 0x65e   : > { %7316 = vmatmul.mubr.msk.f32.gmra.mrb[36].mxu1 %vm3232_vm12, %v10959_v53 }
 0x65f   : > { %7318 = vmatprep.mubr.msk.f32.mxu1 %vm8186_vm10, %v10599_v39 }
 0x662   : > { %7319 = vmatmul.mubr.msk.f32.gmra.mrb[38].mxu1 %vm3232_vm12, %v10968_v29 }
 0x663   : > { %7321 = vmatprep.mubr.msk.f32.mxu1 %vm8186_vm10, %v10599_v39 }
 0x666   : > { %7322 = vmatmul.mubr.msk.f32.gmra.mrb[40].mxu1 %vm3232_vm12, %v10977_v19 }
 0x667   : > { %7324 = vmatprep.mubr.msk.f32.mxu1 %vm8186_vm10, %v10599_v39 }
 0x66a   : > { %7325 = vmatmul.mubr.msk.f32.gmra.mrb[42].mxu1 %vm3232_vm12, %v10986_v0 }
 0x66b   : > { %7327 = vmatprep.mubr.msk.f32.mxu1 %vm8186_vm10, %v10599_v39 }
 0x66e   : > { %7328 = vmatmul.mubr.msk.f32.gmra.mrb[44].mxu1 %vm3232_vm12, %v683_v59 }
 0x66f   : > { %7330 = vmatprep.mubr.msk.f32.mxu1 %vm8186_vm10, %v10599_v39 }
 0x670   : > { %v3225_v3 = vpop.xlane.xlu1 %3224 }
 0x671   : > { %v3227_v54 = vmul.f32 0.00077160494, %v3225_v3 }
 0x672   : > { %7331 = vmatmul.mubr.msk.f32.gmra.mrb[46].mxu1 %vm3232_vm12, %v684_v18 }
 0x673   : > { %v3229_v61 = vsub.f32 %v3227_v54, %v3228_v15  ;;  %7333 = vmatprep.mubr.msk.f32.mxu1 %vm8186_vm10, %v10599_v39 }
 0x675   : > { %v3230_v17 = vadd.f32 1e-05, %v3229_v61 }
 0x676   : > { %7334 = vmatmul.mubr.msk.f32.gmra.mrb[48].mxu1 %vm3232_vm12, %v685_v40 }
 0x677   : > { %8032 = vrsqrt.f32 %v3230_v17  ;;  %7336 = vmatprep.mubr.msk.f32.mxu1 %vm8186_vm10, %v10599_v39 }
 0x67a   : > { %7337 = vmatmul.mubr.msk.f32.gmra.mrb[50].mxu1 %vm3232_vm12, %v686_v11 }
 0x67b   : > { %7339 = vmatprep.mubr.msk.f32.mxu1 %vm8186_vm10, %v10599_v39 }
 0x67e   : > { %7340 = vmatmul.mubr.msk.f32.gmra.mrb[52].mxu1 %vm3232_vm12, %v687_v33 }
 0x67f   : > { %7342 = vmatprep.mubr.msk.f32.mxu1 %vm8186_vm10, %v10599_v39 }
 0x681   : > { %v8033_v20 = vpop.eup %8032 }
 0x682   : > { %7343 = vmatmul.mubr.msk.f32.gmra.mrb[54].mxu1 %vm3232_vm12, %v688_v35  ;;  %7364 = vmatpush3.msk.msra.mxu0 %vm876_vm7, %v8033_v20 }
 0x683   : > { %7366 = vmatmul.mubr.msk.f32.vlgmr.msra.gmra.mrb[20].mxu0 %vm3232_vm12, %v674_v31  ;;  %7345 = vmatprep.mubr.msk.f32.mxu1 %vm8186_vm10, %v10599_v39  ;;  %v691_v31 = vld [vmem:[%s13783_s13 + $0x88] sm:$0xff] }
 0x684   : > { %7368 = vmatprep.mubr.msk.f32.mxu0 %vm8186_vm10, %v10599_v39  ;;  %7749 = vmatprep.subr.bf16.mxu0 %v13763_v41 }
 0x686   : > { %7346 = vmatmul.mubr.msk.f32.gmra.mrb[56].mxu1 %vm3232_vm12, %v689_v14 }
 0x687   : > { %7369 = vmatmul.mubr.msk.f32.gmra.mrb[22].mxu0 %vm3232_vm12, %v675_v30  ;;  %7348 = vmatprep.mubr.msk.f32.mxu1 %vm8186_vm10, %v10599_v39  ;;  %v692_v30 = vld [vmem:[%s13783_s13 + $0x90] sm:$0xff] }
 0x688   : > { %7371 = vmatprep.mubr.msk.f32.mxu0 %vm8186_vm10, %v10599_v39 }
 0x68a   : > { %7349 = vmatmul.mubr.msk.f32.gmra.mrb[58].mxu1 %vm3232_vm12, %v690_v43 }
 0x68b   : > { %7372 = vmatmul.mubr.msk.f32.gmra.mrb[24].mxu0 %vm3232_vm12, %v676_v25  ;;  %7351 = vmatprep.mubr.msk.f32.mxu1 %vm8186_vm10, %v10599_v39  ;;  %v693_v25 = vld [vmem:[%s13783_s13 + $0x98] sm:$0xff] }
 0x68c   : > { %7374 = vmatprep.mubr.msk.f32.mxu0 %vm8186_vm10, %v10599_v39 }
 0x68e   : > { %7352 = vmatmul.mubr.msk.f32.gmra.mrb[60].mxu1 %vm3232_vm12, %v691_v31 }
 0x68f   : > { %7375 = vmatmul.mubr.msk.f32.gmra.mrb[26].mxu0 %vm3232_vm12, %v677_v2  ;;  %7354 = vmatprep.mubr.msk.f32.mxu1 %vm8186_vm10, %v10599_v39  ;;  %v694_v2 = vld [vmem:[%s13783_s13 + $0xa0] sm:$0x3] }
 0x690   : > { %7377 = vmatprep.mubr.msk.f32.mxu0 %vm8186_vm10, %v10599_v39 }
 0x692   : > { %7355 = vmatmul.mubr.msk.f32.gmra.mrb[62].mxu1 %vm3232_vm12, %v692_v30 }
 0x693   : > { %7378 = vmatmul.mubr.msk.f32.gmra.mrb[28].mxu0 %vm3232_vm12, %v678_v37  ;;  %7357 = vmatprep.mubr.msk.f32.mxu1 %vm8186_vm10, %v10599_v39 }
 0x694   : > { %7380 = vmatprep.mubr.msk.f32.mxu0 %vm8186_vm10, %v10599_v39 }
 0x696   : > { %7358 = vmatmul.mubr.msk.f32.gmra.mrb[64].mxu1 %vm3232_vm12, %v693_v25 }
 0x697   : > { %7381 = vmatmul.mubr.msk.f32.gmra.mrb[30].mxu0 %vm3232_vm12, %v10959_v53  ;;  %7360 = vmatprep.mubr.msk.f32.mxu1 %vm8186_vm10, %v10599_v39 }
 0x698   : > { %7383 = vmatprep.mubr.msk.f32.mxu0 %vm8186_vm10, %v10599_v39 }
 0x69a   : > { %7361 = vmatmul.mubr.msk.f32.gmra.mrb[66].mxu1 %vm3232_vm12, %v694_v2 }
 0x69b   : > { %7384 = vmatmul.mubr.msk.f32.gmra.mrb[32].mxu0 %vm3232_vm12, %v10968_v29 }
 0x69c   : > { %7386 = vmatprep.mubr.msk.f32.mxu0 %vm8186_vm10, %v10599_v39 }
 0x69f   : > { %7387 = vmatmul.mubr.msk.f32.gmra.mrb[34].mxu0 %vm3232_vm12, %v10977_v19 }
 0x6a0   : > { %7389 = vmatprep.mubr.msk.f32.mxu0 %vm8186_vm10, %v10599_v39 }
 0x6a3   : > { %7390 = vmatmul.mubr.msk.f32.gmra.mrb[36].mxu0 %vm3232_vm12, %v10986_v0 }
 0x6a4   : > { %7392 = vmatprep.mubr.msk.f32.mxu0 %vm8186_vm10, %v10599_v39 }
 0x6a7   : > { %7393 = vmatmul.mubr.msk.f32.gmra.mrb[38].mxu0 %vm3232_vm12, %v683_v59 }
 0x6a8   : > { %7395 = vmatprep.mubr.msk.f32.mxu0 %vm8186_vm10, %v10599_v39 }
 0x6ab   : > { %7396 = vmatmul.mubr.msk.f32.gmra.mrb[40].mxu0 %vm3232_vm12, %v684_v18 }
 0x6ac   : > { %7398 = vmatprep.mubr.msk.f32.mxu0 %vm8186_vm10, %v10599_v39 }
 0x6af   : > { %7399 = vmatmul.mubr.msk.f32.gmra.mrb[42].mxu0 %vm3232_vm12, %v685_v40 }
 0x6b0   : > { %7401 = vmatprep.mubr.msk.f32.mxu0 %vm8186_vm10, %v10599_v39 }
 0x6b3   : > { %7402 = vmatmul.mubr.msk.f32.gmra.mrb[44].mxu0 %vm3232_vm12, %v686_v11 }
 0x6b4   : > { %7404 = vmatprep.mubr.msk.f32.mxu0 %vm8186_vm10, %v10599_v39 }
 0x6b7   : > { %7405 = vmatmul.mubr.msk.f32.gmra.mrb[46].mxu0 %vm3232_vm12, %v687_v33 }
 0x6b8   : > { %7407 = vmatprep.mubr.msk.f32.mxu0 %vm8186_vm10, %v10599_v39 }
 0x6bb   : > { %7408 = vmatmul.mubr.msk.f32.gmra.mrb[48].mxu0 %vm3232_vm12, %v688_v35 }
 0x6bc   : > { %7410 = vmatprep.mubr.msk.f32.mxu0 %vm8186_vm10, %v10599_v39 }
 0x6bf   : > { %7411 = vmatmul.mubr.msk.f32.gmra.mrb[50].mxu0 %vm3232_vm12, %v689_v14 }
 0x6c0   : > { %7413 = vmatprep.mubr.msk.f32.mxu0 %vm8186_vm10, %v10599_v39 }
 0x6c3   : > { %7414 = vmatmul.mubr.msk.f32.gmra.mrb[52].mxu0 %vm3232_vm12, %v690_v43 }
 0x6c4   : > { %7416 = vmatprep.mubr.msk.f32.mxu0 %vm8186_vm10, %v10599_v39 }
 0x6c7   : > { %7417 = vmatmul.mubr.msk.f32.gmra.mrb[54].mxu0 %vm3232_vm12, %v691_v31 }
 0x6c8   : > { %7419 = vmatprep.mubr.msk.f32.mxu0 %vm8186_vm10, %v10599_v39 }
 0x6cb   : > { %7420 = vmatmul.mubr.msk.f32.gmra.mrb[56].mxu0 %vm3232_vm12, %v692_v30 }
 0x6cc   : > { %7422 = vmatprep.mubr.msk.f32.mxu0 %vm8186_vm10, %v10599_v39 }
 0x6cf   : > { %7423 = vmatmul.mubr.msk.f32.gmra.mrb[58].mxu0 %vm3232_vm12, %v693_v25 }
 0x6d0   : > { %7425 = vmatprep.mubr.msk.f32.mxu0 %vm8186_vm10, %v10599_v39 }
 0x6d3   : > { %7426 = vmatmul.mubr.msk.f32.gmra.mrb[60].mxu0 %vm3232_vm12, %v694_v2 }
 0x6d4   : > { %7107 = vmatprep.mubr.msk.f32.mxu0 %vm3050_vm0, %v10816_v57  ;;  %v3020_v57 = vld [vmem:[%s8309_s15 + $0x8] sm:$0xff] }
 0x71d   : > { %v3365_v37 = vpop.f32.mrb[26].mxu1 }
 0x71e   : > { %3644 = vperm.xlu0 %8029, %v3365_v37   ;;  %v7302_v53 = vpop.f32.mrb[27].mxu1 }
 0x721   : > { %v3370_v29 = vpop.f32.mrb[28].mxu1 }
 0x722   : > { %3649 = vperm.xlu1 %8031, %v3370_v29   ;;  %v7305_v19 = vpop.f32.mrb[29].mxu1 }
 0x725   : > { %v3375_v0 = vpop.f32.mrb[30].mxu1 }
 0x726   : > { %3654 = vperm.xlu1 %8031, %v3375_v0   ;;  %v7308_v59 = vpop.f32.mrb[31].mxu1 }
 0x729   : > { %v3380_v18 = vpop.f32.mrb[32].mxu1 }
 0x72a   : > { %3659 = vperm.xlu1 %8031, %v3380_v18   ;;  %v7311_v3 = vpop.f32.mrb[33].mxu1 }
 0x72d   : > { %v3385_v15 = vpop.f32.mrb[34].mxu1 }
 0x72e   : > { %3664 = vperm.xlu0 %8029, %v3385_v15   ;;  %v7314_v54 = vpop.f32.mrb[35].mxu1 }
 0x731   : > { %v3390_v61 = vpop.f32.mrb[36].mxu1 }
 0x732   : > { %3669 = vperm.xlu0 %8029, %v3390_v61   ;;  %v7317_v40 = vpop.f32.mrb[37].mxu1 }
 0x735   : > { %v3395_v17 = vpop.f32.mrb[38].mxu1 }
 0x736   : > { %3674 = vperm.xlu0 %8029, %v3395_v17   ;;  %v7320_v11 = vpop.f32.mrb[39].mxu1 }
 0x739   : > { %v3400_v33 = vpop.f32.mrb[40].mxu1 }
 0x73a   : > { %3679 = vperm.xlu0 %8029, %v3400_v33   ;;  %v7323_v35 = vpop.f32.mrb[41].mxu1 }
 0x73d   : > { %v3405_v20 = vpop.f32.mrb[42].mxu1 }
 0x73e   : > { %3684 = vperm.xlu0 %8029, %v3405_v20   ;;  %v7326_v14 = vpop.f32.mrb[43].mxu1 }
 0x741   : > { %v3410_v43 = vpop.f32.mrb[44].mxu1 }
 0x742   : > { %3689 = vperm.xlu0 %8029, %v3410_v43   ;;  %v7329_v31 = vpop.f32.mrb[45].mxu1 }
 0x745   : > { %v3415_v30 = vpop.f32.mrb[46].mxu1 }
 0x746   : > { %3694 = vperm.xlu0 %8029, %v3415_v30   ;;  %v7332_v25 = vpop.f32.mrb[47].mxu1 }
 0x749   : > { %v3420_v2 = vpop.f32.mrb[48].mxu1 }
 0x74a   : > { %3699 = vperm.xlu0 %8029, %v3420_v2   ;;  %v7335_v37 = vpop.f32.mrb[49].mxu1 }
 0x74d   : > { %v3425_v53 = vpop.f32.mrb[50].mxu1 }
 0x74e   : > { %3704 = vperm.xlu0 %8029, %v3425_v53   ;;  %v7338_v29 = vpop.f32.mrb[51].mxu1 }
 0x751   : > { %v3430_v19 = vpop.f32.mrb[52].mxu1 }
 0x752   : > { %3709 = vperm.xlu0 %8029, %v3430_v19   ;;  %v7341_v0 = vpop.f32.mrb[53].mxu1 }
 0x755   : > { %v3435_v59 = vpop.f32.mrb[54].mxu1 }
 0x756   : > { %3714 = vperm.xlu0 %8029, %v3435_v59   ;;  %v3538_v18 = vpop.f32.mrb[20].mxu0  ;;  %v7344_v3 = vpop.f32.mrb[55].mxu1 }
 0x757   : > { %3770 = vperm.xlu1 %8031, %v3538_v18   ;;  %v7367_v15 = vpop.f32.mrb[21].mxu0 }
 0x759   : > { %v3440_v54 = vpop.f32.mrb[56].mxu1 }
 0x75a   : > { %3719 = vperm.xlu0 %8029, %v3440_v54   ;;  %v3543_v61 = vpop.f32.mrb[22].mxu0  ;;  %v7347_v40 = vpop.f32.mrb[57].mxu1 }
 0x75b   : > { %3775 = vperm.xlu1 %8031, %v3543_v61   ;;  %v7370_v17 = vpop.f32.mrb[23].mxu0 }
 0x75d   : > { %v3445_v11 = vpop.f32.mrb[58].mxu1 }
 0x75e   : > { %3724 = vperm.xlu0 %8029, %v3445_v11   ;;  %v3548_v33 = vpop.f32.mrb[24].mxu0  ;;  %v7350_v35 = vpop.f32.mrb[59].mxu1 }
 0x75f   : > { %3780 = vperm.xlu1 %8031, %v3548_v33   ;;  %v7373_v20 = vpop.f32.mrb[25].mxu0 }
 0x761   : > { %v3450_v14 = vpop.f32.mrb[60].mxu1 }
 0x762   : > { %3729 = vperm.xlu0 %8029, %v3450_v14   ;;  %v3553_v43 = vpop.f32.mrb[26].mxu0  ;;  %v7353_v31 = vpop.f32.mrb[61].mxu1 }
 0x763   : > { %3785 = vperm.xlu1 %8031, %v3553_v43   ;;  %v7376_v30 = vpop.f32.mrb[27].mxu0 }
 0x765   : > { %v3455_v25 = vpop.f32.mrb[62].mxu1 }
 0x766   : > { %3734 = vperm.xlu0 %8029, %v3455_v25   ;;  %v3558_v2 = vpop.f32.mrb[28].mxu0  ;;  %v7356_v37 = vpop.f32.mrb[63].mxu1 }
 0x767   : > { %3790 = vperm.xlu1 %8031, %v3558_v2   ;;  %v7379_v53 = vpop.f32.mrb[29].mxu0 }
 0x769   : > { %v3460_v29 = vpop.f32.mrb[64].mxu1 }
 0x76a   : > { %3739 = vperm.xlu0 %8029, %v3460_v29   ;;  %v3563_v19 = vpop.f32.mrb[30].mxu0  ;;  %v7359_v0 = vpop.f32.mrb[65].mxu1 }
 0x76b   : > { %3795 = vperm.xlu1 %8031, %v3563_v19   ;;  %v7382_v59 = vpop.f32.mrb[31].mxu0 }
 0x76d   : > { %v3465_v18 = vpop.f32.mrb[66].mxu1 }
 0x76e   : > { %3744 = vperm.xlu0 %8029, %v3465_v18   ;;  %v3568_v3 = vpop.f32.mrb[32].mxu0  ;;  %v7362_v15 = vpop.f32.mrb[67].mxu1 }
 0x76f   : > { %3800 = vperm.xlu1 %8031, %v3568_v3   ;;  %v7385_v54 = vpop.f32.mrb[33].mxu0 }
 0x772   : > { %v3573_v61 = vpop.f32.mrb[34].mxu0 }
 0x773   : > { %3805 = vperm.xlu1 %8031, %v3573_v61   ;;  %v7388_v40 = vpop.f32.mrb[35].mxu0 }
 0x776   : > { %v3578_v17 = vpop.f32.mrb[36].mxu0 }
 0x777   : > { %3810 = vperm.xlu1 %8031, %v3578_v17   ;;  %v7391_v11 = vpop.f32.mrb[37].mxu0 }
 0x77a   : > { %v3583_v33 = vpop.f32.mrb[38].mxu0 }
 0x77b   : > { %3815 = vperm.xlu1 %8031, %v3583_v33   ;;  %v7394_v35 = vpop.f32.mrb[39].mxu0 }
 0x77e   : > { %v3588_v20 = vpop.f32.mrb[40].mxu0 }
 0x77f   : > { %3820 = vperm.xlu1 %8031, %v3588_v20   ;;  %v7397_v14 = vpop.f32.mrb[41].mxu0 }
 0x782   : > { %v3593_v43 = vpop.f32.mrb[42].mxu0 }
 0x783   : > { %3825 = vperm.xlu1 %8031, %v3593_v43   ;;  %v7400_v31 = vpop.f32.mrb[43].mxu0 }
 0x786   : > { %v3598_v30 = vpop.f32.mrb[44].mxu0 }
 0x787   : > { %3830 = vperm.xlu1 %8031, %v3598_v30   ;;  %v7403_v25 = vpop.f32.mrb[45].mxu0 }
 0x788   : > { %v3957_v25 = vld [vmem:[%s8299_s24] sm:$0xff] }
 0x78a   : > { %v3603_v2 = vpop.f32.mrb[46].mxu0 }
 0x78b   : > { %3835 = vperm.xlu1 %8031, %v3603_v2   ;;  %v7406_v37 = vpop.f32.mrb[47].mxu0  ;;  %v3958_v2 = vld [vmem:[%s8299_s24 + $0x8] sm:$0xff] }
 0x78c   : > { %v7723_v37 = vpack.c.bf16 %v3958_v2, %v3957_v25  ;;  %v3962_v25 = vld [vmem:[%s8299_s24 + $0x28] sm:$0xff] }
 0x78e   : > { %v3608_v53 = vpop.f32.mrb[48].mxu0  ;;  %7724 = vmatpush1.bf16.msra.mxu1 %v7723_v37 }
 0x78f   : > { %3840 = vperm.xlu1 %8031, %v3608_v53   ;;  %v7409_v29 = vpop.f32.mrb[49].mxu0  ;;  %7725 = vmatprep.subr.bf16.mxu1 %v13763_v41 }
 0x792   : > { %v3613_v19 = vpop.f32.mrb[50].mxu0 }
 0x793   : > { %3845 = vperm.xlu1 %8031, %v3613_v19   ;;  %v7412_v0 = vpop.f32.mrb[51].mxu0  ;;  %v3959_v19 = vld [vmem:[%s8299_s24 + $0x10] sm:$0xff] }
 0x794   : > { %v3960_v0 = vld [vmem:[%s8299_s24 + $0x18] sm:$0xff] }
 0x796   : > { %v3618_v59 = vpop.f32.mrb[52].mxu0 }
 0x797   : > { %3850 = vperm.xlu1 %8031, %v3618_v59   ;;  %v7415_v18 = vpop.f32.mrb[53].mxu0  ;;  %v2998_v59 = vld [vmem:[%s8304_s25] sm:$0xff] }
 0x798   : > { %v7726_v18 = vpack.c.bf16 %v3960_v0, %v3959_v19 }
 0x79a   : > { %v3623_v3 = vpop.f32.mrb[54].mxu0  ;;  %7727 = vmatpush1.bf16.msra.mxu1 %v7726_v18 }
 0x79b   : > { %3855 = vperm.xlu1 %8031, %v3623_v3   ;;  %v7418_v15 = vpop.f32.mrb[55].mxu0  ;;  %7728 = vmatprep.subr.bf16.mxu1 %v13763_v41 }
 0x79d   : > { %v3645_v35 = vpop.permute.xlu0 %3644 }
 0x79e   : > { %v3628_v54 = vpop.f32.mrb[56].mxu0  ;;  %v3747_v15 = vsub.f32 %v10572_v22, %v3645_v35  ;;  %v3000_v22 = vld [vmem:[%s8304_s25 + $0x10] sm:$0xff] }
 0x79f   : > { %3860 = vperm.xlu1 %8031, %v3628_v54   ;;  %v7421_v61 = vpop.f32.mrb[57].mxu0 }
 0x7a0   : > { %v3019_v61 = vld [vmem:[%s8309_s15] sm:$0xff] }
 0x7a1   : > { %v3650_v14 = vpop.permute.xlu1 %3649 }
 0x7a2   : > { %v3633_v40 = vpop.f32.mrb[58].mxu0  ;;  %v3748_v19 = vsub.f32 %v10615_v42, %v3650_v14 }
 0x7a3   : > { %3865 = vperm.xlu1 %8031, %v3633_v40   ;;  %v7424_v17 = vpop.f32.mrb[59].mxu0  ;;  %v2999_v40 = vld [vmem:[%s8304_s25 + $0x8] sm:$0xff] }
 0x7a5   : > { %v3655_v31 = vpop.permute.xlu1 %3654 }
 0x7a6   : > { %v3638_v11 = vpop.f32.mrb[60].mxu0 }
 0x7a7   : > { %3870 = vperm.xlu1 %8031, %v3638_v11   ;;  %v7427_v33 = vpop.f32.mrb[61].mxu0 }
 0x7a8   : > { %v3961_v33 = vld [vmem:[%s8299_s24 + $0x20] sm:$0xff] }
 0x7a9   : > { %v11140_v53 = vpop.permute.xlu1 %3659  ;;  %v7729_v37 = vpack.c.bf16 %v3962_v25, %v3961_v33 }
 0x7ab   : > { %7730 = vmatpush1.bf16.msra.mxu1 %v7729_v37  ;;  %v3021_v37 = vld [vmem:[%s8309_s15 + $0x10] sm:$0xff] }
 0x7ac   : > { %7731 = vmatprep.subr.bf16.mxu1 %v13763_v41 }
 0x7ad   : > { %v11131_v20 = vpop.permute.xlu0 %3664 }
 0x7b1   : > { %v11133_v43 = vpop.permute.xlu0 %3669 }
 0x7b5   : > { %v11135_v30 = vpop.permute.xlu0 %3674 }
 0x7b9   : > { %v11142_v29 = vpop.permute.xlu0 %3679 }
 0x7bd   : > { %v11151_v17 = vpop.permute.xlu0 %3684 }
 0x7c1   : > { %v11164_v25 = vpop.permute.xlu0 %3689 }
 0x7d6   : > { %v3771_v3 = vpop.permute.xlu1 %3770 }
 0x7d7   : > { %v3873_v54 = vmul.f32 %v3771_v3, %v2998_v59  ;;  %v3963_v3 = vld [vmem:[%s8299_s24 + $0x30] sm:$0xff] }
 0x7d9   : > { %v3894_v11 = vmul.f32 %v3873_v54, %v3747_v15  ;;  %v3964_v15 = vld [vmem:[%s8299_s24 + $0x38] sm:$0xff]  ;;  %v3749_v54 = vsub.f32 %v10657_v13, %v3655_v31 }
 0x7da   : > { %v3776_v2 = vpop.permute.xlu1 %3775  ;;  %v7732_v33 = vpack.c.bf16 %v3964_v15, %v3963_v3  ;;  %v3965_v3 = vld [vmem:[%s8299_s24 + $0x40] sm:$0xff]  ;;  %v3966_v15 = vld [vmem:[%s8299_s24 + $0x48] sm:$0xff] }
 0x7db   : > { %v3915_v0 = vadd.f32 %v3894_v11, %v3019_v61  ;;  %v3874_v18 = vmul.f32 %v3776_v2, %v2999_v40  ;;  %v13784_v61 = vld [vmem:[#allocation13_spill] sm:$0xff]  ;;  %v13785_v11 = vld [vmem:[#allocation27_spill] sm:$0xff] }
 0x7dc   : > { %7733 = vmatpush1.bf16.msra.mxu1 %v7732_v33 }
 0x7dd   : > { %v11158_v35 = vmax.f32 %v3915_v0, 0.0  ;;  %v3895_v59 = vmul.f32 %v3874_v18, %v3748_v19  ;;  %v3001_v19 = vld [vmem:[%s8304_s25 + $0x18] sm:$0xff]  ;;  %7734 = vmatprep.subr.bf16.mxu1 %v13763_v41 }
 0x7de   : > { %v3781_v50 = vpop.permute.xlu1 %3780 }
 0x7df   : > { %v3916_v42 = vadd.f32 %v3895_v59, %v3020_v57  ;;  %v3875_v14 = vmul.f32 %v3781_v50, %v3000_v22  ;;  %v4313_v40 = vmul.f32 %v11158_v35, %v13784_v61  ;;  %v4563_v2 = vmul.f32 %v11158_v35, %v13785_v11  ;;  %v13786_v22 = vld [vmem:[#allocation181_spill] sm:$0xff]  ;;  %v13787_v61 = vld [vmem:[#allocation75_spill] sm:$0xff]  ;;  %v3002_v11 = vld [vmem:[%s8304_s25 + $0x20] sm:$0xff] }
 0x7e0   : > { %v4134_v0 = vrot.slane %v11158_v35, 7  ;;  %v13342_v13 = vrot.slane %v11158_v35, 6  ;;  %v3750_v57 = vsub.f32 %v10672_v4, %v11140_v53  ;;  %v3751_v4 = vsub.f32 %v10702_v5, %v11131_v20  ;;  %v3022_v53 = vld [vmem:[%s8309_s15 + $0x18] sm:$0xff]  ;;  %v13789_v5 = vld [vmem:[#allocation8_spill] sm:$0xff] }
 0x7e1   : > { %v11174_v31 = vmax.f32 %v3916_v42, 0.0  ;;  %v3896_v50 = vmul.f32 %v3875_v14, %v3749_v54  ;;  %4353 = vrot.lane.b32.xlu0 %v4313_v40, %s8178_s0  ;;  %4605 = vrot.lane.b32.xlu1 %v4563_v2, %s8175_s22  ;;  %v13788_v14 = vld [vmem:[#allocation42_spill] sm:$0xff]  ;;  %v4689_v2 = vrot.slane %v11158_v35, 1 }
 0x7e2   : > { %v3786_v18 = vpop.permute.xlu1 %3785  ;;  %v4093_v59 = vmul.f32 %v13342_v13, %v13786_v22  ;;  %v4437_v54 = vmul.f32 %v4134_v0, %v13787_v61  ;;  %v4193_v20 = vmul.f32 %v4134_v0, %v13789_v5  ;;  %v3967_v61 = vld [vmem:[%s8299_s24 + $0x50] sm:$0xff]  ;;  %v3023_v5 = vld [vmem:[%s8309_s15 + $0x20] sm:$0xff] }
 0x7e3   : > { %v3917_v33 = vadd.f32 %v3896_v50, %v3021_v37  ;;  %v3876_v42 = vmul.f32 %v3786_v18, %v3001_v19  ;;  %v4877_v40 = vmul.f32 %v11174_v31, %v13788_v14  ;;  %v4690_v22 = vrot.slane %v11174_v31, 1  ;;  %v11197_v37 = vpop.permute.xlu0 %3694  ;;  %v3968_v14 = vld [vmem:[%s8299_s24 + $0x58] sm:$0xff] }
 0x7e4   : > { %v4135_v13 = vrot.slane %v11174_v31, 7  ;;  %4113 = vst.msk [vmem:[#allocation2 + $0x10] sm:$0xfc] %vm954_vm6, %v4093_v59  ;;  %v7735_v18 = vpack.c.bf16 %v3966_v15, %v3965_v3  ;;  %v5117_v9 = vrot.slane %v11174_v31, 2  ;;  %v13790_v59 = vld [vmem:[#allocation9_spill] sm:$0xff]  ;;  %v7738_v56 = vpack.c.bf16 %v3968_v14, %v3967_v61  ;;  %v3003_v3 = vld [vmem:[%s8304_s25 + $0x28] sm:$0xff] }
 0x7e5   : > { %v11199_v19 = vmax.f32 %v3917_v33, 0.0  ;;  %v3897_v50 = vmul.f32 %v3876_v42, %v3750_v57  ;;  %4479 = vrot.lane.b32.xlu0 %v4437_v54, %s8179_s4  ;;  %4917 = vrot.lane.b32.xlu1 %v4877_v40, %s8183_s21  ;;  %v4314_v16 = vmul.f32 %v11174_v31, %v13790_v59  ;;  %v4691_v33 = vsel %vm1955_vm2, %v4689_v2, %v4690_v22  ;;  %v13793_v14 = vld [vmem:[#allocation11_spill] sm:$0xff] }
 0x7e6   : > { %v3791_v55 = vpop.permute.xlu1 %3790  ;;  %v4136_v57 = vsel %vm1056_vm3, %v4134_v0, %v4135_v13  ;;  %7736 = vmatpush1.bf16.msra.mxu1 %v7735_v18  ;;  %v3752_v15 = vsub.f32 %v10760_v27, %v11133_v43  ;;  %vm13887_vm6 = vcmask 523648  }
 0x7e7   : > { %v5118_v42 = vrot.slane %v11199_v19, 2  ;;  %v3918_v54 = vadd.f32 %v3897_v50, %v3022_v53  ;;  %v3877_v40 = vmul.f32 %v3791_v55, %v3002_v11  ;;  %7737 = vmatprep.subr.bf16.mxu1 %v13763_v41  ;;  %v13791_v55 = vld [vmem:[#allocation186_spill] sm:$0xff]  ;;  %v13792_v11 = vld [vmem:[#allocation29_spill] sm:$0xff]  ;;  %v4692_v18 = vrot.slane %v11199_v19, 1 }
 0x7e8   : > { %v4564_v50 = vmul.f32 %v11174_v31, %v13792_v11  ;;  %v4137_v27 = vrot.slane %v11199_v19, 7 }
 0x7e9   : > { %v5119_v23 = vsel %vm2626_vm5, %v5117_v9, %v5118_v42  ;;  %v11218_v59 = vmax.f32 %v3918_v54, 0.0  ;;  %v3898_v2 = vmul.f32 %v3877_v40, %v3751_v4  ;;  %4233 = vrot.lane.b32.xlu0 %v4193_v20, %s8182_s6  ;;  %4355 = vrot.lane.b32.xlu1 %v4314_v16, %s8178_s0  ;;  %v11227_v9 = vpop.permute.xlu0 %3699  ;;  %v4751_v20 = vmul.f32 %v4691_v33, %v13793_v14  ;;  %v3004_v16 = vld [vmem:[%s8304_s25 + $0x30] sm:$0xff]  ;;  %v13796_v14 = vld [vmem:[#allocation19_spill] sm:$0xff] }
 0x7ea   : > { %v5175_v0 = vmul.f32 %v5119_v23, %v13791_v55  ;;  %v3796_v53 = vpop.permute.xlu1 %3795  ;;  %7739 = vmatpush1.bf16.msra.mxu1 %v7738_v56  ;;  %v3024_v23 = vld [vmem:[%s8309_s15 + $0x28] sm:$0xff]  ;;  %v11235_v54 = vsel %vm1955_vm2, %v4690_v22, %v4692_v18  ;;  %v11238_v40 = vsel %vm1056_vm3, %v4135_v13, %v4137_v27  ;;  %v3753_v56 = vsub.f32 %v10776_v45, %v11135_v30  ;;  %v13794_v22 = vld [vmem:[#allocation198_spill] sm:$0xff] }
 0x7eb   : > { %v5120_v43 = vrot.slane %v11218_v59, 2  ;;  %v3919_v4 = vadd.f32 %v3898_v2, %v3023_v5  ;;  %v3878_v61 = vmul.f32 %v3796_v53, %v3003_v3  ;;  %7740 = vmatprep.subr.bf16.mxu1 %v13763_v41  ;;  %v13795_v2 = vld [vmem:[#allocation15_spill] sm:$0xff]  ;;  %v4694_v45 = vrot.slane %v11218_v59, 1 }
 0x7ec   : > { %5194 = vst.msk [vmem:[#allocation2 + $0x8] sm:$0xff] %vm714_vm4, %v5175_v0  ;;  %v4438_v0 = vmul.f32 %v4136_v57, %v13795_v2  ;;  %v4139_v30 = vrot.slane %v11218_v59, 7 }
 0x7ed   : > { %v5121_v55 = vsel %vm2626_vm5, %v5118_v42, %v5120_v43  ;;  %v11242_v5 = vmax.f32 %v3919_v4, 0.0  ;;  %v3899_v33 = vmul.f32 %v3878_v61, %v3752_v15  ;;  %4607 = vrot.lane.b32.xlu0 %v4564_v50, %s8175_s22  ;;  %4793 = vrot.lane.b32.xlu1 %v4751_v20, %s8177_s3  ;;  %v4194_v4 = vmul.f32 %v4136_v57, %v13796_v14  ;;  %v3025_v50 = vld [vmem:[%s8309_s15 + $0x30] sm:$0xff]  ;;  %v3005_v61 = vld [vmem:[%s8304_s25 + $0x38] sm:$0xff]  ;;  %v11259_v20 = vpop.permute.xlu0 %3704  ;;  %v13798_v57 = vld [vmem:[#allocation202_spill] sm:$0xff] }
 0x7ee   : > { %v5176_v3 = vmul.f32 %v5121_v55, %v13794_v22  ;;  %v3801_v13 = vpop.permute.xlu1 %3800  ;;  %v3754_v15 = vsub.f32 %v10792_v60, %v11142_v29  ;;  %v13797_v60 = vld [vmem:[#allocation24_spill] sm:$0xff] }
 0x7ef   : > { %v5122_v53 = vrot.slane %v11242_v5, 2  ;;  %v3920_v11 = vadd.f32 %v3899_v33, %v3024_v23  ;;  %v3879_v42 = vmul.f32 %v3801_v13, %v3004_v16  ;;  %v4878_v29 = vmul.f32 %v11199_v19, %v13797_v60 }
 0x7f0   : > { %5195 = vst.msk [vmem:[#allocation2 + $0x18] sm:$0xff] %vm714_vm4, %v5176_v3  ;;  %v11270_v3 = vsel %vm1955_vm2, %v4692_v18, %v4694_v45  ;;  %v4696_v13 = vrot.slane %v11242_v5, 1  ;;  %v3006_v18 = vld [vmem:[%s8304_s25 + $0x40] sm:$0xff] }
 0x7f1   : > { %v5123_v55 = vsel %vm2626_vm5, %v5120_v43, %v5122_v53  ;;  %v11262_v22 = vmax.f32 %v3920_v11, 0.0  ;;  %v3900_v23 = vmul.f32 %v3879_v42, %v3753_v56  ;;  %4481 = vrot.lane.b32.xlu0 %v4438_v0, %s8179_s4  ;;  %4235 = vrot.lane.b32.xlu1 %v4194_v4, %s8182_s6  ;;  %v11273_v43 = vsel %vm1056_vm3, %v4137_v27, %v4139_v30  ;;  %v13799_v42 = vld [vmem:[#allocation28_spill] sm:$0xff]  ;;  %v3026_v4 = vld [vmem:[%s8309_s15 + $0x38] sm:$0xff] }
 0x7f2   : > { %v5177_v16 = vmul.f32 %v5123_v55, %v13798_v57  ;;  %v3806_v33 = vpop.permute.xlu1 %3805  ;;  %v4565_v14 = vmul.f32 %v11199_v19, %v13799_v42  ;;  %v11284_v55 = vsel %vm1955_vm2, %v4694_v45, %v4696_v13 }
 0x7f3   : > { %v5124_v56 = vrot.slane %v11262_v22, 2  ;;  %v3921_v2 = vadd.f32 %v3900_v23, %v3025_v50  ;;  %v3880_v0 = vmul.f32 %v3806_v33, %v3005_v61  ;;  %v5214_v11 = vld [vmem:[#allocation2 + $0x8] sm:$0xff]  ;;  %v3755_v61 = vsub.f32 %v10820_v26, %v11151_v17  ;;  %v11297_v33 = vpop.permute.xlu0 %3709  ;;  %v3027_v26 = vld [vmem:[%s8309_s15 + $0x40] sm:$0xff] }
 0x7f4   : > { %5196 = vst.msk [vmem:[#allocation2 + $0x28] sm:$0xff] %vm714_vm4, %v5177_v16  ;;  %7085 = vmatprep.mubr.msk.f32.mxu1 %vm714_vm4, %v5214_v11  ;;  %v13800_v16 = vld [vmem:[#allocation33_spill] sm:$0xff]  ;;  %v3007_v17 = vld [vmem:[%s8304_s25 + $0x48] sm:$0xff]  ;;  %v4698_v42 = vrot.slane %v11262_v22, 1 }
 0x7f5   : > { %v5125_v27 = vsel %vm2626_vm5, %v5122_v53, %v5124_v56  ;;  %v11287_v60 = vmax.f32 %v3921_v2, 0.0  ;;  %v3901_v50 = vmul.f32 %v3880_v0, %v3754_v15  ;;  %4919 = vrot.lane.b32.xlu0 %v4878_v29, %s8183_s21  ;;  %4609 = vrot.lane.b32.xlu1 %v4565_v14, %s8175_s22  ;;  %v4315_v45 = vmul.f32 %v11199_v19, %v13800_v16  ;;  %v13801_v29 = vld [vmem:[#allocation17_spill] sm:$0xff] }
 0x7f6   : > { %v5178_v23 = vmul.f32 %v5125_v27, %v10050_v7  ;;  %v3811_v57 = vpop.permute.xlu1 %3810  ;;  %v4141_v53 = vrot.slane %v11242_v5, 7  ;;  %v4997_v11 = vmul.f32 %v11235_v54, %v13801_v29  ;;  %v4143_v14 = vrot.slane %v11262_v22, 7 }
 0x7f7   : > { %v5126_v2 = vrot.slane %v11287_v60, 2  ;;  %v3922_v15 = vadd.f32 %v3901_v50, %v3026_v4  ;;  %v3881_v0 = vmul.f32 %v3811_v57, %v3006_v18  ;;  %v3756_v27 = vsub.f32 %v10838_v21, %v11164_v25  ;;  %v13802_v57 = vld [vmem:[#allocation22_spill] sm:$0xff] }
 0x7f8   : > { %5197 = vst.msk [vmem:[#allocation2 + $0x38] sm:$0xff] %vm714_vm4, %v5178_v23  ;;  %v11306_v7 = vsel %vm1056_vm3, %v4139_v30, %v4141_v53  ;;  %v4752_v16 = vmul.f32 %v11235_v54, %v13802_v57  ;;  %v11321_v29 = vsel %vm1955_vm2, %v4696_v13, %v4698_v42  ;;  %v11324_v21 = vsel %vm1056_vm3, %v4141_v53, %v4143_v14 }
 0x7f9   : > { %v5127_v4 = vsel %vm2626_vm5, %v5124_v56, %v5126_v2  ;;  %v11313_v18 = vmax.f32 %v3922_v15, 0.0  ;;  %v3902_v50 = vmul.f32 %v3881_v0, %v3755_v61  ;;  %4357 = vrot.lane.b32.xlu0 %v4315_v45, %s8178_s0  ;;  %5037 = vrot.lane.b32.xlu1 %v4997_v11, %s8181_s5  ;;  %v13803_v15 = vld [vmem:[#allocation26_spill] sm:$0xff]  ;;  %v3008_v0 = vld [vmem:[%s8304_s25 + $0x50] sm:$0xff]  ;;  %v3757_v54 = vsub.f32 %v10751_v51, %v11197_v37  ;;  %v11334_v11 = vpop.permute.xlu0 %3714 }
 0x7fa   : > { %v5179_v30 = vmul.f32 %v5127_v4, %v10162_v52  ;;  %v3816_v23 = vpop.permute.xlu1 %3815  ;;  %v4439_v45 = vmul.f32 %v11238_v40, %v13803_v15  ;;  %v3028_v52 = vld [vmem:[%s8309_s15 + $0x48] sm:$0xff]  ;;  %v4700_v51 = vrot.slane %v11287_v60, 1  ;;  %v4145_v37 = vrot.slane %v11287_v60, 7 }
 0x7fb   : > { %v5128_v25 = vrot.slane %v11313_v18, 2  ;;  %v3923_v56 = vadd.f32 %v3902_v50, %v3027_v26  ;;  %v3882_v61 = vmul.f32 %v3816_v23, %v3007_v17  ;;  %v13804_v50 = vld [vmem:[#allocation35_spill] sm:$0xff] }
 0x7fc   : > { %5198 = vst.msk [vmem:[#allocation2 + $0x48] sm:$0xff] %vm714_vm4, %v5179_v30  ;;  %v4879_v30 = vmul.f32 %v11218_v59, %v13804_v50  ;;  %v11356_v15 = vsel %vm1056_vm3, %v4143_v14, %v4145_v37 }
 0x7fd   : > { %v5129_v13 = vsel %vm2626_vm5, %v5126_v2, %v5128_v25  ;;  %v11337_v53 = vmax.f32 %v3923_v56, 0.0  ;;  %v3903_v26 = vmul.f32 %v3882_v61, %v3756_v27  ;;  %4795 = vrot.lane.b32.xlu0 %v4752_v16, %s8177_s3  ;;  %4483 = vrot.lane.b32.xlu1 %v4439_v45, %s8179_s4  ;;  %v13805_v56 = vld [vmem:[#allocation30_spill] sm:$0xff]  ;;  %v3029_v16 = vld [vmem:[%s8309_s15 + $0x50] sm:$0xff]  ;;  %v3009_v61 = vld [vmem:[%s8304_s25 + $0x58] sm:$0xff] }
 0x7fe   : > { %v5180_v17 = vmul.f32 %v5129_v13, %v10236_v63  ;;  %v3821_v4 = vpop.permute.xlu1 %3820  ;;  %v4195_v27 = vmul.f32 %v11238_v40, %v13805_v56  ;;  %v11353_v63 = vsel %vm1955_vm2, %v4698_v42, %v4700_v51  ;;  %v3758_v40 = vsub.f32 %v10778_v34, %v11227_v9  ;;  %v3030_v34 = vld [vmem:[%s8309_s15 + $0x58] sm:$0xff]  ;;  %v3010_v9 = vld [vmem:[%s8304_s25 + $0x60] sm:$0xff] }
 0x7ff   : > { %v5130_v2 = vrot.slane %v11337_v53, 2  ;;  %v3924_v23 = vadd.f32 %v3903_v26, %v3028_v52  ;;  %v3883_v57 = vmul.f32 %v3821_v4, %v3008_v0  ;;  %v13806_v26 = vld [vmem:[#allocation39_spill] sm:$0xff]  ;;  %v11370_v4 = vpop.permute.xlu0 %3719 }
 0x800   : > { %5199 = vst.msk [vmem:[#allocation2 + $0x58] sm:$0xff] %vm714_vm4, %v5180_v17  ;;  %v4566_v14 = vmul.f32 %v11218_v59, %v13806_v26  ;;  %v13807_v17 = vld [vmem:[#allocation44_spill] sm:$0xff] }
 0x801   : > { %v5131_v45 = vsel %vm2626_vm5, %v5128_v25, %v5130_v2  ;;  %v11359_v13 = vmax.f32 %v3924_v23, 0.0  ;;  %v3904_v52 = vmul.f32 %v3883_v57, %v3757_v54  ;;  %4237 = vrot.lane.b32.xlu0 %v4195_v27, %s8182_s6  ;;  %4921 = vrot.lane.b32.xlu1 %v4879_v30, %s8183_s21  ;;  %v4316_v25 = vmul.f32 %v11218_v59, %v13807_v17  ;;  %v13809_v17 = vld [vmem:[#allocation87_spill] sm:$0xff] }
 0x802   : > { %v5181_v42 = vmul.f32 %v5131_v45, %v10292_v38  ;;  %v3826_v0 = vpop.permute.xlu1 %3825  ;;  %v4702_v30 = vrot.slane %v11313_v18, 1  ;;  %v4147_v38 = vrot.slane %v11313_v18, 7 }
 0x803   : > { %v5132_v54 = vrot.slane %v11359_v13, 2  ;;  %v3925_v50 = vadd.f32 %v3904_v52, %v3029_v16  ;;  %v3884_v23 = vmul.f32 %v3826_v0, %v3009_v61  ;;  %v3759_v61 = vsub.f32 %v10807_v24, %v11259_v20  ;;  %v3011_v24 = vld [vmem:[%s8304_s25 + $0x68] sm:$0xff] }
 0x804   : > { %5200 = vst.msk [vmem:[#allocation2 + $0x68] sm:$0xff] %vm714_vm4, %v5181_v42  ;;  %v11384_v16 = vsel %vm1955_vm2, %v4700_v51, %v4702_v30  ;;  %v13808_v42 = vld [vmem:[#allocation16_spill] sm:$0xff]  ;;  %v11392_v0 = vsel %vm1056_vm3, %v4145_v37, %v4147_v38  ;;  %v4753_v51 = vmul.f32 %v11270_v3, %v13809_v17  ;;  %v4704_v20 = vrot.slane %v11337_v53, 1  ;;  %v11404_v37 = vpop.permute.xlu0 %3724 }
 0x805   : > { %v5133_v57 = vsel %vm2626_vm5, %v5130_v2, %v5132_v54  ;;  %v11379_v56 = vmax.f32 %v3925_v50, 0.0  ;;  %v3905_v27 = vmul.f32 %v3884_v23, %v3758_v40  ;;  %4611 = vrot.lane.b32.xlu0 %v4566_v14, %s8175_s22  ;;  %4359 = vrot.lane.b32.xlu1 %v4316_v25, %s8178_s0  ;;  %v4998_v2 = vmul.f32 %v11270_v3, %v13808_v42  ;;  %v3012_v17 = vld [vmem:[%s8304_s25 + $0x70] sm:$0xff] }
 0x806   : > { %v5182_v45 = vmul.f32 %v5133_v57, %v10361_v46  ;;  %v3831_v52 = vpop.permute.xlu1 %3830  ;;  %v3760_v25 = vsub.f32 %v10822_v28, %v11297_v33  ;;  %v3031_v46 = vld [vmem:[%s8309_s15 + $0x60] sm:$0xff]  ;;  %v4149_v50 = vrot.slane %v11337_v53, 7  ;;  %v13347_v28 = vrot.slane %v11174_v31, 6  ;;  %v13810_v57 = vld [vmem:[#allocation76_spill] sm:$0xff] }
 0x807   : > { %v5134_v40 = vrot.slane %v11379_v56, 2  ;;  %v3926_v26 = vadd.f32 %v3905_v27, %v3030_v34  ;;  %v3885_v14 = vmul.f32 %v3831_v52, %v3010_v9  ;;  %v4440_v27 = vmul.f32 %v11273_v43, %v13810_v57 }
 0x808   : > { %5201 = vst.msk [vmem:[#allocation2 + $0x78] sm:$0xff] %vm714_vm4, %v5182_v45  ;;  %v11416_v45 = vsel %vm1955_vm2, %v4702_v30, %v4704_v20  ;;  %v4706_v30 = vrot.slane %v11359_v13, 1 }
 0x809   : > { %v5135_v23 = vsel %vm2626_vm5, %v5132_v54, %v5134_v40  ;;  %v11407_v34 = vmax.f32 %v3926_v26, 0.0  ;;  %v3906_v9 = vmul.f32 %v3885_v14, %v3759_v61  ;;  %5039 = vrot.lane.b32.xlu0 %v4998_v2, %s8181_s5  ;;  %4797 = vrot.lane.b32.xlu1 %v4753_v51, %s8177_s3  ;;  %v11419_v54 = vsel %vm1056_vm3, %v4147_v38, %v4149_v50  ;;  %v13811_v2 = vld [vmem:[#allocation61_spill] sm:$0xff]  ;;  %v3032_v14 = vld [vmem:[%s8309_s15 + $0x68] sm:$0xff] }
 0x80a   : > { %v5183_v3 = vmul.f32 %v5135_v23, %v10440_v49  ;;  %v3836_v33 = vpop.permute.xlu1 %3835  ;;  %v4196_v26 = vmul.f32 %v11273_v43, %v13811_v2  ;;  %v3761_v49 = vsub.f32 %v10836_v1, %v11334_v11  ;;  %v4151_v1 = vrot.slane %v11359_v13, 7  ;;  %v13812_v43 = vld [vmem:[#allocation171_spill] sm:$0xff] }
 0x80b   : > { %v5136_v61 = vrot.slane %v11407_v34, 2  ;;  %v3927_v52 = vadd.f32 %v3906_v9, %v3031_v46  ;;  %v3886_v42 = vmul.f32 %v3836_v33, %v3011_v24  ;;  %v13813_v23 = vld [vmem:[#allocation43_spill] sm:$0xff]  ;;  %v11447_v33 = vpop.permute.xlu0 %3729 }
 0x80c   : > { %5202 = vst.msk [vmem:[#allocation2 + $0x88] sm:$0xff] %vm714_vm4, %v5183_v3  ;;  %v4880_v9 = vmul.f32 %v11242_v5, %v13813_v23  ;;  %v13817_v23 = vld [vmem:[#allocation188_spill] sm:$0xff] }
 0x80d   : > { %v5137_v51 = vsel %vm2626_vm5, %v5134_v40, %v5136_v61  ;;  %v11431_v38 = vmax.f32 %v3927_v52, 0.0  ;;  %v3907_v46 = vmul.f32 %v3886_v42, %v3760_v25  ;;  %4485 = vrot.lane.b32.xlu0 %v4440_v27, %s8179_s4  ;;  %4239 = vrot.lane.b32.xlu1 %v4196_v26, %s8182_s6  ;;  %v11440_v40 = vsel %vm1955_vm2, %v4704_v20, %v4706_v30  ;;  %v13815_v42 = vld [vmem:[#allocation31_spill] sm:$0xff]  ;;  %v3969_v26 = vld [vmem:[%s8299_s24 + $0x60] sm:$0xff] }
 0x80e   : > { %v5184_v11 = vmul.f32 %v5137_v51, %v13812_v43  ;;  %v3841_v24 = vpop.permute.xlu1 %3840  ;;  %v13814_v25 = vrot.slane %v11158_v35, 6  ;;  %v4567_v2 = vmul.f32 %v11242_v5, %v13815_v42  ;;  %v3970_v20 = vld [vmem:[%s8299_s24 + $0x68] sm:$0xff]  ;;  %v3033_v51 = vld [vmem:[%s8309_s15 + $0x70] sm:$0xff]  ;;  %v3013_v43 = vld [vmem:[%s8304_s25 + $0x78] sm:$0xff]  ;;  %v11458_v35 = vsel %vm1056_vm3, %v4149_v50, %v4151_v1 }
 0x80f   : > { %v5138_v57 = vrot.slane %v11431_v38, 2  ;;  %v3928_v27 = vadd.f32 %v3907_v46, %v3032_v14  ;;  %v3887_v52 = vmul.f32 %v3841_v24, %v3012_v17  ;;  %13816 = vst [vmem:[#allocation160_spill] sm:$0xff] %v11458_v35  ;;  %v3762_v14 = vsub.f32 %v10849_v48, %v11370_v4  ;;  %v3972_v42 = vld [vmem:[%s8299_s24 + $0x78] sm:$0xff]  ;;  %v13818_v50 = vld [vmem:[#allocation135_spill] sm:$0xff] }
 0x810   : > { %v4038_v3 = vsel %vm876_vm7, %v13814_v25, %v13347_v28  ;;  %5203 = vst.msk [vmem:[#allocation2 + $0x98] sm:$0xff] %vm714_vm4, %v5184_v11  ;;  %v3971_v11 = vld [vmem:[%s8299_s24 + $0x70] sm:$0xff]  ;;  %v13820_v48 = vld [vmem:[#allocation37_spill] sm:$0xff] }
 0x811   : > { %v4094_v25 = vmul.f32 %v4038_v3, %v13817_v23  ;;  %v5139_v17 = vsel %vm2626_vm5, %v5136_v61, %v5138_v57  ;;  %v11464_v46 = vmax.f32 %v3928_v27, 0.0  ;;  %v3908_v24 = vmul.f32 %v3887_v52, %v3761_v49  ;;  %4923 = vrot.lane.b32.xlu0 %v4880_v9, %s8183_s21  ;;  %4613 = vrot.lane.b32.xlu1 %v4567_v2, %s8175_s22  ;;  %v13819_v3 = vld [vmem:[#allocation56_spill] sm:$0xff] }
 0x812   : > { %v5185_v28 = vmul.f32 %v5139_v17, %v13818_v50  ;;  %v3846_v35 = vpop.permute.xlu1 %3845  ;;  %v4317_v23 = vmul.f32 %v11242_v5, %v13819_v3  ;;  %v4999_v4 = vmul.f32 %v11284_v55, %v13820_v48  ;;  %v7741_v61 = vpack.c.bf16 %v3970_v20, %v3969_v26  ;;  %v3034_v17 = vld [vmem:[%s8309_s15 + $0x78] sm:$0xff]  ;;  %v3014_v50 = vld [vmem:[%s8304_s25 + $0x80] sm:$0xff]  ;;  %v11484_v26 = vpop.permute.xlu0 %3734 }
 0x813   : > { %4114 = vst.msk [vmem:[#allocation2 + $0x20] sm:$0xff] %vm714_vm4, %v4094_v25  ;;  %v5140_v49 = vrot.slane %v11464_v46, 2  ;;  %v3929_v9 = vadd.f32 %v3908_v24, %v3033_v51  ;;  %v3888_v27 = vmul.f32 %v3846_v35, %v3013_v43  ;;  %v4708_v52 = vrot.slane %v11379_v56, 1  ;;  %v13821_v24 = vld [vmem:[#allocation143_spill] sm:$0xff] }
 0x814   : > { %v3763_v2 = vsub.f32 %v10858_v36, %v11404_v37  ;;  %5204 = vst.msk [vmem:[#allocation2 + $0xa8] sm:$0xff] %vm714_vm4, %v5185_v28  ;;  %7742 = vmatpush1.bf16.msra.mxu1 %v7741_v61  ;;  %v7744_v3 = vpack.c.bf16 %v3972_v42, %v3971_v11  ;;  %v4153_v25 = vrot.slane %v11379_v56, 7  ;;  %v3973_v37 = vld [vmem:[%s8299_s24 + $0x80] sm:$0xff]  ;;  %v3974_v28 = vld [vmem:[%s8299_s24 + $0x88] sm:$0xff]  ;;  %v3764_v35 = vsub.f32 %v10860_v8, %v11447_v33  ;;  %v13822_v42 = vld [vmem:[#allocation41_spill] sm:$0xff] }
 0x815   : > { %v5141_v20 = vsel %vm2626_vm5, %v5138_v57, %v5140_v49  ;;  %v11487_v51 = vmax.f32 %v3929_v9, 0.0  ;;  %v3909_v43 = vmul.f32 %v3888_v27, %v3762_v14  ;;  %4361 = vrot.lane.b32.xlu0 %v4317_v23, %s8178_s0  ;;  %5041 = vrot.lane.b32.xlu1 %v4999_v4, %s8181_s5  ;;  %v11492_v36 = vsel %vm1955_vm2, %v4706_v30, %v4708_v52  ;;  %v13823_v61 = vld [vmem:[#allocation46_spill] sm:$0xff]  ;;  %v3015_v33 = vld [vmem:[%s8304_s25 + $0x88] sm:$0xff] }
 0x816   : > { %v5186_v11 = vmul.f32 %v5141_v20, %v13821_v24  ;;  %v3851_v57 = vpop.permute.xlu1 %3850  ;;  %v4754_v14 = vmul.f32 %v11284_v55, %v13822_v42  ;;  %7743 = vmatprep.subr.bf16.mxu1 %v13763_v41  ;;  %v11503_v23 = vsel %vm1056_vm3, %v4151_v1, %v4153_v25  ;;  %v4441_v9 = vmul.f32 %v11306_v7, %v13823_v61  ;;  %v3035_v8 = vld [vmem:[%s8309_s15 + $0x80] sm:$0xff]  ;;  %v13825_v55 = vld [vmem:[#allocation45_spill] sm:$0xff] }
 0x817   : > { %v5142_v48 = vrot.slane %v11487_v51, 2  ;;  %v3930_v30 = vadd.f32 %v3909_v43, %v3034_v17  ;;  %v3889_v4 = vmul.f32 %v3851_v57, %v3014_v50  ;;  %v13824_v27 = vld [vmem:[#allocation50_spill] sm:$0xff]  ;;  %v4881_v24 = vmul.f32 %v11262_v22, %v13825_v55  ;;  %v3016_v55 = vld [vmem:[%s8304_s25 + $0x90] sm:$0xff] }
 0x818   : > { %5205 = vst.msk [vmem:[#allocation2 + $0xb8] sm:$0xff] %vm714_vm4, %v5186_v11  ;;  %v4197_v20 = vmul.f32 %v11306_v7, %v13824_v27  ;;  %7745 = vmatpush1.bf16.msra.mxu1 %v7744_v3  ;;  %v7747_v1 = vpack.c.bf16 %v3974_v28, %v3973_v37  ;;  %v4039_v42 = vrot.slane %v11199_v19, 6  ;;  %v4710_v7 = vrot.slane %v11407_v34, 1  ;;  %v13826_v11 = vld [vmem:[#allocation150_spill] sm:$0xff]  ;;  %v3740_v37 = vpop.permute.xlu0 %3739  ;;  %v3036_v27 = vld [vmem:[%s8309_s15 + $0x88] sm:$0xff] }
 0x819   : > { %v5143_v17 = vsel %vm2626_vm5, %v5140_v49, %v5142_v48  ;;  %v11517_v50 = vmax.f32 %v3930_v30, 0.0  ;;  %v3910_v43 = vmul.f32 %v3889_v4, %v3763_v2  ;;  %4799 = vrot.lane.b32.xlu0 %v4754_v14, %s8177_s3  ;;  %4487 = vrot.lane.b32.xlu1 %v4441_v9, %s8179_s4  ;;  %v13827_v19 = vrot.slane %v11174_v31, 6  ;;  %v13828_v4 = vld [vmem:[#allocation200_spill] sm:$0xff] }
 0x81a   : > { %v5187_v57 = vmul.f32 %v5143_v17, %v13826_v11  ;;  %v3856_v61 = vpop.permute.xlu1 %3855  ;;  %7746 = vmatprep.subr.bf16.mxu1 %v13763_v41  ;;  %v4155_v3 = vrot.slane %v11407_v34, 7  ;;  %v4041_v2 = vrot.slane %v11218_v59, 6  ;;  %v11535_v31 = vsel %vm1955_vm2, %v4708_v52, %v4710_v7 }
 0x81b   : > { %v4040_v49 = vsel %vm876_vm7, %v13827_v19, %v4039_v42  ;;  %v5144_v28 = vrot.slane %v11517_v50, 2  ;;  %v3931_v14 = vadd.f32 %v3910_v43, %v3035_v8  ;;  %v3890_v30 = vmul.f32 %v3856_v61, %v3015_v33  ;;  %v13831_v43 = vld [vmem:[#allocation73_spill] sm:$0xff] }
 0x81c   : > { %v4095_v9 = vmul.f32 %v4040_v49, %v13828_v4  ;;  %5206 = vst.msk [vmem:[#allocation2 + $0xc8] sm:$0xff] %vm714_vm4, %v5187_v57  ;;  %7748 = vmatpush1.bf16.msra.mxu1 %v7747_v1  ;;  %v11538_v17 = vsel %vm1056_vm3, %v4153_v25, %v4155_v3  ;;  %v4042_v59 = vsel %vm876_vm7, %v4039_v42, %v4041_v2  ;;  %v13829_v25 = vld [vmem:[#allocation159_spill] sm:$0xff]  ;;  %v13830_v42 = vld [vmem:[#allocation64_spill] sm:$0xff]  ;;  %v3745_v4 = vpop.permute.xlu0 %3744 }
 0x81d   : > { %v5145_v11 = vsel %vm2626_vm5, %v5142_v48, %v5144_v28  ;;  %v11542_v19 = vmax.f32 %v3931_v14, 0.0  ;;  %v3911_v8 = vmul.f32 %v3890_v30, %v3764_v35  ;;  %4241 = vrot.lane.b32.xlu0 %v4197_v20, %s8182_s6  ;;  %4925 = vrot.lane.b32.xlu1 %v4881_v24, %s8183_s21  ;;  %v3765_v52 = vsub.f32 %v10868_v58, %v11484_v26  ;;  %v3037_v58 = vld [vmem:[%s8309_s15 + $0x90] sm:$0xff]  ;;  %v3017_v26 = vld [vmem:[%s8304_s25 + $0x98] sm:$0xff] }
 0x81e   : > { %4115 = vst.msk [vmem:[#allocation2 + $0x30] sm:$0xff] %vm714_vm4, %v4095_v9  ;;  %v5188_v33 = vmul.f32 %v5145_v11, %v13829_v25  ;;  %v3861_v1 = vpop.permute.xlu1 %3860  ;;  %v4568_v48 = vmul.f32 %v11262_v22, %v13830_v42  ;;  %v4318_v35 = vmul.f32 %v11262_v22, %v13831_v43  ;;  %7493 = vmatprep.subr.mxu1 %v10599_v39  ;;  %v4712_v14 = vrot.slane %v11431_v38, 1  ;;  %v3018_v43 = vld [vmem:[%s8304_s25 + $0xa0] sm:$0x3] }
 0x81f   : > { %v5146_v20 = vrot.slane %v11542_v19, 2  ;;  %v3932_v57 = vadd.f32 %v3911_v8, %v3036_v27  ;;  %v3891_v24 = vmul.f32 %v3861_v1, %v3016_v55  ;;  %v4096_v61 = vmul.f32 %v4042_v59, %v10055_v44  ;;  %v13832_v44 = vld [vmem:[#allocation48_spill] sm:$0xff]  ;;  %v13833_v1 = vld [vmem:[#allocation97_spill] sm:$0xff] }
 0x820   : > { %v3766_v49 = vsub.f32 %v10871_v62, %v3740_v37  ;;  %5207 = vst.msk [vmem:[#allocation2 + $0xd8] sm:$0xff] %vm714_vm4, %v5188_v33  ;;  %v4157_v30 = vrot.slane %v11431_v38, 7  ;;  %v5000_v62 = vmul.f32 %v11321_v29, %v13832_v44  ;;  %v11573_v55 = vsel %vm1955_vm2, %v4710_v7, %v4712_v14 }
 0x821   : > { %v5147_v9 = vsel %vm2626_vm5, %v5144_v28, %v5146_v20  ;;  %v11564_v11 = vmax.f32 %v3932_v57, 0.0  ;;  %v3912_v25 = vmul.f32 %v3891_v24, %v3765_v52  ;;  %4615 = vrot.lane.b32.xlu0 %v4568_v48, %s8175_s22  ;;  %4363 = vrot.lane.b32.xlu1 %v4318_v35, %s8178_s0  ;;  %4116 = vst.msk [vmem:[#allocation2 + $0x40] sm:$0xff] %vm714_vm4, %v4096_v61  ;;  %v4043_v59 = vrot.slane %v11242_v5, 6  ;;  %v13834_v57 = vld [vmem:[#allocation187_spill] sm:$0xff]  ;;  %v13835_v61 = vld [vmem:[#allocation60_spill] sm:$0xff] }
 0x822   : > { %v5189_v37 = vmul.f32 %v5147_v9, %v10509_v47  ;;  %v3866_v27 = vpop.permute.xlu1 %3865  ;;  %v11576_v28 = vsel %vm1056_vm3, %v4155_v3, %v4157_v30  ;;  %v4755_v42 = vmul.f32 %v11321_v29, %v13833_v1  ;;  %v3767_v48 = vsub.f32 %v10880_v12, %v3745_v4  ;;  %v3038_v47 = vld [vmem:[%s8309_s15 + $0x98] sm:$0xff] }
 0x823   : > { %v5148_v8 = vrot.slane %v11564_v11, 2  ;;  %v3933_v52 = vadd.f32 %v3912_v25, %v3037_v58  ;;  %v3892_v33 = vmul.f32 %v3866_v27, %v3017_v26  ;;  %v4044_v7 = vsel %vm876_vm7, %v4041_v2, %v4043_v59  ;;  %v13836_v26 = vld [vmem:[#allocation63_spill] sm:$0xff] }
 0x824   : > { %5208 = vst.msk [vmem:[#allocation2 + $0xe8] sm:$0xff] %vm714_vm4, %v5189_v37  ;;  %v4097_v29 = vmul.f32 %v4044_v7, %v10080_v32  ;;  %v4442_v58 = vmul.f32 %v11324_v21, %v13835_v61  ;;  %v4198_v2 = vmul.f32 %v11324_v21, %v13836_v26  ;;  %v4159_v25 = vrot.slane %v11464_v46, 7  ;;  %v3039_v32 = vld [vmem:[%s8309_s15 + $0xa0] sm:$0x3] }
 0x825   : > { %v5149_v3 = vsel %vm2626_vm5, %v5146_v20, %v5148_v8  ;;  %v11588_v35 = vmax.f32 %v3933_v52, 0.0  ;;  %v3913_v5 = vmul.f32 %v3892_v33, %v3766_v49  ;;  %5043 = vrot.lane.b32.xlu0 %v5000_v62, %s8181_s5  ;;  %4801 = vrot.lane.b32.xlu1 %v4755_v42, %s8177_s3  ;;  %v4714_v20 = vrot.slane %v11464_v46, 1 }
 0x826   : > { %v5190_v12 = vmul.f32 %v5149_v3, %v13834_v57  ;;  %v3871_v24 = vpop.permute.xlu1 %3870  ;;  %4117 = vst.msk [vmem:[#allocation2 + $0x50] sm:$0xff] %vm714_vm4, %v4097_v29  ;;  %v4045_v62 = vrot.slane %v11262_v22, 6  ;;  %v11615_v33 = vsel %vm1056_vm3, %v4157_v30, %v4159_v25  ;;  %v13837_v22 = vld [vmem:[#allocation47_spill] sm:$0xff]  ;;  %v4161_v30 = vrot.slane %v11487_v51, 7 }
 0x827   : > { %v5150_v4 = vrot.slane %v11588_v35, 2  ;;  %v3934_v49 = vadd.f32 %v3913_v5, %v3038_v47  ;;  %v3893_v9 = vmul.f32 %v3871_v24, %v3018_v43  ;;  %v11605_v44 = vsel %vm1955_vm2, %v4712_v14, %v4714_v20  ;;  %v13838_v47 = vld [vmem:[#allocation205_spill] sm:$0xff]  ;;  %v13839_v5 = vld [vmem:[#allocation204_spill] sm:$0xff]  ;;  %v13840_v24 = vld [vmem:[#allocation10_spill] sm:$0xff] }
 0x828   : > { %5209 = vst.msk [vmem:[#allocation2 + $0xf8] sm:$0xff] %vm714_vm4, %v5190_v12  ;;  %v4046_v1 = vsel %vm876_vm7, %v4043_v59, %v4045_v62  ;;  %v4047_v3 = vrot.slane %v11287_v60, 6  ;;  %v11639_v57 = vsel %vm1056_vm3, %v4159_v25, %v4161_v30  ;;  %v4319_v61 = vmul.f32 %v11287_v60, %v13840_v24 }
 0x829   : > { %v5151_v21 = vsel %vm2626_vm5, %v5148_v8, %v5150_v4  ;;  %v11609_v37 = vmax.f32 %v3934_v49, 0.0  ;;  %v3914_v27 = vmul.f32 %v3893_v9, %v3767_v48  ;;  %4489 = vrot.lane.b32.xlu0 %v4442_v58, %s8179_s4  ;;  %4243 = vrot.lane.b32.xlu1 %v4198_v2, %s8182_s6  ;;  %v4882_v8 = vmul.f32 %v11287_v60, %v13837_v22  ;;  %v13841_v58 = vld [vmem:[#allocation18_spill] sm:$0xff] }
 0x82a   : > { %v5191_v52 = vmul.f32 %v5151_v21, %v10651_v6  ;;  %v4569_v48 = vmul.f32 %v11287_v60, %v13647_v10  ;;  %v4098_v43 = vmul.f32 %v4046_v1, %v13838_v47  ;;  %v4716_v6 = vrot.slane %v11487_v51, 1  ;;  %v13842_v49 = vld [vmem:[#allocation206_spill] sm:$0xff]  ;;  %v13845_v1 = vld [vmem:[#allocation79_spill] sm:$0xff] }
 0x82b   : > { %v5152_v14 = vrot.slane %v11609_v37, 2  ;;  %v3935_v42 = vadd.f32 %v3914_v27, %v3039_v32  ;;  %v5001_v26 = vmul.f32 %v11353_v63, %v13841_v58  ;;  %v4048_v2 = vsel %vm876_vm7, %v4045_v62, %v4047_v3  ;;  %v13843_v32 = vld [vmem:[#allocation153_spill] sm:$0xff]  ;;  %v13844_v62 = vld [vmem:[#allocation70_spill] sm:$0xff] }
 0x82c   : > { %5210 = vst.msk [vmem:[#allocation2 + $0x108] sm:$0xff] %vm714_vm4, %v5191_v52  ;;  %4118 = vst.msk [vmem:[#allocation2 + $0x60] sm:$0xff] %vm714_vm4, %v4098_v43  ;;  %v11636_v29 = vsel %vm1955_vm2, %v4714_v20, %v4716_v6  ;;  %v4099_v9 = vmul.f32 %v4048_v2, %v13842_v49  ;;  %v4163_v25 = vrot.slane %v11517_v50, 7  ;;  %v4049_v60 = vrot.slane %v11313_v18, 6  ;;  %v13850_v49 = vld [vmem:[#allocation99_spill] sm:$0xff] }
 0x82d   : > { %v5153_v7 = vsel %vm2626_vm5, %v5150_v4, %v5152_v14  ;;  %v11628_v59 = vmax.f32 %v3935_v42, 0.0  ;;  %4927 = vrot.lane.b32.xlu0 %v4882_v8, %s8183_s21  ;;  %4617 = vrot.lane.b32.xlu1 %v4569_v48, %s8175_s22  ;;  %v4718_v4 = vrot.slane %v11517_v50, 1  ;;  %v4756_v52 = vmul.f32 %v11353_v63, %v13844_v62  ;;  %v13846_v8 = vld [vmem:[#allocation112_spill] sm:$0xff] }
 0x82e   : > { %v5192_v10 = vmul.f32 %v5153_v7, %v13839_v5  ;;  %4119 = vst.msk [vmem:[#allocation2 + $0x70] sm:$0xff] %vm714_vm4, %v4099_v9  ;;  %v11665_v42 = vsel %vm1056_vm3, %v4161_v30, %v4163_v25  ;;  %v4050_v22 = vsel %vm876_vm7, %v4047_v3, %v4049_v60  ;;  %v4720_v63 = vrot.slane %v11542_v19, 1  ;;  %v13848_v7 = vld [vmem:[#allocation93_spill] sm:$0xff] }
 0x82f   : > { %v5154_v12 = vrot.slane %v11628_v59, 2  ;;  %v11657_v27 = vsel %vm1955_vm2, %v4716_v6, %v4718_v4  ;;  %v4100_v48 = vmul.f32 %v4050_v22, %v13846_v8  ;;  %v4165_v47 = vrot.slane %v11542_v19, 7  ;;  %v13847_v6 = vld [vmem:[#allocation88_spill] sm:$0xff] }
 0x830   : > { %5211 = vst.msk [vmem:[#allocation2 + $0x118] sm:$0xff] %vm714_vm4, %v5192_v10  ;;  %v4051_v43 = vrot.slane %v11337_v53, 6  ;;  %v4199_v30 = vmul.f32 %v11356_v15, %v13847_v6  ;;  %v4883_v3 = vmul.f32 %v11313_v18, %v13848_v7  ;;  %v4722_v5 = vrot.slane %v11564_v11, 1 }
 0x831   : > { %v5155_v20 = vsel %vm2626_vm5, %v5152_v14, %v5154_v12  ;;  %4365 = vrot.lane.b32.xlu0 %v4319_v61, %s8178_s0  ;;  %5045 = vrot.lane.b32.xlu1 %v5001_v26, %s8181_s5  ;;  %v4443_v14 = vmul.f32 %v11356_v15, %v13845_v1  ;;  %4120 = vst.msk [vmem:[#allocation2 + $0x80] sm:$0xff] %vm714_vm4, %v4100_v48  ;;  %v4167_v10 = vrot.slane %v11564_v11, 7  ;;  %v4053_v58 = vrot.slane %v11359_v13, 6  ;;  %v13849_v15 = vld [vmem:[#allocation133_spill] sm:$0xff] }
 0x832   : > { %v5193_v21 = vmul.f32 %v5155_v20, %v13843_v32  ;;  %v11683_v12 = vsel %vm1955_vm2, %v4718_v4, %v4720_v63  ;;  %v11686_v24 = vsel %vm1056_vm3, %v4163_v25, %v4165_v47  ;;  %v4052_v61 = vsel %vm876_vm7, %v4049_v60, %v4051_v43  ;;  %v13851_v25 = vld [vmem:[#allocation109_spill] sm:$0xff] }
 0x833   : > { %v4101_v26 = vmul.f32 %v4052_v61, %v13849_v15  ;;  %v11694_v2 = vsel %vm1955_vm2, %v4720_v63, %v4722_v5  ;;  %v11697_v20 = vsel %vm1056_vm3, %v4165_v47, %v4167_v10  ;;  %v4724_v4 = vrot.slane %v11588_v35, 1  ;;  %v13853_v63 = vld [vmem:[#allocation81_spill] sm:$0xff] }
 0x834   : > { %5212 = vst.msk [vmem:[#allocation2 + $0x128] sm:$0xff] %vm714_vm4, %v5193_v21  ;;  %v4570_v9 = vmul.f32 %v11313_v18, %v13850_v49  ;;  %v4320_v60 = vmul.f32 %v11313_v18, %v13851_v25  ;;  %v4054_v32 = vsel %vm876_vm7, %v4051_v43, %v4053_v58  ;;  %v13852_v21 = vld [vmem:[#allocation32_spill] sm:$0xff]  ;;  %v4169_v1 = vrot.slane %v11588_v35, 7  ;;  %v13854_v43 = vld [vmem:[#allocation89_spill] sm:$0xff]  ;;  %v13857_v49 = vld [vmem:[#allocation102_spill] sm:$0xff] }
 0x835   : > { %4803 = vrot.lane.b32.xlu0 %v4756_v52, %s8177_s3  ;;  %4491 = vrot.lane.b32.xlu1 %v4443_v14, %s8179_s4  ;;  %4121 = vst.msk [vmem:[#allocation2 + $0x90] sm:$0xff] %vm714_vm4, %v4101_v26  ;;  %v4102_v62 = vmul.f32 %v4054_v32, %v13852_v21  ;;  %v11708_v52 = vsel %vm1955_vm2, %v4722_v5, %v4724_v4  ;;  %v4055_v14 = vrot.slane %v11379_v56, 6  ;;  %v4726_v22 = vrot.slane %v11609_v37, 1  ;;  %v13856_v26 = vld [vmem:[#allocation94_spill] sm:$0xff]  ;;  %v13858_v25 = vld [vmem:[#allocation123_spill] sm:$0xff] }
 0x836   : > { %v11716_v18 = vsel %vm1056_vm3, %v4167_v10, %v4169_v1  ;;  %v11720_v8 = vrot.slane %v11628_v59, 1  ;;  %v4171_v48 = vrot.slane %v11609_v37, 7  ;;  %v5002_v47 = vmul.f32 %v11384_v16, %v13853_v63  ;;  %v13859_v32 = vld [vmem:[#allocation111_spill] sm:$0xff] }
 0x837   : > { %4122 = vst.msk [vmem:[#allocation2 + $0xa0] sm:$0xff] %vm714_vm4, %v4102_v62  ;;  %v4757_v6 = vmul.f32 %v11384_v16, %v13854_v43  ;;  %v4057_v7 = vrot.slane %v11407_v34, 6  ;;  %v11731_v10 = vsel %vm1955_vm2, %v4724_v4, %v4726_v22  ;;  %v4434_v15 = vrot.slane %v11628_v59, 7 }
 0x838   : > { %v11734_v61 = vsel %vm1056_vm3, %v4169_v1, %v4171_v48  ;;  %v11742_v16 = vsel %vm1955_vm2, %v4726_v22, %v11720_v8  ;;  %v4444_v4 = vmul.f32 %v11392_v0, %v13856_v26  ;;  %v4884_v21 = vmul.f32 %v11337_v53, %v13859_v32 }
 0x839   : > { %4245 = vrot.lane.b32.xlu0 %v4199_v30, %s8182_s6  ;;  %4929 = vrot.lane.b32.xlu1 %v4883_v3, %s8183_s21  ;;  %v4056_v30 = vsel %vm876_vm7, %v4053_v58, %v4055_v14  ;;  %v13855_v3 = vld [vmem:[#allocation209_spill] sm:$0xff]  ;;  %v4058_v58 = vsel %vm876_vm7, %v4055_v14, %v4057_v7  ;;  %v11753_v62 = vsel %vm1056_vm3, %v4171_v48, %v4434_v15  ;;  %v4059_v1 = vrot.slane %v11431_v38, 6  ;;  %v13860_v14 = vld [vmem:[#allocation118_spill] sm:$0xff] }
 0x83a   : > { %v4103_v5 = vmul.f32 %v4056_v30, %v13855_v3  ;;  %v4571_v22 = vmul.f32 %v11337_v53, %v13860_v14  ;;  %v4063_v63 = vrot.slane %v11487_v51, 6  ;;  %v4067_v43 = vrot.slane %v11542_v19, 6  ;;  %v13861_v3 = vld [vmem:[#allocation207_spill] sm:$0xff]  ;;  %v13865_v14 = vld [vmem:[#allocation138_spill] sm:$0xff] }
 0x83b   : > { %v4060_v48 = vsel %vm876_vm7, %v4057_v7, %v4059_v1  ;;  %v4071_v30 = vrot.slane %v11588_v35, 6  ;;  %vm13879_vm2 = vcmask 392448   ;;  %vm13883_vm3 = vcmask 786048  }
 0x83c   : > { %4123 = vst.msk [vmem:[#allocation2 + $0xb0] sm:$0xff] %vm714_vm4, %v4103_v5  ;;  %v4105_v5 = vmul.f32 %v4060_v48, %v13861_v3  ;;  %v13866_v48 = vld [vmem:[#allocation155_spill] sm:$0xff]  ;;  %v13867_v3 = vld [vmem:[#allocation158_spill] sm:$0xff]  ;;  %vm13884_vm5 = vcmask 917248  }
 0x83d   : > { %4619 = vrot.lane.b32.xlu0 %v4570_v9, %s8175_s22  ;;  %4367 = vrot.lane.b32.xlu1 %v4320_v60, %s8178_s0  ;;  %v4200_v9 = vmul.f32 %v11392_v0, %v13857_v49  ;;  %v4104_v60 = vmul.f32 %v4058_v58, %v13858_v25  ;;  %v4061_v0 = vrot.slane %v11464_v46, 6 }
 0x83e   : > { %4125 = vst.msk [vmem:[#allocation2 + $0xd0] sm:$0xff] %vm714_vm4, %v4105_v5 }
 0x83f   : > { %4124 = vst.msk [vmem:[#allocation2 + $0xc0] sm:$0xff] %vm714_vm4, %v4104_v60  ;;  %v4062_v15 = vsel %vm876_vm7, %v4059_v1, %v4061_v0  ;;  %v4064_v58 = vsel %vm876_vm7, %v4061_v0, %v4063_v63  ;;  %v13864_v60 = vld [vmem:[#allocation140_spill] sm:$0xff] }
 0x841   : > { %5047 = vrot.lane.b32.xlu0 %v5002_v47, %s8181_s5  ;;  %4805 = vrot.lane.b32.xlu1 %v4757_v6, %s8177_s3  ;;  %v4065_v47 = vrot.slane %v11517_v50, 6  ;;  %v4069_v6 = vrot.slane %v11564_v11, 6 }
 0x843   : > { %v4066_v26 = vsel %vm876_vm7, %v4063_v63, %v4065_v47  ;;  %v4068_v32 = vsel %vm876_vm7, %v4065_v47, %v4067_v43  ;;  %v4070_v0 = vsel %vm876_vm7, %v4067_v43, %v4069_v6  ;;  %v4072_v63 = vsel %vm876_vm7, %v4069_v6, %v4071_v30  ;;  %v13871_v6 = vld [vmem:[#allocation104_spill] sm:$0xff] }
 0x844   : > { %v4108_v7 = vmul.f32 %v4066_v26, %v13864_v60  ;;  %v4109_v1 = vmul.f32 %v4068_v32, %v13865_v14  ;;  %v4110_v47 = vmul.f32 %v4070_v0, %v13866_v48  ;;  %v13870_v26 = vld [vmem:[#allocation20_spill] sm:$0xff] }
 0x845   : > { %4493 = vrot.lane.b32.xlu0 %v4444_v4, %s8179_s4  ;;  %4247 = vrot.lane.b32.xlu1 %v4200_v9, %s8182_s6  ;;  %v13862_v4 = vld [vmem:[#allocation137_spill] sm:$0xff]  ;;  %v13863_v9 = vld [vmem:[#allocation208_spill] sm:$0xff]  ;;  %v5003_v43 = vmul.f32 %v11416_v45, %v13870_v26 }
 0x846   : > { %v4106_v49 = vmul.f32 %v4062_v15, %v13862_v4  ;;  %v4107_v25 = vmul.f32 %v4064_v58, %v13863_v9  ;;  %4128 = vst.msk [vmem:[#allocation2 + $0x100] sm:$0xff] %vm714_vm4, %v4108_v7  ;;  %v13868_v15 = vld [vmem:[#allocation108_spill] sm:$0xff]  ;;  %v13869_v58 = vld [vmem:[#allocation122_spill] sm:$0xff]  ;;  %4129 = vst.msk [vmem:[#allocation2 + $0x110] sm:$0xff] %vm714_vm4, %v4109_v1 }
 0x847   : > { %v4321_v5 = vmul.f32 %v11337_v53, %v13869_v58  ;;  %4130 = vst.msk [vmem:[#allocation2 + $0x120] sm:$0xff] %vm714_vm4, %v4110_v47  ;;  %v13872_v4 = vld [vmem:[#allocation80_spill] sm:$0xff]  ;;  %v13874_v7 = vld [vmem:[#allocation51_spill] sm:$0xff] }
 0x848   : > { %4126 = vst.msk [vmem:[#allocation2 + $0xe0] sm:$0xff] %vm714_vm4, %v4106_v49  ;;  %4127 = vst.msk [vmem:[#allocation2 + $0xf0] sm:$0xff] %vm714_vm4, %v4107_v25  ;;  %v4445_v53 = vmul.f32 %v11419_v54, %v13872_v4  ;;  %v13873_v25 = vld [vmem:[#allocation67_spill] sm:$0xff]  ;;  %v4885_v32 = vmul.f32 %v11359_v13, %v13874_v7  ;;  %v13875_v1 = vld [vmem:[#allocation36_spill] sm:$0xff] }
 0x849   : > { %4931 = vrot.lane.b32.xlu0 %v4884_v21, %s8183_s21  ;;  %4621 = vrot.lane.b32.xlu1 %v4571_v22, %s8175_s22  ;;  %v4111_v21 = vmul.f32 %v4072_v63, %v13867_v3  ;;  %v4112_v22 = vmul.f32 %v4071_v30, %v13868_v15  ;;  %v4758_v30 = vmul.f32 %v11416_v45, %v13871_v6  ;;  %v13876_v63 = vld [vmem:[#allocation58_spill] sm:$0xff]  ;;  %v13877_v3 = vld [vmem:[#allocation117_spill] sm:$0xff]  ;;  %v13881_v26 = vld [vmem:[#allocation160_spill] sm:$0xff] }
 0x84a   : > { %v4201_v60 = vmul.f32 %v11419_v54, %v13873_v25  ;;  %v4572_v0 = vmul.f32 %v11359_v13, %v13875_v1  ;;  %v4322_v48 = vmul.f32 %v11359_v13, %v13876_v63  ;;  %v13878_v15 = vld [vmem:[#allocation121_spill] sm:$0xff] }
 0x84b   : > { %4131 = vst.msk [vmem:[#allocation2 + $0x130] sm:$0xff] %vm714_vm4, %v4111_v21  ;;  %v5004_v21 = vmul.f32 %v11440_v40, %v13877_v3  ;;  %v13882_v6 = vld [vmem:[#allocation53_spill] sm:$0xff] }
 0x84c   : > { %4132 = vst.msk [vmem:[#allocation2 + $0x140] sm:$0x3] %vm755_vm1, %v4112_v22  ;;  %v4759_v22 = vmul.f32 %v11440_v40, %v13878_v15  ;;  %v13895_v15 = vld [vmem:[#allocation68_spill] sm:$0xff] }
 0x84d   : > { %4369 = vrot.lane.b32.xlu0 %v4321_v5, %s8178_s0  ;;  %5049 = vrot.lane.b32.xlu1 %v5003_v43, %s8181_s5  ;;  %v13880_v5 = vld [vmem:[#allocation126_spill] sm:$0xff] }
 0x84e   : > { %v4446_v43 = vmul.f32 %v13881_v26, %v13880_v5 }
 0x851   : > { %4807 = vrot.lane.b32.xlu0 %v4758_v30, %s8177_s3  ;;  %4495 = vrot.lane.b32.xlu1 %v4445_v53, %s8179_s4  ;;  %v4202_v30 = vmul.f32 %v13881_v26, %v13882_v6  ;;  %v13885_v53 = vld [vmem:[#allocation54_spill] sm:$0xff]  ;;  %v13900_v6 = vld [vmem:[#allocation92_spill] sm:$0xff] }
 0x853   : > { %v4354_v49 = vpop.permute.xlu0 %4353  ;;  %v4606_v9 = vpop.permute.xlu1 %4605 }
 0x855   : > { %4249 = vrot.lane.b32.xlu0 %v4201_v60, %s8182_s6  ;;  %4933 = vrot.lane.b32.xlu1 %v4885_v32, %s8183_s21  ;;  %v13890_v32 = vld [vmem:[#allocation74_spill] sm:$0xff] }
 0x857   : > { %v4480_v45 = vpop.permute.xlu0 %4479  ;;  %v4918_v14 = vpop.permute.xlu1 %4917 }
 0x858   : > { %4542 = vst.msk [vmem:[#allocation2] sm:$0xfe] %vm1635_vm8, %v4480_v45  ;;  %vm13888_vm8 = vcmask 261248   ;;  %v4323_v45 = vmul.f32 %v11379_v56, %v13890_v32  ;;  %v13903_v32 = vld [vmem:[#allocation78_spill] sm:$0xff] }
 0x859   : > { %4668 = vst.msk [vmem:[#allocation2] sm:$0xff] %vm1848_vm9, %v4606_v9  ;;  %4623 = vrot.lane.b32.xlu0 %v4572_v0, %s8175_s22  ;;  %4371 = vrot.lane.b32.xlu1 %v4322_v48, %s8178_s0  ;;  %v13886_v9 = vld [vmem:[#allocation66_spill] sm:$0xff] }
 0x85a   : > { %v4573_v25 = vmul.f32 %v11379_v56, %v13886_v9  ;;  %v13892_v48 = vld [vmem:[#allocation110_spill] sm:$0xff] }
 0x85b   : > { %v4234_v54 = vpop.permute.xlu0 %4233  ;;  %v4356_v47 = vpop.permute.xlu1 %4355 }
 0x85c   : > { %4293 = vst.msk [vmem:[#allocation2 + $0x10] sm:$0xfe] %vm1216_vm11, %v4234_v54  ;;  %vm13889_vm11 = vmmov %vm13879_vm2  ;;  %v4760_v54 = vmul.f32 %v11492_v36, %v13892_v48 }
 0x85d   : > { %4413 = vst.msk [vmem:[#allocation2 + $0x10] sm:$0xff] %vm13879_vm2, %v4354_v49  ;;  %5051 = vrot.lane.b32.xlu0 %v5004_v21, %s8181_s5  ;;  %4809 = vrot.lane.b32.xlu1 %v4759_v22, %s8177_s3  ;;  %v4886_v49 = vmul.f32 %v11379_v56, %v13885_v53  ;;  %vm13894_vm2 = vcmask 1048448   ;;  %v4203_v22 = vmul.f32 %v11503_v23, %v13895_v15 }
 0x85f   : > { %v4608_v13 = vpop.permute.xlu0 %4607  ;;  %v4794_v58 = vpop.permute.xlu1 %4793 }
 0x860   : > { %4856 = vst.msk [vmem:[#allocation2] sm:$0xff] %vm13883_vm3, %v4794_v58 }
 0x861   : > { %4977 = vst.msk [vmem:[#allocation2] sm:$0xff] %vm13884_vm5, %v4918_v14  ;;  %4497 = vrot.lane.b32.xlu0 %v4446_v43, %s8179_s4  ;;  %4251 = vrot.lane.b32.xlu1 %v4202_v30, %s8182_s6  ;;  %v13891_v14 = vld [vmem:[#allocation127_spill] sm:$0xff]  ;;  %vm13897_vm5 = vmmov %vm13887_vm6  ;;  %v13899_v43 = vld [vmem:[#allocation85_spill] sm:$0xff]  ;;  %v4324_v30 = vmul.f32 %v11407_v34, %v13900_v6 }
 0x862   : > { %v5005_v1 = vmul.f32 %v11492_v36, %v13891_v14  ;;  %v13904_v14 = vld [vmem:[#allocation65_spill] sm:$0xff] }
 0x863   : > { %v4482_v40 = vpop.permute.xlu0 %4481  ;;  %v4236_v4 = vpop.permute.xlu1 %4235 }
 0x864   : > { %4543 = vst.msk [vmem:[#allocation2 + $0x10] sm:$0xff] %vm13887_vm6, %v4482_v40  ;;  %vm13898_vm6 = vcmask 917248   ;;  %v5216_v40 = vld [vmem:[#allocation2 + $0x18] sm:$0xff] }
 0x865   : > { %4294 = vst.msk [vmem:[#allocation2 + $0x20] sm:$0xff] %vm13888_vm8, %v4236_v4  ;;  %4935 = vrot.lane.b32.xlu0 %v4886_v49, %s8183_s21  ;;  %4625 = vrot.lane.b32.xlu1 %v4573_v25, %s8175_s22  ;;  %v13901_v49 = vld [vmem:[#allocation23_spill] sm:$0xff]  ;;  %v13902_v25 = vld [vmem:[#allocation100_spill] sm:$0xff] }
 0x866   : > { %4669 = vst.msk [vmem:[#allocation2 + $0x10] sm:$0xff] %vm1848_vm9, %v4608_v13  ;;  %v13896_v13 = vld [vmem:[#allocation77_spill] sm:$0xff]  ;;  %v5006_v9 = vmul.f32 %v11535_v31, %v13901_v49 }
 0x867   : > { %4414 = vst.msk [vmem:[#allocation2 + $0x20] sm:$0xff] %vm13889_vm11, %v4356_v47  ;;  %v4920_v60 = vpop.permute.xlu0 %4919  ;;  %v4610_v7 = vpop.permute.xlu1 %4609  ;;  %v13893_v47 = vld [vmem:[#allocation62_spill] sm:$0xff]  ;;  %v4887_v58 = vmul.f32 %v11407_v34, %v13896_v13 }
 0x868   : > { %v4447_v3 = vmul.f32 %v11503_v23, %v13893_v47  ;;  %v4574_v23 = vmul.f32 %v11407_v34, %v13899_v43  ;;  %v4761_v34 = vmul.f32 %v11535_v31, %v13902_v25 }
 0x869   : > { %4373 = vrot.lane.b32.xlu0 %v4323_v45, %s8178_s0  ;;  %5053 = vrot.lane.b32.xlu1 %v5005_v1, %s8181_s5  ;;  %v4448_v45 = vmul.f32 %v11538_v17, %v13903_v32  ;;  %v4204_v1 = vmul.f32 %v11538_v17, %v13904_v14  ;;  %v5220_v32 = vld [vmem:[#allocation2 + $0x38] sm:$0xff] }
 0x86b   : > { %v4358_v0 = vpop.permute.xlu0 %4357  ;;  %v5038_v63 = vpop.permute.xlu1 %5037 }
 0x86c   : > { %5097 = vst.msk [vmem:[#allocation2] sm:$0xff] %vm13894_vm2, %v5038_v63  ;;  %v13906_v63 = vld [vmem:[#allocation49_spill] sm:$0xff] }
 0x86d   : > { %4811 = vrot.lane.b32.xlu0 %v4760_v54, %s8177_s3  ;;  %4499 = vrot.lane.b32.xlu1 %v4447_v3, %s8179_s4  ;;  %v4888_v48 = vmul.f32 %v11431_v38, %v13906_v63  ;;  %v13907_v54 = vld [vmem:[#allocation34_spill] sm:$0xff] }
 0x86e   : > { %v4575_v47 = vmul.f32 %v11431_v38, %v13907_v54  ;;  %v13921_v54 = vld [vmem:[#allocation116_spill] sm:$0xff] }
 0x86f   : > { %v4796_v56 = vpop.permute.xlu0 %4795  ;;  %v4484_v21 = vpop.permute.xlu1 %4483 }
 0x870   : > { %4857 = vst.msk [vmem:[#allocation2 + $0x10] sm:$0xff] %vm13883_vm3, %v4796_v56 }
 0x871   : > { %4544 = vst.msk [vmem:[#allocation2 + $0x20] sm:$0xff] %vm13897_vm5, %v4484_v21  ;;  %4253 = vrot.lane.b32.xlu0 %v4203_v22, %s8182_s6  ;;  %4937 = vrot.lane.b32.xlu1 %v4887_v58, %s8183_s21  ;;  %vm13905_vm5 = vmmov %vm13898_vm6  ;;  %v13909_v21 = vld [vmem:[#allocation12_spill] sm:$0xff]  ;;  %v13910_v22 = vld [vmem:[#allocation83_spill] sm:$0xff] }
 0x872   : > { %4978 = vst.msk [vmem:[#allocation2 + $0x10] sm:$0xff] %vm13898_vm6, %v4920_v60  ;;  %vm13908_vm6 = vcmask 523648   ;;  %v4325_v15 = vmul.f32 %v11431_v38, %v13909_v21  ;;  %v5007_v13 = vmul.f32 %v11573_v55, %v13910_v22  ;;  %v5218_v58 = vld [vmem:[#allocation2 + $0x28] sm:$0xff]  ;;  %v13924_v21 = vld [vmem:[#allocation125_spill] sm:$0xff] }
 0x873   : > { %4670 = vst.msk [vmem:[#allocation2 + $0x20] sm:$0xff] %vm1848_vm9, %v4610_v7  ;;  %v4238_v36 = vpop.permute.xlu0 %4237  ;;  %v4922_v5 = vpop.permute.xlu1 %4921  ;;  %v5213_v26 = vld [vmem:[#allocation2] sm:$0xff]  ;;  %v13925_v22 = vld [vmem:[#allocation129_spill] sm:$0xff] }
 0x874   : > { %4295 = vst.msk [vmem:[#allocation2 + $0x30] sm:$0xff] %vm13888_vm8, %v4238_v36  ;;  %5383 = vmatmul.mubr.f32.vlgmr.msra.gmra.mrb[68].mxu1 %v5213_v26  ;;  %v13911_v26 = vld [vmem:[#allocation91_spill] sm:$0xff] }
 0x875   : > { %4415 = vst.msk [vmem:[#allocation2 + $0x30] sm:$0xff] %vm13889_vm11, %v4358_v0  ;;  %4627 = vrot.lane.b32.xlu0 %v4574_v23, %s8175_s22  ;;  %4375 = vrot.lane.b32.xlu1 %v4324_v30, %s8178_s0  ;;  %v4762_v43 = vmul.f32 %v11573_v55, %v13911_v26  ;;  %v13912_v23 = vld [vmem:[#allocation96_spill] sm:$0xff] }
 0x876   : > { %7086 = vmatprep.mubr.msk.f32.mxu1 %vm714_vm4, %v5216_v40  ;;  %v4449_v6 = vmul.f32 %v11576_v28, %v13912_v23  ;;  %v13913_v40 = vld [vmem:[#allocation105_spill] sm:$0xff] }
 0x877   : > { %v4612_v4 = vpop.permute.xlu0 %4611  ;;  %v4360_v53 = vpop.permute.xlu1 %4359 }
 0x879   : > { %5055 = vrot.lane.b32.xlu0 %v5006_v9, %s8181_s5  ;;  %4813 = vrot.lane.b32.xlu1 %v4761_v34, %s8177_s3  ;;  %v13917_v34 = vld [vmem:[#allocation119_spill] sm:$0xff] }
 0x87b   : > { %v5040_v60 = vpop.permute.xlu0 %5039  ;;  %v4798_v7 = vpop.permute.xlu1 %4797 }
 0x87c   : > { %5098 = vst.msk [vmem:[#allocation2 + $0x10] sm:$0xff] %vm13894_vm2, %v5040_v60  ;;  %v13918_v60 = vld [vmem:[#allocation124_spill] sm:$0xff] }
 0x87d   : > { %4858 = vst.msk [vmem:[#allocation2 + $0x20] sm:$0xff] %vm13883_vm3, %v4798_v7  ;;  %4501 = vrot.lane.b32.xlu0 %v4448_v45, %s8179_s4  ;;  %4255 = vrot.lane.b32.xlu1 %v4204_v1, %s8182_s6  ;;  %v4326_v7 = vmul.f32 %v11464_v46, %v13918_v60  ;;  %v13919_v1 = vld [vmem:[#allocation98_spill] sm:$0xff] }
 0x87e   : > { %4979 = vst.msk [vmem:[#allocation2 + $0x20] sm:$0xff] %vm13905_vm5, %v4922_v5  ;;  %vm13915_vm5 = vmmov %vm13908_vm6 }
 0x87f   : > { %v4486_v31 = vpop.permute.xlu0 %4485  ;;  %v4240_v0 = vpop.permute.xlu1 %4239 }
 0x880   : > { %4545 = vst.msk [vmem:[#allocation2 + $0x30] sm:$0xff] %vm13908_vm6, %v4486_v31  ;;  %vm13916_vm6 = vcmask 917248   ;;  %v5008_v31 = vmul.f32 %v11605_v44, %v13919_v1  ;;  %v5224_v1 = vld [vmem:[#allocation2 + $0x58] sm:$0xff] }
 0x881   : > { %4296 = vst.msk [vmem:[#allocation2 + $0x40] sm:$0xff] %vm13888_vm8, %v4240_v0  ;;  %4939 = vrot.lane.b32.xlu0 %v4888_v48, %s8183_s21  ;;  %4629 = vrot.lane.b32.xlu1 %v4575_v47, %s8175_s22  ;;  %v13920_v0 = vld [vmem:[#allocation107_spill] sm:$0xff]  ;;  %v4450_v47 = vmul.f32 %v11615_v33, %v13921_v54 }
 0x882   : > { %4671 = vst.msk [vmem:[#allocation2 + $0x30] sm:$0xff] %vm1848_vm9, %v4612_v4  ;;  %v4205_v4 = vmul.f32 %v11576_v28, %v13913_v40  ;;  %v4576_v28 = vmul.f32 %v11464_v46, %v13917_v34  ;;  %v13929_v40 = vld [vmem:[#allocation106_spill] sm:$0xff] }
 0x883   : > { %4416 = vst.msk [vmem:[#allocation2 + $0x40] sm:$0xff] %vm13889_vm11, %v4360_v53  ;;  %v4924_v17 = vpop.permute.xlu0 %4923  ;;  %v4614_v3 = vpop.permute.xlu1 %4613  ;;  %v5215_v56 = vld [vmem:[#allocation2 + $0x10] sm:$0xff]  ;;  %v13914_v53 = vld [vmem:[#allocation114_spill] sm:$0xff] }
 0x884   : > { %5388 = vmatmul.mubr.f32.gmra.mrb[70].mxu1 %v5215_v56  ;;  %v4889_v49 = vmul.f32 %v11464_v46, %v13914_v53  ;;  %v4763_v46 = vmul.f32 %v11605_v44, %v13920_v0  ;;  %v13930_v53 = vld [vmem:[#allocation82_spill] sm:$0xff] }
 0x885   : > { %4377 = vrot.lane.b32.xlu0 %v4325_v15, %s8178_s0  ;;  %5057 = vrot.lane.b32.xlu1 %v5007_v13, %s8181_s5  ;;  %v4890_v15 = vmul.f32 %v11487_v51, %v13924_v21  ;;  %v4577_v13 = vmul.f32 %v11487_v51, %v13925_v22  ;;  %v13932_v34 = vld [vmem:[#allocation134_spill] sm:$0xff] }
 0x886   : > { %7087 = vmatprep.mubr.msk.f32.mxu1 %vm714_vm4, %v5218_v58 }
 0x887   : > { %v4362_v36 = vpop.permute.xlu0 %4361  ;;  %v5042_v5 = vpop.permute.xlu1 %5041 }
 0x888   : > { %5099 = vst.msk [vmem:[#allocation2 + $0x20] sm:$0xff] %vm13894_vm2, %v5042_v5  ;;  %v13927_v5 = vld [vmem:[#allocation132_spill] sm:$0xff] }
 0x889   : > { %4815 = vrot.lane.b32.xlu0 %v4762_v43, %s8177_s3  ;;  %4503 = vrot.lane.b32.xlu1 %v4449_v6, %s8179_s4  ;;  %v4327_v26 = vmul.f32 %v11487_v51, %v13927_v5  ;;  %v13928_v43 = vld [vmem:[#allocation21_spill] sm:$0xff]  ;;  %v5222_v6 = vld [vmem:[#allocation2 + $0x48] sm:$0xff]  ;;  %v13945_v5 = vld [vmem:[#allocation14_spill] sm:$0xff] }
 0x88a   : > { %v5009_v23 = vmul.f32 %v11636_v29, %v13928_v43  ;;  %v13946_v43 = vld [vmem:[#allocation139_spill] sm:$0xff] }
 0x88b   : > { %v4800_v38 = vpop.permute.xlu0 %4799  ;;  %v4488_v30 = vpop.permute.xlu1 %4487 }
 0x88c   : > { %4859 = vst.msk [vmem:[#allocation2 + $0x30] sm:$0xff] %vm13883_vm3, %v4800_v38 }
 0x88d   : > { %4546 = vst.msk [vmem:[#allocation2 + $0x40] sm:$0xff] %vm13915_vm5, %v4488_v30  ;;  %4257 = vrot.lane.b32.xlu0 %v4205_v4, %s8182_s6  ;;  %4941 = vrot.lane.b32.xlu1 %v4889_v49, %s8183_s21  ;;  %vm13923_vm5 = vmmov %vm13916_vm6  ;;  %v4764_v4 = vmul.f32 %v11636_v29, %v13929_v40  ;;  %v4451_v49 = vmul.f32 %v11639_v57, %v13930_v53  ;;  %v13947_v40 = vld [vmem:[#allocation144_spill] sm:$0xff]  ;;  %v13948_v53 = vld [vmem:[#allocation146_spill] sm:$0xff] }
 0x88e   : > { %4980 = vst.msk [vmem:[#allocation2 + $0x30] sm:$0xff] %vm13916_vm6, %v4924_v17  ;;  %v13922_v17 = vld [vmem:[#allocation120_spill] sm:$0xff]  ;;  %vm13926_vm6 = vcmask 523648  }
 0x88f   : > { %4672 = vst.msk [vmem:[#allocation2 + $0x40] sm:$0xff] %vm1848_vm9, %v4614_v3  ;;  %v4242_v55 = vpop.permute.xlu0 %4241  ;;  %v4926_v9 = vpop.permute.xlu1 %4925  ;;  %v5217_v25 = vld [vmem:[#allocation2 + $0x20] sm:$0xff]  ;;  %v4206_v3 = vmul.f32 %v11615_v33, %v13922_v17  ;;  %v13939_v17 = vld [vmem:[#allocation136_spill] sm:$0xff] }
 0x890   : > { %4297 = vst.msk [vmem:[#allocation2 + $0x50] sm:$0xff] %vm13888_vm8, %v4242_v55  ;;  %5393 = vmatmul.mubr.f32.gmra.mrb[72].mxu1 %v5217_v25 }
 0x891   : > { %4417 = vst.msk [vmem:[#allocation2 + $0x50] sm:$0xff] %vm13889_vm11, %v4362_v36  ;;  %4631 = vrot.lane.b32.xlu0 %v4576_v28, %s8175_s22  ;;  %4379 = vrot.lane.b32.xlu1 %v4326_v7, %s8178_s0  ;;  %v4891_v28 = vmul.f32 %v11517_v50, %v13932_v34 }
 0x892   : > { %7088 = vmatprep.mubr.msk.f32.mxu1 %vm714_vm4, %v5220_v32  ;;  %v13935_v32 = vld [vmem:[#allocation141_spill] sm:$0xff] }
 0x893   : > { %v4616_v45 = vpop.permute.xlu0 %4615  ;;  %v4364_v14 = vpop.permute.xlu1 %4363 }
 0x895   : > { %5059 = vrot.lane.b32.xlu0 %v5008_v31, %s8181_s5  ;;  %4817 = vrot.lane.b32.xlu1 %v4763_v46, %s8177_s3  ;;  %v13937_v46 = vld [vmem:[#allocation128_spill] sm:$0xff] }
 0x897   : > { %v5044_v63 = vpop.permute.xlu0 %5043  ;;  %v4802_v48 = vpop.permute.xlu1 %4801 }
 0x898   : > { %5100 = vst.msk [vmem:[#allocation2 + $0x30] sm:$0xff] %vm13894_vm2, %v5044_v63  ;;  %v5010_v63 = vmul.f32 %v11657_v27, %v13937_v46 }
 0x899   : > { %4860 = vst.msk [vmem:[#allocation2 + $0x40] sm:$0xff] %vm13883_vm3, %v4802_v48  ;;  %4505 = vrot.lane.b32.xlu0 %v4450_v47, %s8179_s4  ;;  %4259 = vrot.lane.b32.xlu1 %v4206_v3, %s8182_s6  ;;  %v13938_v48 = vld [vmem:[#allocation131_spill] sm:$0xff]  ;;  %v4452_v3 = vmul.f32 %v11665_v42, %v13939_v17 }
 0x89a   : > { %4981 = vst.msk [vmem:[#allocation2 + $0x40] sm:$0xff] %vm13923_vm5, %v4926_v9  ;;  %v13931_v9 = vld [vmem:[#allocation130_spill] sm:$0xff]  ;;  %vm13933_vm5 = vmmov %vm13926_vm6 }
 0x89b   : > { %v4490_v44 = vpop.permute.xlu0 %4489  ;;  %v4244_v56 = vpop.permute.xlu1 %4243  ;;  %v4207_v25 = vmul.f32 %v11639_v57, %v13931_v9  ;;  %v4578_v57 = vmul.f32 %v11517_v50, %v13935_v32 }
 0x89c   : > { %4547 = vst.msk [vmem:[#allocation2 + $0x50] sm:$0xff] %vm13926_vm6, %v4490_v44  ;;  %vm13934_vm6 = vcmask 917248   ;;  %v13940_v44 = vld [vmem:[#allocation69_spill] sm:$0xff] }
 0x89d   : > { %4298 = vst.msk [vmem:[#allocation2 + $0x60] sm:$0xff] %vm13888_vm8, %v4244_v56  ;;  %4943 = vrot.lane.b32.xlu0 %v4890_v15, %s8183_s21  ;;  %4633 = vrot.lane.b32.xlu1 %v4577_v13, %s8175_s22  ;;  %v4208_v56 = vmul.f32 %v11665_v42, %v13940_v44  ;;  %v13942_v15 = vld [vmem:[#allocation55_spill] sm:$0xff]  ;;  %v13943_v13 = vld [vmem:[#allocation38_spill] sm:$0xff] }
 0x89e   : > { %4673 = vst.msk [vmem:[#allocation2 + $0x50] sm:$0xff] %vm1848_vm9, %v4616_v45  ;;  %v13936_v45 = vld [vmem:[#allocation145_spill] sm:$0xff]  ;;  %v4892_v22 = vmul.f32 %v11542_v19, %v13942_v15 }
 0x89f   : > { %4418 = vst.msk [vmem:[#allocation2 + $0x60] sm:$0xff] %vm13889_vm11, %v4364_v14  ;;  %v4928_v33 = vpop.permute.xlu0 %4927  ;;  %v4618_v58 = vpop.permute.xlu1 %4617  ;;  %v5219_v36 = vld [vmem:[#allocation2 + $0x30] sm:$0xff]  ;;  %v4328_v14 = vmul.f32 %v11517_v50, %v13936_v45  ;;  %v4765_v50 = vmul.f32 %v11657_v27, %v13938_v48  ;;  %v13957_v48 = vld [vmem:[#allocation154_spill] sm:$0xff] }
 0x8a0   : > { %5398 = vmatmul.mubr.f32.gmra.mrb[74].mxu1 %v5219_v36 }
 0x8a1   : > { %4381 = vrot.lane.b32.xlu0 %v4327_v26, %s8178_s0  ;;  %5061 = vrot.lane.b32.xlu1 %v5009_v23, %s8181_s5  ;;  %v4329_v26 = vmul.f32 %v11542_v19, %v13945_v5  ;;  %v5011_v23 = vmul.f32 %v11683_v12, %v13946_v43 }
 0x8a2   : > { %7089 = vmatprep.mubr.msk.f32.mxu1 %vm714_vm4, %v5222_v6  ;;  %v5226_v6 = vld [vmem:[#allocation2 + $0x68] sm:$0xff] }
 0x8a3   : > { %v4366_v38 = vpop.permute.xlu0 %4365  ;;  %v5046_v30 = vpop.permute.xlu1 %5045 }
 0x8a4   : > { %5101 = vst.msk [vmem:[#allocation2 + $0x40] sm:$0xff] %vm13894_vm2, %v5046_v30 }
 0x8a5   : > { %4819 = vrot.lane.b32.xlu0 %v4764_v4, %s8177_s3  ;;  %4507 = vrot.lane.b32.xlu1 %v4451_v49, %s8179_s4  ;;  %v4766_v4 = vmul.f32 %v11683_v12, %v13947_v40  ;;  %v4453_v49 = vmul.f32 %v11686_v24, %v13948_v53 }
 0x8a7   : > { %v4804_v51 = vpop.permute.xlu0 %4803  ;;  %v4492_v55 = vpop.permute.xlu1 %4491 }
 0x8a8   : > { %4861 = vst.msk [vmem:[#allocation2 + $0x50] sm:$0xff] %vm13883_vm3, %v4804_v51 }
 0x8a9   : > { %4548 = vst.msk [vmem:[#allocation2 + $0x60] sm:$0xff] %vm13933_vm5, %v4492_v55  ;;  %4261 = vrot.lane.b32.xlu0 %v4207_v25, %s8182_s6  ;;  %4945 = vrot.lane.b32.xlu1 %v4891_v28, %s8183_s21  ;;  %vm13941_vm5 = vmmov %vm13934_vm6  ;;  %v13949_v55 = vld [vmem:[#allocation149_spill] sm:$0xff]  ;;  %v13950_v25 = vld [vmem:[#allocation152_spill] sm:$0xff] }
 0x8aa   : > { %4982 = vst.msk [vmem:[#allocation2 + $0x50] sm:$0xff] %vm13934_vm6, %v4928_v33  ;;  %v4579_v33 = vmul.f32 %v11542_v19, %v13943_v13  ;;  %vm13944_vm6 = vcmask 523648   ;;  %v4209_v9 = vmul.f32 %v11686_v24, %v13949_v55  ;;  %v4893_v34 = vmul.f32 %v11564_v11, %v13950_v25  ;;  %v13972_v55 = vld [vmem:[#allocation168_spill] sm:$0xff]  ;;  %v5232_v25 = vld [vmem:[#allocation2 + $0x98] sm:$0xff] }
 0x8ab   : > { %4674 = vst.msk [vmem:[#allocation2 + $0x60] sm:$0xff] %vm1848_vm9, %v4618_v58  ;;  %v4246_v29 = vpop.permute.xlu0 %4245  ;;  %v4930_v60 = vpop.permute.xlu1 %4929  ;;  %v5221_v7 = vld [vmem:[#allocation2 + $0x40] sm:$0xff] }
 0x8ac   : > { %4299 = vst.msk [vmem:[#allocation2 + $0x70] sm:$0xff] %vm13888_vm8, %v4246_v29  ;;  %5403 = vmatmul.mubr.f32.gmra.mrb[76].mxu1 %v5221_v7  ;;  %v13954_v7 = vld [vmem:[#allocation52_spill] sm:$0xff] }
 0x8ad   : > { %4419 = vst.msk [vmem:[#allocation2 + $0x70] sm:$0xff] %vm13889_vm11, %v4366_v38  ;;  %4635 = vrot.lane.b32.xlu0 %v4578_v57, %s8175_s22  ;;  %4383 = vrot.lane.b32.xlu1 %v4328_v14, %s8178_s0  ;;  %v4330_v32 = vmul.f32 %v11564_v11, %v13954_v7  ;;  %v5228_v57 = vld [vmem:[#allocation2 + $0x78] sm:$0xff] }
 0x8ae   : > { %7090 = vmatprep.mubr.msk.f32.mxu1 %vm714_vm4, %v5224_v1  ;;  %v13955_v1 = vld [vmem:[#allocation147_spill] sm:$0xff] }
 0x8af   : > { %v4620_v31 = vpop.permute.xlu0 %4619  ;;  %v4368_v0 = vpop.permute.xlu1 %4367 }
 0x8b1   : > { %5063 = vrot.lane.b32.xlu0 %v5010_v63, %s8181_s5  ;;  %4821 = vrot.lane.b32.xlu1 %v4765_v50, %s8177_s3  ;;  %v4454_v50 = vmul.f32 %v11697_v20, %v13957_v48 }
 0x8b3   : > { %v5048_v54 = vpop.permute.xlu0 %5047  ;;  %v4806_v47 = vpop.permute.xlu1 %4805 }
 0x8b4   : > { %5102 = vst.msk [vmem:[#allocation2 + $0x50] sm:$0xff] %vm13894_vm2, %v5048_v54  ;;  %v13958_v54 = vld [vmem:[#allocation157_spill] sm:$0xff] }
 0x8b5   : > { %4862 = vst.msk [vmem:[#allocation2 + $0x60] sm:$0xff] %vm13883_vm3, %v4806_v47  ;;  %4509 = vrot.lane.b32.xlu0 %v4452_v3, %s8179_s4  ;;  %4263 = vrot.lane.b32.xlu1 %v4208_v56, %s8182_s6  ;;  %v4210_v47 = vmul.f32 %v11697_v20, %v13958_v54  ;;  %v13960_v3 = vld [vmem:[#allocation161_spill] sm:$0xff]  ;;  %v13961_v56 = vld [vmem:[#allocation166_spill] sm:$0xff] }
 0x8b6   : > { %4983 = vst.msk [vmem:[#allocation2 + $0x60] sm:$0xff] %vm13941_vm5, %v4930_v60  ;;  %vm13951_vm5 = vmmov %vm13944_vm6  ;;  %v13953_v60 = vld [vmem:[#allocation156_spill] sm:$0xff]  ;;  %v4894_v44 = vmul.f32 %v11588_v35, %v13960_v3 }
 0x8b7   : > { %v4494_v27 = vpop.permute.xlu0 %4493  ;;  %v4248_v21 = vpop.permute.xlu1 %4247  ;;  %v4580_v24 = vmul.f32 %v11564_v11, %v13953_v60  ;;  %v13974_v60 = vld [vmem:[#allocation183_spill] sm:$0xff] }
 0x8b8   : > { %4549 = vst.msk [vmem:[#allocation2 + $0x70] sm:$0xff] %vm13944_vm6, %v4494_v27  ;;  %vm13952_vm6 = vcmask 917248   ;;  %v4581_v27 = vmul.f32 %v11588_v35, %v13961_v56  ;;  %v13983_v56 = vld [vmem:[#allocation86_spill] sm:$0xff] }
 0x8b9   : > { %4300 = vst.msk [vmem:[#allocation2 + $0x80] sm:$0xff] %vm13888_vm8, %v4248_v21  ;;  %4947 = vrot.lane.b32.xlu0 %v4892_v22, %s8183_s21  ;;  %4637 = vrot.lane.b32.xlu1 %v4579_v33, %s8175_s22  ;;  %v13963_v22 = vld [vmem:[#allocation172_spill] sm:$0xff]  ;;  %v13964_v33 = vld [vmem:[#allocation25_spill] sm:$0xff] }
 0x8ba   : > { %4675 = vst.msk [vmem:[#allocation2 + $0x70] sm:$0xff] %vm1848_vm9, %v4620_v31  ;;  %v5012_v31 = vmul.f32 %v11694_v2, %v13955_v1  ;;  %v4331_v13 = vmul.f32 %v11588_v35, %v13963_v22  ;;  %v13985_v22 = vld [vmem:[#allocation115_spill] sm:$0xff] }
 0x8bb   : > { %4420 = vst.msk [vmem:[#allocation2 + $0x80] sm:$0xff] %vm13889_vm11, %v4368_v0  ;;  %v4932_v42 = vpop.permute.xlu0 %4931  ;;  %v4622_v58 = vpop.permute.xlu1 %4621  ;;  %v5223_v36 = vld [vmem:[#allocation2 + $0x50] sm:$0xff]  ;;  %v13956_v0 = vld [vmem:[#allocation151_spill] sm:$0xff] }
 0x8bc   : > { %5408 = vmatmul.mubr.f32.gmra.mrb[78].mxu1 %v5223_v36  ;;  %v4767_v11 = vmul.f32 %v11694_v2, %v13956_v0  ;;  %v13978_v0 = vld [vmem:[#allocation72_spill] sm:$0xff] }
 0x8bd   : > { %4385 = vrot.lane.b32.xlu0 %v4329_v26, %s8178_s0  ;;  %5065 = vrot.lane.b32.xlu1 %v5011_v23, %s8181_s5  ;;  %v13965_v26 = vld [vmem:[#allocation113_spill] sm:$0xff]  ;;  %v13966_v23 = vld [vmem:[#allocation84_spill] sm:$0xff] }
 0x8be   : > { %7091 = vmatprep.mubr.msk.f32.mxu1 %vm714_vm4, %v5226_v6  ;;  %v4768_v43 = vmul.f32 %v11708_v52, %v13965_v26  ;;  %v4455_v6 = vmul.f32 %v11716_v18, %v13966_v23 }
 0x8bf   : > { %v4370_v38 = vpop.permute.xlu0 %4369  ;;  %v5050_v30 = vpop.permute.xlu1 %5049 }
 0x8c0   : > { %5103 = vst.msk [vmem:[#allocation2 + $0x60] sm:$0xff] %vm13894_vm2, %v5050_v30  ;;  %v13967_v30 = vld [vmem:[#allocation71_spill] sm:$0xff] }
 0x8c1   : > { %4823 = vrot.lane.b32.xlu0 %v4766_v4, %s8177_s3  ;;  %4511 = vrot.lane.b32.xlu1 %v4453_v49, %s8179_s4  ;;  %v4211_v40 = vmul.f32 %v11716_v18, %v13967_v30  ;;  %v13968_v4 = vld [vmem:[#allocation57_spill] sm:$0xff] }
 0x8c2   : > { %v4895_v53 = vmul.f32 %v11609_v37, %v13968_v4 }
 0x8c3   : > { %v4808_v19 = vpop.permute.xlu0 %4807  ;;  %v4496_v51 = vpop.permute.xlu1 %4495 }
 0x8c4   : > { %4863 = vst.msk [vmem:[#allocation2 + $0x70] sm:$0xff] %vm13883_vm3, %v4808_v19 }
 0x8c5   : > { %4550 = vst.msk [vmem:[#allocation2 + $0x80] sm:$0xff] %vm13951_vm5, %v4496_v51  ;;  %4265 = vrot.lane.b32.xlu0 %v4209_v9, %s8182_s6  ;;  %4949 = vrot.lane.b32.xlu1 %v4893_v34, %s8183_s21  ;;  %vm13959_vm5 = vmmov %vm13952_vm6  ;;  %v13971_v51 = vld [vmem:[#allocation40_spill] sm:$0xff]  ;;  %v4769_v9 = vmul.f32 %v11731_v10, %v13972_v55 }
 0x8c6   : > { %4984 = vst.msk [vmem:[#allocation2 + $0x70] sm:$0xff] %vm13952_vm6, %v4932_v42  ;;  %vm13962_vm6 = vcmask 523648   ;;  %v5013_v42 = vmul.f32 %v11708_v52, %v13964_v33  ;;  %v4582_v18 = vmul.f32 %v11609_v37, %v13971_v51  ;;  %v5240_v51 = vld [vmem:[#allocation2 + $0xd8] sm:$0xff] }
 0x8c7   : > { %4676 = vst.msk [vmem:[#allocation2 + $0x80] sm:$0xff] %vm1848_vm9, %v4622_v58  ;;  %v4250_v12 = vpop.permute.xlu0 %4249  ;;  %v4934_v28 = vpop.permute.xlu1 %4933  ;;  %v5225_v29 = vld [vmem:[#allocation2 + $0x60] sm:$0xff]  ;;  %v5230_v58 = vld [vmem:[#allocation2 + $0x88] sm:$0xff] }
 0x8c8   : > { %4301 = vst.msk [vmem:[#allocation2 + $0x90] sm:$0xff] %vm13888_vm8, %v4250_v12  ;;  %5413 = vmatmul.mubr.f32.gmra.mrb[80].mxu1 %v5225_v29 }
 0x8c9   : > { %4421 = vst.msk [vmem:[#allocation2 + $0x90] sm:$0xff] %vm13889_vm11, %v4370_v38  ;;  %4639 = vrot.lane.b32.xlu0 %v4580_v24, %s8175_s22  ;;  %4387 = vrot.lane.b32.xlu1 %v4330_v32, %s8178_s0  ;;  %v5016_v24 = vmul.f32 %v11720_v8, %v13974_v60 }
 0x8ca   : > { %7092 = vmatprep.mubr.msk.f32.mxu1 %vm714_vm4, %v5228_v57  ;;  %v13975_v57 = vld [vmem:[#allocation175_spill] sm:$0xff] }
 0x8cb   : > { %v4624_v45 = vpop.permute.xlu0 %4623  ;;  %v4372_v14 = vpop.permute.xlu1 %4371 }
 0x8cd   : > { %5067 = vrot.lane.b32.xlu0 %v5012_v31, %s8181_s5  ;;  %4825 = vrot.lane.b32.xlu1 %v4767_v11, %s8177_s3  ;;  %v4212_v11 = vmul.f32 %v11734_v61, %v13978_v0 }
 0x8cf   : > { %v5052_v46 = vpop.permute.xlu0 %5051  ;;  %v4810_v63 = vpop.permute.xlu1 %4809 }
 0x8d0   : > { %5104 = vst.msk [vmem:[#allocation2 + $0x70] sm:$0xff] %vm13894_vm2, %v5052_v46  ;;  %v13979_v46 = vld [vmem:[#allocation95_spill] sm:$0xff] }
 0x8d1   : > { %4864 = vst.msk [vmem:[#allocation2 + $0x80] sm:$0xff] %vm13883_vm3, %v4810_v63  ;;  %4513 = vrot.lane.b32.xlu0 %v4454_v50, %s8179_s4  ;;  %4267 = vrot.lane.b32.xlu1 %v4210_v47, %s8182_s6  ;;  %v4770_v63 = vmul.f32 %v11742_v16, %v13979_v46  ;;  %v13981_v47 = vld [vmem:[#allocation59_spill] sm:$0xff] }
 0x8d2   : > { %4985 = vst.msk [vmem:[#allocation2 + $0x80] sm:$0xff] %vm13959_vm5, %v4934_v28  ;;  %vm13969_vm5 = vmmov %vm13962_vm6  ;;  %v13973_v28 = vld [vmem:[#allocation163_spill] sm:$0xff] }
 0x8d3   : > { %v4498_v2 = vpop.permute.xlu0 %4497  ;;  %v4252_v17 = vpop.permute.xlu1 %4251  ;;  %v5014_v29 = vmul.f32 %v11731_v10, %v13973_v28 }
 0x8d4   : > { %4551 = vst.msk [vmem:[#allocation2 + $0x90] sm:$0xff] %vm13962_vm6, %v4498_v2  ;;  %vm13970_vm6 = vcmask 917248   ;;  %v13982_v2 = vld [vmem:[#allocation193_spill] sm:$0xff] }
 0x8d5   : > { %4302 = vst.msk [vmem:[#allocation2 + $0xa0] sm:$0xff] %vm13888_vm8, %v4252_v17  ;;  %4951 = vrot.lane.b32.xlu0 %v4894_v44, %s8183_s21  ;;  %4641 = vrot.lane.b32.xlu1 %v4581_v27, %s8175_s22  ;;  %v5234_v17 = vld [vmem:[#allocation2 + $0xa8] sm:$0xff]  ;;  %v4457_v27 = vmul.f32 %v11753_v62, %v13983_v56 }
 0x8d6   : > { %4677 = vst.msk [vmem:[#allocation2 + $0x90] sm:$0xff] %vm1848_vm9, %v4624_v45  ;;  %v4456_v45 = vmul.f32 %v11734_v61, %v13975_v57  ;;  %v4896_v61 = vmul.f32 %v11628_v59, %v13981_v47 }
 0x8d7   : > { %4422 = vst.msk [vmem:[#allocation2 + $0xa0] sm:$0xff] %vm13889_vm11, %v4372_v14  ;;  %v4936_v20 = vpop.permute.xlu0 %4935  ;;  %v4626_v21 = vpop.permute.xlu1 %4625  ;;  %v5227_v15 = vld [vmem:[#allocation2 + $0x70] sm:$0xff] }
 0x8d8   : > { %5418 = vmatmul.mubr.f32.gmra.mrb[82].mxu1 %v5227_v15  ;;  %v13976_v14 = vld [vmem:[#allocation176_spill] sm:$0xff] }
 0x8d9   : > { %4389 = vrot.lane.b32.xlu0 %v4331_v13, %s8178_s0  ;;  %5069 = vrot.lane.b32.xlu1 %v5013_v42, %s8181_s5  ;;  %v5015_v1 = vmul.f32 %v11742_v16, %v13976_v14  ;;  %v4332_v16 = vmul.f32 %v11609_v37, %v13982_v2  ;;  %v4771_v13 = vmul.f32 %v11720_v8, %v13985_v22  ;;  %v5236_v42 = vld [vmem:[#allocation2 + $0xb8] sm:$0xff] }
 0x8da   : > { %7093 = vmatprep.mubr.msk.f32.mxu1 %vm714_vm4, %v5230_v58 }
 0x8db   : > { %v4374_v36 = vpop.permute.xlu0 %4373  ;;  %v5054_v5 = vpop.permute.xlu1 %5053 }
 0x8dc   : > { %5105 = vst.msk [vmem:[#allocation2 + $0x80] sm:$0xff] %vm13894_vm2, %v5054_v5 }
 0x8dd   : > { %4827 = vrot.lane.b32.xlu0 %v4768_v43, %s8177_s3  ;;  %4515 = vrot.lane.b32.xlu1 %v4455_v6, %s8179_s4 }
 0x8df   : > { %v4812_v35 = vpop.permute.xlu0 %4811  ;;  %v4500_v38 = vpop.permute.xlu1 %4499 }
 0x8e0   : > { %4865 = vst.msk [vmem:[#allocation2 + $0x90] sm:$0xff] %vm13883_vm3, %v4812_v35 }
 0x8e1   : > { %4552 = vst.msk [vmem:[#allocation2 + $0xa0] sm:$0xff] %vm13969_vm5, %v4500_v38  ;;  %4269 = vrot.lane.b32.xlu0 %v4211_v40, %s8182_s6  ;;  %4953 = vrot.lane.b32.xlu1 %v4895_v53, %s8183_s21  ;;  %vm13977_vm5 = vmmov %vm13970_vm6  ;;  %v5238_v38 = vld [vmem:[#allocation2 + $0xc8] sm:$0xff] }
 0x8e2   : > { %4986 = vst.msk [vmem:[#allocation2 + $0x90] sm:$0xff] %vm13970_vm6, %v4936_v20  ;;  %vm13980_vm6 = vcmask 523648   ;;  %v13984_v20 = vld [vmem:[#allocation196_spill] sm:$0xff] }
 0x8e3   : > { %4678 = vst.msk [vmem:[#allocation2 + $0xa0] sm:$0xff] %vm1848_vm9, %v4626_v21  ;;  %v4254_v52 = vpop.permute.xlu0 %4253  ;;  %v4938_v49 = vpop.permute.xlu1 %4937  ;;  %v5229_v19 = vld [vmem:[#allocation2 + $0x80] sm:$0xff]  ;;  %v4583_v21 = vmul.f32 %v11628_v59, %v13984_v20 }
 0x8e4   : > { %4303 = vst.msk [vmem:[#allocation2 + $0xb0] sm:$0xff] %vm13888_vm8, %v4254_v52  ;;  %5423 = vmatmul.mubr.f32.gmra.mrb[84].mxu1 %v5229_v19 }
 0x8e5   : > { %4423 = vst.msk [vmem:[#allocation2 + $0xb0] sm:$0xff] %vm13889_vm11, %v4374_v36  ;;  %4643 = vrot.lane.b32.xlu0 %v4582_v18, %s8175_s22  ;;  %4829 = vrot.lane.b32.xlu1 %v4769_v9, %s8177_s3 }
 0x8e6   : > { %7094 = vmatprep.mubr.msk.f32.mxu1 %vm714_vm4, %v5232_v25 }
 0x8e7   : > { %v4628_v34 = vpop.permute.xlu0 %4627  ;;  %v4376_v12 = vpop.permute.xlu1 %4375 }
 0x8e9   : > { %5071 = vrot.lane.b32.xlu0 %v5014_v29, %s8181_s5  ;;  %5075 = vrot.lane.b32.xlu1 %v5016_v24, %s8181_s5  ;;  %v5242_v24 = vld [vmem:[#allocation2 + $0xe8] sm:$0xff] }
 0x8eb   : > { %v5056_v7 = vpop.permute.xlu0 %5055  ;;  %v4814_v32 = vpop.permute.xlu1 %4813 }
 0x8ec   : > { %5106 = vst.msk [vmem:[#allocation2 + $0x90] sm:$0xff] %vm13894_vm2, %v5056_v7 }
 0x8ed   : > { %4866 = vst.msk [vmem:[#allocation2 + $0xa0] sm:$0xff] %vm13883_vm3, %v4814_v32  ;;  %4517 = vrot.lane.b32.xlu0 %v4456_v45, %s8179_s4  ;;  %5073 = vrot.lane.b32.xlu1 %v5015_v1, %s8181_s5 }
 0x8ee   : > { %4987 = vst.msk [vmem:[#allocation2 + $0xa0] sm:$0xff] %vm13977_vm5, %v4938_v49  ;;  %vm13986_vm5 = vmmov %vm13980_vm6 }
 0x8ef   : > { %v4502_v10 = vpop.permute.xlu0 %4501  ;;  %v4256_v31 = vpop.permute.xlu1 %4255 }
 0x8f0   : > { %4553 = vst.msk [vmem:[#allocation2 + $0xb0] sm:$0xff] %vm13980_vm6, %v4502_v10  ;;  %vm13987_vm6 = vcmask 917248  }
 0x8f1   : > { %4304 = vst.msk [vmem:[#allocation2 + $0xc0] sm:$0xff] %vm13888_vm8, %v4256_v31  ;;  %4271 = vrot.lane.b32.xlu0 %v4212_v11, %s8182_s6  ;;  %4831 = vrot.lane.b32.xlu1 %v4770_v63, %s8177_s3  ;;  %v5244_v31 = vld [vmem:[#allocation2 + $0xf8] sm:$0xff] }
 0x8f2   : > { %4679 = vst.msk [vmem:[#allocation2 + $0xb0] sm:$0xff] %vm1848_vm9, %v4628_v34 }
 0x8f3   : > { %4424 = vst.msk [vmem:[#allocation2 + $0xc0] sm:$0xff] %vm13889_vm11, %v4376_v12  ;;  %v4940_v48 = vpop.permute.xlu0 %4939  ;;  %v4630_v50 = vpop.permute.xlu1 %4629  ;;  %v5231_v54 = vld [vmem:[#allocation2 + $0x90] sm:$0xff] }
 0x8f4   : > { %5428 = vmatmul.mubr.f32.gmra.mrb[86].mxu1 %v5231_v54 }
 0x8f5   : > { %4955 = vrot.lane.b32.xlu0 %v4896_v61, %s8183_s21  ;;  %4391 = vrot.lane.b32.xlu1 %v4332_v16, %s8178_s0 }
 0x8f6   : > { %7095 = vmatprep.mubr.msk.f32.mxu1 %vm714_vm4, %v5234_v17  ;;  %v5246_v17 = vld [vmem:[#allocation2 + $0x108] sm:$0xff] }
 0x8f7   : > { %v4378_v3 = vpop.permute.xlu0 %4377  ;;  %v5058_v44 = vpop.permute.xlu1 %5057 }
 0x8f8   : > { %5107 = vst.msk [vmem:[#allocation2 + $0xa0] sm:$0xff] %vm13894_vm2, %v5058_v44 }
 0x8f9   : > { %4519 = vrot.lane.b32.xlu0 %v4457_v27, %s8179_s4  ;;  %4645 = vrot.lane.b32.xlu1 %v4583_v21, %s8175_s22 }
 0x8fb   : > { %v4816_v37 = vpop.permute.xlu0 %4815  ;;  %v4504_v15 = vpop.permute.xlu1 %4503 }
 0x8fc   : > { %4867 = vst.msk [vmem:[#allocation2 + $0xb0] sm:$0xff] %vm13883_vm3, %v4816_v37 }
 0x8fd   : > { %4554 = vst.msk [vmem:[#allocation2 + $0xc0] sm:$0xff] %vm13986_vm5, %v4504_v15  ;;  %4833 = vrot.lane.b32.xlu0 %v4771_v13, %s8177_s3  ;;  %vm13988_vm5 = vmmov %vm13987_vm6  ;;  %v5248_v15 = vld [vmem:[#allocation2 + $0x118] sm:$0xff] }
 0x8fe   : > { %4988 = vst.msk [vmem:[#allocation2 + $0xb0] sm:$0xff] %vm13987_vm6, %v4940_v48  ;;  %vm13989_vm6 = vcmask 523648  }
 0x8ff   : > { %4680 = vst.msk [vmem:[#allocation2 + $0xc0] sm:$0xff] %vm1848_vm9, %v4630_v50  ;;  %v4258_v59 = vpop.permute.xlu0 %4257  ;;  %v4942_v62 = vpop.permute.xlu1 %4941  ;;  %v5233_v33 = vld [vmem:[#allocation2 + $0xa0] sm:$0xff] }
 0x900   : > { %4305 = vst.msk [vmem:[#allocation2 + $0xd0] sm:$0xff] %vm13888_vm8, %v4258_v59  ;;  %5433 = vmatmul.mubr.f32.gmra.mrb[88].mxu1 %v5233_v33 }
 0x901   : > { %4425 = vst.msk [vmem:[#allocation2 + $0xd0] sm:$0xff] %vm13889_vm11, %v4378_v3  ;;  %7096 = vmatprep.mubr.msk.f32.mxu1 %vm714_vm4, %v5236_v42 }
 0x903   : > { %v4632_v8 = vpop.permute.xlu0 %4631  ;;  %v4380_v58 = vpop.permute.xlu1 %4379 }
 0x907   : > { %v5060_v36 = vpop.permute.xlu0 %5059  ;;  %v4818_v5 = vpop.permute.xlu1 %4817 }
 0x908   : > { %5108 = vst.msk [vmem:[#allocation2 + $0xb0] sm:$0xff] %vm13894_vm2, %v5060_v36 }
 0x909   : > { %4868 = vst.msk [vmem:[#allocation2 + $0xc0] sm:$0xff] %vm13883_vm3, %v4818_v5 }
 0x90a   : > { %4989 = vst.msk [vmem:[#allocation2 + $0xc0] sm:$0xff] %vm13988_vm5, %v4942_v62  ;;  %vm13990_vm5 = vmmov %vm13989_vm6 }
 0x90b   : > { %v4506_v26 = vpop.permute.xlu0 %4505  ;;  %v4260_v43 = vpop.permute.xlu1 %4259 }
 0x90c   : > { %4555 = vst.msk [vmem:[#allocation2 + $0xd0] sm:$0xff] %vm13989_vm6, %v4506_v26  ;;  %vm13991_vm6 = vcmask 917248  }
 0x90d   : > { %4306 = vst.msk [vmem:[#allocation2 + $0xe0] sm:$0xff] %vm13888_vm8, %v4260_v43 }
 0x90e   : > { %4681 = vst.msk [vmem:[#allocation2 + $0xd0] sm:$0xff] %vm1848_vm9, %v4632_v8 }
 0x90f   : > { %4426 = vst.msk [vmem:[#allocation2 + $0xe0] sm:$0xff] %vm13889_vm11, %v4380_v58  ;;  %v4944_v23 = vpop.permute.xlu0 %4943  ;;  %v4634_v6 = vpop.permute.xlu1 %4633  ;;  %v5235_v35 = vld [vmem:[#allocation2 + $0xb0] sm:$0xff] }
 0x910   : > { %5438 = vmatmul.mubr.f32.gmra.mrb[90].mxu1 %v5235_v35 }
 0x911   : > { %7097 = vmatprep.mubr.msk.f32.mxu1 %vm714_vm4, %v5238_v38 }
 0x913   : > { %v4382_v30 = vpop.permute.xlu0 %4381  ;;  %v5062_v40 = vpop.permute.xlu1 %5061 }
 0x914   : > { %5109 = vst.msk [vmem:[#allocation2 + $0xc0] sm:$0xff] %vm13894_vm2, %v5062_v40  ;;  %v5250_v40 = vld [vmem:[#allocation2 + $0x128] sm:$0xff] }
 0x917   : > { %v4820_v4 = vpop.permute.xlu0 %4819  ;;  %v4508_v53 = vpop.permute.xlu1 %4507 }
 0x918   : > { %4869 = vst.msk [vmem:[#allocation2 + $0xd0] sm:$0xff] %vm13883_vm3, %v4820_v4 }
 0x919   : > { %4556 = vst.msk [vmem:[#allocation2 + $0xe0] sm:$0xff] %vm13990_vm5, %v4508_v53  ;;  %vm13992_vm5 = vmmov %vm13991_vm6  ;;  %v5252_v53 = vld [vmem:[#allocation2 + $0x138] sm:$0xff] }
 0x91a   : > { %4990 = vst.msk [vmem:[#allocation2 + $0xd0] sm:$0xff] %vm13991_vm6, %v4944_v23  ;;  %vm13993_vm6 = vcmask 523648  }
 0x91b   : > { %4682 = vst.msk [vmem:[#allocation2 + $0xe0] sm:$0xff] %vm1848_vm9, %v4634_v6  ;;  %v4262_v52 = vpop.permute.xlu0 %4261  ;;  %v4946_v49 = vpop.permute.xlu1 %4945  ;;  %v5237_v19 = vld [vmem:[#allocation2 + $0xc0] sm:$0xff] }
 0x91c   : > { %4307 = vst.msk [vmem:[#allocation2 + $0xf0] sm:$0xff] %vm13888_vm8, %v4262_v52  ;;  %5443 = vmatmul.mubr.f32.gmra.mrb[92].mxu1 %v5237_v19 }
 0x91d   : > { %4427 = vst.msk [vmem:[#allocation2 + $0xf0] sm:$0xff] %vm13889_vm11, %v4382_v30  ;;  %7098 = vmatprep.mubr.msk.f32.mxu1 %vm714_vm4, %v5240_v51 }
 0x91f   : > { %v4636_v18 = vpop.permute.xlu0 %4635  ;;  %v4384_v55 = vpop.permute.xlu1 %4383 }
 0x923   : > { %v5064_v9 = vpop.permute.xlu0 %5063  ;;  %v4822_v25 = vpop.permute.xlu1 %4821 }
 0x924   : > { %5110 = vst.msk [vmem:[#allocation2 + $0xd0] sm:$0xff] %vm13894_vm2, %v5064_v9 }
 0x925   : > { %4870 = vst.msk [vmem:[#allocation2 + $0xe0] sm:$0xff] %vm13883_vm3, %v4822_v25 }
 0x926   : > { %4991 = vst.msk [vmem:[#allocation2 + $0xe0] sm:$0xff] %vm13992_vm5, %v4946_v49  ;;  %vm13994_vm5 = vmmov %vm13993_vm6 }
 0x927   : > { %v4510_v34 = vpop.permute.xlu0 %4509  ;;  %v4264_v12 = vpop.permute.xlu1 %4263 }
 0x928   : > { %4557 = vst.msk [vmem:[#allocation2 + $0xf0] sm:$0xff] %vm13993_vm6, %v4510_v34  ;;  %vm13995_vm6 = vcmask 917248  }
 0x929   : > { %4308 = vst.msk [vmem:[#allocation2 + $0x100] sm:$0xff] %vm13888_vm8, %v4264_v12 }
 0x92a   : > { %4683 = vst.msk [vmem:[#allocation2 + $0xf0] sm:$0xff] %vm1848_vm9, %v4636_v18 }
 0x92b   : > { %4428 = vst.msk [vmem:[#allocation2 + $0x100] sm:$0xff] %vm13889_vm11, %v4384_v55  ;;  %v4948_v28 = vpop.permute.xlu0 %4947  ;;  %v4638_v29 = vpop.permute.xlu1 %4637  ;;  %v5239_v60 = vld [vmem:[#allocation2 + $0xd0] sm:$0xff]  ;;  %v5254_v55 = vld [vmem:[#allocation2 + $0x148] sm:$0x3] }
 0x92c   : > { %5448 = vmatmul.mubr.f32.gmra.mrb[94].mxu1 %v5239_v60 }
 0x92d   : > { %7099 = vmatprep.mubr.msk.f32.mxu1 %vm714_vm4, %v5242_v24 }
 0x92f   : > { %v4386_v7 = vpop.permute.xlu0 %4385  ;;  %v5066_v32 = vpop.permute.xlu1 %5065 }
 0x930   : > { %5111 = vst.msk [vmem:[#allocation2 + $0xe0] sm:$0xff] %vm13894_vm2, %v5066_v32 }
 0x933   : > { %v4824_v57 = vpop.permute.xlu0 %4823  ;;  %v4512_v45 = vpop.permute.xlu1 %4511 }
 0x934   : > { %4871 = vst.msk [vmem:[#allocation2 + $0xf0] sm:$0xff] %vm13883_vm3, %v4824_v57 }
 0x935   : > { %4558 = vst.msk [vmem:[#allocation2 + $0x100] sm:$0xff] %vm13994_vm5, %v4512_v45  ;;  %vm13996_vm5 = vmmov %vm13995_vm6 }
 0x936   : > { %4992 = vst.msk [vmem:[#allocation2 + $0xf0] sm:$0xff] %vm13995_vm6, %v4948_v28  ;;  %vm13997_vm6 = vcmask 523648  }
 0x937   : > { %4684 = vst.msk [vmem:[#allocation2 + $0x100] sm:$0xff] %vm1848_vm9, %v4638_v29  ;;  %v4266_v14 = vpop.permute.xlu0 %4265  ;;  %v4950_v1 = vpop.permute.xlu1 %4949  ;;  %v5241_v10 = vld [vmem:[#allocation2 + $0xe0] sm:$0xff] }
 0x938   : > { %4309 = vst.msk [vmem:[#allocation2 + $0x110] sm:$0xff] %vm13888_vm8, %v4266_v14  ;;  %5453 = vmatmul.mubr.f32.gmra.mrb[96].mxu1 %v5241_v10 }
 0x939   : > { %4429 = vst.msk [vmem:[#allocation2 + $0x110] sm:$0xff] %vm13889_vm11, %v4386_v7  ;;  %7100 = vmatprep.mubr.msk.f32.mxu1 %vm714_vm4, %v5244_v31 }
 0x93b   : > { %v4640_v0 = vpop.permute.xlu0 %4639  ;;  %v4388_v11 = vpop.permute.xlu1 %4387 }
 0x93f   : > { %v5068_v46 = vpop.permute.xlu0 %5067  ;;  %v4826_v63 = vpop.permute.xlu1 %4825 }
 0x940   : > { %5112 = vst.msk [vmem:[#allocation2 + $0xf0] sm:$0xff] %vm13894_vm2, %v5068_v46 }
 0x941   : > { %4872 = vst.msk [vmem:[#allocation2 + $0x100] sm:$0xff] %vm13883_vm3, %v4826_v63 }
 0x942   : > { %4993 = vst.msk [vmem:[#allocation2 + $0x100] sm:$0xff] %vm13996_vm5, %v4950_v1 }
 0x943   : > { %v4514_v48 = vpop.permute.xlu0 %4513  ;;  %v4268_v50 = vpop.permute.xlu1 %4267 }
 0x944   : > { %4559 = vst.msk [vmem:[#allocation2 + $0x110] sm:$0xff] %vm13997_vm6, %v4514_v48 }
 0x945   : > { %4310 = vst.msk [vmem:[#allocation2 + $0x120] sm:$0xff] %vm13888_vm8, %v4268_v50 }
 0x946   : > { %4685 = vst.msk [vmem:[#allocation2 + $0x110] sm:$0xff] %vm1848_vm9, %v4640_v0 }
 0x947   : > { %4430 = vst.msk [vmem:[#allocation2 + $0x120] sm:$0xff] %vm13889_vm11, %v4388_v11  ;;  %v4952_v54 = vpop.permute.xlu0 %4951  ;;  %v12196_v47 = vpop.f32.mrb[68].mxu1  ;;  %v5243_v61 = vld [vmem:[#allocation2 + $0xf0] sm:$0xff] }
 0x948   : > { %v4642_v2 = vpop.permute.xlu1 %4641  ;;  %v5386_v16 = vpop.f32.mrb[69].mxu1  ;;  %5458 = vmatmul.mubr.f32.gmra.mrb[98].mxu1 %v5243_v61  ;;  %v12211_v59 = vmul.f32 %v12196_v47, %v12196_v47 }
 0x949   : > { %7101 = vmatprep.mubr.msk.f32.mxu1 %vm714_vm4, %v5246_v17 }
 0x94b   : > { %v4390_v3 = vpop.permute.xlu0 %4389 }
 0x94c   : > { %v5070_v44 = vpop.permute.xlu1 %5069 }
 0x94d   : > { %5113 = vst.msk [vmem:[#allocation2 + $0x100] sm:$0xff] %vm13894_vm2, %v5070_v44  ;;  %vm13998_vm2 = vmmov %vm13883_vm3 }
 0x94f   : > { %v4828_v56 = vpop.permute.xlu0 %4827 }
 0x950   : > { %4873 = vst.msk [vmem:[#allocation2 + $0x110] sm:$0xff] %vm13883_vm3, %v4828_v56  ;;  %v4516_v27 = vpop.permute.xlu1 %4515  ;;  %vm13999_vm3 = vmmov %vm13996_vm5 }
 0x951   : > { %4994 = vst.msk [vmem:[#allocation2 + $0x110] sm:$0xff] %vm13996_vm5, %v4952_v54  ;;  %vm14000_vm5 = vcmask 1048448  }
 0x952   : > { %4560 = vst.msk [vmem:[#allocation2 + $0x120] sm:$0xff] %vm13997_vm6, %v4516_v27 }
 0x953   : > { %4686 = vst.msk [vmem:[#allocation2 + $0x120] sm:$0xff] %vm1848_vm9, %v4642_v2  ;;  %v4270_v20 = vpop.permute.xlu0 %4269 }
 0x954   : > { %4311 = vst.msk [vmem:[#allocation2 + $0x130] sm:$0xff] %vm13888_vm8, %v4270_v20  ;;  %v4954_v21 = vpop.permute.xlu1 %4953  ;;  %v5245_v37 = vld [vmem:[#allocation2 + $0x100] sm:$0xff]  ;;  %vm14001_vm8 = vmmov %vm14000_vm5 }
 0x955   : > { %4431 = vst.msk [vmem:[#allocation2 + $0x130] sm:$0xff] %vm13889_vm11, %v4390_v3  ;;  %5463 = vmatmul.mubr.f32.gmra.mrb[100].mxu1 %v5245_v37  ;;  %vm14002_vm11 = vmmov %vm13998_vm2 }
 0x956   : > { %7102 = vmatprep.mubr.msk.f32.mxu1 %vm714_vm4, %v5248_v15 }
 0x957   : > { %v4644_v22 = vpop.permute.xlu0 %4643  ;;  %v12207_v13 = vpop.f32.mrb[70].mxu1 }
 0x958   : > { %v7750_v62 = vpack.c.bf16 %v12207_v13, %v12196_v47  ;;  %v12217_v33 = vmul.f32 %v12207_v13, %v12207_v13  ;;  %v4830_v42 = vpop.permute.xlu1 %4829  ;;  %v5391_v8 = vpop.f32.mrb[71].mxu1 }
 0x959   : > { %4874 = vst.msk [vmem:[#allocation2 + $0x120] sm:$0xff] %vm13998_vm2, %v4830_v42  ;;  %vm14005_vm2 = vcmask 648704  }
 0x95a   : > { %v7780_v58 = vpack.c.bf16 %v12217_v33, %v12211_v59  ;;  %4995 = vst.msk [vmem:[#allocation2 + $0x120] sm:$0xff] %vm13999_vm3, %v4954_v21  ;;  %7751 = vmatpush1.bf16.msra.mxu0 %v7750_v62  ;;  %vm14006_vm3 = vcmask 778880  }
 0x95b   : > { %v5072_v36 = vpop.permute.xlu0 %5071  ;;  %7752 = vmatprep.subr.bf16.mxu0 %v13763_v41 }
 0x95c   : > { %5114 = vst.msk [vmem:[#allocation2 + $0x110] sm:$0xff] %vm14000_vm5, %v5072_v36  ;;  %v5076_v5 = vpop.permute.xlu1 %5075 }
 0x95f   : > { %v4518_v26 = vpop.permute.xlu0 %4517 }
 0x960   : > { %4561 = vst.msk [vmem:[#allocation2 + $0x130] sm:$0xff] %vm13997_vm6, %v4518_v26  ;;  %v5074_v43 = vpop.permute.xlu1 %5073 }
 0x961   : > { %4687 = vst.msk [vmem:[#allocation2 + $0x130] sm:$0xff] %vm1848_vm9, %v4644_v22  ;;  %vm14003_vm9 = vcmask 1041280  }
 0x962   : > { %5115 = vst.msk [vmem:[#allocation2 + $0x120] sm:$0xff] %vm14001_vm8, %v5074_v43 }
 0x963   : > { %v4272_v23 = vpop.permute.xlu0 %4271  ;;  %v12228_v6 = vpop.f32.mrb[72].mxu1  ;;  %v5247_v35 = vld [vmem:[#allocation2 + $0x110] sm:$0xff] }
 0x964   : > { %4312 = vst.msk [vmem:[#allocation2 + $0x140] sm:$0x3] %vm1237_vm13, %v4272_v23  ;;  %v4832_v38 = vpop.permute.xlu1 %4831  ;;  %v5396_v30 = vpop.f32.mrb[73].mxu1  ;;  %5468 = vmatmul.mubr.f32.gmra.mrb[102].mxu1 %v5247_v35  ;;  %vm14004_vm13 = vcmask 517504   ;;  %v12245_v34 = vmul.f32 %v12228_v6, %v12228_v6 }
 0x965   : > { %4875 = vst.msk [vmem:[#allocation2 + $0x130] sm:$0xff] %vm14002_vm11, %v4832_v38  ;;  %7103 = vmatprep.mubr.msk.f32.mxu1 %vm714_vm4, %v5250_v40 }
 0x967   : > { %v4956_v4 = vpop.permute.xlu0 %4955 }
 0x968   : > { %4996 = vst.msk [vmem:[#allocation2 + $0x130] sm:$0x3] %vm2346_vm15, %v4956_v4  ;;  %v4392_v52 = vpop.permute.xlu1 %4391 }
 0x969   : > { %v5249_v49 = vld [vmem:[#allocation2 + $0x120] sm:$0xff]  ;;  %5116 = vst.msk [vmem:[#allocation2 + $0x130] sm:$0x1] %vm14003_vm9, %v5076_v5 }
 0x96a   : > { %4432 = vst.msk [vmem:[#allocation2 + $0x140] sm:$0x3] %vm1439_vm14, %v4392_v52  ;;  %5473 = vmatmul.mubr.f32.gmra.mrb[104].mxu1 %v5249_v49  ;;  %vm6500_vm14 = vcmask 64512  }
 0x96b   : > { %7104 = vmatprep.mubr.msk.f32.mxu1 %vm714_vm4, %v5252_v53  ;;  %v4520_v19 = vpop.permute.xlu0 %4519 }
 0x96c   : > { %4562 = vst.msk [vmem:[#allocation2 + $0x140] sm:$0x3] %vm14004_vm13, %v4520_v19  ;;  %v4646_v51 = vpop.permute.xlu1 %4645 }
 0x96d   : > { %4688 = vst.msk [vmem:[#allocation2 + $0x140] sm:$0x3] %vm14005_vm2, %v4646_v51 }
 0x96f   : > { %v4834_v18 = vpop.permute.xlu0 %4833 }
 0x970   : > { %4876 = vst.msk [vmem:[#allocation2 + $0x140] sm:$0x1] %vm14006_vm3, %v4834_v18  ;;  %v5251_v9 = vld [vmem:[#allocation2 + $0x130] sm:$0xff] }
 0x971   : > { %5478 = vmatmul.mubr.f32.gmra.mrb[106].mxu1 %v5251_v9 }
 0x972   : > { %7105 = vmatprep.mubr.msk.f32.mxu1 %vm714_vm4, %v5254_v55 }
 0x973   : > { %v12241_v25 = vpop.f32.mrb[74].mxu1 }
 0x974   : > { %v7753_v12 = vpack.c.bf16 %v12241_v25, %v12228_v6  ;;  %v12251_v28 = vmul.f32 %v12241_v25, %v12241_v25  ;;  %v5401_v29 = vpop.f32.mrb[75].mxu1 }
 0x976   : > { %v7783_v60 = vpack.c.bf16 %v12251_v28, %v12245_v34  ;;  %7754 = vmatpush1.bf16.msra.mxu0 %v7753_v12 }
 0x977   : > { %v5253_v24 = vld [vmem:[#allocation2 + $0x140] sm:$0x3]  ;;  %7755 = vmatprep.subr.bf16.mxu0 %v13763_v41 }
 0x978   : > { %5483 = vmatmul.mubr.f32.gmra.mrb[108].mxu1 %v5253_v24 }
 0x979   : > { %7495 = vmatprep.mubr.msk.f32.mxu1 %vm8186_vm10, %v10599_v39 }
 0x97f   : > { %v12258_v7 = vpop.f32.mrb[76].mxu1 }
 0x980   : > { %v5406_v32 = vpop.f32.mrb[77].mxu1  ;;  %v12264_v45 = vmul.f32 %v12258_v7, %v12258_v7 }
 0x98f   : > { %v12260_v57 = vpop.f32.mrb[78].mxu1 }
 0x990   : > { %v7756_v14 = vpack.c.bf16 %v12260_v57, %v12258_v7  ;;  %v12270_v1 = vmul.f32 %v12260_v57, %v12260_v57  ;;  %v5411_v10 = vpop.f32.mrb[79].mxu1 }
 0x992   : > { %v7786_v31 = vpack.c.bf16 %v12270_v1, %v12264_v45  ;;  %7757 = vmatpush1.bf16.msra.mxu0 %v7756_v14 }
 0x993   : > { %7758 = vmatprep.subr.bf16.mxu0 %v13763_v41 }
 0x99b   : > { %v12275_v0 = vpop.f32.mrb[80].mxu1 }
 0x99c   : > { %v5416_v11 = vpop.f32.mrb[81].mxu1  ;;  %v12281_v63 = vmul.f32 %v12275_v0, %v12275_v0 }
 0x9ab   : > { %v12277_v46 = vpop.f32.mrb[82].mxu1 }
 0x9ac   : > { %v7759_v48 = vpack.c.bf16 %v12277_v46, %v12275_v0  ;;  %v12287_v50 = vmul.f32 %v12277_v46, %v12277_v46  ;;  %v5421_v54 = vpop.f32.mrb[83].mxu1 }
 0x9ae   : > { %v7789_v61 = vpack.c.bf16 %v12287_v50, %v12281_v63  ;;  %7760 = vmatpush1.bf16.msra.mxu0 %v7759_v48  ;;  %v12418_v63 = vld [vmem:[%s13783_s13] sm:$0xff]  ;;  %v12428_v50 = vld [vmem:[%s13783_s13 + $0x8] sm:$0xff] }
 0x9af   : > { %7761 = vmatprep.subr.bf16.mxu0 %v13763_v41 }
 0x9b7   : > { %v12292_v2 = vpop.f32.mrb[84].mxu1 }
 0x9b8   : > { %v5426_v16 = vpop.f32.mrb[85].mxu1  ;;  %v12298_v3 = vmul.f32 %v12292_v2, %v12292_v2 }
 0x9c7   : > { %v12294_v17 = vpop.f32.mrb[86].mxu1 }
 0x9c8   : > { %v7762_v44 = vpack.c.bf16 %v12294_v17, %v12292_v2  ;;  %v12304_v56 = vmul.f32 %v12294_v17, %v12294_v17  ;;  %v5431_v27 = vpop.f32.mrb[87].mxu1 }
 0x9ca   : > { %v7792_v20 = vpack.c.bf16 %v12304_v56, %v12298_v3  ;;  %7763 = vmatpush1.bf16.msra.mxu0 %v7762_v44  ;;  %v12446_v3 = vld [vmem:[%s13783_s13 + $0x18] sm:$0xff]  ;;  %v12455_v56 = vld [vmem:[%s13783_s13 + $0x20] sm:$0xff] }
 0x9cb   : > { %7764 = vmatprep.subr.bf16.mxu0 %v13763_v41 }
 0x9d3   : > { %v12309_v21 = vpop.f32.mrb[88].mxu1 }
 0x9d4   : > { %v5436_v37 = vpop.f32.mrb[89].mxu1  ;;  %v12315_v22 = vmul.f32 %v12309_v21, %v12309_v21 }
 0x9e3   : > { %v12311_v15 = vpop.f32.mrb[90].mxu1 }
 0x9e4   : > { %v7765_v62 = vpack.c.bf16 %v12311_v15, %v12309_v21  ;;  %v5617_v42 = vmul.f32 %v12311_v15, %v12311_v15  ;;  %v5441_v8 = vpop.f32.mrb[91].mxu1 }
 0x9e6   : > { %v7795_v36 = vpack.c.bf16 %v5617_v42, %v12315_v22  ;;  %7766 = vmatpush1.bf16.msra.mxu0 %v7765_v62 }
 0x9e7   : > { %7767 = vmatprep.subr.bf16.mxu0 %v13763_v41 }
 0x9ef   : > { %v12323_v5 = vpop.f32.mrb[92].mxu1 }
 0x9f0   : > { %v5446_v26 = vpop.f32.mrb[93].mxu1  ;;  %v5618_v23 = vmul.f32 %v12323_v5, %v12323_v5 }
 0x9f1   : > { %v12374_v26 = vld.sshfl [vmem:[%s13776_s28] sm:$0x33 pattern:$0x76325410] }
 0x9ff   : > { %v12325_v43 = vpop.f32.mrb[94].mxu1 }
 0xa00   : > { %v7768_v35 = vpack.c.bf16 %v12325_v43, %v12323_v5  ;;  %v5619_v38 = vmul.f32 %v12325_v43, %v12325_v43  ;;  %v5451_v30 = vpop.f32.mrb[95].mxu1 }
 0xa01   : > { %v12500_v30 = vld [vmem:[%s13783_s13 + $0x48] sm:$0xff] }
 0xa02   : > { %v7798_v40 = vpack.c.bf16 %v5619_v38, %v5618_v23  ;;  %7769 = vmatpush1.bf16.msra.mxu0 %v7768_v35  ;;  %v14007_v23 = vld [vmem:[#allocation148_spill] sm:$0xff]  ;;  %v12482_v35 = vld [vmem:[%s13783_s13 + $0x38] sm:$0xff]  ;;  %v12491_v38 = vld [vmem:[%s13783_s13 + $0x40] sm:$0xff]  ;;  %14009 = vst [vmem:[#allocation162_spill] sm:$0xff] %v12500_v30 }
 0xa03   : > { %7770 = vmatprep.subr.bf16.mxu0 %v13763_v41  ;;  %14008 = vst [vmem:[#allocation103_spill] sm:$0xff] %v12491_v38 }
 0xa0b   : > { %v12334_v4 = vpop.f32.mrb[96].mxu1 }
 0xa0c   : > { %v5456_v53 = vpop.f32.mrb[97].mxu1  ;;  %v5620_v49 = vmul.f32 %v12334_v4, %v12334_v4 }
 0xa1b   : > { %v12336_v52 = vpop.f32.mrb[98].mxu1 }
 0xa1c   : > { %v7771_v19 = vpack.c.bf16 %v12336_v52, %v12334_v4  ;;  %v5621_v51 = vmul.f32 %v12336_v52, %v12336_v52  ;;  %v5461_v18 = vpop.f32.mrb[99].mxu1 }
 0xa1e   : > { %v7801_v55 = vpack.c.bf16 %v5621_v51, %v5620_v49  ;;  %7772 = vmatpush1.bf16.msra.mxu0 %v7771_v19  ;;  %v12509_v19 = vld [vmem:[%s13783_s13 + $0x50] sm:$0xff] }
 0xa1f   : > { %7773 = vmatprep.subr.bf16.mxu0 %v13763_v41  ;;  %14010 = vst [vmem:[#allocation170_spill] sm:$0xff] %v12509_v19 }
 0xa28   : > { %v12345_v9 = vpop.f32.mrb[100].mxu1 }
 0xa29   : > { %v5466_v12 = vpop.f32.mrb[101].mxu1  ;;  %v5622_v24 = vmul.f32 %v12345_v9, %v12345_v9 }
 0xa2a   : > { %v12527_v12 = vld [vmem:[%s13783_s13 + $0x60] sm:$0xff] }
 0xa2b   : > { %14012 = vst [vmem:[#allocation164_spill] sm:$0xff] %v12527_v12 }
 0xa37   : > { %v12347_v29 = vpop.f32.mrb[102].mxu1 }
 0xa38   : > { %v7774_v32 = vpack.c.bf16 %v12347_v29, %v12345_v9  ;;  %v5623_v14 = vmul.f32 %v12347_v29, %v12347_v29  ;;  %v5471_v10 = vpop.f32.mrb[103].mxu1 }
 0xa39   : > { %v12560_v10 = vld [vmem:[%s13783_s13 + $0x78] sm:$0xff] }
 0xa3a   : > { %v7804_v11 = vpack.c.bf16 %v5623_v14, %v5622_v24  ;;  %7775 = vmatpush1.bf16.msra.mxu0 %v7774_v32  ;;  %v12536_v24 = vld [vmem:[%s13783_s13 + $0x68] sm:$0xff]  ;;  %v12545_v14 = vld [vmem:[%s13783_s13 + $0x70] sm:$0xff]  ;;  %14015 = vst [vmem:[#allocation174_spill] sm:$0xff] %v12560_v10 }
 0xa3b   : > { %7776 = vmatprep.subr.bf16.mxu0 %v13763_v41  ;;  %14013 = vst [vmem:[#allocation169_spill] sm:$0xff] %v12536_v24  ;;  %14014 = vst [vmem:[#allocation178_spill] sm:$0xff] %v12545_v14 }
 0xa3d   : > { %v12356_v48 = vpop.f32.mrb[104].mxu1 }
 0xa3e   : > { %v5476_v54 = vpop.f32.mrb[105].mxu1  ;;  %v5624_v44 = vmul.f32 %v12356_v48, %v12356_v48 }
 0xa3f   : > { %v12586_v54 = vld [vmem:[%s13783_s13 + $0x88] sm:$0xff] }
 0xa40   : > { %14017 = vst [vmem:[#allocation90_spill] sm:$0xff] %v12586_v54 }
 0xa44   : > { %v12358_v16 = vpop.f32.mrb[106].mxu1 }
 0xa45   : > { %v7777_v27 = vpack.c.bf16 %v12358_v16, %v12356_v48  ;;  %v5625_v37 = vmul.f32 %v12358_v16, %v12358_v16  ;;  %v5481_v22 = vpop.f32.mrb[107].mxu1 }
 0xa47   : > { %v7807_v62 = vpack.c.bf16 %v5625_v37, %v5624_v44  ;;  %7778 = vmatpush1.bf16.msra.mxu0 %v7777_v27  ;;  %v12599_v44 = vld [vmem:[%s13783_s13 + $0x90] sm:$0xff]  ;;  %v12612_v27 = vld [vmem:[%s13783_s13 + $0x98] sm:$0xff]  ;;  %v12625_v37 = vld [vmem:[%s13783_s13 + $0xa0] sm:$0x3] }
 0xa48   : > { %5573 = vmatprep.subr.mxu0 %v10599_v39  ;;  %14018 = vst [vmem:[#allocation142_spill] sm:$0xff] %v12599_v44  ;;  %14019 = vst [vmem:[#allocation185_spill] sm:$0xff] %v12612_v27 }
 0xa49   : > { %14020 = vst [vmem:[#allocation182_spill] sm:$0xff] %v12625_v37 }
 0xa4b   : > { %v12367_v42 = vpop.f32.mrb[108].mxu1 }
 0xa4c   : > { %v5486_v8 = vpop.f32.mrb[109].mxu1  ;;  %7106 = vmatpush1.msk.msra.mxu0 %vm876_vm7, %v12367_v42  ;;  %v5626_v59 = vmul.f32 %v12367_v42, %v12367_v42 }
 0xa4d   : > { %5598 = vmatmul.mubr.f32.vlgmr.msra.gmra.mrb[62].mxu0 %v12374_v26  ;;  %7779 = vmatprep.subr.bf16.mxu0 %v13763_v41 }
 0xa4e   : > { %7781 = vmatpush1.bf16.msra.mxu0 %v7780_v58  ;;  %7109 = vmatprep.mubr.msk.f32.mxu0 %vm3050_vm0, %v14007_v23 }
 0xa4f   : > { %7782 = vmatprep.subr.bf16.mxu0 %v13763_v41 }
 0xa52   : > { %7784 = vmatpush1.bf16.msra.mxu0 %v7783_v60 }
 0xa53   : > { %7785 = vmatprep.subr.bf16.mxu0 %v13763_v41 }
 0xa56   : > { %7787 = vmatpush1.bf16.msra.mxu0 %v7786_v31 }
 0xa57   : > { %7788 = vmatprep.subr.bf16.mxu0 %v13763_v41 }
 0xa5a   : > { %7790 = vmatpush1.bf16.msra.mxu0 %v7789_v61  ;;  %v12437_v61 = vld [vmem:[%s13783_s13 + $0x10] sm:$0xff] }
 0xa5b   : > { %7791 = vmatprep.subr.bf16.mxu0 %v13763_v41 }
 0xa5e   : > { %7793 = vmatpush1.bf16.msra.mxu0 %v7792_v20  ;;  %v12464_v20 = vld [vmem:[%s13783_s13 + $0x28] sm:$0xff] }
 0xa5f   : > { %7794 = vmatprep.subr.bf16.mxu0 %v13763_v41 }
 0xa62   : > { %7796 = vmatpush1.bf16.msra.mxu0 %v7795_v36  ;;  %v12473_v36 = vld [vmem:[%s13783_s13 + $0x30] sm:$0xff] }
 0xa63   : > { %7797 = vmatprep.subr.bf16.mxu0 %v13763_v41 }
 0xa66   : > { %7799 = vmatpush1.bf16.msra.mxu0 %v7798_v40 }
 0xa67   : > { %7800 = vmatprep.subr.bf16.mxu0 %v13763_v41 }
 0xa6a   : > { %7802 = vmatpush1.bf16.msra.mxu0 %v7801_v55  ;;  %v12518_v55 = vld [vmem:[%s13783_s13 + $0x58] sm:$0xff] }
 0xa6b   : > { %7803 = vmatprep.subr.bf16.mxu0 %v13763_v41  ;;  %14011 = vst [vmem:[#allocation165_spill] sm:$0xff] %v12518_v55 }
 0xa6e   : > { %7805 = vmatpush1.bf16.msra.mxu0 %v7804_v11  ;;  %v12573_v11 = vld [vmem:[%s13783_s13 + $0x80] sm:$0xff] }
 0xa6f   : > { %7806 = vmatprep.subr.bf16.mxu0 %v13763_v41  ;;  %14016 = vst [vmem:[#allocation173_spill] sm:$0xff] %v12573_v11 }
 0xa72   : > { %7808 = vmatpush1.bf16.msra.mxu0 %v7807_v62 }
 0xa73   : > { %5670 = vmatprep.subr.mxu0 %v10599_v39 }
 0xa76   : > { %7108 = vmatpush1.msk.msra.mxu0 %vm876_vm7, %v5626_v59 }
 0xa77   : > { %5695 = vmatmul.mubr.f32.vlgmr.msra.gmra.mrb[64].mxu0 %v12374_v26  ;;  %7428 = vmatprep.subr.mxu0 %v10599_v39 }
 0xa78   : > { %7430 = vmatprep.mubr.msk.f32.mxu0 %vm8186_vm10, %v10599_v39 }
 0xb20   : > { %v5599_v33 = vpop.f32.mrb[62].mxu0 }
 0xb21   : > { %v5603_v58 = vsel %vm755_vm1, %v5599_v33, 0.0  ;;  %v5601_v34 = vpop.f32.mrb[63].mxu0 }
 0xb22   : > { %5604 = vadd.xlane.f32.xlu1 %v5603_v58 }
 0xb4a   : > { %v5696_v28 = vpop.f32.mrb[64].mxu0 }
 0xb4b   : > { %v5700_v60 = vsel %vm755_vm1, %v5696_v28, 0.0  ;;  %v5698_v45 = vpop.f32.mrb[65].mxu0 }
 0xb4c   : > { %5701 = vadd.xlane.f32.xlu0 %v5700_v60 }
 0xbaf   : > { %v5605_v1 = vpop.xlane.xlu1 %5604 }
 0xbb0   : > { %v5703_v31 = vmul.f32 0.00077160494, %v5605_v1 }
 0xbb2   : > { %7429 = vmatpush3.msk.msra.mxu0 %vm876_vm7, %v5703_v31  ;;  %v5705_v53 = vmul.f32 %v5703_v31, %v5703_v31 }
 0xbb3   : > { %7431 = vmatmul.mubr.msk.f32.vlgmr.msra.gmra.mrb[66].mxu0 %vm3232_vm12, %v12418_v63  ;;  %7809 = vmatprep.subr.bf16.mxu0 %v13763_v41 }
 0xbb4   : > { %7433 = vmatprep.mubr.msk.f32.mxu0 %vm8186_vm10, %v10599_v39 }
 0xbb7   : > { %7434 = vmatmul.mubr.msk.f32.gmra.mrb[68].mxu0 %vm3232_vm12, %v12428_v50 }
 0xbb8   : > { %7436 = vmatprep.mubr.msk.f32.mxu0 %vm8186_vm10, %v10599_v39 }
 0xbbb   : > { %7437 = vmatmul.mubr.msk.f32.gmra.mrb[70].mxu0 %vm3232_vm12, %v12437_v61 }
 0xbbc   : > { %7439 = vmatprep.mubr.msk.f32.mxu0 %vm8186_vm10, %v10599_v39 }
 0xbbf   : > { %7440 = vmatmul.mubr.msk.f32.gmra.mrb[72].mxu0 %vm3232_vm12, %v12446_v3 }
 0xbc0   : > { %7442 = vmatprep.mubr.msk.f32.mxu0 %vm8186_vm10, %v10599_v39 }
 0xbc3   : > { %7443 = vmatmul.mubr.msk.f32.gmra.mrb[74].mxu0 %vm3232_vm12, %v12455_v56 }
 0xbc4   : > { %7445 = vmatprep.mubr.msk.f32.mxu0 %vm8186_vm10, %v10599_v39 }
 0xbc7   : > { %7446 = vmatmul.mubr.msk.f32.gmra.mrb[76].mxu0 %vm3232_vm12, %v12464_v20 }
 0xbc8   : > { %7448 = vmatprep.mubr.msk.f32.mxu0 %vm8186_vm10, %v10599_v39 }
 0xbcb   : > { %7449 = vmatmul.mubr.msk.f32.gmra.mrb[78].mxu0 %vm3232_vm12, %v12473_v36 }
 0xbcc   : > { %7451 = vmatprep.mubr.msk.f32.mxu0 %vm8186_vm10, %v10599_v39 }
 0xbcf   : > { %7452 = vmatmul.mubr.msk.f32.gmra.mrb[80].mxu0 %vm3232_vm12, %v12482_v35 }
 0xbd0   : > { %7454 = vmatprep.mubr.msk.f32.mxu0 %vm8186_vm10, %v10599_v39 }
 0xbd3   : > { %7455 = vmatmul.mubr.msk.f32.gmra.mrb[82].mxu0 %vm3232_vm12, %v12491_v38 }
 0xbd4   : > { %7457 = vmatprep.mubr.msk.f32.mxu0 %vm8186_vm10, %v10599_v39 }
 0xbd7   : > { %7458 = vmatmul.mubr.msk.f32.gmra.mrb[84].mxu0 %vm3232_vm12, %v12500_v30 }
 0xbd8   : > { %7460 = vmatprep.mubr.msk.f32.mxu0 %vm8186_vm10, %v10599_v39 }
 0xbd9   : > { %v5702_v40 = vpop.xlane.xlu0 %5701 }
 0xbda   : > { %v5704_v49 = vmul.f32 0.00077160494, %v5702_v40 }
 0xbdb   : > { %7461 = vmatmul.mubr.msk.f32.gmra.mrb[86].mxu0 %vm3232_vm12, %v12509_v19 }
 0xbdc   : > { %v5706_v51 = vsub.f32 %v5704_v49, %v5705_v53  ;;  %7463 = vmatprep.mubr.msk.f32.mxu0 %vm8186_vm10, %v10599_v39 }
 0xbde   : > { %v5707_v18 = vadd.f32 1e-05, %v5706_v51 }
 0xbdf   : > { %7464 = vmatmul.mubr.msk.f32.gmra.mrb[88].mxu0 %vm3232_vm12, %v12518_v55 }
 0xbe0   : > { %8034 = vrsqrt.f32 %v5707_v18  ;;  %7466 = vmatprep.mubr.msk.f32.mxu0 %vm8186_vm10, %v10599_v39 }
 0xbe3   : > { %7467 = vmatmul.mubr.msk.f32.gmra.mrb[90].mxu0 %vm3232_vm12, %v12527_v12 }
 0xbe4   : > { %7469 = vmatprep.mubr.msk.f32.mxu0 %vm8186_vm10, %v10599_v39 }
 0xbe7   : > { %7470 = vmatmul.mubr.msk.f32.gmra.mrb[92].mxu0 %vm3232_vm12, %v12536_v24 }
 0xbe8   : > { %7472 = vmatprep.mubr.msk.f32.mxu0 %vm8186_vm10, %v10599_v39 }
 0xbea   : > { %v8035_v32 = vpop.eup %8034 }
 0xbeb   : > { %7473 = vmatmul.mubr.msk.f32.gmra.mrb[94].mxu0 %vm3232_vm12, %v12545_v14  ;;  %7494 = vmatpush3.msk.msra.mxu1 %vm876_vm7, %v8035_v32 }
 0xbec   : > { %7496 = vmatmul.mubr.msk.f32.vlgmr.msra.gmra.mrb[110].mxu1 %vm3232_vm12, %v12418_v63  ;;  %7475 = vmatprep.mubr.msk.f32.mxu0 %vm8186_vm10, %v10599_v39 }
 0xbed   : > { %7498 = vmatprep.mubr.msk.f32.mxu1 %vm8186_vm10, %v10599_v39  ;;  %7565 = vmatprep.subr.mxu1 %v10599_v39 }
 0xbef   : > { %7476 = vmatmul.mubr.msk.f32.gmra.mrb[96].mxu0 %vm3232_vm12, %v12560_v10 }
 0xbf0   : > { %7499 = vmatmul.mubr.msk.f32.gmra.mrb[112].mxu1 %vm3232_vm12, %v12428_v50  ;;  %7478 = vmatprep.mubr.msk.f32.mxu0 %vm8186_vm10, %v10599_v39 }
 0xbf1   : > { %7501 = vmatprep.mubr.msk.f32.mxu1 %vm8186_vm10, %v10599_v39 }
 0xbf3   : > { %7479 = vmatmul.mubr.msk.f32.gmra.mrb[98].mxu0 %vm3232_vm12, %v12573_v11 }
 0xbf4   : > { %7502 = vmatmul.mubr.msk.f32.gmra.mrb[114].mxu1 %vm3232_vm12, %v12437_v61  ;;  %7481 = vmatprep.mubr.msk.f32.mxu0 %vm8186_vm10, %v10599_v39 }
 0xbf5   : > { %7504 = vmatprep.mubr.msk.f32.mxu1 %vm8186_vm10, %v10599_v39 }
 0xbf7   : > { %7482 = vmatmul.mubr.msk.f32.gmra.mrb[100].mxu0 %vm3232_vm12, %v12586_v54 }
 0xbf8   : > { %7505 = vmatmul.mubr.msk.f32.gmra.mrb[116].mxu1 %vm3232_vm12, %v12446_v3  ;;  %7484 = vmatprep.mubr.msk.f32.mxu0 %vm8186_vm10, %v10599_v39 }
 0xbf9   : > { %7507 = vmatprep.mubr.msk.f32.mxu1 %vm8186_vm10, %v10599_v39 }
 0xbfb   : > { %7485 = vmatmul.mubr.msk.f32.gmra.mrb[102].mxu0 %vm3232_vm12, %v12599_v44 }
 0xbfc   : > { %7508 = vmatmul.mubr.msk.f32.gmra.mrb[118].mxu1 %vm3232_vm12, %v12455_v56  ;;  %7487 = vmatprep.mubr.msk.f32.mxu0 %vm8186_vm10, %v10599_v39 }
 0xbfd   : > { %7510 = vmatprep.mubr.msk.f32.mxu1 %vm8186_vm10, %v10599_v39 }
 0xbff   : > { %7488 = vmatmul.mubr.msk.f32.gmra.mrb[104].mxu0 %vm3232_vm12, %v12612_v27 }
 0xc00   : > { %7511 = vmatmul.mubr.msk.f32.gmra.mrb[120].mxu1 %vm3232_vm12, %v12464_v20  ;;  %7490 = vmatprep.mubr.msk.f32.mxu0 %vm8186_vm10, %v10599_v39 }
 0xc01   : > { %7513 = vmatprep.mubr.msk.f32.mxu1 %vm8186_vm10, %v10599_v39 }
 0xc03   : > { %7491 = vmatmul.mubr.msk.f32.gmra.mrb[106].mxu0 %vm3232_vm12, %v12625_v37 }
 0xc04   : > { %7514 = vmatmul.mubr.msk.f32.gmra.mrb[122].mxu1 %vm3232_vm12, %v12473_v36  ;;  %7155 = vmatprep.mubr.msk.f32.mxu0 %vm3050_vm0, %v14007_v23 }
 0xc05   : > { %7516 = vmatprep.mubr.msk.f32.mxu1 %vm8186_vm10, %v10599_v39 }
 0xc08   : > { %7517 = vmatmul.mubr.msk.f32.gmra.mrb[124].mxu1 %vm3232_vm12, %v12482_v35 }
 0xc09   : > { %7519 = vmatprep.mubr.msk.f32.mxu1 %vm8186_vm10, %v10599_v39 }
 0xc0c   : > { %7520 = vmatmul.mubr.msk.f32.gmra.mrb[126].mxu1 %vm3232_vm12, %v12491_v38  ;;  %v5491_v38 = vld [vmem:[%s8314_s18 + $0x18] sm:$0xff] }
 0xc0d   : > { %7522 = vmatprep.mubr.msk.f32.mxu1 %vm8186_vm10, %v10599_v39 }
 0xc10   : > { %7523 = vmatmul.mubr.msk.f32.gmra.mrb[128].mxu1 %vm3232_vm12, %v12500_v30 }
 0xc11   : > { %7525 = vmatprep.mubr.msk.f32.mxu1 %vm8186_vm10, %v10599_v39 }
 0xc14   : > { %7526 = vmatmul.mubr.msk.f32.gmra.mrb[130].mxu1 %vm3232_vm12, %v12509_v19 }
 0xc15   : > { %7528 = vmatprep.mubr.msk.f32.mxu1 %vm8186_vm10, %v10599_v39 }
 0xc18   : > { %7529 = vmatmul.mubr.msk.f32.gmra.mrb[132].mxu1 %vm3232_vm12, %v12518_v55  ;;  %v5490_v55 = vld [vmem:[%s8314_s18 + $0x10] sm:$0xff] }
 0xc19   : > { %7531 = vmatprep.mubr.msk.f32.mxu1 %vm8186_vm10, %v10599_v39 }
 0xc1c   : > { %7532 = vmatmul.mubr.msk.f32.gmra.mrb[134].mxu1 %vm3232_vm12, %v12527_v12  ;;  %v5510_v12 = vld [vmem:[%s8319_s26 + $0x8] sm:$0xff] }
 0xc1d   : > { %7534 = vmatprep.mubr.msk.f32.mxu1 %vm8186_vm10, %v10599_v39 }
 0xc20   : > { %7535 = vmatmul.mubr.msk.f32.gmra.mrb[136].mxu1 %vm3232_vm12, %v12536_v24  ;;  %v5509_v24 = vld [vmem:[%s8319_s26] sm:$0xff] }
 0xc21   : > { %7537 = vmatprep.mubr.msk.f32.mxu1 %vm8186_vm10, %v10599_v39 }
 0xc24   : > { %7538 = vmatmul.mubr.msk.f32.gmra.mrb[138].mxu1 %vm3232_vm12, %v12545_v14 }
 0xc25   : > { %7540 = vmatprep.mubr.msk.f32.mxu1 %vm8186_vm10, %v10599_v39 }
 0xc28   : > { %7541 = vmatmul.mubr.msk.f32.gmra.mrb[140].mxu1 %vm3232_vm12, %v12560_v10 }
 0xc29   : > { %7543 = vmatprep.mubr.msk.f32.mxu1 %vm8186_vm10, %v10599_v39 }
 0xc2c   : > { %7544 = vmatmul.mubr.msk.f32.gmra.mrb[142].mxu1 %vm3232_vm12, %v12573_v11 }
 0xc2d   : > { %7546 = vmatprep.mubr.msk.f32.mxu1 %vm8186_vm10, %v10599_v39 }
 0xc30   : > { %7547 = vmatmul.mubr.msk.f32.gmra.mrb[144].mxu1 %vm3232_vm12, %v12586_v54 }
 0xc31   : > { %7549 = vmatprep.mubr.msk.f32.mxu1 %vm8186_vm10, %v10599_v39 }
 0xc34   : > { %7550 = vmatmul.mubr.msk.f32.gmra.mrb[146].mxu1 %vm3232_vm12, %v12599_v44 }
 0xc35   : > { %7552 = vmatprep.mubr.msk.f32.mxu1 %vm8186_vm10, %v10599_v39 }
 0xc38   : > { %7553 = vmatmul.mubr.msk.f32.gmra.mrb[148].mxu1 %vm3232_vm12, %v12612_v27 }
 0xc39   : > { %7555 = vmatprep.mubr.msk.f32.mxu1 %vm8186_vm10, %v10599_v39 }
 0xc3c   : > { %7556 = vmatmul.mubr.msk.f32.gmra.mrb[150].mxu1 %vm3232_vm12, %v12625_v37  ;;  %v5489_v37 = vld [vmem:[%s8314_s18 + $0x8] sm:$0xff] }
 0xc3d   : > { %7567 = vmatprep.mubr.msk.f32.mxu1 %vm8186_vm10, %v10599_v39 }
 0xc86   : > { %v5778_v22 = vpop.f32.mrb[66].mxu0 }
 0xc87   : > { %6057 = vperm.xlu0 %8029, %v5778_v22   ;;  %v7432_v62 = vpop.f32.mrb[67].mxu0 }
 0xc8a   : > { %v5783_v8 = vpop.f32.mrb[68].mxu0 }
 0xc8b   : > { %6062 = vperm.xlu1 %8031, %v5783_v8   ;;  %v7435_v23 = vpop.f32.mrb[69].mxu0 }
 0xc8e   : > { %v5788_v59 = vpop.f32.mrb[70].mxu0 }
 0xc8f   : > { %6067 = vperm.xlu1 %8031, %v5788_v59   ;;  %v7438_v33 = vpop.f32.mrb[71].mxu0 }
 0xc92   : > { %v5793_v58 = vpop.f32.mrb[72].mxu0 }
 0xc93   : > { %6072 = vperm.xlu0 %8029, %v5793_v58   ;;  %v7441_v34 = vpop.f32.mrb[73].mxu0 }
 0xc96   : > { %v5798_v28 = vpop.f32.mrb[74].mxu0 }
 0xc97   : > { %6077 = vperm.xlu1 %8031, %v5798_v28   ;;  %v7444_v60 = vpop.f32.mrb[75].mxu0 }
 0xc9a   : > { %v5803_v45 = vpop.f32.mrb[76].mxu0 }
 0xc9b   : > { %6082 = vperm.xlu0 %8029, %v5803_v45   ;;  %v7447_v1 = vpop.f32.mrb[77].mxu0 }
 0xc9e   : > { %v5808_v31 = vpop.f32.mrb[78].mxu0 }
 0xc9f   : > { %6087 = vperm.xlu1 %8031, %v5808_v31   ;;  %v7450_v40 = vpop.f32.mrb[79].mxu0 }
 0xca2   : > { %v5813_v53 = vpop.f32.mrb[80].mxu0 }
 0xca3   : > { %6092 = vperm.xlu0 %8029, %v5813_v53   ;;  %v7453_v49 = vpop.f32.mrb[81].mxu0 }
 0xca6   : > { %v5818_v51 = vpop.f32.mrb[82].mxu0 }
 0xca7   : > { %6097 = vperm.xlu1 %8031, %v5818_v51   ;;  %v7456_v18 = vpop.f32.mrb[83].mxu0 }
 0xcaa   : > { %v5823_v32 = vpop.f32.mrb[84].mxu0 }
 0xcab   : > { %6102 = vperm.xlu0 %8029, %v5823_v32   ;;  %v7459_v22 = vpop.f32.mrb[85].mxu0 }
 0xcae   : > { %v5828_v62 = vpop.f32.mrb[86].mxu0 }
 0xcaf   : > { %6107 = vperm.xlu1 %8031, %v5828_v62   ;;  %v7462_v8 = vpop.f32.mrb[87].mxu0 }
 0xcb2   : > { %v5833_v23 = vpop.f32.mrb[88].mxu0 }
 0xcb3   : > { %6112 = vperm.xlu0 %8029, %v5833_v23   ;;  %v7465_v59 = vpop.f32.mrb[89].mxu0 }
 0xcb6   : > { %v5838_v33 = vpop.f32.mrb[90].mxu0 }
 0xcb7   : > { %6117 = vperm.xlu1 %8031, %v5838_v33   ;;  %v7468_v58 = vpop.f32.mrb[91].mxu0 }
 0xcba   : > { %v5843_v34 = vpop.f32.mrb[92].mxu0 }
 0xcbb   : > { %6122 = vperm.xlu0 %8029, %v5843_v34   ;;  %v7471_v28 = vpop.f32.mrb[93].mxu0 }
 0xcbe   : > { %v5848_v60 = vpop.f32.mrb[94].mxu0 }
 0xcbf   : > { %6127 = vperm.xlu1 %8031, %v5848_v60   ;;  %v7474_v45 = vpop.f32.mrb[95].mxu0  ;;  %v5951_v1 = vpop.f32.mrb[110].mxu1 }
 0xcc0   : > { %v7497_v31 = vpop.f32.mrb[111].mxu1 }
 0xcc2   : > { %v5853_v40 = vpop.f32.mrb[96].mxu0 }
 0xcc3   : > { %6183 = vperm.xlu1 %8031, %v5951_v1   ;;  %6132 = vperm.xlu0 %8029, %v5853_v40   ;;  %v7477_v53 = vpop.f32.mrb[97].mxu0  ;;  %v5956_v49 = vpop.f32.mrb[112].mxu1 }
 0xcc4   : > { %v7500_v51 = vpop.f32.mrb[113].mxu1 }
 0xcc6   : > { %v5858_v18 = vpop.f32.mrb[98].mxu0 }
 0xcc7   : > { %6188 = vperm.xlu0 %8029, %v5956_v49   ;;  %6137 = vperm.xlu1 %8031, %v5858_v18   ;;  %v7480_v32 = vpop.f32.mrb[99].mxu0  ;;  %v5961_v22 = vpop.f32.mrb[114].mxu1 }
 0xcc8   : > { %v7503_v62 = vpop.f32.mrb[115].mxu1 }
 0xcca   : > { %v5863_v8 = vpop.f32.mrb[100].mxu0 }
 0xccb   : > { %6193 = vperm.xlu1 %8031, %v5961_v22   ;;  %6142 = vperm.xlu0 %8029, %v5863_v8   ;;  %v7483_v23 = vpop.f32.mrb[101].mxu0  ;;  %v5966_v59 = vpop.f32.mrb[116].mxu1 }
 0xccc   : > { %v7506_v33 = vpop.f32.mrb[117].mxu1 }
 0xcce   : > { %v5868_v58 = vpop.f32.mrb[102].mxu0 }
 0xccf   : > { %6198 = vperm.xlu0 %8029, %v5966_v59   ;;  %6147 = vperm.xlu1 %8031, %v5868_v58   ;;  %v7486_v34 = vpop.f32.mrb[103].mxu0  ;;  %v5971_v28 = vpop.f32.mrb[118].mxu1 }
 0xcd0   : > { %v7509_v60 = vpop.f32.mrb[119].mxu1 }
 0xcd2   : > { %v5873_v45 = vpop.f32.mrb[104].mxu0 }
 0xcd3   : > { %6203 = vperm.xlu1 %8031, %v5971_v28   ;;  %6152 = vperm.xlu0 %8029, %v5873_v45   ;;  %v5976_v1 = vpop.f32.mrb[120].mxu1  ;;  %v7489_v31 = vpop.f32.mrb[105].mxu0 }
 0xcd4   : > { %v7512_v40 = vpop.f32.mrb[121].mxu1 }
 0xcd6   : > { %v5878_v53 = vpop.f32.mrb[106].mxu0 }
 0xcd7   : > { %v5981_v49 = vpop.f32.mrb[122].mxu1  ;;  %6208 = vperm.xlu0 %8029, %v5976_v1   ;;  %v7492_v51 = vpop.f32.mrb[107].mxu0 }
 0xcd8   : > { %6213 = vperm.xlu1 %8031, %v5981_v49   ;;  %v7515_v18 = vpop.f32.mrb[123].mxu1 }
 0xcdb   : > { %v5986_v32 = vpop.f32.mrb[124].mxu1 }
 0xcdc   : > { %6218 = vperm.xlu0 %8029, %v5986_v32   ;;  %v7518_v22 = vpop.f32.mrb[125].mxu1 }
 0xcdf   : > { %v5991_v62 = vpop.f32.mrb[126].mxu1 }
 0xce0   : > { %6223 = vperm.xlu1 %8031, %v5991_v62   ;;  %v7521_v8 = vpop.f32.mrb[127].mxu1 }
 0xce3   : > { %v5996_v23 = vpop.f32.mrb[128].mxu1 }
 0xce4   : > { %6228 = vperm.xlu0 %8029, %v5996_v23   ;;  %v7524_v59 = vpop.f32.mrb[129].mxu1 }
 0xce7   : > { %v6001_v33 = vpop.f32.mrb[130].mxu1 }
 0xce8   : > { %6233 = vperm.xlu1 %8031, %v6001_v33   ;;  %v7527_v58 = vpop.f32.mrb[131].mxu1 }
 0xceb   : > { %v6006_v34 = vpop.f32.mrb[132].mxu1 }
 0xcec   : > { %6238 = vperm.xlu0 %8029, %v6006_v34   ;;  %v7530_v28 = vpop.f32.mrb[133].mxu1 }
 0xcef   : > { %v6011_v60 = vpop.f32.mrb[134].mxu1 }
 0xcf0   : > { %6243 = vperm.xlu1 %8031, %v6011_v60   ;;  %v7533_v45 = vpop.f32.mrb[135].mxu1 }
 0xcf3   : > { %v6016_v1 = vpop.f32.mrb[136].mxu1 }
 0xcf4   : > { %6248 = vperm.xlu0 %8029, %v6016_v1   ;;  %v7536_v31 = vpop.f32.mrb[137].mxu1 }
 0xcf7   : > { %v6021_v40 = vpop.f32.mrb[138].mxu1 }
 0xcf8   : > { %6253 = vperm.xlu1 %8031, %v6021_v40   ;;  %v7539_v49 = vpop.f32.mrb[139].mxu1 }
 0xcfb   : > { %v6026_v51 = vpop.f32.mrb[140].mxu1 }
 0xcfc   : > { %6258 = vperm.xlu0 %8029, %v6026_v51   ;;  %v7542_v18 = vpop.f32.mrb[141].mxu1 }
 0xcff   : > { %v6031_v32 = vpop.f32.mrb[142].mxu1 }
 0xd00   : > { %6263 = vperm.xlu1 %8031, %v6031_v32   ;;  %v7545_v22 = vpop.f32.mrb[143].mxu1 }
 0xd03   : > { %v6036_v62 = vpop.f32.mrb[144].mxu1 }
 0xd04   : > { %6268 = vperm.xlu0 %8029, %v6036_v62   ;;  %v7548_v8 = vpop.f32.mrb[145].mxu1 }
 0xd06   : > { %v6058_v45 = vpop.permute.xlu0 %6057 }
 0xd07   : > { %v6041_v23 = vpop.f32.mrb[146].mxu1  ;;  %v6160_v27 = vsub.f32 %v12196_v47, %v6058_v45 }
 0xd08   : > { %6273 = vperm.xlu1 %8031, %v6041_v23   ;;  %v7551_v59 = vpop.f32.mrb[147].mxu1 }
 0xd0a   : > { %v6063_v60 = vpop.permute.xlu1 %6062 }
 0xd0b   : > { %v6046_v33 = vpop.f32.mrb[148].mxu1  ;;  %v6161_v11 = vsub.f32 %v12207_v13, %v6063_v60 }
 0xd0c   : > { %6278 = vperm.xlu0 %8029, %v6046_v33   ;;  %6157 = vperm.xlu1 %8031, %v5878_v53   ;;  %v7554_v58 = vpop.f32.mrb[149].mxu1  ;;  %v5488_v33 = vld [vmem:[%s8314_s18] sm:$0xff] }
 0xd0e   : > { %v6068_v1 = vpop.permute.xlu1 %6067 }
 0xd0f   : > { %v6051_v34 = vpop.f32.mrb[150].mxu1  ;;  %v6162_v13 = vsub.f32 %v12228_v6, %v6068_v1 }
 0xd10   : > { %6283 = vperm.xlu0 %8029, %v6051_v34   ;;  %v7557_v28 = vpop.f32.mrb[151].mxu1 }
 0xd12   : > { %v6073_v31 = vpop.permute.xlu0 %6072 }
 0xd16   : > { %v6078_v40 = vpop.permute.xlu1 %6077 }
 0xd1a   : > { %v12691_v49 = vpop.permute.xlu0 %6082 }
 0xd1e   : > { %v12693_v51 = vpop.permute.xlu1 %6087 }
 0xd22   : > { %v12695_v18 = vpop.permute.xlu0 %6092 }
 0xd26   : > { %v12697_v32 = vpop.permute.xlu1 %6097 }
 0xd2a   : > { %v12699_v53 = vpop.permute.xlu0 %6102 }
 0xd2e   : > { %v12701_v22 = vpop.permute.xlu1 %6107 }
 0xd32   : > { %v12703_v62 = vpop.permute.xlu0 %6112 }
 0xd36   : > { %v12705_v8 = vpop.permute.xlu1 %6117 }
 0xd3a   : > { %v12707_v23 = vpop.permute.xlu0 %6122 }
 0xd3e   : > { %v12709_v59 = vpop.permute.xlu1 %6127 }
 0xd42   : > { %v6184_v58 = vpop.permute.xlu1 %6183  ;;  %v12712_v34 = vpop.permute.xlu0 %6132 }
 0xd43   : > { %v6286_v28 = vmul.f32 %v6184_v58, %v5488_v33 }
 0xd45   : > { %v6307_v10 = vmul.f32 %v6286_v28, %v6160_v27 }
 0xd46   : > { %v6189_v44 = vpop.permute.xlu0 %6188  ;;  %v12716_v54 = vpop.permute.xlu1 %6137 }
 0xd47   : > { %v6287_v14 = vmul.f32 %v6189_v44, %v5489_v37  ;;  %v12724_v58 = vadd.f32 %v6307_v10, %v5509_v24  ;;  %v5511_v24 = vld [vmem:[%s8319_s26 + $0x10] sm:$0xff] }
 0xd49   : > { %v6308_v19 = vmul.f32 %v6287_v14, %v6161_v11  ;;  %v6163_v14 = vsub.f32 %v12241_v25, %v6073_v31  ;;  %v5493_v31 = vld [vmem:[%s8314_s18 + $0x28] sm:$0xff] }
 0xd4a   : > { %v6194_v30 = vpop.permute.xlu1 %6193  ;;  %v12722_v33 = vpop.permute.xlu0 %6142 }
 0xd4b   : > { %v12726_v47 = vadd.f32 %v6308_v19, %v5510_v12  ;;  %v6288_v45 = vmul.f32 %v6194_v30, %v5490_v55  ;;  %v5512_v19 = vld [vmem:[%s8319_s26 + $0x18] sm:$0xff]  ;;  %v5492_v12 = vld [vmem:[%s8314_s18 + $0x20] sm:$0xff] }
 0xd4d   : > { %v7810_v44 = vpack.c.bf16 %v12726_v47, %v12724_v58  ;;  %v6309_v11 = vmul.f32 %v6288_v45, %v6162_v13  ;;  %v5494_v45 = vld [vmem:[%s8314_s18 + $0x30] sm:$0xff] }
 0xd4e   : > { %v6199_v27 = vpop.permute.xlu0 %6198  ;;  %v12732_v37 = vpop.permute.xlu1 %6147 }
 0xd4f   : > { %v6289_v60 = vmul.f32 %v6199_v27, %v5491_v38  ;;  %7811 = vmatpush1.bf16.msra.mxu0 %v7810_v44  ;;  %v12741_v10 = vadd.f32 %v6309_v11, %v5511_v24  ;;  %v6164_v38 = vsub.f32 %v12258_v7, %v6078_v40  ;;  %v6165_v44 = vsub.f32 %v12260_v57, %v12691_v49  ;;  %v5514_v24 = vld [vmem:[%s8319_s26 + $0x28] sm:$0xff]  ;;  %v5495_v40 = vld [vmem:[%s8314_s18 + $0x38] sm:$0xff] }
 0xd50   : > { %7812 = vmatprep.subr.bf16.mxu0 %v13763_v41 }
 0xd51   : > { %v6310_v30 = vmul.f32 %v6289_v60, %v6163_v14  ;;  %v5513_v60 = vld [vmem:[%s8319_s26 + $0x20] sm:$0xff] }
 0xd52   : > { %v6204_v6 = vpop.permute.xlu1 %6203  ;;  %v12739_v55 = vpop.permute.xlu0 %6152 }
 0xd53   : > { %v12743_v1 = vadd.f32 %v6310_v30, %v5512_v19  ;;  %v6290_v25 = vmul.f32 %v6204_v6, %v5492_v12  ;;  %v6166_v12 = vsub.f32 %v12275_v0, %v12693_v51  ;;  %v6167_v6 = vsub.f32 %v12277_v46, %v12695_v18  ;;  %v5497_v46 = vld [vmem:[%s8314_s18 + $0x48] sm:$0xff] }
 0xd54   : > { %v6168_v18 = vsub.f32 %v12292_v2, %v12697_v32 }
 0xd55   : > { %v7813_v28 = vpack.c.bf16 %v12743_v1, %v12741_v10  ;;  %v6311_v27 = vmul.f32 %v6290_v25, %v6164_v38 }
 0xd56   : > { %v6209_v13 = vpop.permute.xlu0 %6208 }
 0xd57   : > { %v6291_v14 = vmul.f32 %v6209_v13, %v5493_v31  ;;  %7814 = vmatpush1.bf16.msra.mxu0 %v7813_v28  ;;  %v6214_v11 = vpop.permute.xlu1 %6213  ;;  %v12758_v30 = vadd.f32 %v6311_v27, %v5513_v60  ;;  %v5515_v28 = vld [vmem:[%s8319_s26 + $0x30] sm:$0xff]  ;;  %v5496_v13 = vld [vmem:[%s8314_s18 + $0x40] sm:$0xff] }
 0xd58   : > { %v6292_v19 = vmul.f32 %v6214_v11, %v5494_v45  ;;  %7815 = vmatprep.subr.bf16.mxu0 %v13763_v41  ;;  %v5516_v45 = vld [vmem:[%s8319_s26 + $0x38] sm:$0xff] }
 0xd59   : > { %v6312_v7 = vmul.f32 %v6291_v14, %v6165_v44 }
 0xd5a   : > { %v6313_v25 = vmul.f32 %v6292_v19, %v6166_v12  ;;  %v5518_v12 = vld [vmem:[%s8319_s26 + $0x48] sm:$0xff] }
 0xd5b   : > { %v12760_v57 = vadd.f32 %v6312_v7, %v5514_v24  ;;  %v6219_v49 = vpop.permute.xlu0 %6218  ;;  %v6169_v24 = vsub.f32 %v12294_v17, %v12699_v53  ;;  %v6170_v17 = vsub.f32 %v12309_v21, %v12701_v22 }
 0xd5c   : > { %v6293_v31 = vmul.f32 %v6219_v49, %v5495_v40  ;;  %v12769_v51 = vadd.f32 %v6313_v25, %v5515_v28  ;;  %v5517_v40 = vld [vmem:[%s8319_s26 + $0x40] sm:$0xff]  ;;  %v5498_v49 = vld [vmem:[%s8314_s18 + $0x50] sm:$0xff] }
 0xd5d   : > { %v7816_v38 = vpack.c.bf16 %v12760_v57, %v12758_v30 }
 0xd5e   : > { %v6314_v44 = vmul.f32 %v6293_v31, %v6167_v6 }
 0xd5f   : > { %v6224_v0 = vpop.permute.xlu1 %6223  ;;  %7817 = vmatpush1.bf16.msra.mxu0 %v7816_v38  ;;  %v5499_v38 = vld [vmem:[%s8314_s18 + $0x58] sm:$0xff] }
 0xd60   : > { %v12771_v27 = vadd.f32 %v6314_v44, %v5516_v45  ;;  %v6294_v14 = vmul.f32 %v6224_v0, %v5496_v13  ;;  %7818 = vmatprep.subr.bf16.mxu0 %v13763_v41  ;;  %v6171_v45 = vsub.f32 %v12311_v15, %v12703_v62  ;;  %v5519_v0 = vld [vmem:[%s8319_s26 + $0x50] sm:$0xff]  ;;  %v6172_v15 = vsub.f32 %v12323_v5, %v12705_v8 }
 0xd62   : > { %v7819_v11 = vpack.c.bf16 %v12771_v27, %v12769_v51  ;;  %v6315_v19 = vmul.f32 %v6294_v14, %v6168_v18  ;;  %v5520_v14 = vld [vmem:[%s8319_s26 + $0x58] sm:$0xff] }
 0xd63   : > { %v6229_v60 = vpop.permute.xlu0 %6228 }
 0xd64   : > { %v6295_v7 = vmul.f32 %v6229_v60, %v5497_v46  ;;  %7820 = vmatpush1.bf16.msra.mxu0 %v7819_v11  ;;  %v12785_v6 = vadd.f32 %v6315_v19, %v5517_v40  ;;  %v5500_v46 = vld [vmem:[%s8314_s18 + $0x60] sm:$0xff] }
 0xd65   : > { %7821 = vmatprep.subr.bf16.mxu0 %v13763_v41 }
 0xd66   : > { %v6316_v2 = vmul.f32 %v6295_v7, %v6169_v24  ;;  %v5501_v24 = vld [vmem:[%s8314_s18 + $0x68] sm:$0xff]  ;;  %v6173_v7 = vsub.f32 %v12325_v43, %v12707_v23  ;;  %v6174_v43 = vsub.f32 %v12334_v4, %v12709_v59 }
 0xd67   : > { %v6234_v32 = vpop.permute.xlu1 %6233 }
 0xd68   : > { %v12787_v25 = vadd.f32 %v6316_v2, %v5518_v12  ;;  %v6296_v31 = vmul.f32 %v6234_v32, %v5498_v49  ;;  %v5521_v49 = vld [vmem:[%s8319_s26 + $0x60] sm:$0xff]  ;;  %v5522_v2 = vld [vmem:[%s8319_s26 + $0x68] sm:$0xff]  ;;  %v5502_v32 = vld [vmem:[%s8314_s18 + $0x70] sm:$0xff] }
 0xd6a   : > { %v7822_v53 = vpack.c.bf16 %v12787_v25, %v12785_v6  ;;  %v6317_v13 = vmul.f32 %v6296_v31, %v6170_v17 }
 0xd6b   : > { %v6239_v28 = vpop.permute.xlu0 %6238 }
 0xd6c   : > { %v6297_v44 = vmul.f32 %v6239_v28, %v5499_v38  ;;  %7823 = vmatpush1.bf16.msra.mxu0 %v7822_v53  ;;  %v12800_v18 = vadd.f32 %v6317_v13, %v5519_v0  ;;  %v5503_v53 = vld [vmem:[%s8314_s18 + $0x78] sm:$0xff]  ;;  %v5523_v0 = vld [vmem:[%s8319_s26 + $0x70] sm:$0xff] }
 0xd6d   : > { %7824 = vmatprep.subr.bf16.mxu0 %v13763_v41 }
 0xd6e   : > { %v6318_v21 = vmul.f32 %v6297_v44, %v6171_v45  ;;  %v6175_v45 = vsub.f32 %v12336_v52, %v12712_v34  ;;  %v6176_v52 = vsub.f32 %v12345_v9, %v12716_v54 }
 0xd6f   : > { %v6244_v22 = vpop.permute.xlu1 %6243 }
 0xd70   : > { %v12802_v11 = vadd.f32 %v6318_v21, %v5520_v14  ;;  %v6298_v60 = vmul.f32 %v6244_v22, %v5500_v46  ;;  %v5524_v14 = vld [vmem:[%s8319_s26 + $0x78] sm:$0xff]  ;;  %v5504_v46 = vld [vmem:[%s8314_s18 + $0x80] sm:$0xff] }
 0xd72   : > { %v7825_v62 = vpack.c.bf16 %v12802_v11, %v12800_v18  ;;  %v6319_v40 = vmul.f32 %v6298_v60, %v6172_v15 }
 0xd73   : > { %v6249_v19 = vpop.permute.xlu0 %6248 }
 0xd74   : > { %v6299_v12 = vmul.f32 %v6249_v19, %v5501_v24  ;;  %7826 = vmatpush1.bf16.msra.mxu0 %v7825_v62  ;;  %v12815_v31 = vadd.f32 %v6319_v40, %v5521_v49  ;;  %v5505_v24 = vld [vmem:[%s8314_s18 + $0x88] sm:$0xff]  ;;  %v6177_v62 = vsub.f32 %v12347_v29, %v12722_v33  ;;  %v5525_v40 = vld [vmem:[%s8319_s26 + $0x80] sm:$0xff]  ;;  %v5506_v49 = vld [vmem:[%s8314_s18 + $0x90] sm:$0xff]  ;;  %v6178_v29 = vsub.f32 %v12356_v48, %v12732_v37 }
 0xd75   : > { %7827 = vmatprep.subr.bf16.mxu0 %v13763_v41 }
 0xd76   : > { %v6320_v5 = vmul.f32 %v6299_v12, %v6173_v7  ;;  %v5526_v12 = vld [vmem:[%s8319_s26 + $0x88] sm:$0xff] }
 0xd77   : > { %v6254_v8 = vpop.permute.xlu1 %6253 }
 0xd78   : > { %v12817_v38 = vadd.f32 %v6320_v5, %v5522_v2  ;;  %v6300_v17 = vmul.f32 %v6254_v8, %v5502_v32  ;;  %v5507_v8 = vld [vmem:[%s8314_s18 + $0x98] sm:$0xff] }
 0xd7a   : > { %v7828_v23 = vpack.c.bf16 %v12817_v38, %v12815_v31  ;;  %v6321_v13 = vmul.f32 %v6300_v17, %v6174_v43 }
 0xd7b   : > { %v6259_v28 = vpop.permute.xlu0 %6258 }
 0xd7c   : > { %v6301_v44 = vmul.f32 %v6259_v28, %v5503_v53  ;;  %7829 = vmatpush1.bf16.msra.mxu0 %v7828_v23  ;;  %v12830_v21 = vadd.f32 %v6321_v13, %v5523_v0  ;;  %v6179_v53 = vsub.f32 %v12358_v16, %v12739_v55  ;;  %v5527_v28 = vld [vmem:[%s8319_s26 + $0x90] sm:$0xff] }
 0xd7d   : > { %7830 = vmatprep.subr.bf16.mxu0 %v13763_v41 }
 0xd7e   : > { %v6322_v4 = vmul.f32 %v6301_v44, %v6175_v45  ;;  %v5528_v45 = vld [vmem:[%s8319_s26 + $0x98] sm:$0xff]  ;;  %v5508_v44 = vld [vmem:[%s8314_s18 + $0xa0] sm:$0x3] }
 0xd7f   : > { %v6264_v59 = vpop.permute.xlu1 %6263 }
 0xd80   : > { %v12832_v22 = vadd.f32 %v6322_v4, %v5524_v14  ;;  %v6302_v60 = vmul.f32 %v6264_v59, %v5504_v46  ;;  %v5529_v59 = vld [vmem:[%s8319_s26 + $0xa0] sm:$0x3] }
 0xd82   : > { %v7831_v34 = vpack.c.bf16 %v12832_v22, %v12830_v21  ;;  %v6323_v19 = vmul.f32 %v6302_v60, %v6176_v52 }
 0xd83   : > { %v6269_v15 = vpop.permute.xlu0 %6268 }
 0xd84   : > { %v6303_v7 = vmul.f32 %v6269_v15, %v5505_v24  ;;  %7832 = vmatpush1.bf16.msra.mxu0 %v7831_v34  ;;  %v12845_v54 = vadd.f32 %v6323_v19, %v5525_v40  ;;  %v6424_v24 = vld [vmem:[%s8324_s23 + $0x8] sm:$0xff] }
 0xd85   : > { %7833 = vmatprep.subr.bf16.mxu0 %v13763_v41 }
 0xd86   : > { %v6324_v2 = vmul.f32 %v6303_v7, %v6177_v62 }
 0xd87   : > { %v6274_v9 = vpop.permute.xlu1 %6273 }
 0xd88   : > { %v12847_v32 = vadd.f32 %v6324_v2, %v5526_v12  ;;  %v6304_v5 = vmul.f32 %v6274_v9, %v5506_v49 }
 0xd8a   : > { %v7834_v33 = vpack.c.bf16 %v12847_v32, %v12845_v54  ;;  %v6325_v43 = vmul.f32 %v6304_v5, %v6178_v29  ;;  %v14029_v29 = vld [vmem:[#allocation173_spill] sm:$0xff] }
 0xd8b   : > { %v6279_v17 = vpop.permute.xlu0 %6278  ;;  %v6158_v13 = vpop.permute.xlu1 %6157 }
 0xd8c   : > { %v6305_v23 = vmul.f32 %v6279_v17, %v5507_v8  ;;  %7835 = vmatpush1.bf16.msra.mxu0 %v7834_v33  ;;  %v12860_v37 = vadd.f32 %v6325_v43, %v5527_v28  ;;  %v6180_v16 = vsub.f32 %v12367_v42, %v6158_v13  ;;  %v6423_v42 = vld [vmem:[%s8324_s23] sm:$0xff] }
 0xd8d   : > { %7836 = vmatprep.subr.bf16.mxu0 %v13763_v41  ;;  %v7840_v52 = vpack.c.bf16 %v6424_v24, %v6423_v42  ;;  %v14030_v33 = vld [vmem:[#allocation90_spill] sm:$0xff]  ;;  %v8109_v24 = vld [vmem:[%s8334_s2 + $0x10] sm:$0xff] }
 0xd8e   : > { %v6326_v0 = vmul.f32 %v6305_v23, %v6179_v53  ;;  %v14031_v17 = vld [vmem:[#allocation142_spill] sm:$0xff]  ;;  %v14032_v53 = vld [vmem:[#allocation185_spill] sm:$0xff] }
 0xd8f   : > { %v6284_v48 = vpop.permute.xlu0 %6283  ;;  %v14033_v43 = vld [vmem:[#allocation182_spill] sm:$0xff] }
 0xd90   : > { %v12862_v14 = vadd.f32 %v6326_v0, %v5528_v45  ;;  %v6306_v55 = vmul.f32 %v6284_v48, %v5508_v44  ;;  %v8107_v13 = vld [vmem:[%s8334_s2] sm:$0xff] }
 0xd92   : > { %v7837_v46 = vpack.c.bf16 %v12862_v14, %v12860_v37  ;;  %v6327_v4 = vmul.f32 %v6306_v55, %v6180_v16 }
 0xd94   : > { %7838 = vmatpush1.bf16.msra.mxu0 %v7837_v46  ;;  %v12869_v60 = vadd.f32 %v6327_v4, %v5529_v59 }
 0xd95   : > { %6392 = vmatprep.subr.mxu0 %v10599_v39 }
 0xd98   : > { %7154 = vmatpush1.msk.msra.mxu0 %vm876_vm7, %v12869_v60 }
 0xd99   : > { %6417 = vmatmul.mubr.f32.vlgmr.msra.gmra.mrb[108].mxu0 %v12374_v26  ;;  %7839 = vmatprep.subr.bf16.mxu0 %v13763_v41  ;;  %v6499_v26 = vld [vmem:[%s8329_s14] sm:$0xff] }
 0xd9a   : > { %7562 = vmatprep.mubr.msk.f32.mxu0 %vm8186_vm10, %v10599_v39  ;;  %7841 = vmatpush3.bf16.msra.mxu0 %v7840_v52 }
 0xd9b   : > { %7570 = vmatprep.subr.mxu0 %v10599_v39  ;;  %7566 = vmatpush3.msra.mxu1 %v6499_v26  ;;  %v8110_v26 = vld [vmem:[%s8334_s2 + $0x18] sm:$0xff] }
 0xe6c   : > { %v6418_v34 = vpop.f32.mrb[108].mxu0 }
 0xe6d   : > { %v6422_v15 = vmul.f32 0.012345679, %v6418_v34  ;;  %v6420_v62 = vpop.f32.mrb[109].mxu0 }
 0xe6f   : > { %7563 = vmatmul.mubr.msk.f32.vlgmr.msra.gmra.mrb[110].mxu0 %vm714_vm4, %v6422_v15 }
 0xe70   : > { %7572 = vmatprep.mubr.msk.f32.mxu0 %vm8186_vm10, %v10599_v39 }
 0xf42   : > { %v6494_v41 = vpop.f32.mrb[110].mxu0 }
 0xf43   : > { %v6498_v19 = vmax.f32 %v6494_v41, 0.0  ;;  %v7564_v7 = vpop.f32.mrb[111].mxu0 }
 0xf45   : > { %7568 = vmatmul.mubr.msk.f32.vlgmr.msra.gmra.mrb[152].mxu1 %vm6500_vm14, %v6498_v19 }
0x1018   : > { %v6570_v40 = vpop.f32.mrb[152].mxu1 }
0x1019   : > { %v6574_v12 = vsub.f32 0.0, %v6570_v40  ;;  %v7569_v49 = vpop.f32.mrb[153].mxu1 }
0x101b   : > { %v6575_v2 = vmul.f32 1.442695, %v6574_v12  ;;  %v8111_v12 = vld [vmem:[%s8334_s2 + $0x20] sm:$0xff] }
0x101d   : > { %8036 = vpow2.f32 %v6575_v2 }
0x1027   : > { %v8037_v9 = vpop.eup %8036 }
0x1028   : > { %v6577_v5 = vadd.f32 1.0, %v8037_v9 }
0x102a   : > { %8038 = vrcp.f32 %v6577_v5 }
0x1034   : > { %v8039_v8 = vpop.eup %8038 }
0x1035   : > { %7571 = vmatpush3.msk.msra.mxu0 %vm876_vm7, %v8039_v8  ;;  %v8112_v8 = vld [vmem:[%s8334_s2 + $0x28] sm:$0xff] }
0x1036   : > { %7573 = vmatmul.mubr.msk.f32.vlgmr.msra.gmra.mrb[112].mxu0 %vm3232_vm12, %v12418_v63  ;;  %v14021_v63 = vld [vmem:[#allocation103_spill] sm:$0xff] }
0x1037   : > { %7575 = vmatprep.mubr.msk.f32.mxu0 %vm8186_vm10, %v10599_v39 }
0x103a   : > { %7576 = vmatmul.mubr.msk.f32.gmra.mrb[114].mxu0 %vm3232_vm12, %v12428_v50  ;;  %v14022_v50 = vld [vmem:[#allocation162_spill] sm:$0xff] }
0x103b   : > { %7578 = vmatprep.mubr.msk.f32.mxu0 %vm8186_vm10, %v10599_v39 }
0x103e   : > { %7579 = vmatmul.mubr.msk.f32.gmra.mrb[116].mxu0 %vm3232_vm12, %v12437_v61  ;;  %v14023_v61 = vld [vmem:[#allocation170_spill] sm:$0xff] }
0x103f   : > { %7581 = vmatprep.mubr.msk.f32.mxu0 %vm8186_vm10, %v10599_v39 }
0x1042   : > { %7582 = vmatmul.mubr.msk.f32.gmra.mrb[118].mxu0 %vm3232_vm12, %v12446_v3  ;;  %v14024_v3 = vld [vmem:[#allocation165_spill] sm:$0xff] }
0x1043   : > { %7584 = vmatprep.mubr.msk.f32.mxu0 %vm8186_vm10, %v10599_v39 }
0x1046   : > { %7585 = vmatmul.mubr.msk.f32.gmra.mrb[120].mxu0 %vm3232_vm12, %v12455_v56  ;;  %v14025_v56 = vld [vmem:[#allocation164_spill] sm:$0xff] }
0x1047   : > { %7587 = vmatprep.mubr.msk.f32.mxu0 %vm8186_vm10, %v10599_v39 }
0x104a   : > { %7588 = vmatmul.mubr.msk.f32.gmra.mrb[122].mxu0 %vm3232_vm12, %v12464_v20  ;;  %v14026_v20 = vld [vmem:[#allocation169_spill] sm:$0xff] }
0x104b   : > { %7590 = vmatprep.mubr.msk.f32.mxu0 %vm8186_vm10, %v10599_v39 }
0x104e   : > { %7591 = vmatmul.mubr.msk.f32.gmra.mrb[124].mxu0 %vm3232_vm12, %v12473_v36  ;;  %v14027_v36 = vld [vmem:[#allocation178_spill] sm:$0xff] }
0x104f   : > { %7593 = vmatprep.mubr.msk.f32.mxu0 %vm8186_vm10, %v10599_v39 }
0x1052   : > { %7594 = vmatmul.mubr.msk.f32.gmra.mrb[126].mxu0 %vm3232_vm12, %v12482_v35  ;;  %v14028_v35 = vld [vmem:[#allocation174_spill] sm:$0xff] }
0x1053   : > { %7596 = vmatprep.mubr.msk.f32.mxu0 %vm8186_vm10, %v10599_v39 }
0x1056   : > { %7597 = vmatmul.mubr.msk.f32.gmra.mrb[128].mxu0 %vm3232_vm12, %v14021_v63 }
0x1057   : > { %7599 = vmatprep.mubr.msk.f32.mxu0 %vm8186_vm10, %v10599_v39 }
0x105a   : > { %7600 = vmatmul.mubr.msk.f32.gmra.mrb[130].mxu0 %vm3232_vm12, %v14022_v50 }
0x105b   : > { %7602 = vmatprep.mubr.msk.f32.mxu0 %vm8186_vm10, %v10599_v39 }
0x105e   : > { %7603 = vmatmul.mubr.msk.f32.gmra.mrb[132].mxu0 %vm3232_vm12, %v14023_v61 }
0x105f   : > { %7605 = vmatprep.mubr.msk.f32.mxu0 %vm8186_vm10, %v10599_v39 }
0x1062   : > { %7606 = vmatmul.mubr.msk.f32.gmra.mrb[134].mxu0 %vm3232_vm12, %v14024_v3 }
0x1063   : > { %7608 = vmatprep.mubr.msk.f32.mxu0 %vm8186_vm10, %v10599_v39 }
0x1066   : > { %7609 = vmatmul.mubr.msk.f32.gmra.mrb[136].mxu0 %vm3232_vm12, %v14025_v56  ;;  %v8113_v56 = vld [vmem:[%s8334_s2 + $0x30] sm:$0xff] }
0x1067   : > { %7611 = vmatprep.mubr.msk.f32.mxu0 %vm8186_vm10, %v10599_v39 }
0x106a   : > { %7612 = vmatmul.mubr.msk.f32.gmra.mrb[138].mxu0 %vm3232_vm12, %v14026_v20 }
0x106b   : > { %7614 = vmatprep.mubr.msk.f32.mxu0 %vm8186_vm10, %v10599_v39 }
0x106e   : > { %7615 = vmatmul.mubr.msk.f32.gmra.mrb[140].mxu0 %vm3232_vm12, %v14027_v36 }
0x106f   : > { %7617 = vmatprep.mubr.msk.f32.mxu0 %vm8186_vm10, %v10599_v39 }
0x1072   : > { %7618 = vmatmul.mubr.msk.f32.gmra.mrb[142].mxu0 %vm3232_vm12, %v14028_v35 }
0x1073   : > { %7620 = vmatprep.mubr.msk.f32.mxu0 %vm8186_vm10, %v10599_v39 }
0x1076   : > { %7621 = vmatmul.mubr.msk.f32.gmra.mrb[144].mxu0 %vm3232_vm12, %v14029_v29 }
0x1077   : > { %7623 = vmatprep.mubr.msk.f32.mxu0 %vm8186_vm10, %v10599_v39 }
0x107a   : > { %7624 = vmatmul.mubr.msk.f32.gmra.mrb[146].mxu0 %vm3232_vm12, %v14030_v33  ;;  %v8114_v33 = vld [vmem:[%s8334_s2 + $0x38] sm:$0xff] }
0x107b   : > { %7626 = vmatprep.mubr.msk.f32.mxu0 %vm8186_vm10, %v10599_v39 }
0x107e   : > { %7627 = vmatmul.mubr.msk.f32.gmra.mrb[148].mxu0 %vm3232_vm12, %v14031_v17 }
0x107f   : > { %7629 = vmatprep.mubr.msk.f32.mxu0 %vm8186_vm10, %v10599_v39 }
0x1082   : > { %7630 = vmatmul.mubr.msk.f32.gmra.mrb[150].mxu0 %vm3232_vm12, %v14032_v53 }
0x1083   : > { %7632 = vmatprep.mubr.msk.f32.mxu0 %vm8186_vm10, %v10599_v39  ;;  %v8108_v39 = vld [vmem:[%s8334_s2 + $0x8] sm:$0xff] }
0x1086   : > { %7633 = vmatmul.mubr.msk.f32.gmra.mrb[152].mxu0 %vm3232_vm12, %v14033_v43 }
0x1109   : > { %v6648_v23 = vpop.f32.mrb[112].mxu0 }
0x110a   : > { %v6752_v28 = vmul.f32 %v6648_v23, %v12724_v58  ;;  %v7574_v45 = vpop.f32.mrb[113].mxu0 }
0x110c   : > { %v6773_v44 = vadd.f32 %v8107_v13, %v6752_v28  ;;  %v8115_v28 = vld [vmem:[%s8334_s2 + $0x40] sm:$0xff] }
0x110d   : > { %v6653_v0 = vpop.f32.mrb[114].mxu0 }
0x110e   : > { %v6794_v48 = vmax.f32 %v6773_v44, 0.0  ;;  %v6753_v16 = vmul.f32 %v6653_v0, %v12726_v47  ;;  %v7577_v55 = vpop.f32.mrb[115].mxu0 }
0x1110   : > { %6815 = vst.msk [vmem:[%s8334_s2] sm:$0xff] %vm714_vm4, %v6794_v48  ;;  %v6774_v46 = vadd.f32 %v8108_v39, %v6753_v16  ;;  %v8116_v48 = vld [vmem:[%s8334_s2 + $0x48] sm:$0xff] }
0x1111   : > { %v6658_v4 = vpop.f32.mrb[116].mxu0 }
0x1112   : > { %v6795_v59 = vmax.f32 %v6774_v46, 0.0  ;;  %v6754_v42 = vmul.f32 %v6658_v4, %v12741_v10  ;;  %v7580_v58 = vpop.f32.mrb[117].mxu0  ;;  %v8117_v4 = vld [vmem:[%s8334_s2 + $0x50] sm:$0xff] }
0x1114   : > { %6816 = vst.msk [vmem:[%s8334_s2 + $0x8] sm:$0xff] %vm714_vm4, %v6795_v59  ;;  %v6775_v52 = vadd.f32 %v8109_v24, %v6754_v42 }
0x1115   : > { %v6663_v34 = vpop.f32.mrb[118].mxu0 }
0x1116   : > { %v6796_v47 = vmax.f32 %v6775_v52, 0.0  ;;  %v6755_v15 = vmul.f32 %v6663_v34, %v12743_v1  ;;  %v7583_v62 = vpop.f32.mrb[119].mxu0  ;;  %v8118_v52 = vld [vmem:[%s8334_s2 + $0x58] sm:$0xff] }
0x1118   : > { %6817 = vst.msk [vmem:[%s8334_s2 + $0x10] sm:$0xff] %vm714_vm4, %v6796_v47  ;;  %v6776_v41 = vadd.f32 %v8110_v26, %v6755_v15  ;;  %v8119_v26 = vld [vmem:[%s8334_s2 + $0x60] sm:$0xff] }
0x1119   : > { %v6668_v19 = vpop.f32.mrb[120].mxu0 }
0x111a   : > { %v6797_v10 = vmax.f32 %v6776_v41, 0.0  ;;  %v6756_v7 = vmul.f32 %v6668_v19, %v12758_v30  ;;  %v7586_v40 = vpop.f32.mrb[121].mxu0 }
0x111b   : > { %v8120_v40 = vld [vmem:[%s8334_s2 + $0x68] sm:$0xff] }
0x111c   : > { %6818 = vst.msk [vmem:[%s8334_s2 + $0x18] sm:$0xff] %vm714_vm4, %v6797_v10  ;;  %v6777_v49 = vadd.f32 %v8111_v12, %v6756_v7 }
0x111d   : > { %v6673_v2 = vpop.f32.mrb[122].mxu0 }
0x111e   : > { %v6798_v1 = vmax.f32 %v6777_v49, 0.0  ;;  %v6757_v9 = vmul.f32 %v6673_v2, %v12760_v57  ;;  %v7589_v5 = vpop.f32.mrb[123].mxu0 }
0x1120   : > { %6819 = vst.msk [vmem:[%s8334_s2 + $0x20] sm:$0xff] %vm714_vm4, %v6798_v1  ;;  %v6778_v63 = vadd.f32 %v8112_v8, %v6757_v9  ;;  %v8121_v9 = vld [vmem:[%s8334_s2 + $0x70] sm:$0xff] }
0x1121   : > { %v6678_v50 = vpop.f32.mrb[124].mxu0 }
0x1122   : > { %v6799_v30 = vmax.f32 %v6778_v63, 0.0  ;;  %v6758_v61 = vmul.f32 %v6678_v50, %v12769_v51  ;;  %v7592_v3 = vpop.f32.mrb[125].mxu0 }
0x1124   : > { %6820 = vst.msk [vmem:[%s8334_s2 + $0x28] sm:$0xff] %vm714_vm4, %v6799_v30  ;;  %v6779_v20 = vadd.f32 %v8113_v56, %v6758_v61  ;;  %v8122_v30 = vld [vmem:[%s8334_s2 + $0x78] sm:$0xff] }
0x1125   : > { %v6683_v36 = vpop.f32.mrb[126].mxu0 }
0x1126   : > { %v6800_v57 = vmax.f32 %v6779_v20, 0.0  ;;  %v6759_v35 = vmul.f32 %v6683_v36, %v12771_v27  ;;  %v7595_v29 = vpop.f32.mrb[127].mxu0  ;;  %v8123_v36 = vld [vmem:[%s8334_s2 + $0x80] sm:$0xff] }
0x1128   : > { %6821 = vst.msk [vmem:[%s8334_s2 + $0x30] sm:$0xff] %vm714_vm4, %v6800_v57  ;;  %v6780_v17 = vadd.f32 %v8114_v33, %v6759_v35 }
0x1129   : > { %v6688_v53 = vpop.f32.mrb[128].mxu0 }
0x112a   : > { %v6801_v51 = vmax.f32 %v6780_v17, 0.0  ;;  %v6760_v43 = vmul.f32 %v6688_v53, %v12785_v6  ;;  %v7598_v23 = vpop.f32.mrb[129].mxu0  ;;  %v8124_v17 = vld [vmem:[%s8334_s2 + $0x88] sm:$0xff] }
0x112c   : > { %6822 = vst.msk [vmem:[%s8334_s2 + $0x38] sm:$0xff] %vm714_vm4, %v6801_v51  ;;  %v6781_v45 = vadd.f32 %v8115_v28, %v6760_v43  ;;  %v8125_v28 = vld [vmem:[%s8334_s2 + $0x90] sm:$0xff] }
0x112d   : > { %v6693_v13 = vpop.f32.mrb[130].mxu0 }
0x112e   : > { %v6802_v27 = vmax.f32 %v6781_v45, 0.0  ;;  %v6761_v44 = vmul.f32 %v6693_v13, %v12787_v25  ;;  %v7601_v0 = vpop.f32.mrb[131].mxu0 }
0x112f   : > { %v8126_v0 = vld [vmem:[%s8334_s2 + $0x98] sm:$0xff] }
0x1130   : > { %6823 = vst.msk [vmem:[%s8334_s2 + $0x40] sm:$0xff] %vm714_vm4, %v6802_v27  ;;  %v6782_v16 = vadd.f32 %v8116_v48, %v6761_v44 }
0x1131   : > { %v6698_v55 = vpop.f32.mrb[132].mxu0 }
0x1132   : > { %v6803_v6 = vmax.f32 %v6782_v16, 0.0  ;;  %v6762_v39 = vmul.f32 %v6698_v55, %v12800_v18  ;;  %v7604_v46 = vpop.f32.mrb[133].mxu0 }
0x1134   : > { %6824 = vst.msk [vmem:[%s8334_s2 + $0x48] sm:$0xff] %vm714_vm4, %v6803_v6  ;;  %v6783_v59 = vadd.f32 %v8117_v4, %v6762_v39  ;;  %v8127_v39 = vld [vmem:[%s8334_s2 + $0xa0] sm:$0x3] }
0x1135   : > { %v6703_v42 = vpop.f32.mrb[134].mxu0 }
0x1136   : > { %v6804_v25 = vmax.f32 %v6783_v59, 0.0  ;;  %v6763_v58 = vmul.f32 %v6703_v42, %v12802_v11  ;;  %v7607_v24 = vpop.f32.mrb[135].mxu0 }
0x1138   : > { %6825 = vst.msk [vmem:[%s8334_s2 + $0x50] sm:$0xff] %vm714_vm4, %v6804_v25  ;;  %v6784_v34 = vadd.f32 %v8118_v52, %v6763_v58 }
0x1139   : > { %v6708_v47 = vpop.f32.mrb[136].mxu0 }
0x113a   : > { %v6805_v18 = vmax.f32 %v6784_v34, 0.0  ;;  %v6764_v15 = vmul.f32 %v6708_v47, %v12815_v31  ;;  %v7610_v62 = vpop.f32.mrb[137].mxu0 }
0x113c   : > { %6826 = vst.msk [vmem:[%s8334_s2 + $0x58] sm:$0xff] %vm714_vm4, %v6805_v18  ;;  %v6785_v41 = vadd.f32 %v8119_v26, %v6764_v15 }
0x113d   : > { %v6713_v19 = vpop.f32.mrb[138].mxu0 }
0x113e   : > { %v6806_v11 = vmax.f32 %v6785_v41, 0.0  ;;  %v6765_v10 = vmul.f32 %v6713_v19, %v12817_v38  ;;  %v7613_v7 = vpop.f32.mrb[139].mxu0 }
0x1140   : > { %6827 = vst.msk [vmem:[%s8334_s2 + $0x60] sm:$0xff] %vm714_vm4, %v6806_v11  ;;  %v6786_v12 = vadd.f32 %v8120_v40, %v6765_v10 }
0x1141   : > { %v6718_v49 = vpop.f32.mrb[140].mxu0 }
0x1142   : > { %v6807_v31 = vmax.f32 %v6786_v12, 0.0  ;;  %v6766_v2 = vmul.f32 %v6718_v49, %v12830_v21  ;;  %v7616_v1 = vpop.f32.mrb[141].mxu0 }
0x1144   : > { %6828 = vst.msk [vmem:[%s8334_s2 + $0x68] sm:$0xff] %vm714_vm4, %v6807_v31  ;;  %v6787_v5 = vadd.f32 %v8121_v9, %v6766_v2 }
0x1145   : > { %v6723_v8 = vpop.f32.mrb[142].mxu0 }
0x1146   : > { %v6808_v38 = vmax.f32 %v6787_v5, 0.0  ;;  %v6767_v63 = vmul.f32 %v6723_v8, %v12832_v22  ;;  %v7619_v50 = vpop.f32.mrb[143].mxu0 }
0x1148   : > { %6829 = vst.msk [vmem:[%s8334_s2 + $0x70] sm:$0xff] %vm714_vm4, %v6808_v38  ;;  %v6788_v61 = vadd.f32 %v8122_v30, %v6767_v63 }
0x1149   : > { %v6728_v3 = vpop.f32.mrb[144].mxu0 }
0x114a   : > { %v6809_v21 = vmax.f32 %v6788_v61, 0.0  ;;  %v6768_v56 = vmul.f32 %v6728_v3, %v12845_v54  ;;  %v7622_v20 = vpop.f32.mrb[145].mxu0 }
0x114c   : > { %6830 = vst.msk [vmem:[%s8334_s2 + $0x78] sm:$0xff] %vm714_vm4, %v6809_v21  ;;  %v6789_v57 = vadd.f32 %v8123_v36, %v6768_v56 }
0x114d   : > { %v6733_v35 = vpop.f32.mrb[146].mxu0 }
0x114e   : > { %v6810_v22 = vmax.f32 %v6789_v57, 0.0  ;;  %v6769_v29 = vmul.f32 %v6733_v35, %v12847_v32  ;;  %v7625_v33 = vpop.f32.mrb[147].mxu0 }
0x1150   : > { %6831 = vst.msk [vmem:[%s8334_s2 + $0x80] sm:$0xff] %vm714_vm4, %v6810_v22  ;;  %v6790_v53 = vadd.f32 %v8124_v17, %v6769_v29 }
0x1151   : > { %v6738_v51 = vpop.f32.mrb[148].mxu0 }
0x1152   : > { %v6811_v54 = vmax.f32 %v6790_v53, 0.0  ;;  %v6770_v43 = vmul.f32 %v6738_v51, %v12860_v37  ;;  %v7628_v23 = vpop.f32.mrb[149].mxu0 }
0x1154   : > { %6832 = vst.msk [vmem:[%s8334_s2 + $0x88] sm:$0xff] %vm714_vm4, %v6811_v54  ;;  %v6791_v45 = vadd.f32 %v8125_v28, %v6770_v43 }
0x1155   : > { %v6743_v32 = vpop.f32.mrb[150].mxu0 }
0x1156   : > { %v6812_v13 = vmax.f32 %v6791_v45, 0.0  ;;  %v6771_v27 = vmul.f32 %v6743_v32, %v12862_v14  ;;  %v7631_v44 = vpop.f32.mrb[151].mxu0 }
0x1158   : > { %6833 = vst.msk [vmem:[%s8334_s2 + $0x90] sm:$0xff] %vm714_vm4, %v6812_v13  ;;  %v6792_v48 = vadd.f32 %v8126_v0, %v6771_v27 }
0x1159   : > { %v6748_v16 = vpop.f32.mrb[152].mxu0 }
0x115a   : > { %v6813_v55 = vmax.f32 %v6792_v48, 0.0  ;;  %v6772_v37 = vmul.f32 %v6748_v16, %v12869_v60  ;;  %v7634_v6 = vpop.f32.mrb[153].mxu0 }
0x115c   : > { %6834 = vst.msk [vmem:[%s8334_s2 + $0x98] sm:$0xff] %vm714_vm4, %v6813_v55  ;;  %v6793_v46 = vadd.f32 %v8127_v39, %v6772_v37 }
0x115e   : > { %v6814_v4 = vmax.f32 %v6793_v46, 0.0 }
0x1160   : > { %6835 = vst.msk [vmem:[%s8334_s2 + $0xa0] sm:$0x3] %vm755_vm1, %v6814_v4 }
0x1161 PF: > { %s14034_s18 = sld [smem:[#allocation5_spill]]  ;;  %s14035_s21 = sld [smem:[#allocation3_spill]] }
0x1162   : > { %s14036_s22 = sld [smem:[#allocation4_spill]]  ;;  %s14037_s23 = sld [smem:[#allocation6_spill]] }
0x1163   : > { %s14038_s24 = sld [smem:[#allocation7_spill]] }
0x1167   : > { %s22_s25 = sadd.s32 1, %s14034_s18  }
0x1168   : > { %p19_p8 = scmp.ge.s32.totalorder %s22_s25, 6  }
0x116a   :  { %21 = sbr.rel (!%p19_p8) target bundleno = 7 (0x7), region = 126 }

</bundles_post_ra>
